<compile_context>
chip_gen: v6e
topology: v6e:2x2x1
jax: 0.10.0
libtpu: 0.0.40
codegen_flags: <defaults>
</compile_context>

<pallas_src>
import jax
import jax.numpy as jnp
from jax.experimental import pallas as pl
from jax.experimental.pallas import tpu as pltpu

# ----------------------------- configuration -------------------------------
B = 2            # batch
S = 4            # sequence length (time steps of point clouds)
N_PTS = 16       # points per cloud
CH = 6           # normal_channel=True -> 6 input channels
TARGET_DIM = 16  # extra target features concatenated to the 1024-d feature
GLOBAL_FEA = 1024
INPUT_SIZE = TARGET_DIM + GLOBAL_FEA     # 1040
HIDDEN = 32      # RNN hidden size
NUM_LAYERS = 2   # RNN layers
K_CLS = 5        # number of classes
BN_EPS = 1e-5

# lane-dense padded sizes
H_PAD = 128      # hidden 32 -> 128
K_PAD = 128      # 9 (stn) / 5 (classes) -> 128
NEG_INF = -1e30  # pad-lane bias so padded logits vanish in softmax

# Encoder kernel grid: 2 steps so both TensorCores are used on v7x; each step
# handles SB/2 clouds.  On v5e/v6e this just costs one extra ~0.35us grid step.
GRID_A = 2
CLOUDS_PER_STEP = (S * B) // GRID_A        # 4 clouds per grid step
ROWS_PER_STEP = CLOUDS_PER_STEP * N_PTS    # 64 points per grid step
T_PER_STEP = S // GRID_A                   # 2 time steps per grid step
assert CLOUDS_PER_STEP == T_PER_STEP * B


# ----------------------------- small helpers --------------------------------
def _fold_bn_w(w, b, bn):
  """Fold eval-mode BatchNorm1d into the preceding conv1d(k=1)/linear.

  w: (Cout, Cin) torch layout.  Returns (w_t:(Cin,Cout) fused, bias:(1,Cout)).
  """
  scale = bn["gamma"] * jax.lax.rsqrt(bn["var"] + BN_EPS)
  w_t = w.T * scale[None, :]
  bias = (b - bn["mean"]) * scale + bn["beta"]
  return w_t, bias[None, :]


def _const_spec(shape):
  """BlockSpec for an array that is fully resident (same block every step)."""
  zeros = (0,) * len(shape)
  return pl.BlockSpec(shape, lambda *_: zeros)


# --------- kernel 1: fused STN + xyz transform + encoder + layer-0 proj -----
def _encoder_kernel(x_ref, tgt_ref,
                    sw1, sb1, sw2, sb2, sw3, sb3,
                    sf1, sg1, sf2, sg2, sf3, sg3,
                    ew1, eb1, ew2, eb2, ew3, eb3,
                    wt, wg, b0,
                    u_ref):
  x = x_ref[0]        # (64, 6)  : CLOUDS_PER_STEP clouds, (t_local, b, n) order
  tgt = tgt_ref[0]    # (4, 16)  : one row per cloud, same order

  # ---- STN3d conv stack on all 64 points at once (M=64 on the MXU) ----
  h = jnp.maximum(jnp.dot(x, sw1[...], preferred_element_type=jnp.float32) + sb1[...], 0.0)
  h = jnp.maximum(jnp.dot(h, sw2[...], preferred_element_type=jnp.float32) + sb2[...], 0.0)
  h = jnp.maximum(jnp.dot(h, sw3[...], preferred_element_type=jnp.float32) + sb3[...], 0.0)
  # segmented max-pool over the clouds: unrolled static 16-row slices (no reshape)
  g = jnp.concatenate(
      [jnp.max(h[c * N_PTS:(c + 1) * N_PTS], axis=0, keepdims=True)
       for c in range(CLOUDS_PER_STEP)], axis=0)                     # (4, 1024)

  # ---- STN3d FC stack -> flattened 3x3 transforms (identity folded in bias) --
  f = jnp.maximum(jnp.dot(g, sf1[...], preferred_element_type=jnp.float32) + sg1[...], 0.0)
  f = jnp.maximum(jnp.dot(f, sf2[...], preferred_element_type=jnp.float32) + sg2[...], 0.0)
  t9 = jnp.dot(f, sf3[...], preferred_element_type=jnp.float32) + sg3[...]  # (4,128), lanes 0:9

  # ---- apply each cloud's 3x3 transform to its xyz, keep the normals ----
  pieces = []
  for c in range(CLOUDS_PER_STEP):
    xc = x[c * N_PTS:(c + 1) * N_PTS]          # (16, 6)
    r = t9[c:c + 1]                            # (1, 128), vec[3*row+col] layout
    x0, x1, x2 = xc[:, 0:1], xc[:, 1:2], xc[:, 2:3]
    y0 = x0 * r[:, 0:1] + x1 * r[:, 3:4] + x2 * r[:, 6:7]
    y1 = x0 * r[:, 1:2] + x1 * r[:, 4:5] + x2 * r[:, 7:8]
    y2 = x0 * r[:, 2:3] + x1 * r[:, 5:6] + x2 * r[:, 8:9]
    pieces.append(jnp.concatenate([y0, y1, y2, xc[:, 3:6]], axis=1))  # (16, 6)
  xt = jnp.concatenate(pieces, axis=0)                                # (64, 6)

  # ---- PointNet encoder conv stack + segmented max-pool (no relu pre-pool) --
  e = jnp.maximum(jnp.dot(xt, ew1[...], preferred_element_type=jnp.float32) + eb1[...], 0.0)
  e = jnp.maximum(jnp.dot(e, ew2[...], preferred_element_type=jnp.float32) + eb2[...], 0.0)
  e = jnp.dot(e, ew3[...], preferred_element_type=jnp.float32) + eb3[...]
  gf = jnp.concatenate(
      [jnp.max(e[c * N_PTS:(c + 1) * N_PTS], axis=0, keepdims=True)
       for c in range(CLOUDS_PER_STEP)], axis=0)                     # (4, 1024)

  # ---- hoisted RNN layer-0 input projection: U = [target, gfeat] @ Wih0^T + b0
  u = (jnp.dot(tgt, wt[...], preferred_element_type=jnp.float32)
       + jnp.dot(gf, wg[...], preferred_element_type=jnp.float32)
       + b0[...])                                                    # (4, 128)

  # write (T_PER_STEP, B, H_PAD) block; cloud c == (t_local = c // B, b = c % B)
  for tl in range(T_PER_STEP):
    u_ref[tl] = u[tl * B:(tl + 1) * B]


def encoder_forward(x, tgt, params):
  """x:(GRID_A, 64, CH) tgt:(GRID_A, 4, TARGET_DIM) -> U:(S, B, H_PAD)."""
  enc = params["enc"]
  stn = enc["stn"]
  l0 = params["rnn"][0]

  sw1, sb1 = _fold_bn_w(stn["c1w"], stn["c1b"], stn["bn1"])
  sw2, sb2 = _fold_bn_w(stn["c2w"], stn["c2b"], stn["bn2"])
  sw3, sb3 = _fold_bn_w(stn["c3w"], stn["c3b"], stn["bn3"])
  sf1, sg1 = _fold_bn_w(stn["f1w"], stn["f1b"], stn["bn4"])
  sf2, sg2 = _fold_bn_w(stn["f2w"], stn["f2b"], stn["bn5"])
  sf3 = jnp.pad(stn["f3w"].T, ((0, 0), (0, K_PAD - 9)))
  sg3 = jnp.pad(stn["f3b"] + jnp.eye(3, dtype=jnp.float32).reshape(9),
                (0, K_PAD - 9))[None, :]

  ew1, eb1 = _fold_bn_w(enc["c1w"], enc["c1b"], enc["bn1"])
  ew2, eb2 = _fold_bn_w(enc["c2w"], enc["c2b"], enc["bn2"])
  ew3, eb3 = _fold_bn_w(enc["c3w"], enc["c3b"], enc["bn3"])

  hp = H_PAD - HIDDEN
  wih0_t = l0["w_ih"].T                                   # (1040, 32)
  wt = jnp.pad(wih0_t[:TARGET_DIM], ((0, 0), (0, hp)))    # (16, 128)  target part
  wg = jnp.pad(wih0_t[TARGET_DIM:], ((0, 0), (0, hp)))    # (1024, 128) gfeat part
  b0 = jnp.pad(l0["b_ih"] + l0["b_hh"], (0, hp))[None, :]

  args = (x, tgt, sw1, sb1, sw2, sb2, sw3, sb3, sf1, sg1, sf2, sg2, sf3, sg3,
          ew1, eb1, ew2, eb2, ew3, eb3, wt, wg, b0)
  in_specs = [pl.BlockSpec((1, ROWS_PER_STEP, CH), lambda i: (i, 0, 0)),
              pl.BlockSpec((1, CLOUDS_PER_STEP, TARGET_DIM), lambda i: (i, 0, 0))]
  in_specs += [_const_spec(a.shape) for a in args[2:]]

  return pl.pallas_call(
      _encoder_kernel,
      out_shape=jax.ShapeDtypeStruct((S, B, H_PAD), jnp.float32),
      grid=(GRID_A,),
      in_specs=in_specs,
      out_specs=pl.BlockSpec((T_PER_STEP, B, H_PAD), lambda i: (i, 0, 0)),
      compiler_params=pltpu.CompilerParams(dimension_semantics=("parallel",)),
  )(*args)


# ------------------ kernel 2: 2-layer RNN recurrence + classifier -----------
def _rnn_head_kernel(u_ref, whh0, wih1, whh1, b1,
                     wf1, bf1, wf2, bf2, wf3, bf3, o_ref):
  # t = 0 : hidden states are zero -> recurrent terms vanish exactly
  h1 = jnp.tanh(u_ref[0])
  h2 = jnp.tanh(jnp.dot(h1, wih1[...], preferred_element_type=jnp.float32) + b1[...])
  # remaining steps, statically unrolled (only the small recurrent matmuls stay serial)
  for t in range(1, S):
    h1 = jnp.tanh(u_ref[t]
                  + jnp.dot(h1, whh0[...], preferred_element_type=jnp.float32))
    h2 = jnp.tanh(jnp.dot(h1, wih1[...], preferred_element_type=jnp.float32)
                  + jnp.dot(h2, whh1[...], preferred_element_type=jnp.float32)
                  + b1[...])

  # classifier head on out[:, -1, :] (padded hidden lanes are exactly zero)
  z = jnp.maximum(jnp.dot(h2, wf1[...], preferred_element_type=jnp.float32) + bf1[...], 0.0)
  z = jnp.maximum(jnp.dot(z, wf2[...], preferred_element_type=jnp.float32) + bf2[...], 0.0)
  logits = jnp.dot(z, wf3[...], preferred_element_type=jnp.float32) + bf3[...]
  mx = jnp.max(logits, axis=1, keepdims=True)      # pad lanes hold -1e30 -> ignored
  zz = logits - mx
  lse = jnp.log(jnp.sum(jnp.exp(zz), axis=1, keepdims=True))
  o_ref[...] = zz - lse


def rnn_head_forward(u, params):
  """u: (S, B, H_PAD) precomputed layer-0 pre-activations -> log-probs (B, K_PAD)."""
  l0, l1 = params["rnn"]
  head = params["head"]
  hp = H_PAD - HIDDEN

  whh0 = jnp.pad(l0["w_hh"].T, ((0, hp), (0, hp)))
  wih1 = jnp.pad(l1["w_ih"].T, ((0, hp), (0, hp)))
  whh1 = jnp.pad(l1["w_hh"].T, ((0, hp), (0, hp)))
  b1 = jnp.pad(l1["b_ih"] + l1["b_hh"], (0, hp))[None, :]

  wf1, bf1 = _fold_bn_w(head["f1w"], head["f1b"], head["bn1"])
  wf1 = jnp.pad(wf1, ((0, hp), (0, 0)))
  wf2, bf2 = _fold_bn_w(head["f2w"], head["f2b"], head["bn2"])
  wf3 = jnp.pad(head["f3w"].T, ((0, 0), (0, K_PAD - K_CLS)))
  bf3 = jnp.concatenate(
      [head["f3b"],
       jnp.full((K_PAD - K_CLS,), NEG_INF, jnp.float32)])[None, :]

  # no grid: single invocation, everything (< ~1.2 MiB) resident in VMEM,
  # head weights loaded exactly once.
  return pl.pallas_call(
      _rnn_head_kernel,
      out_shape=jax.ShapeDtypeStruct((B, K_PAD), jnp.float32),
  )(u, whh0, wih1, whh1, b1, wf1, bf1, wf2, bf2, wf3, bf3)


# ------------------------------ full forward --------------------------------
def forward(params, point_data, target_data):
  """point_data:(B,S,CH,N) target_data:(B,S,TARGET_DIM) -> (log_probs:(B,K), None)."""
  b, s, c, n = point_data.shape
  # (B,S,CH,N) -> (S,B,N,CH) -> (GRID_A, ROWS_PER_STEP, CH): clouds in (s,b) order
  x = jnp.transpose(point_data, (1, 0, 3, 2)).reshape(GRID_A, ROWS_PER_STEP, c)
  tgt = jnp.transpose(target_data, (1, 0, 2)).reshape(
      GRID_A, CLOUDS_PER_STEP, TARGET_DIM)

  u = encoder_forward(x, tgt, params)        # (S, B, H_PAD)
  logp = rnn_head_forward(u, params)         # (B, K_PAD)
  # dropout(p=0.4) is defined in __init__ but never used in forward -> no-op
  return logp[:, :K_CLS], None               # feat_trans=False -> (out, None)


# ------------------------------ parameters ----------------------------------
def init_params(key):
  keys = iter(jax.random.split(key, 128))

  def nrm(shape, scale=0.1):
    return scale * jax.random.normal(next(keys), shape, jnp.float32)

  def bn(c):
    return dict(
        gamma=1.0 + 0.1 * jax.random.normal(next(keys), (c,), jnp.float32),
        beta=0.1 * jax.random.normal(next(keys), (c,), jnp.float32),
        mean=0.1 * jax.random.normal(next(keys), (c,), jnp.float32),
        var=jax.random.uniform(next(keys), (c,), jnp.float32, 0.5, 1.5),
    )

  stn = dict(
      c1w=nrm((64, CH)), c1b=nrm((64,)), bn1=bn(64),
      c2w=nrm((128, 64)), c2b=nrm((128,)), bn2=bn(128),
      c3w=nrm((GLOBAL_FEA, 128)), c3b=nrm((GLOBAL_FEA,)), bn3=bn(GLOBAL_FEA),
      f1w=nrm((512, GLOBAL_FEA)), f1b=nrm((512,)), bn4=bn(512),
      f2w=nrm((256, 512)), f2b=nrm((256,)), bn5=bn(256),
      f3w=nrm((9, 256)), f3b=nrm((9,)),
  )
  enc = dict(
      stn=stn,
      c1w=nrm((64, CH)), c1b=nrm((64,)), bn1=bn(64),
      c2w=nrm((128, 64)), c2b=nrm((128,)), bn2=bn(128),
      c3w=nrm((GLOBAL_FEA, 128)), c3b=nrm((GLOBAL_FEA,)), bn3=bn(GLOBAL_FEA),
  )
  rnn = []
  for layer in range(NUM_LAYERS):
    d_in = INPUT_SIZE if layer == 0 else HIDDEN
    rnn.append(dict(
        w_ih=nrm((HIDDEN, d_in)), w_hh=nrm((HIDDEN, HIDDEN)),
        b_ih=nrm((HIDDEN,)), b_hh=nrm((HIDDEN,)),
    ))
  head = dict(
      f1w=nrm((512, HIDDEN)), f1b=nrm((512,)), bn1=bn(512),
      f2w=nrm((256, 512)), f2b=nrm((256,)), bn2=bn(256),
      f3w=nrm((K_CLS, 256)), f3b=nrm((K_CLS,)),
  )
  return dict(enc=enc, rnn=rnn, head=head)


# --------------------------------- main --------------------------------------
if __name__ == "__main__":
  root = jax.random.PRNGKey(0)
  kp, kx, kt = jax.random.split(root, 3)
  params = init_params(kp)
  point_data = jax.random.normal(kx, (B, S, CH, N_PTS), jnp.float32)
  target_data = jax.random.normal(kt, (B, S, TARGET_DIM), jnp.float32)

  out, trans_feat = jax.jit(forward)(params, point_data, target_data)
  out = jax.block_until_ready(out)

  assert out.shape == (B, K_CLS), out.shape
  assert trans_feat is None
  # log_softmax rows should sum to ~1 in probability space
  assert jnp.allclose(jnp.sum(jnp.exp(out), axis=1), 1.0, atol=1e-4)
  assert bool(jnp.all(jnp.isfinite(out)))
  print("KERNEL_OK")
</pallas_src>

<mosaic_0001>
module attributes {stable_mosaic.version = 11 : i64} {
  func.func @_encoder_kernel(%arg0: i32, %arg1: memref<1x64x6xf32, #tpu.memory_space<vmem>>, %arg2: memref<1x4x16xf32, #tpu.memory_space<vmem>>, %arg3: memref<6x64xf32, #tpu.memory_space<vmem>>, %arg4: memref<1x64xf32, #tpu.memory_space<vmem>>, %arg5: memref<64x128xf32, #tpu.memory_space<vmem>>, %arg6: memref<1x128xf32, #tpu.memory_space<vmem>>, %arg7: memref<128x1024xf32, #tpu.memory_space<vmem>>, %arg8: memref<1x1024xf32, #tpu.memory_space<vmem>>, %arg9: memref<1024x512xf32, #tpu.memory_space<vmem>>, %arg10: memref<1x512xf32, #tpu.memory_space<vmem>>, %arg11: memref<512x256xf32, #tpu.memory_space<vmem>>, %arg12: memref<1x256xf32, #tpu.memory_space<vmem>>, %arg13: memref<256x128xf32, #tpu.memory_space<vmem>>, %arg14: memref<1x128xf32, #tpu.memory_space<vmem>>, %arg15: memref<6x64xf32, #tpu.memory_space<vmem>>, %arg16: memref<1x64xf32, #tpu.memory_space<vmem>>, %arg17: memref<64x128xf32, #tpu.memory_space<vmem>>, %arg18: memref<1x128xf32, #tpu.memory_space<vmem>>, %arg19: memref<128x1024xf32, #tpu.memory_space<vmem>>, %arg20: memref<1x1024xf32, #tpu.memory_space<vmem>>, %arg21: memref<16x128xf32, #tpu.memory_space<vmem>>, %arg22: memref<1024x128xf32, #tpu.memory_space<vmem>>, %arg23: memref<1x128xf32, #tpu.memory_space<vmem>>, %arg24: memref<2x2x128xf32, #tpu.memory_space<vmem>>) attributes {dimension_semantics = [#tpu.dimension_semantics<parallel>], iteration_bounds = array<i64: 2>, scalar_prefetch = 0 : i64, scratch_operands = 0 : i64, tpu.core_type = #tpu.core_type<tc>, window_params = [{transform_indices = @transform_0, window_bounds = array<i64: 1, 64, 6>}, {transform_indices = @transform_1, window_bounds = array<i64: 1, 4, 16>}, {pipeline_mode = #tpu.pipeline_mode<synchronous>, transform_indices = @transform_2, window_bounds = array<i64: 6, 64>}, {pipeline_mode = #tpu.pipeline_mode<synchronous>, transform_indices = @transform_3, window_bounds = array<i64: 1, 64>}, {pipeline_mode = #tpu.pipeline_mode<synchronous>, transform_indices = @transform_4, window_bounds = array<i64: 64, 128>}, {pipeline_mode = #tpu.pipeline_mode<synchronous>, transform_indices = @transform_5, window_bounds = array<i64: 1, 128>}, {pipeline_mode = #tpu.pipeline_mode<synchronous>, transform_indices = @transform_6, window_bounds = array<i64: 128, 1024>}, {pipeline_mode = #tpu.pipeline_mode<synchronous>, transform_indices = @transform_7, window_bounds = array<i64: 1, 1024>}, {pipeline_mode = #tpu.pipeline_mode<synchronous>, transform_indices = @transform_8, window_bounds = array<i64: 1024, 512>}, {pipeline_mode = #tpu.pipeline_mode<synchronous>, transform_indices = @transform_9, window_bounds = array<i64: 1, 512>}, {pipeline_mode = #tpu.pipeline_mode<synchronous>, transform_indices = @transform_10, window_bounds = array<i64: 512, 256>}, {pipeline_mode = #tpu.pipeline_mode<synchronous>, transform_indices = @transform_11, window_bounds = array<i64: 1, 256>}, {pipeline_mode = #tpu.pipeline_mode<synchronous>, transform_indices = @transform_12, window_bounds = array<i64: 256, 128>}, {pipeline_mode = #tpu.pipeline_mode<synchronous>, transform_indices = @transform_13, window_bounds = array<i64: 1, 128>}, {pipeline_mode = #tpu.pipeline_mode<synchronous>, transform_indices = @transform_14, window_bounds = array<i64: 6, 64>}, {pipeline_mode = #tpu.pipeline_mode<synchronous>, transform_indices = @transform_15, window_bounds = array<i64: 1, 64>}, {pipeline_mode = #tpu.pipeline_mode<synchronous>, transform_indices = @transform_16, window_bounds = array<i64: 64, 128>}, {pipeline_mode = #tpu.pipeline_mode<synchronous>, transform_indices = @transform_17, window_bounds = array<i64: 1, 128>}, {pipeline_mode = #tpu.pipeline_mode<synchronous>, transform_indices = @transform_18, window_bounds = array<i64: 128, 1024>}, {pipeline_mode = #tpu.pipeline_mode<synchronous>, transform_indices = @transform_19, window_bounds = array<i64: 1, 1024>}, {pipeline_mode = #tpu.pipeline_mode<synchronous>, transform_indices = @transform_20, window_bounds = array<i64: 16, 128>}, {pipeline_mode = #tpu.pipeline_mode<synchronous>, transform_indices = @transform_21, window_bounds = array<i64: 1024, 128>}, {pipeline_mode = #tpu.pipeline_mode<synchronous>, transform_indices = @transform_22, window_bounds = array<i64: 1, 128>}, {transform_indices = @transform_23, window_bounds = array<i64: 2, 2, 128>}]} {
    %c0 = arith.constant 0 : index
    %c0_0 = arith.constant 0 : index
    %c0_1 = arith.constant 0 : index
    %0 = vector.load %arg1[%c0, %c0_0, %c0_1] : memref<1x64x6xf32, #tpu.memory_space<vmem>>, vector<1x64x6xf32>
    %1 = vector.shape_cast %0 : vector<1x64x6xf32> to vector<64x6xf32>
    %c0_2 = arith.constant 0 : index
    %c0_3 = arith.constant 0 : index
    %c0_4 = arith.constant 0 : index
    %2 = vector.load %arg2[%c0_2, %c0_3, %c0_4] : memref<1x4x16xf32, #tpu.memory_space<vmem>>, vector<1x4x16xf32>
    %3 = vector.shape_cast %2 : vector<1x4x16xf32> to vector<4x16xf32>
    %c0_5 = arith.constant 0 : index
    %c0_6 = arith.constant 0 : index
    %4 = vector.load %arg3[%c0_5, %c0_6] : memref<6x64xf32, #tpu.memory_space<vmem>>, vector<6x64xf32>
    %cst = arith.constant dense<0.000000e+00> : vector<64x64xf32>
    %5 = tpu.matmul %1, %4, %cst {dimension_numbers = #tpu.dot_dimension_numbers<[1], [0], [0], [1], [0, 0, 1, 1], [], []>} : vector<64x6xf32>, vector<6x64xf32>, vector<64x64xf32> -> vector<64x64xf32>
    %c0_7 = arith.constant 0 : index
    %c0_8 = arith.constant 0 : index
    %6 = vector.load %arg4[%c0_7, %c0_8] : memref<1x64xf32, #tpu.memory_space<vmem>>, vector<1x64xf32>
    %7 = vector.broadcast %6 : vector<1x64xf32> to vector<64x64xf32>
    %8 = arith.addf %5, %7 : vector<64x64xf32>
    %cst_9 = arith.constant 0.000000e+00 : f32
    %9 = vector.broadcast %cst_9 : f32 to vector<64x64xf32>
    %10 = arith.maximumf %8, %9 : vector<64x64xf32>
    %c0_10 = arith.constant 0 : index
    %c0_11 = arith.constant 0 : index
    %11 = vector.load %arg5[%c0_10, %c0_11] : memref<64x128xf32, #tpu.memory_space<vmem>>, vector<64x128xf32>
    %cst_12 = arith.constant dense<0.000000e+00> : vector<64x128xf32>
    %12 = tpu.matmul %10, %11, %cst_12 {dimension_numbers = #tpu.dot_dimension_numbers<[1], [0], [0], [1], [0, 0, 1, 1], [], []>} : vector<64x64xf32>, vector<64x128xf32>, vector<64x128xf32> -> vector<64x128xf32>
    %c0_13 = arith.constant 0 : index
    %c0_14 = arith.constant 0 : index
    %13 = vector.load %arg6[%c0_13, %c0_14] : memref<1x128xf32, #tpu.memory_space<vmem>>, vector<1x128xf32>
    %14 = vector.broadcast %13 : vector<1x128xf32> to vector<64x128xf32>
    %15 = arith.addf %12, %14 : vector<64x128xf32>
    %cst_15 = arith.constant 0.000000e+00 : f32
    %16 = vector.broadcast %cst_15 : f32 to vector<64x128xf32>
    %17 = arith.maximumf %15, %16 : vector<64x128xf32>
    %c0_16 = arith.constant 0 : index
    %c0_17 = arith.constant 0 : index
    %18 = vector.load %arg7[%c0_16, %c0_17] : memref<128x1024xf32, #tpu.memory_space<vmem>>, vector<128x1024xf32>
    %cst_18 = arith.constant dense<0.000000e+00> : vector<64x1024xf32>
    %19 = tpu.matmul %17, %18, %cst_18 {dimension_numbers = #tpu.dot_dimension_numbers<[1], [0], [0], [1], [0, 0, 1, 1], [], []>} : vector<64x128xf32>, vector<128x1024xf32>, vector<64x1024xf32> -> vector<64x1024xf32>
    %c0_19 = arith.constant 0 : index
    %c0_20 = arith.constant 0 : index
    %20 = vector.load %arg8[%c0_19, %c0_20] : memref<1x1024xf32, #tpu.memory_space<vmem>>, vector<1x1024xf32>
    %21 = vector.broadcast %20 : vector<1x1024xf32> to vector<64x1024xf32>
    %22 = arith.addf %19, %21 : vector<64x1024xf32>
    %cst_21 = arith.constant 0.000000e+00 : f32
    %23 = vector.broadcast %cst_21 : f32 to vector<64x1024xf32>
    %24 = arith.maximumf %22, %23 : vector<64x1024xf32>
    %25 = vector.extract_strided_slice %24 {offsets = [0, 0], sizes = [16, 1024], strides = [1, 1]} : vector<64x1024xf32> to vector<16x1024xf32>
    %cst_22 = arith.constant dense<0xFF800000> : vector<1024xf32>
    %26 = vector.multi_reduction <maximumf>, %25, %cst_22 [0] : vector<16x1024xf32> to vector<1024xf32>
    %27 = vector.shape_cast %26 : vector<1024xf32> to vector<1x1024xf32>
    %28 = vector.extract_strided_slice %24 {offsets = [16, 0], sizes = [16, 1024], strides = [1, 1]} : vector<64x1024xf32> to vector<16x1024xf32>
    %cst_23 = arith.constant dense<0xFF800000> : vector<1024xf32>
    %29 = vector.multi_reduction <maximumf>, %28, %cst_23 [0] : vector<16x1024xf32> to vector<1024xf32>
    %30 = vector.shape_cast %29 : vector<1024xf32> to vector<1x1024xf32>
    %31 = vector.extract_strided_slice %24 {offsets = [32, 0], sizes = [16, 1024], strides = [1, 1]} : vector<64x1024xf32> to vector<16x1024xf32>
    %cst_24 = arith.constant dense<0xFF800000> : vector<1024xf32>
    %32 = vector.multi_reduction <maximumf>, %31, %cst_24 [0] : vector<16x1024xf32> to vector<1024xf32>
    %33 = vector.shape_cast %32 : vector<1024xf32> to vector<1x1024xf32>
    %34 = vector.extract_strided_slice %24 {offsets = [48, 0], sizes = [16, 1024], strides = [1, 1]} : vector<64x1024xf32> to vector<16x1024xf32>
    %cst_25 = arith.constant dense<0xFF800000> : vector<1024xf32>
    %35 = vector.multi_reduction <maximumf>, %34, %cst_25 [0] : vector<16x1024xf32> to vector<1024xf32>
    %36 = vector.shape_cast %35 : vector<1024xf32> to vector<1x1024xf32>
    %37 = tpu.concatenate %27, %30, %33, %36 in 0 : vector<1x1024xf32>, vector<1x1024xf32>, vector<1x1024xf32>, vector<1x1024xf32> -> vector<4x1024xf32>
    %c0_26 = arith.constant 0 : index
    %c0_27 = arith.constant 0 : index
    %38 = vector.load %arg9[%c0_26, %c0_27] : memref<1024x512xf32, #tpu.memory_space<vmem>>, vector<1024x512xf32>
    %cst_28 = arith.constant dense<0.000000e+00> : vector<4x512xf32>
    %39 = tpu.matmul %37, %38, %cst_28 {dimension_numbers = #tpu.dot_dimension_numbers<[1], [0], [0], [1], [0, 0, 1, 1], [], []>} : vector<4x1024xf32>, vector<1024x512xf32>, vector<4x512xf32> -> vector<4x512xf32>
    %c0_29 = arith.constant 0 : index
    %c0_30 = arith.constant 0 : index
    %40 = vector.load %arg10[%c0_29, %c0_30] : memref<1x512xf32, #tpu.memory_space<vmem>>, vector<1x512xf32>
    %41 = vector.broadcast %40 : vector<1x512xf32> to vector<4x512xf32>
    %42 = arith.addf %39, %41 : vector<4x512xf32>
    %cst_31 = arith.constant 0.000000e+00 : f32
    %43 = vector.broadcast %cst_31 : f32 to vector<4x512xf32>
    %44 = arith.maximumf %42, %43 : vector<4x512xf32>
    %c0_32 = arith.constant 0 : index
    %c0_33 = arith.constant 0 : index
    %45 = vector.load %arg11[%c0_32, %c0_33] : memref<512x256xf32, #tpu.memory_space<vmem>>, vector<512x256xf32>
    %cst_34 = arith.constant dense<0.000000e+00> : vector<4x256xf32>
    %46 = tpu.matmul %44, %45, %cst_34 {dimension_numbers = #tpu.dot_dimension_numbers<[1], [0], [0], [1], [0, 0, 1, 1], [], []>} : vector<4x512xf32>, vector<512x256xf32>, vector<4x256xf32> -> vector<4x256xf32>
    %c0_35 = arith.constant 0 : index
    %c0_36 = arith.constant 0 : index
    %47 = vector.load %arg12[%c0_35, %c0_36] : memref<1x256xf32, #tpu.memory_space<vmem>>, vector<1x256xf32>
    %48 = vector.broadcast %47 : vector<1x256xf32> to vector<4x256xf32>
    %49 = arith.addf %46, %48 : vector<4x256xf32>
    %cst_37 = arith.constant 0.000000e+00 : f32
    %50 = vector.broadcast %cst_37 : f32 to vector<4x256xf32>
    %51 = arith.maximumf %49, %50 : vector<4x256xf32>
    %c0_38 = arith.constant 0 : index
    %c0_39 = arith.constant 0 : index
    %52 = vector.load %arg13[%c0_38, %c0_39] : memref<256x128xf32, #tpu.memory_space<vmem>>, vector<256x128xf32>
    %cst_40 = arith.constant dense<0.000000e+00> : vector<4x128xf32>
    %53 = tpu.matmul %51, %52, %cst_40 {dimension_numbers = #tpu.dot_dimension_numbers<[1], [0], [0], [1], [0, 0, 1, 1], [], []>} : vector<4x256xf32>, vector<256x128xf32>, vector<4x128xf32> -> vector<4x128xf32>
    %c0_41 = arith.constant 0 : index
    %c0_42 = arith.constant 0 : index
    %54 = vector.load %arg14[%c0_41, %c0_42] : memref<1x128xf32, #tpu.memory_space<vmem>>, vector<1x128xf32>
    %55 = vector.broadcast %54 : vector<1x128xf32> to vector<4x128xf32>
    %56 = arith.addf %53, %55 : vector<4x128xf32>
    %57 = vector.extract_strided_slice %1 {offsets = [0, 0], sizes = [16, 6], strides = [1, 1]} : vector<64x6xf32> to vector<16x6xf32>
    %58 = vector.extract_strided_slice %56 {offsets = [0, 0], sizes = [1, 128], strides = [1, 1]} : vector<4x128xf32> to vector<1x128xf32>
    %59 = vector.extract_strided_slice %57 {offsets = [0, 0], sizes = [16, 1], strides = [1, 1]} : vector<16x6xf32> to vector<16x1xf32>
    %60 = vector.extract_strided_slice %57 {offsets = [0, 1], sizes = [16, 1], strides = [1, 1]} : vector<16x6xf32> to vector<16x1xf32>
    %61 = vector.extract_strided_slice %57 {offsets = [0, 2], sizes = [16, 1], strides = [1, 1]} : vector<16x6xf32> to vector<16x1xf32>
    %62 = vector.extract_strided_slice %58 {offsets = [0, 0], sizes = [1, 1], strides = [1, 1]} : vector<1x128xf32> to vector<1x1xf32>
    %63 = vector.broadcast %62 : vector<1x1xf32> to vector<16x1xf32>
    %64 = arith.mulf %59, %63 : vector<16x1xf32>
    %65 = vector.extract_strided_slice %58 {offsets = [0, 3], sizes = [1, 1], strides = [1, 1]} : vector<1x128xf32> to vector<1x1xf32>
    %66 = vector.broadcast %65 : vector<1x1xf32> to vector<16x1xf32>
    %67 = arith.mulf %60, %66 : vector<16x1xf32>
    %68 = arith.addf %64, %67 : vector<16x1xf32>
    %69 = vector.extract_strided_slice %58 {offsets = [0, 6], sizes = [1, 1], strides = [1, 1]} : vector<1x128xf32> to vector<1x1xf32>
    %70 = vector.broadcast %69 : vector<1x1xf32> to vector<16x1xf32>
    %71 = arith.mulf %61, %70 : vector<16x1xf32>
    %72 = arith.addf %68, %71 : vector<16x1xf32>
    %73 = vector.extract_strided_slice %58 {offsets = [0, 1], sizes = [1, 1], strides = [1, 1]} : vector<1x128xf32> to vector<1x1xf32>
    %74 = vector.broadcast %73 : vector<1x1xf32> to vector<16x1xf32>
    %75 = arith.mulf %59, %74 : vector<16x1xf32>
    %76 = vector.extract_strided_slice %58 {offsets = [0, 4], sizes = [1, 1], strides = [1, 1]} : vector<1x128xf32> to vector<1x1xf32>
    %77 = vector.broadcast %76 : vector<1x1xf32> to vector<16x1xf32>
    %78 = arith.mulf %60, %77 : vector<16x1xf32>
    %79 = arith.addf %75, %78 : vector<16x1xf32>
    %80 = vector.extract_strided_slice %58 {offsets = [0, 7], sizes = [1, 1], strides = [1, 1]} : vector<1x128xf32> to vector<1x1xf32>
    %81 = vector.broadcast %80 : vector<1x1xf32> to vector<16x1xf32>
    %82 = arith.mulf %61, %81 : vector<16x1xf32>
    %83 = arith.addf %79, %82 : vector<16x1xf32>
    %84 = vector.extract_strided_slice %58 {offsets = [0, 2], sizes = [1, 1], strides = [1, 1]} : vector<1x128xf32> to vector<1x1xf32>
    %85 = vector.broadcast %84 : vector<1x1xf32> to vector<16x1xf32>
    %86 = arith.mulf %59, %85 : vector<16x1xf32>
    %87 = vector.extract_strided_slice %58 {offsets = [0, 5], sizes = [1, 1], strides = [1, 1]} : vector<1x128xf32> to vector<1x1xf32>
    %88 = vector.broadcast %87 : vector<1x1xf32> to vector<16x1xf32>
    %89 = arith.mulf %60, %88 : vector<16x1xf32>
    %90 = arith.addf %86, %89 : vector<16x1xf32>
    %91 = vector.extract_strided_slice %58 {offsets = [0, 8], sizes = [1, 1], strides = [1, 1]} : vector<1x128xf32> to vector<1x1xf32>
    %92 = vector.broadcast %91 : vector<1x1xf32> to vector<16x1xf32>
    %93 = arith.mulf %61, %92 : vector<16x1xf32>
    %94 = arith.addf %90, %93 : vector<16x1xf32>
    %95 = vector.extract_strided_slice %57 {offsets = [0, 3], sizes = [16, 3], strides = [1, 1]} : vector<16x6xf32> to vector<16x3xf32>
    %96 = tpu.concatenate %72, %83, %94, %95 in 1 : vector<16x1xf32>, vector<16x1xf32>, vector<16x1xf32>, vector<16x3xf32> -> vector<16x6xf32>
    %97 = vector.extract_strided_slice %1 {offsets = [16, 0], sizes = [16, 6], strides = [1, 1]} : vector<64x6xf32> to vector<16x6xf32>
    %98 = vector.extract_strided_slice %56 {offsets = [1, 0], sizes = [1, 128], strides = [1, 1]} : vector<4x128xf32> to vector<1x128xf32>
    %99 = vector.extract_strided_slice %97 {offsets = [0, 0], sizes = [16, 1], strides = [1, 1]} : vector<16x6xf32> to vector<16x1xf32>
    %100 = vector.extract_strided_slice %97 {offsets = [0, 1], sizes = [16, 1], strides = [1, 1]} : vector<16x6xf32> to vector<16x1xf32>
    %101 = vector.extract_strided_slice %97 {offsets = [0, 2], sizes = [16, 1], strides = [1, 1]} : vector<16x6xf32> to vector<16x1xf32>
    %102 = vector.extract_strided_slice %98 {offsets = [0, 0], sizes = [1, 1], strides = [1, 1]} : vector<1x128xf32> to vector<1x1xf32>
    %103 = vector.broadcast %102 : vector<1x1xf32> to vector<16x1xf32>
    %104 = arith.mulf %99, %103 : vector<16x1xf32>
    %105 = vector.extract_strided_slice %98 {offsets = [0, 3], sizes = [1, 1], strides = [1, 1]} : vector<1x128xf32> to vector<1x1xf32>
    %106 = vector.broadcast %105 : vector<1x1xf32> to vector<16x1xf32>
    %107 = arith.mulf %100, %106 : vector<16x1xf32>
    %108 = arith.addf %104, %107 : vector<16x1xf32>
    %109 = vector.extract_strided_slice %98 {offsets = [0, 6], sizes = [1, 1], strides = [1, 1]} : vector<1x128xf32> to vector<1x1xf32>
    %110 = vector.broadcast %109 : vector<1x1xf32> to vector<16x1xf32>
    %111 = arith.mulf %101, %110 : vector<16x1xf32>
    %112 = arith.addf %108, %111 : vector<16x1xf32>
    %113 = vector.extract_strided_slice %98 {offsets = [0, 1], sizes = [1, 1], strides = [1, 1]} : vector<1x128xf32> to vector<1x1xf32>
    %114 = vector.broadcast %113 : vector<1x1xf32> to vector<16x1xf32>
    %115 = arith.mulf %99, %114 : vector<16x1xf32>
    %116 = vector.extract_strided_slice %98 {offsets = [0, 4], sizes = [1, 1], strides = [1, 1]} : vector<1x128xf32> to vector<1x1xf32>
    %117 = vector.broadcast %116 : vector<1x1xf32> to vector<16x1xf32>
    %118 = arith.mulf %100, %117 : vector<16x1xf32>
    %119 = arith.addf %115, %118 : vector<16x1xf32>
    %120 = vector.extract_strided_slice %98 {offsets = [0, 7], sizes = [1, 1], strides = [1, 1]} : vector<1x128xf32> to vector<1x1xf32>
    %121 = vector.broadcast %120 : vector<1x1xf32> to vector<16x1xf32>
    %122 = arith.mulf %101, %121 : vector<16x1xf32>
    %123 = arith.addf %119, %122 : vector<16x1xf32>
    %124 = vector.extract_strided_slice %98 {offsets = [0, 2], sizes = [1, 1], strides = [1, 1]} : vector<1x128xf32> to vector<1x1xf32>
    %125 = vector.broadcast %124 : vector<1x1xf32> to vector<16x1xf32>
    %126 = arith.mulf %99, %125 : vector<16x1xf32>
    %127 = vector.extract_strided_slice %98 {offsets = [0, 5], sizes = [1, 1], strides = [1, 1]} : vector<1x128xf32> to vector<1x1xf32>
    %128 = vector.broadcast %127 : vector<1x1xf32> to vector<16x1xf32>
    %129 = arith.mulf %100, %128 : vector<16x1xf32>
    %130 = arith.addf %126, %129 : vector<16x1xf32>
    %131 = vector.extract_strided_slice %98 {offsets = [0, 8], sizes = [1, 1], strides = [1, 1]} : vector<1x128xf32> to vector<1x1xf32>
    %132 = vector.broadcast %131 : vector<1x1xf32> to vector<16x1xf32>
    %133 = arith.mulf %101, %132 : vector<16x1xf32>
    %134 = arith.addf %130, %133 : vector<16x1xf32>
    %135 = vector.extract_strided_slice %97 {offsets = [0, 3], sizes = [16, 3], strides = [1, 1]} : vector<16x6xf32> to vector<16x3xf32>
    %136 = tpu.concatenate %112, %123, %134, %135 in 1 : vector<16x1xf32>, vector<16x1xf32>, vector<16x1xf32>, vector<16x3xf32> -> vector<16x6xf32>
    %137 = vector.extract_strided_slice %1 {offsets = [32, 0], sizes = [16, 6], strides = [1, 1]} : vector<64x6xf32> to vector<16x6xf32>
    %138 = vector.extract_strided_slice %56 {offsets = [2, 0], sizes = [1, 128], strides = [1, 1]} : vector<4x128xf32> to vector<1x128xf32>
    %139 = vector.extract_strided_slice %137 {offsets = [0, 0], sizes = [16, 1], strides = [1, 1]} : vector<16x6xf32> to vector<16x1xf32>
    %140 = vector.extract_strided_slice %137 {offsets = [0, 1], sizes = [16, 1], strides = [1, 1]} : vector<16x6xf32> to vector<16x1xf32>
    %141 = vector.extract_strided_slice %137 {offsets = [0, 2], sizes = [16, 1], strides = [1, 1]} : vector<16x6xf32> to vector<16x1xf32>
    %142 = vector.extract_strided_slice %138 {offsets = [0, 0], sizes = [1, 1], strides = [1, 1]} : vector<1x128xf32> to vector<1x1xf32>
    %143 = vector.broadcast %142 : vector<1x1xf32> to vector<16x1xf32>
    %144 = arith.mulf %139, %143 : vector<16x1xf32>
    %145 = vector.extract_strided_slice %138 {offsets = [0, 3], sizes = [1, 1], strides = [1, 1]} : vector<1x128xf32> to vector<1x1xf32>
    %146 = vector.broadcast %145 : vector<1x1xf32> to vector<16x1xf32>
    %147 = arith.mulf %140, %146 : vector<16x1xf32>
    %148 = arith.addf %144, %147 : vector<16x1xf32>
    %149 = vector.extract_strided_slice %138 {offsets = [0, 6], sizes = [1, 1], strides = [1, 1]} : vector<1x128xf32> to vector<1x1xf32>
    %150 = vector.broadcast %149 : vector<1x1xf32> to vector<16x1xf32>
    %151 = arith.mulf %141, %150 : vector<16x1xf32>
    %152 = arith.addf %148, %151 : vector<16x1xf32>
    %153 = vector.extract_strided_slice %138 {offsets = [0, 1], sizes = [1, 1], strides = [1, 1]} : vector<1x128xf32> to vector<1x1xf32>
    %154 = vector.broadcast %153 : vector<1x1xf32> to vector<16x1xf32>
    %155 = arith.mulf %139, %154 : vector<16x1xf32>
    %156 = vector.extract_strided_slice %138 {offsets = [0, 4], sizes = [1, 1], strides = [1, 1]} : vector<1x128xf32> to vector<1x1xf32>
    %157 = vector.broadcast %156 : vector<1x1xf32> to vector<16x1xf32>
    %158 = arith.mulf %140, %157 : vector<16x1xf32>
    %159 = arith.addf %155, %158 : vector<16x1xf32>
    %160 = vector.extract_strided_slice %138 {offsets = [0, 7], sizes = [1, 1], strides = [1, 1]} : vector<1x128xf32> to vector<1x1xf32>
    %161 = vector.broadcast %160 : vector<1x1xf32> to vector<16x1xf32>
    %162 = arith.mulf %141, %161 : vector<16x1xf32>
    %163 = arith.addf %159, %162 : vector<16x1xf32>
    %164 = vector.extract_strided_slice %138 {offsets = [0, 2], sizes = [1, 1], strides = [1, 1]} : vector<1x128xf32> to vector<1x1xf32>
    %165 = vector.broadcast %164 : vector<1x1xf32> to vector<16x1xf32>
    %166 = arith.mulf %139, %165 : vector<16x1xf32>
    %167 = vector.extract_strided_slice %138 {offsets = [0, 5], sizes = [1, 1], strides = [1, 1]} : vector<1x128xf32> to vector<1x1xf32>
    %168 = vector.broadcast %167 : vector<1x1xf32> to vector<16x1xf32>
    %169 = arith.mulf %140, %168 : vector<16x1xf32>
    %170 = arith.addf %166, %169 : vector<16x1xf32>
    %171 = vector.extract_strided_slice %138 {offsets = [0, 8], sizes = [1, 1], strides = [1, 1]} : vector<1x128xf32> to vector<1x1xf32>
    %172 = vector.broadcast %171 : vector<1x1xf32> to vector<16x1xf32>
    %173 = arith.mulf %141, %172 : vector<16x1xf32>
    %174 = arith.addf %170, %173 : vector<16x1xf32>
    %175 = vector.extract_strided_slice %137 {offsets = [0, 3], sizes = [16, 3], strides = [1, 1]} : vector<16x6xf32> to vector<16x3xf32>
    %176 = tpu.concatenate %152, %163, %174, %175 in 1 : vector<16x1xf32>, vector<16x1xf32>, vector<16x1xf32>, vector<16x3xf32> -> vector<16x6xf32>
    %177 = vector.extract_strided_slice %1 {offsets = [48, 0], sizes = [16, 6], strides = [1, 1]} : vector<64x6xf32> to vector<16x6xf32>
    %178 = vector.extract_strided_slice %56 {offsets = [3, 0], sizes = [1, 128], strides = [1, 1]} : vector<4x128xf32> to vector<1x128xf32>
    %179 = vector.extract_strided_slice %177 {offsets = [0, 0], sizes = [16, 1], strides = [1, 1]} : vector<16x6xf32> to vector<16x1xf32>
    %180 = vector.extract_strided_slice %177 {offsets = [0, 1], sizes = [16, 1], strides = [1, 1]} : vector<16x6xf32> to vector<16x1xf32>
    %181 = vector.extract_strided_slice %177 {offsets = [0, 2], sizes = [16, 1], strides = [1, 1]} : vector<16x6xf32> to vector<16x1xf32>
    %182 = vector.extract_strided_slice %178 {offsets = [0, 0], sizes = [1, 1], strides = [1, 1]} : vector<1x128xf32> to vector<1x1xf32>
    %183 = vector.broadcast %182 : vector<1x1xf32> to vector<16x1xf32>
    %184 = arith.mulf %179, %183 : vector<16x1xf32>
    %185 = vector.extract_strided_slice %178 {offsets = [0, 3], sizes = [1, 1], strides = [1, 1]} : vector<1x128xf32> to vector<1x1xf32>
    %186 = vector.broadcast %185 : vector<1x1xf32> to vector<16x1xf32>
    %187 = arith.mulf %180, %186 : vector<16x1xf32>
    %188 = arith.addf %184, %187 : vector<16x1xf32>
    %189 = vector.extract_strided_slice %178 {offsets = [0, 6], sizes = [1, 1], strides = [1, 1]} : vector<1x128xf32> to vector<1x1xf32>
    %190 = vector.broadcast %189 : vector<1x1xf32> to vector<16x1xf32>
    %191 = arith.mulf %181, %190 : vector<16x1xf32>
    %192 = arith.addf %188, %191 : vector<16x1xf32>
    %193 = vector.extract_strided_slice %178 {offsets = [0, 1], sizes = [1, 1], strides = [1, 1]} : vector<1x128xf32> to vector<1x1xf32>
    %194 = vector.broadcast %193 : vector<1x1xf32> to vector<16x1xf32>
    %195 = arith.mulf %179, %194 : vector<16x1xf32>
    %196 = vector.extract_strided_slice %178 {offsets = [0, 4], sizes = [1, 1], strides = [1, 1]} : vector<1x128xf32> to vector<1x1xf32>
    %197 = vector.broadcast %196 : vector<1x1xf32> to vector<16x1xf32>
    %198 = arith.mulf %180, %197 : vector<16x1xf32>
    %199 = arith.addf %195, %198 : vector<16x1xf32>
    %200 = vector.extract_strided_slice %178 {offsets = [0, 7], sizes = [1, 1], strides = [1, 1]} : vector<1x128xf32> to vector<1x1xf32>
    %201 = vector.broadcast %200 : vector<1x1xf32> to vector<16x1xf32>
    %202 = arith.mulf %181, %201 : vector<16x1xf32>
    %203 = arith.addf %199, %202 : vector<16x1xf32>
    %204 = vector.extract_strided_slice %178 {offsets = [0, 2], sizes = [1, 1], strides = [1, 1]} : vector<1x128xf32> to vector<1x1xf32>
    %205 = vector.broadcast %204 : vector<1x1xf32> to vector<16x1xf32>
    %206 = arith.mulf %179, %205 : vector<16x1xf32>
    %207 = vector.extract_strided_slice %178 {offsets = [0, 5], sizes = [1, 1], strides = [1, 1]} : vector<1x128xf32> to vector<1x1xf32>
    %208 = vector.broadcast %207 : vector<1x1xf32> to vector<16x1xf32>
    %209 = arith.mulf %180, %208 : vector<16x1xf32>
    %210 = arith.addf %206, %209 : vector<16x1xf32>
    %211 = vector.extract_strided_slice %178 {offsets = [0, 8], sizes = [1, 1], strides = [1, 1]} : vector<1x128xf32> to vector<1x1xf32>
    %212 = vector.broadcast %211 : vector<1x1xf32> to vector<16x1xf32>
    %213 = arith.mulf %181, %212 : vector<16x1xf32>
    %214 = arith.addf %210, %213 : vector<16x1xf32>
    %215 = vector.extract_strided_slice %177 {offsets = [0, 3], sizes = [16, 3], strides = [1, 1]} : vector<16x6xf32> to vector<16x3xf32>
    %216 = tpu.concatenate %192, %203, %214, %215 in 1 : vector<16x1xf32>, vector<16x1xf32>, vector<16x1xf32>, vector<16x3xf32> -> vector<16x6xf32>
    %217 = tpu.concatenate %96, %136, %176, %216 in 0 : vector<16x6xf32>, vector<16x6xf32>, vector<16x6xf32>, vector<16x6xf32> -> vector<64x6xf32>
    %c0_43 = arith.constant 0 : index
    %c0_44 = arith.constant 0 : index
    %218 = vector.load %arg15[%c0_43, %c0_44] : memref<6x64xf32, #tpu.memory_space<vmem>>, vector<6x64xf32>
    %cst_45 = arith.constant dense<0.000000e+00> : vector<64x64xf32>
    %219 = tpu.matmul %217, %218, %cst_45 {dimension_numbers = #tpu.dot_dimension_numbers<[1], [0], [0], [1], [0, 0, 1, 1], [], []>} : vector<64x6xf32>, vector<6x64xf32>, vector<64x64xf32> -> vector<64x64xf32>
    %c0_46 = arith.constant 0 : index
    %c0_47 = arith.constant 0 : index
    %220 = vector.load %arg16[%c0_46, %c0_47] : memref<1x64xf32, #tpu.memory_space<vmem>>, vector<1x64xf32>
    %221 = vector.broadcast %220 : vector<1x64xf32> to vector<64x64xf32>
    %222 = arith.addf %219, %221 : vector<64x64xf32>
    %cst_48 = arith.constant 0.000000e+00 : f32
    %223 = vector.broadcast %cst_48 : f32 to vector<64x64xf32>
    %224 = arith.maximumf %222, %223 : vector<64x64xf32>
    %c0_49 = arith.constant 0 : index
    %c0_50 = arith.constant 0 : index
    %225 = vector.load %arg17[%c0_49, %c0_50] : memref<64x128xf32, #tpu.memory_space<vmem>>, vector<64x128xf32>
    %cst_51 = arith.constant dense<0.000000e+00> : vector<64x128xf32>
    %226 = tpu.matmul %224, %225, %cst_51 {dimension_numbers = #tpu.dot_dimension_numbers<[1], [0], [0], [1], [0, 0, 1, 1], [], []>} : vector<64x64xf32>, vector<64x128xf32>, vector<64x128xf32> -> vector<64x128xf32>
    %c0_52 = arith.constant 0 : index
    %c0_53 = arith.constant 0 : index
    %227 = vector.load %arg18[%c0_52, %c0_53] : memref<1x128xf32, #tpu.memory_space<vmem>>, vector<1x128xf32>
    %228 = vector.broadcast %227 : vector<1x128xf32> to vector<64x128xf32>
    %229 = arith.addf %226, %228 : vector<64x128xf32>
    %cst_54 = arith.constant 0.000000e+00 : f32
    %230 = vector.broadcast %cst_54 : f32 to vector<64x128xf32>
    %231 = arith.maximumf %229, %230 : vector<64x128xf32>
    %c0_55 = arith.constant 0 : index
    %c0_56 = arith.constant 0 : index
    %232 = vector.load %arg19[%c0_55, %c0_56] : memref<128x1024xf32, #tpu.memory_space<vmem>>, vector<128x1024xf32>
    %cst_57 = arith.constant dense<0.000000e+00> : vector<64x1024xf32>
    %233 = tpu.matmul %231, %232, %cst_57 {dimension_numbers = #tpu.dot_dimension_numbers<[1], [0], [0], [1], [0, 0, 1, 1], [], []>} : vector<64x128xf32>, vector<128x1024xf32>, vector<64x1024xf32> -> vector<64x1024xf32>
    %c0_58 = arith.constant 0 : index
    %c0_59 = arith.constant 0 : index
    %234 = vector.load %arg20[%c0_58, %c0_59] : memref<1x1024xf32, #tpu.memory_space<vmem>>, vector<1x1024xf32>
    %235 = vector.broadcast %234 : vector<1x1024xf32> to vector<64x1024xf32>
    %236 = arith.addf %233, %235 : vector<64x1024xf32>
    %237 = vector.extract_strided_slice %236 {offsets = [0, 0], sizes = [16, 1024], strides = [1, 1]} : vector<64x1024xf32> to vector<16x1024xf32>
    %cst_60 = arith.constant dense<0xFF800000> : vector<1024xf32>
    %238 = vector.multi_reduction <maximumf>, %237, %cst_60 [0] : vector<16x1024xf32> to vector<1024xf32>
    %239 = vector.shape_cast %238 : vector<1024xf32> to vector<1x1024xf32>
    %240 = vector.extract_strided_slice %236 {offsets = [16, 0], sizes = [16, 1024], strides = [1, 1]} : vector<64x1024xf32> to vector<16x1024xf32>
    %cst_61 = arith.constant dense<0xFF800000> : vector<1024xf32>
    %241 = vector.multi_reduction <maximumf>, %240, %cst_61 [0] : vector<16x1024xf32> to vector<1024xf32>
    %242 = vector.shape_cast %241 : vector<1024xf32> to vector<1x1024xf32>
    %243 = vector.extract_strided_slice %236 {offsets = [32, 0], sizes = [16, 1024], strides = [1, 1]} : vector<64x1024xf32> to vector<16x1024xf32>
    %cst_62 = arith.constant dense<0xFF800000> : vector<1024xf32>
    %244 = vector.multi_reduction <maximumf>, %243, %cst_62 [0] : vector<16x1024xf32> to vector<1024xf32>
    %245 = vector.shape_cast %244 : vector<1024xf32> to vector<1x1024xf32>
    %246 = vector.extract_strided_slice %236 {offsets = [48, 0], sizes = [16, 1024], strides = [1, 1]} : vector<64x1024xf32> to vector<16x1024xf32>
    %cst_63 = arith.constant dense<0xFF800000> : vector<1024xf32>
    %247 = vector.multi_reduction <maximumf>, %246, %cst_63 [0] : vector<16x1024xf32> to vector<1024xf32>
    %248 = vector.shape_cast %247 : vector<1024xf32> to vector<1x1024xf32>
    %249 = tpu.concatenate %239, %242, %245, %248 in 0 : vector<1x1024xf32>, vector<1x1024xf32>, vector<1x1024xf32>, vector<1x1024xf32> -> vector<4x1024xf32>
    %c0_64 = arith.constant 0 : index
    %c0_65 = arith.constant 0 : index
    %250 = vector.load %arg21[%c0_64, %c0_65] : memref<16x128xf32, #tpu.memory_space<vmem>>, vector<16x128xf32>
    %cst_66 = arith.constant dense<0.000000e+00> : vector<4x128xf32>
    %251 = tpu.matmul %3, %250, %cst_66 {dimension_numbers = #tpu.dot_dimension_numbers<[1], [0], [0], [1], [0, 0, 1, 1], [], []>} : vector<4x16xf32>, vector<16x128xf32>, vector<4x128xf32> -> vector<4x128xf32>
    %c0_67 = arith.constant 0 : index
    %c0_68 = arith.constant 0 : index
    %252 = vector.load %arg22[%c0_67, %c0_68] : memref<1024x128xf32, #tpu.memory_space<vmem>>, vector<1024x128xf32>
    %cst_69 = arith.constant dense<0.000000e+00> : vector<4x128xf32>
    %253 = tpu.matmul %249, %252, %cst_69 {dimension_numbers = #tpu.dot_dimension_numbers<[1], [0], [0], [1], [0, 0, 1, 1], [], []>} : vector<4x1024xf32>, vector<1024x128xf32>, vector<4x128xf32> -> vector<4x128xf32>
    %254 = arith.addf %251, %253 : vector<4x128xf32>
    %c0_70 = arith.constant 0 : index
    %c0_71 = arith.constant 0 : index
    %255 = vector.load %arg23[%c0_70, %c0_71] : memref<1x128xf32, #tpu.memory_space<vmem>>, vector<1x128xf32>
    %256 = vector.broadcast %255 : vector<1x128xf32> to vector<4x128xf32>
    %257 = arith.addf %254, %256 : vector<4x128xf32>
    %258 = vector.extract_strided_slice %257 {offsets = [0, 0], sizes = [2, 128], strides = [1, 1]} : vector<4x128xf32> to vector<2x128xf32>
    %c0_72 = arith.constant 0 : index
    %c0_73 = arith.constant 0 : index
    %c0_74 = arith.constant 0 : index
    %259 = vector.load %arg24[%c0_72, %c0_73, %c0_74] : memref<2x2x128xf32, #tpu.memory_space<vmem>>, vector<1x2x128xf32>
    %260 = vector.shape_cast %259 : vector<1x2x128xf32> to vector<2x128xf32>
    %261 = vector.shape_cast %258 : vector<2x128xf32> to vector<1x2x128xf32>
    tpu.vector_store %arg24[%c0_72, %c0_73, %c0_74], %261 {strides = array<i32>} : memref<2x2x128xf32, #tpu.memory_space<vmem>>, vector<1x2x128xf32>,
    %262 = vector.extract_strided_slice %257 {offsets = [2, 0], sizes = [2, 128], strides = [1, 1]} : vector<4x128xf32> to vector<2x128xf32>
    %c1 = arith.constant 1 : index
    %c0_75 = arith.constant 0 : index
    %c0_76 = arith.constant 0 : index
    %263 = vector.load %arg24[%c1, %c0_75, %c0_76] : memref<2x2x128xf32, #tpu.memory_space<vmem>>, vector<1x2x128xf32>
    %264 = vector.shape_cast %263 : vector<1x2x128xf32> to vector<2x128xf32>
    %265 = vector.shape_cast %262 : vector<2x128xf32> to vector<1x2x128xf32>
    tpu.vector_store %arg24[%c1, %c0_75, %c0_76], %265 {strides = array<i32>} : memref<2x2x128xf32, #tpu.memory_space<vmem>>, vector<1x2x128xf32>,
    return
  }
  func.func @transform_0(%arg0: i32) -> (i32, i32, i32) {
    %c0_i32 = arith.constant 0 : i32
    %c0_i32_0 = arith.constant 0 : i32
    %c0_i32_1 = arith.constant 0 : i32
    return %arg0, %c0_i32, %c0_i32_0 : i32, i32, i32
  }
  func.func @transform_1(%arg0: i32) -> (i32, i32, i32) {
    %c0_i32 = arith.constant 0 : i32
    %c0_i32_0 = arith.constant 0 : i32
    %c0_i32_1 = arith.constant 0 : i32
    return %arg0, %c0_i32, %c0_i32_0 : i32, i32, i32
  }
  func.func @transform_2(%arg0: i32) -> (i32, i32) {
    %c0_i32 = arith.constant 0 : i32
    %c0_i32_0 = arith.constant 0 : i32
    %c0_i32_1 = arith.constant 0 : i32
    return %c0_i32, %c0_i32_0 : i32, i32
  }
  func.func @transform_3(%arg0: i32) -> (i32, i32) {
    %c0_i32 = arith.constant 0 : i32
    %c0_i32_0 = arith.constant 0 : i32
    %c0_i32_1 = arith.constant 0 : i32
    return %c0_i32, %c0_i32_0 : i32, i32
  }
  func.func @transform_4(%arg0: i32) -> (i32, i32) {
    %c0_i32 = arith.constant 0 : i32
    %c0_i32_0 = arith.constant 0 : i32
    %c0_i32_1 = arith.constant 0 : i32
    return %c0_i32, %c0_i32_0 : i32, i32
  }
  func.func @transform_5(%arg0: i32) -> (i32, i32) {
    %c0_i32 = arith.constant 0 : i32
    %c0_i32_0 = arith.constant 0 : i32
    %c0_i32_1 = arith.constant 0 : i32
    return %c0_i32, %c0_i32_0 : i32, i32
  }
  func.func @transform_6(%arg0: i32) -> (i32, i32) {
    %c0_i32 = arith.constant 0 : i32
    %c0_i32_0 = arith.constant 0 : i32
    %c0_i32_1 = arith.constant 0 : i32
    return %c0_i32, %c0_i32_0 : i32, i32
  }
  func.func @transform_7(%arg0: i32) -> (i32, i32) {
    %c0_i32 = arith.constant 0 : i32
    %c0_i32_0 = arith.constant 0 : i32
    %c0_i32_1 = arith.constant 0 : i32
    return %c0_i32, %c0_i32_0 : i32, i32
  }
  func.func @transform_8(%arg0: i32) -> (i32, i32) {
    %c0_i32 = arith.constant 0 : i32
    %c0_i32_0 = arith.constant 0 : i32
    %c0_i32_1 = arith.constant 0 : i32
    return %c0_i32, %c0_i32_0 : i32, i32
  }
  func.func @transform_9(%arg0: i32) -> (i32, i32) {
    %c0_i32 = arith.constant 0 : i32
    %c0_i32_0 = arith.constant 0 : i32
    %c0_i32_1 = arith.constant 0 : i32
    return %c0_i32, %c0_i32_0 : i32, i32
  }
  func.func @transform_10(%arg0: i32) -> (i32, i32) {
    %c0_i32 = arith.constant 0 : i32
    %c0_i32_0 = arith.constant 0 : i32
    %c0_i32_1 = arith.constant 0 : i32
    return %c0_i32, %c0_i32_0 : i32, i32
  }
  func.func @transform_11(%arg0: i32) -> (i32, i32) {
    %c0_i32 = arith.constant 0 : i32
    %c0_i32_0 = arith.constant 0 : i32
    %c0_i32_1 = arith.constant 0 : i32
    return %c0_i32, %c0_i32_0 : i32, i32
  }
  func.func @transform_12(%arg0: i32) -> (i32, i32) {
    %c0_i32 = arith.constant 0 : i32
    %c0_i32_0 = arith.constant 0 : i32
    %c0_i32_1 = arith.constant 0 : i32
    return %c0_i32, %c0_i32_0 : i32, i32
  }
  func.func @transform_13(%arg0: i32) -> (i32, i32) {
    %c0_i32 = arith.constant 0 : i32
    %c0_i32_0 = arith.constant 0 : i32
    %c0_i32_1 = arith.constant 0 : i32
    return %c0_i32, %c0_i32_0 : i32, i32
  }
  func.func @transform_14(%arg0: i32) -> (i32, i32) {
    %c0_i32 = arith.constant 0 : i32
    %c0_i32_0 = arith.constant 0 : i32
    %c0_i32_1 = arith.constant 0 : i32
    return %c0_i32, %c0_i32_0 : i32, i32
  }
  func.func @transform_15(%arg0: i32) -> (i32, i32) {
    %c0_i32 = arith.constant 0 : i32
    %c0_i32_0 = arith.constant 0 : i32
    %c0_i32_1 = arith.constant 0 : i32
    return %c0_i32, %c0_i32_0 : i32, i32
  }
  func.func @transform_16(%arg0: i32) -> (i32, i32) {
    %c0_i32 = arith.constant 0 : i32
    %c0_i32_0 = arith.constant 0 : i32
    %c0_i32_1 = arith.constant 0 : i32
    return %c0_i32, %c0_i32_0 : i32, i32
  }
  func.func @transform_17(%arg0: i32) -> (i32, i32) {
    %c0_i32 = arith.constant 0 : i32
    %c0_i32_0 = arith.constant 0 : i32
    %c0_i32_1 = arith.constant 0 : i32
    return %c0_i32, %c0_i32_0 : i32, i32
  }
  func.func @transform_18(%arg0: i32) -> (i32, i32) {
    %c0_i32 = arith.constant 0 : i32
    %c0_i32_0 = arith.constant 0 : i32
    %c0_i32_1 = arith.constant 0 : i32
    return %c0_i32, %c0_i32_0 : i32, i32
  }
  func.func @transform_19(%arg0: i32) -> (i32, i32) {
    %c0_i32 = arith.constant 0 : i32
    %c0_i32_0 = arith.constant 0 : i32
    %c0_i32_1 = arith.constant 0 : i32
    return %c0_i32, %c0_i32_0 : i32, i32
  }
  func.func @transform_20(%arg0: i32) -> (i32, i32) {
    %c0_i32 = arith.constant 0 : i32
    %c0_i32_0 = arith.constant 0 : i32
    %c0_i32_1 = arith.constant 0 : i32
    return %c0_i32, %c0_i32_0 : i32, i32
  }
  func.func @transform_21(%arg0: i32) -> (i32, i32) {
    %c0_i32 = arith.constant 0 : i32
    %c0_i32_0 = arith.constant 0 : i32
    %c0_i32_1 = arith.constant 0 : i32
    return %c0_i32, %c0_i32_0 : i32, i32
  }
  func.func @transform_22(%arg0: i32) -> (i32, i32) {
    %c0_i32 = arith.constant 0 : i32
    %c0_i32_0 = arith.constant 0 : i32
    %c0_i32_1 = arith.constant 0 : i32
    return %c0_i32, %c0_i32_0 : i32, i32
  }
  func.func @transform_23(%arg0: i32) -> (i32, i32, i32) {
    %c0_i32 = arith.constant 0 : i32
    %c0_i32_0 = arith.constant 0 : i32
    %c0_i32_1 = arith.constant 0 : i32
    return %arg0, %c0_i32, %c0_i32_0 : i32, i32, i32
  }
}

module attributes {stable_mosaic.version = 11 : i64} {
  func.func @_rnn_head_kernel(%arg0: memref<4x2x128xf32, #tpu.memory_space<vmem>>, %arg1: memref<128x128xf32, #tpu.memory_space<vmem>>, %arg2: memref<128x128xf32, #tpu.memory_space<vmem>>, %arg3: memref<128x128xf32, #tpu.memory_space<vmem>>, %arg4: memref<1x128xf32, #tpu.memory_space<vmem>>, %arg5: memref<128x512xf32, #tpu.memory_space<vmem>>, %arg6: memref<1x512xf32, #tpu.memory_space<vmem>>, %arg7: memref<512x256xf32, #tpu.memory_space<vmem>>, %arg8: memref<1x256xf32, #tpu.memory_space<vmem>>, %arg9: memref<256x128xf32, #tpu.memory_space<vmem>>, %arg10: memref<1x128xf32, #tpu.memory_space<vmem>>, %arg11: memref<2x128xf32, #tpu.memory_space<vmem>>) attributes {dimension_semantics = [], scalar_prefetch = 0 : i64, scratch_operands = 0 : i64, tpu.core_type = #tpu.core_type<tc>} {
    %c0 = arith.constant 0 : index
    %c0_0 = arith.constant 0 : index
    %c0_1 = arith.constant 0 : index
    %0 = vector.load %arg0[%c0, %c0_0, %c0_1] : memref<4x2x128xf32, #tpu.memory_space<vmem>>, vector<1x2x128xf32>
    %1 = vector.shape_cast %0 : vector<1x2x128xf32> to vector<2x128xf32>
    %2 = math.tanh %1 : vector<2x128xf32>
    %c0_2 = arith.constant 0 : index
    %c0_3 = arith.constant 0 : index
    %3 = vector.load %arg2[%c0_2, %c0_3] : memref<128x128xf32, #tpu.memory_space<vmem>>, vector<128x128xf32>
    %cst = arith.constant dense<0.000000e+00> : vector<2x128xf32>
    %4 = tpu.matmul %2, %3, %cst {dimension_numbers = #tpu.dot_dimension_numbers<[1], [0], [0], [1], [0, 0, 1, 1], [], []>} : vector<2x128xf32>, vector<128x128xf32>, vector<2x128xf32> -> vector<2x128xf32>
    %c0_4 = arith.constant 0 : index
    %c0_5 = arith.constant 0 : index
    %5 = vector.load %arg4[%c0_4, %c0_5] : memref<1x128xf32, #tpu.memory_space<vmem>>, vector<1x128xf32>
    %6 = vector.broadcast %5 : vector<1x128xf32> to vector<2x128xf32>
    %7 = arith.addf %4, %6 : vector<2x128xf32>
    %8 = math.tanh %7 : vector<2x128xf32>
    %c1 = arith.constant 1 : index
    %c0_6 = arith.constant 0 : index
    %c0_7 = arith.constant 0 : index
    %9 = vector.load %arg0[%c1, %c0_6, %c0_7] : memref<4x2x128xf32, #tpu.memory_space<vmem>>, vector<1x2x128xf32>
    %10 = vector.shape_cast %9 : vector<1x2x128xf32> to vector<2x128xf32>
    %c0_8 = arith.constant 0 : index
    %c0_9 = arith.constant 0 : index
    %11 = vector.load %arg1[%c0_8, %c0_9] : memref<128x128xf32, #tpu.memory_space<vmem>>, vector<128x128xf32>
    %cst_10 = arith.constant dense<0.000000e+00> : vector<2x128xf32>
    %12 = tpu.matmul %2, %11, %cst_10 {dimension_numbers = #tpu.dot_dimension_numbers<[1], [0], [0], [1], [0, 0, 1, 1], [], []>} : vector<2x128xf32>, vector<128x128xf32>, vector<2x128xf32> -> vector<2x128xf32>
    %13 = arith.addf %10, %12 : vector<2x128xf32>
    %14 = math.tanh %13 : vector<2x128xf32>
    %c0_11 = arith.constant 0 : index
    %c0_12 = arith.constant 0 : index
    %15 = vector.load %arg2[%c0_11, %c0_12] : memref<128x128xf32, #tpu.memory_space<vmem>>, vector<128x128xf32>
    %cst_13 = arith.constant dense<0.000000e+00> : vector<2x128xf32>
    %16 = tpu.matmul %14, %15, %cst_13 {dimension_numbers = #tpu.dot_dimension_numbers<[1], [0], [0], [1], [0, 0, 1, 1], [], []>} : vector<2x128xf32>, vector<128x128xf32>, vector<2x128xf32> -> vector<2x128xf32>
    %c0_14 = arith.constant 0 : index
    %c0_15 = arith.constant 0 : index
    %17 = vector.load %arg3[%c0_14, %c0_15] : memref<128x128xf32, #tpu.memory_space<vmem>>, vector<128x128xf32>
    %cst_16 = arith.constant dense<0.000000e+00> : vector<2x128xf32>
    %18 = tpu.matmul %8, %17, %cst_16 {dimension_numbers = #tpu.dot_dimension_numbers<[1], [0], [0], [1], [0, 0, 1, 1], [], []>} : vector<2x128xf32>, vector<128x128xf32>, vector<2x128xf32> -> vector<2x128xf32>
    %19 = arith.addf %16, %18 : vector<2x128xf32>
    %c0_17 = arith.constant 0 : index
    %c0_18 = arith.constant 0 : index
    %20 = vector.load %arg4[%c0_17, %c0_18] : memref<1x128xf32, #tpu.memory_space<vmem>>, vector<1x128xf32>
    %21 = vector.broadcast %20 : vector<1x128xf32> to vector<2x128xf32>
    %22 = arith.addf %19, %21 : vector<2x128xf32>
    %23 = math.tanh %22 : vector<2x128xf32>
    %c2 = arith.constant 2 : index
    %c0_19 = arith.constant 0 : index
    %c0_20 = arith.constant 0 : index
    %24 = vector.load %arg0[%c2, %c0_19, %c0_20] : memref<4x2x128xf32, #tpu.memory_space<vmem>>, vector<1x2x128xf32>
    %25 = vector.shape_cast %24 : vector<1x2x128xf32> to vector<2x128xf32>
    %c0_21 = arith.constant 0 : index
    %c0_22 = arith.constant 0 : index
    %26 = vector.load %arg1[%c0_21, %c0_22] : memref<128x128xf32, #tpu.memory_space<vmem>>, vector<128x128xf32>
    %cst_23 = arith.constant dense<0.000000e+00> : vector<2x128xf32>
    %27 = tpu.matmul %14, %26, %cst_23 {dimension_numbers = #tpu.dot_dimension_numbers<[1], [0], [0], [1], [0, 0, 1, 1], [], []>} : vector<2x128xf32>, vector<128x128xf32>, vector<2x128xf32> -> vector<2x128xf32>
    %28 = arith.addf %25, %27 : vector<2x128xf32>
    %29 = math.tanh %28 : vector<2x128xf32>
    %c0_24 = arith.constant 0 : index
    %c0_25 = arith.constant 0 : index
    %30 = vector.load %arg2[%c0_24, %c0_25] : memref<128x128xf32, #tpu.memory_space<vmem>>, vector<128x128xf32>
    %cst_26 = arith.constant dense<0.000000e+00> : vector<2x128xf32>
    %31 = tpu.matmul %29, %30, %cst_26 {dimension_numbers = #tpu.dot_dimension_numbers<[1], [0], [0], [1], [0, 0, 1, 1], [], []>} : vector<2x128xf32>, vector<128x128xf32>, vector<2x128xf32> -> vector<2x128xf32>
    %c0_27 = arith.constant 0 : index
    %c0_28 = arith.constant 0 : index
    %32 = vector.load %arg3[%c0_27, %c0_28] : memref<128x128xf32, #tpu.memory_space<vmem>>, vector<128x128xf32>
    %cst_29 = arith.constant dense<0.000000e+00> : vector<2x128xf32>
    %33 = tpu.matmul %23, %32, %cst_29 {dimension_numbers = #tpu.dot_dimension_numbers<[1], [0], [0], [1], [0, 0, 1, 1], [], []>} : vector<2x128xf32>, vector<128x128xf32>, vector<2x128xf32> -> vector<2x128xf32>
    %34 = arith.addf %31, %33 : vector<2x128xf32>
    %c0_30 = arith.constant 0 : index
    %c0_31 = arith.constant 0 : index
    %35 = vector.load %arg4[%c0_30, %c0_31] : memref<1x128xf32, #tpu.memory_space<vmem>>, vector<1x128xf32>
    %36 = vector.broadcast %35 : vector<1x128xf32> to vector<2x128xf32>
    %37 = arith.addf %34, %36 : vector<2x128xf32>
    %38 = math.tanh %37 : vector<2x128xf32>
    %c3 = arith.constant 3 : index
    %c0_32 = arith.constant 0 : index
    %c0_33 = arith.constant 0 : index
    %39 = vector.load %arg0[%c3, %c0_32, %c0_33] : memref<4x2x128xf32, #tpu.memory_space<vmem>>, vector<1x2x128xf32>
    %40 = vector.shape_cast %39 : vector<1x2x128xf32> to vector<2x128xf32>
    %c0_34 = arith.constant 0 : index
    %c0_35 = arith.constant 0 : index
    %41 = vector.load %arg1[%c0_34, %c0_35] : memref<128x128xf32, #tpu.memory_space<vmem>>, vector<128x128xf32>
    %cst_36 = arith.constant dense<0.000000e+00> : vector<2x128xf32>
    %42 = tpu.matmul %29, %41, %cst_36 {dimension_numbers = #tpu.dot_dimension_numbers<[1], [0], [0], [1], [0, 0, 1, 1], [], []>} : vector<2x128xf32>, vector<128x128xf32>, vector<2x128xf32> -> vector<2x128xf32>
    %43 = arith.addf %40, %42 : vector<2x128xf32>
    %44 = math.tanh %43 : vector<2x128xf32>
    %c0_37 = arith.constant 0 : index
    %c0_38 = arith.constant 0 : index
    %45 = vector.load %arg2[%c0_37, %c0_38] : memref<128x128xf32, #tpu.memory_space<vmem>>, vector<128x128xf32>
    %cst_39 = arith.constant dense<0.000000e+00> : vector<2x128xf32>
    %46 = tpu.matmul %44, %45, %cst_39 {dimension_numbers = #tpu.dot_dimension_numbers<[1], [0], [0], [1], [0, 0, 1, 1], [], []>} : vector<2x128xf32>, vector<128x128xf32>, vector<2x128xf32> -> vector<2x128xf32>
    %c0_40 = arith.constant 0 : index
    %c0_41 = arith.constant 0 : index
    %47 = vector.load %arg3[%c0_40, %c0_41] : memref<128x128xf32, #tpu.memory_space<vmem>>, vector<128x128xf32>
    %cst_42 = arith.constant dense<0.000000e+00> : vector<2x128xf32>
    %48 = tpu.matmul %38, %47, %cst_42 {dimension_numbers = #tpu.dot_dimension_numbers<[1], [0], [0], [1], [0, 0, 1, 1], [], []>} : vector<2x128xf32>, vector<128x128xf32>, vector<2x128xf32> -> vector<2x128xf32>
    %49 = arith.addf %46, %48 : vector<2x128xf32>
    %c0_43 = arith.constant 0 : index
    %c0_44 = arith.constant 0 : index
    %50 = vector.load %arg4[%c0_43, %c0_44] : memref<1x128xf32, #tpu.memory_space<vmem>>, vector<1x128xf32>
    %51 = vector.broadcast %50 : vector<1x128xf32> to vector<2x128xf32>
    %52 = arith.addf %49, %51 : vector<2x128xf32>
    %53 = math.tanh %52 : vector<2x128xf32>
    %c0_45 = arith.constant 0 : index
    %c0_46 = arith.constant 0 : index
    %54 = vector.load %arg5[%c0_45, %c0_46] : memref<128x512xf32, #tpu.memory_space<vmem>>, vector<128x512xf32>
    %cst_47 = arith.constant dense<0.000000e+00> : vector<2x512xf32>
    %55 = tpu.matmul %53, %54, %cst_47 {dimension_numbers = #tpu.dot_dimension_numbers<[1], [0], [0], [1], [0, 0, 1, 1], [], []>} : vector<2x128xf32>, vector<128x512xf32>, vector<2x512xf32> -> vector<2x512xf32>
    %c0_48 = arith.constant 0 : index
    %c0_49 = arith.constant 0 : index
    %56 = vector.load %arg6[%c0_48, %c0_49] : memref<1x512xf32, #tpu.memory_space<vmem>>, vector<1x512xf32>
    %57 = vector.broadcast %56 : vector<1x512xf32> to vector<2x512xf32>
    %58 = arith.addf %55, %57 : vector<2x512xf32>
    %cst_50 = arith.constant 0.000000e+00 : f32
    %59 = vector.broadcast %cst_50 : f32 to vector<2x512xf32>
    %60 = arith.maximumf %58, %59 : vector<2x512xf32>
    %c0_51 = arith.constant 0 : index
    %c0_52 = arith.constant 0 : index
    %61 = vector.load %arg7[%c0_51, %c0_52] : memref<512x256xf32, #tpu.memory_space<vmem>>, vector<512x256xf32>
    %cst_53 = arith.constant dense<0.000000e+00> : vector<2x256xf32>
    %62 = tpu.matmul %60, %61, %cst_53 {dimension_numbers = #tpu.dot_dimension_numbers<[1], [0], [0], [1], [0, 0, 1, 1], [], []>} : vector<2x512xf32>, vector<512x256xf32>, vector<2x256xf32> -> vector<2x256xf32>
    %c0_54 = arith.constant 0 : index
    %c0_55 = arith.constant 0 : index
    %63 = vector.load %arg8[%c0_54, %c0_55] : memref<1x256xf32, #tpu.memory_space<vmem>>, vector<1x256xf32>
    %64 = vector.broadcast %63 : vector<1x256xf32> to vector<2x256xf32>
    %65 = arith.addf %62, %64 : vector<2x256xf32>
    %cst_56 = arith.constant 0.000000e+00 : f32
    %66 = vector.broadcast %cst_56 : f32 to vector<2x256xf32>
    %67 = arith.maximumf %65, %66 : vector<2x256xf32>
    %c0_57 = arith.constant 0 : index
    %c0_58 = arith.constant 0 : index
    %68 = vector.load %arg9[%c0_57, %c0_58] : memref<256x128xf32, #tpu.memory_space<vmem>>, vector<256x128xf32>
    %cst_59 = arith.constant dense<0.000000e+00> : vector<2x128xf32>
    %69 = tpu.matmul %67, %68, %cst_59 {dimension_numbers = #tpu.dot_dimension_numbers<[1], [0], [0], [1], [0, 0, 1, 1], [], []>} : vector<2x256xf32>, vector<256x128xf32>, vector<2x128xf32> -> vector<2x128xf32>
    %c0_60 = arith.constant 0 : index
    %c0_61 = arith.constant 0 : index
    %70 = vector.load %arg10[%c0_60, %c0_61] : memref<1x128xf32, #tpu.memory_space<vmem>>, vector<1x128xf32>
    %71 = vector.broadcast %70 : vector<1x128xf32> to vector<2x128xf32>
    %72 = arith.addf %69, %71 : vector<2x128xf32>
    %cst_62 = arith.constant dense<0xFF800000> : vector<2xf32>
    %73 = vector.multi_reduction <maximumf>, %72, %cst_62 [1] : vector<2x128xf32> to vector<2xf32>
    %74 = vector.shape_cast %73 : vector<2xf32> to vector<2x1xf32>
    %75 = vector.broadcast %74 : vector<2x1xf32> to vector<2x128xf32>
    %76 = arith.subf %72, %75 : vector<2x128xf32>
    %77 = math.exp %76 : vector<2x128xf32>
    %cst_63 = arith.constant dense<0.000000e+00> : vector<2xf32>
    %78 = vector.multi_reduction <add>, %77, %cst_63 [1] : vector<2x128xf32> to vector<2xf32>
    %79 = vector.shape_cast %78 : vector<2xf32> to vector<2x1xf32>
    %80 = math.log %79 : vector<2x1xf32>
    %81 = vector.broadcast %80 : vector<2x1xf32> to vector<2x128xf32>
    %82 = arith.subf %76, %81 : vector<2x128xf32>
    %c0_64 = arith.constant 0 : index
    %c0_65 = arith.constant 0 : index
    %83 = vector.load %arg11[%c0_64, %c0_65] : memref<2x128xf32, #tpu.memory_space<vmem>>, vector<2x128xf32>
    tpu.vector_store %arg11[%c0_64, %c0_65], %82 {strides = array<i32>} : memref<2x128xf32, #tpu.memory_space<vmem>>, vector<2x128xf32>,
    return
  }
}

</mosaic_0001>

<bundles_post_ra>
// kernel: forward.3
= control target key start
LH: loop header
LB: loop body
LE: loop exit
PB: predicated region body
PF: predicated region fallthrough
CT: control target
= control target key end

     0   :  { %v2073_v2 = vmov 0.0   ;;  %s3441_s0 = inlined_call_operand.vmem [shape: f32[4,2,128], index: 0, kind: input, shape index: {}]   ;;  %s3442_s1 = inlined_call_operand.vmem [shape: f32[128,128], index: 1, kind: input, shape index: {}]   ;;  %s3443_s2 = inlined_call_operand.vmem [shape: f32[128,128], index: 2, kind: input, shape index: {}]   ;;  %s3444_s3 = inlined_call_operand.vmem [shape: f32[128,128], index: 3, kind: input, shape index: {}]   ;;  %s3445_s4 = inlined_call_operand.vmem [shape: f32[1,128], index: 4, kind: input, shape index: {}]   ;;  %s3446_s5 = inlined_call_operand.vmem [shape: f32[128,512], index: 5, kind: input, shape index: {}]   ;;  %s3447_s6 = inlined_call_operand.vmem [shape: f32[1,512], index: 6, kind: input, shape index: {}]   ;;  %s3448_s7 = inlined_call_operand.vmem [shape: f32[512,256], index: 7, kind: input, shape index: {}]   ;;  %s3449_s8 = inlined_call_operand.vmem [shape: f32[1,256], index: 8, kind: input, shape index: {}]   ;;  %s3450_s9 = inlined_call_operand.vmem [shape: f32[256,128], index: 9, kind: input, shape index: {}]   ;;  %s3451_s10 = inlined_call_operand.vmem [shape: f32[1,128], index: 10, kind: input, shape index: {}]   ;;  %s3452_s11 = inlined_call_operand.hbm [shape: f32[2,128], index: 11, kind: output, shape index: {}]  }
   0x1   :  { %v2139_v0 = vld [vmem:[%s3443_s2 + $0x78] sm:$0xff]  ;;  %1678 = vmatprep.subr.mxu0 %v2073_v2  ;;  %1713 = vmatprep.subr.mxu1 %v2073_v2  ;;  %v2151_v3 = vld [vmem:[%s3443_s2 + $0x70] sm:$0xff]  ;;  %v2165_v5 = vld [vmem:[%s3443_s2 + $0x68] sm:$0xff] }
   0x2   :  { %v2144_v1 = vld [vmem:[%s3442_s1 + $0x78] sm:$0xff]  ;;  %v2156_v4 = vld [vmem:[%s3442_s1 + $0x70] sm:$0xff]  ;;  %1679 = vmatpush3.msra.mxu0 %v2139_v0  ;;  %v2170_v6 = vld [vmem:[%s3442_s1 + $0x68] sm:$0xff] }
   0x3   :  { %1714 = vmatpush3.msra.mxu1 %v2144_v1  ;;  %1680 = vmatprep.subr.mxu0 %v2073_v2  ;;  %v2179_v7 = vld [vmem:[%s3443_s2 + $0x60] sm:$0xff]  ;;  %v2193_v9 = vld [vmem:[%s3443_s2 + $0x58] sm:$0xff]  ;;  %v2207_v11 = vld [vmem:[%s3443_s2 + $0x50] sm:$0xff] }
   0x4   :  { %1715 = vmatprep.subr.mxu1 %v2073_v2  ;;  %1681 = vmatpush3.msra.mxu0 %v2151_v3  ;;  %v2184_v8 = vld [vmem:[%s3442_s1 + $0x60] sm:$0xff]  ;;  %v2198_v10 = vld [vmem:[%s3442_s1 + $0x58] sm:$0xff]  ;;  %v2212_v12 = vld [vmem:[%s3442_s1 + $0x50] sm:$0xff] }
   0x5   :  { %1716 = vmatpush3.msra.mxu1 %v2156_v4  ;;  %1682 = vmatprep.subr.mxu0 %v2073_v2  ;;  %v2221_v13 = vld [vmem:[%s3443_s2 + $0x48] sm:$0xff]  ;;  %v2235_v15 = vld [vmem:[%s3443_s2 + $0x40] sm:$0xff] }
   0x6   :  { %1717 = vmatprep.subr.mxu1 %v2073_v2  ;;  %1683 = vmatpush3.msra.mxu0 %v2165_v5  ;;  %v2226_v14 = vld [vmem:[%s3442_s1 + $0x48] sm:$0xff]  ;;  %v2240_v16 = vld [vmem:[%s3442_s1 + $0x40] sm:$0xff] }
   0x7   :  { %1718 = vmatpush3.msra.mxu1 %v2170_v6  ;;  %1684 = vmatprep.subr.mxu0 %v2073_v2 }
   0x8   :  { %1719 = vmatprep.subr.mxu1 %v2073_v2  ;;  %1685 = vmatpush3.msra.mxu0 %v2179_v7 }
   0x9   :  { %1720 = vmatpush3.msra.mxu1 %v2184_v8  ;;  %1686 = vmatprep.subr.mxu0 %v2073_v2 }
   0xa   :  { %1721 = vmatprep.subr.mxu1 %v2073_v2  ;;  %1687 = vmatpush3.msra.mxu0 %v2193_v9 }
   0xb   :  { %1722 = vmatpush3.msra.mxu1 %v2198_v10  ;;  %1688 = vmatprep.subr.mxu0 %v2073_v2 }
   0xc   :  { %1723 = vmatprep.subr.mxu1 %v2073_v2  ;;  %1689 = vmatpush3.msra.mxu0 %v2207_v11 }
   0xd   :  { %1724 = vmatpush3.msra.mxu1 %v2212_v12  ;;  %1690 = vmatprep.subr.mxu0 %v2073_v2 }
   0xe   :  { %1725 = vmatprep.subr.mxu1 %v2073_v2  ;;  %1691 = vmatpush3.msra.mxu0 %v2221_v13 }
   0xf   :  { %1726 = vmatpush3.msra.mxu1 %v2226_v14 }
  0x10   :  { %16 = vsyncpa [#allocation3], 0  ;;  %1692 = vmatprep.subr.mxu0 %v2073_v2  ;;  %1727 = vmatprep.subr.mxu1 %v2073_v2  ;;  %v2249_v17 = vld [vmem:[%s3443_s2 + $0x38] sm:$0xff]  ;;  %v39_v19 = vld [vmem:[%s3441_s0] sm:$0x3]  ;;  %vm2074_vm0 = vmmov 0  }
  0x11   :  { %v2254_v18 = vld [vmem:[%s3442_s1 + $0x38] sm:$0xff]  ;;  %1693 = vmatpush3.msra.mxu0 %v2235_v15  ;;  %1728 = vmatpush3.msra.mxu1 %v2240_v16  ;;  %v2266_v20 = vld [vmem:[%s3443_s2 + $0x30] sm:$0xff]  ;;  %2031 = vtanh.f32 %v39_v19  ;;  %v2280_v22 = vld [vmem:[%s3443_s2 + $0x28] sm:$0xff]  ;;  %vm1440_vm1 = vcmask 1041408   ;;  %s2075_s23 = smov [#allocation2]  }
  0x12   :  { %1694 = vmatprep.subr.mxu0 %v2073_v2  ;;  %1729 = vmatprep.subr.mxu1 %v2073_v2  ;;  %v2271_v21 = vld [vmem:[%s3442_s1 + $0x30] sm:$0xff]  ;;  %v2285_v23 = vld [vmem:[%s3442_s1 + $0x28] sm:$0xff]  ;;  %v2294_v24 = vld [vmem:[%s3443_s2 + $0x20] sm:$0xff]  ;;  %s1460_s24 = sshll.u32 %s2075_s23, 4  ;;  %s1461_s24 = int_to_ptr.vmem [resolvable:$true] %s1460_s24 }
  0x13   :  { %1695 = vmatpush3.msra.mxu0 %v2249_v17  ;;  %1730 = vmatpush3.msra.mxu1 %v2254_v18  ;;  %v2299_v25 = vld [vmem:[%s3442_s1 + $0x20] sm:$0xff]  ;;  %v2308_v26 = vld [vmem:[%s3443_s2 + $0x18] sm:$0xff]  ;;  %v2322_v28 = vld [vmem:[%s3443_s2 + $0x10] sm:$0xff]  ;;  %p2056_p1 = scmp.lt.s32.totalorder %s1461_s24, %s1461_s24 }
  0x14   :  { %1696 = vmatprep.subr.mxu0 %v2073_v2  ;;  %1731 = vmatprep.subr.mxu1 %v2073_v2  ;;  %v2313_v27 = vld [vmem:[%s3442_s1 + $0x18] sm:$0xff]  ;;  %v2327_v29 = vld [vmem:[%s3442_s1 + $0x10] sm:$0xff]  ;;  %v2336_v30 = vld [vmem:[%s3443_s2 + $0x8] sm:$0xff] }
  0x15   :  { %1697 = vmatpush3.msra.mxu0 %v2266_v20  ;;  %1732 = vmatpush3.msra.mxu1 %v2271_v21  ;;  %v2341_v31 = vld [vmem:[%s3442_s1 + $0x8] sm:$0xff]  ;;  %v2350_v32 = vld [vmem:[%s3443_s2] sm:$0xff]  ;;  %v2370_v35 = vld [vmem:[%s3444_s3 + $0x78] sm:$0xff] }
  0x16   :  { %1698 = vmatprep.subr.mxu0 %v2073_v2  ;;  %1733 = vmatprep.subr.mxu1 %v2073_v2  ;;  %v2357_v33 = vld [vmem:[%s3442_s1] sm:$0xff]  ;;  %v2377_v36 = vld [vmem:[%s3444_s3 + $0x70] sm:$0xff]  ;;  %v2386_v37 = vld [vmem:[%s3444_s3 + $0x68] sm:$0xff] }
  0x17   :  { %1699 = vmatpush3.msra.mxu0 %v2280_v22  ;;  %1734 = vmatpush3.msra.mxu1 %v2285_v23  ;;  %v2395_v38 = vld [vmem:[%s3444_s3 + $0x60] sm:$0xff]  ;;  %v2404_v39 = vld [vmem:[%s3444_s3 + $0x58] sm:$0xff]  ;;  %v2413_v40 = vld [vmem:[%s3444_s3 + $0x50] sm:$0xff] }
  0x18   :  { %1700 = vmatprep.subr.mxu0 %v2073_v2  ;;  %1735 = vmatprep.subr.mxu1 %v2073_v2  ;;  %v2422_v41 = vld [vmem:[%s3444_s3 + $0x48] sm:$0xff]  ;;  %v2431_v42 = vld [vmem:[%s3444_s3 + $0x40] sm:$0xff]  ;;  %v2464_v43 = vld [vmem:[%s3444_s3 + $0x38] sm:$0xff] }
  0x19   :  { %1701 = vmatpush3.msra.mxu0 %v2294_v24  ;;  %1736 = vmatpush3.msra.mxu1 %v2299_v25  ;;  %v2471_v44 = vld [vmem:[%s3444_s3 + $0x30] sm:$0xff]  ;;  %v2477_v45 = vld [vmem:[%s3444_s3 + $0x28] sm:$0xff]  ;;  %v2483_v46 = vld [vmem:[%s3444_s3 + $0x20] sm:$0xff] }
  0x1a   :  { %1702 = vmatprep.subr.mxu0 %v2073_v2  ;;  %1737 = vmatprep.subr.mxu1 %v2073_v2  ;;  %v2490_v47 = vld [vmem:[%s3444_s3 + $0x18] sm:$0xff]  ;;  %v2497_v48 = vld [vmem:[%s3444_s3 + $0x10] sm:$0xff]  ;;  %v2504_v49 = vld [vmem:[%s3444_s3 + $0x8] sm:$0xff] }
  0x1b   :  { %1703 = vmatpush3.msra.mxu0 %v2308_v26  ;;  %1738 = vmatpush3.msra.mxu1 %v2313_v27  ;;  %v2511_v50 = vld [vmem:[%s3444_s3] sm:$0xff] }
  0x1c   :  { %1704 = vmatprep.subr.mxu0 %v2073_v2  ;;  %1739 = vmatprep.subr.mxu1 %v2073_v2  ;;  %v2520_v51 = vld [vmem:[%s3445_s4] ss:$0 sm:$0xff]  ;;  %v1469_v52 = vld [vmem:[%s3441_s0 + $0x2] sm:$0x3] }
  0x1d   :  { %1705 = vmatpush3.msra.mxu0 %v2322_v28  ;;  %1740 = vmatpush3.msra.mxu1 %v2327_v29 }
  0x1e   :  { %1706 = vmatprep.subr.mxu0 %v2073_v2  ;;  %1741 = vmatprep.subr.mxu1 %v2073_v2  ;;  %v2032_v34 = vpop.eup %2031 }
  0x1f   :  { %1707 = vmatpush3.msra.mxu0 %v2336_v30  ;;  %1742 = vmatpush3.msra.mxu1 %v2341_v31 }
  0x20   :  { %1708 = vmatprep.subr.mxu0 %v2073_v2  ;;  %1743 = vmatprep.subr.mxu1 %v2073_v2 }
  0x21   :  { %1709 = vmatpush3.msra.mxu0 %v2350_v32  ;;  %1710 = vmatprep.mubr.msk.f32.mxu0 %vm2074_vm0, %v2073_v2 }
  0x22   :  { %1744 = vmatpush3.msra.mxu1 %v2357_v33  ;;  %1745 = vmatprep.mubr.msk.f32.mxu1 %vm2074_vm0, %v2073_v2 }
  0x23   :  { %1711 = vmatmul.mubr.f32.vlgmr.msra.gmra.mxu0 %v2032_v34  ;;  %1746 = vmatmul.mubr.f32.vlgmr.msra.gmra.mxu1 %v2032_v34 }
  0x24   :  { %1748 = vmatprep.subr.mxu0 %v2073_v2  ;;  %1783 = vmatprep.subr.mxu1 %v2073_v2 }
  0x25   :  { %1749 = vmatpush3.msra.mxu0 %v2370_v35  ;;  %1784 = vmatpush3.msra.mxu1 %v2139_v0 }
  0x26   :  { %1750 = vmatprep.subr.mxu0 %v2073_v2  ;;  %1785 = vmatprep.subr.mxu1 %v2073_v2 }
  0x27   :  { %1751 = vmatpush3.msra.mxu0 %v2377_v36  ;;  %1786 = vmatpush3.msra.mxu1 %v2151_v3 }
  0x28   :  { %1752 = vmatprep.subr.mxu0 %v2073_v2  ;;  %1787 = vmatprep.subr.mxu1 %v2073_v2 }
  0x29   :  { %1753 = vmatpush3.msra.mxu0 %v2386_v37  ;;  %1788 = vmatpush3.msra.mxu1 %v2165_v5 }
  0x2a   :  { %1754 = vmatprep.subr.mxu0 %v2073_v2  ;;  %1789 = vmatprep.subr.mxu1 %v2073_v2 }
  0x2b   :  { %1755 = vmatpush3.msra.mxu0 %v2395_v38  ;;  %1790 = vmatpush3.msra.mxu1 %v2179_v7 }
  0x2c   :  { %1756 = vmatprep.subr.mxu0 %v2073_v2  ;;  %1791 = vmatprep.subr.mxu1 %v2073_v2 }
  0x2d   :  { %1757 = vmatpush3.msra.mxu0 %v2404_v39  ;;  %1792 = vmatpush3.msra.mxu1 %v2193_v9 }
  0x2e   :  { %1758 = vmatprep.subr.mxu0 %v2073_v2  ;;  %1793 = vmatprep.subr.mxu1 %v2073_v2 }
  0x2f   :  { %1759 = vmatpush3.msra.mxu0 %v2413_v40  ;;  %1794 = vmatpush3.msra.mxu1 %v2207_v11 }
  0x30   :  { %1760 = vmatprep.subr.mxu0 %v2073_v2  ;;  %1795 = vmatprep.subr.mxu1 %v2073_v2 }
  0x31   :  { %1761 = vmatpush3.msra.mxu0 %v2422_v41  ;;  %1796 = vmatpush3.msra.mxu1 %v2221_v13 }
  0x32   :  { %1762 = vmatprep.subr.mxu0 %v2073_v2  ;;  %1797 = vmatprep.subr.mxu1 %v2073_v2 }
  0x33   :  { %1763 = vmatpush3.msra.mxu0 %v2431_v42  ;;  %1798 = vmatpush3.msra.mxu1 %v2235_v15 }
  0x34   :  { %1764 = vmatprep.subr.mxu0 %v2073_v2  ;;  %1799 = vmatprep.subr.mxu1 %v2073_v2 }
  0x35   :  { %1800 = vmatpush3.msra.mxu1 %v2249_v17  ;;  %1780 = vmatprep.mubr.msk.f32.mxu0 %vm2074_vm0, %v2073_v2 }
  0x36   :  { %1801 = vmatprep.subr.mxu1 %v2073_v2  ;;  %1815 = vmatprep.mubr.msk.f32.mxu1 %vm2074_vm0, %v2073_v2 }
  0x37   :  { %1802 = vmatpush3.msra.mxu1 %v2266_v20  ;;  %1765 = vmatpush3.msra.mxu0 %v2464_v43 }
  0x38   :  { %1803 = vmatprep.subr.mxu1 %v2073_v2  ;;  %1766 = vmatprep.subr.mxu0 %v2073_v2 }
  0x39   :  { %1804 = vmatpush3.msra.mxu1 %v2280_v22  ;;  %1767 = vmatpush3.msra.mxu0 %v2471_v44 }
  0x3a   :  { %1805 = vmatprep.subr.mxu1 %v2073_v2  ;;  %1768 = vmatprep.subr.mxu0 %v2073_v2 }
  0x3b   :  { %1806 = vmatpush3.msra.mxu1 %v2294_v24  ;;  %1769 = vmatpush3.msra.mxu0 %v2477_v45 }
  0x3c   :  { %1807 = vmatprep.subr.mxu1 %v2073_v2  ;;  %1770 = vmatprep.subr.mxu0 %v2073_v2 }
  0x3d   :  { %1808 = vmatpush3.msra.mxu1 %v2308_v26  ;;  %1771 = vmatpush3.msra.mxu0 %v2483_v46 }
  0x3e   :  { %1809 = vmatprep.subr.mxu1 %v2073_v2  ;;  %1772 = vmatprep.subr.mxu0 %v2073_v2 }
  0x3f   :  { %1810 = vmatpush3.msra.mxu1 %v2322_v28  ;;  %1773 = vmatpush3.msra.mxu0 %v2490_v47 }
  0x40   :  { %1811 = vmatprep.subr.mxu1 %v2073_v2  ;;  %1774 = vmatprep.subr.mxu0 %v2073_v2 }
  0x41   :  { %1812 = vmatpush3.msra.mxu1 %v2336_v30  ;;  %1775 = vmatpush3.msra.mxu0 %v2497_v48 }
  0x42   :  { %1813 = vmatprep.subr.mxu1 %v2073_v2  ;;  %1776 = vmatprep.subr.mxu0 %v2073_v2 }
  0x43   :  { %1814 = vmatpush3.msra.mxu1 %v2350_v32  ;;  %1777 = vmatpush3.msra.mxu0 %v2504_v49 }
  0x44   :  { %1853 = vmatprep.subr.mxu1 %v2073_v2  ;;  %1778 = vmatprep.subr.mxu0 %v2073_v2 }
  0x45   :  { %1779 = vmatpush3.msra.mxu0 %v2511_v50 }
  0x46   :  { %1818 = vmatprep.subr.mxu0 %v2073_v2 }
  0xe3   :  { %v130_v53 = vpop.f32.mrf.mxu0  ;;  %v219_v54 = vpop.f32.mrf.mxu1 }
  0xe4   :  { %v131_v55 = vadd.f32 %v2520_v51, %v130_v53  ;;  %v223_v56 = vadd.f32 %v1469_v52, %v219_v54  ;;  %v844_v54 = vld [vmem:[%s3446_s5 + $0xe8] sm:$0xff] }
  0xe5   :  { %v1712_v57 = vpop.f32.mrf.mxu0  ;;  %v1747_v58 = vpop.f32.mrf.mxu1 }
  0xe6   :  { %2033 = vtanh.f32 %v131_v55  ;;  %v846_v55 = vld [vmem:[%s3446_s5 + $0xf8] sm:$0xff]  ;;  %v845_v57 = vld [vmem:[%s3446_s5 + $0xf0] sm:$0xff]  ;;  %v840_v58 = vld [vmem:[%s3446_s5 + $0xc8] sm:$0xff] }
  0xe7   :  { %2035 = vtanh.f32 %v223_v56  ;;  %v843_v56 = vld [vmem:[%s3446_s5 + $0xe0] sm:$0xff] }
  0xf3   :  { %v2034_v59 = vpop.eup %2033 }
  0xf4   :  { %v2526_v60 = vpop.eup %2035  ;;  %1781 = vmatmul.mubr.f32.vlgmr.msra.gmra.mxu0 %v2034_v59  ;;  %v842_v59 = vld [vmem:[%s3446_s5 + $0xd8] sm:$0xff] }
  0xf5   :  { %1816 = vmatmul.mubr.f32.vlgmr.msra.gmra.mxu1 %v2526_v60  ;;  %1819 = vmatpush3.msra.mxu0 %v2144_v1 }
  0xf6   :  { %1820 = vmatprep.subr.mxu0 %v2073_v2  ;;  %1850 = vmatprep.mubr.msk.f32.mxu0 %vm2074_vm0, %v2073_v2 }
  0xf7   :  { %1821 = vmatpush3.msra.mxu0 %v2156_v4  ;;  %1854 = vmatpush3.msra.mxu1 %v2370_v35 }
  0xf8   :  { %1822 = vmatprep.subr.mxu0 %v2073_v2  ;;  %1855 = vmatprep.subr.mxu1 %v2073_v2 }
  0xf9   :  { %1823 = vmatpush3.msra.mxu0 %v2170_v6  ;;  %1856 = vmatpush3.msra.mxu1 %v2377_v36 }
  0xfa   :  { %1824 = vmatprep.subr.mxu0 %v2073_v2  ;;  %1857 = vmatprep.subr.mxu1 %v2073_v2 }
  0xfb   :  { %1825 = vmatpush3.msra.mxu0 %v2184_v8  ;;  %1858 = vmatpush3.msra.mxu1 %v2386_v37 }
  0xfc   :  { %1826 = vmatprep.subr.mxu0 %v2073_v2  ;;  %1859 = vmatprep.subr.mxu1 %v2073_v2 }
  0xfd   :  { %1827 = vmatpush3.msra.mxu0 %v2198_v10  ;;  %1860 = vmatpush3.msra.mxu1 %v2395_v38 }
  0xfe   :  { %1828 = vmatprep.subr.mxu0 %v2073_v2  ;;  %1861 = vmatprep.subr.mxu1 %v2073_v2 }
  0xff   :  { %1829 = vmatpush3.msra.mxu0 %v2212_v12  ;;  %1862 = vmatpush3.msra.mxu1 %v2404_v39 }
 0x100   :  { %1830 = vmatprep.subr.mxu0 %v2073_v2  ;;  %1863 = vmatprep.subr.mxu1 %v2073_v2 }
 0x101   :  { %1831 = vmatpush3.msra.mxu0 %v2226_v14  ;;  %1864 = vmatpush3.msra.mxu1 %v2413_v40 }
 0x102   :  { %1832 = vmatprep.subr.mxu0 %v2073_v2  ;;  %1865 = vmatprep.subr.mxu1 %v2073_v2 }
 0x103   :  { %1833 = vmatpush3.msra.mxu0 %v2240_v16  ;;  %1866 = vmatpush3.msra.mxu1 %v2422_v41 }
 0x104   :  { %1834 = vmatprep.subr.mxu0 %v2073_v2  ;;  %1867 = vmatprep.subr.mxu1 %v2073_v2 }
 0x105   :  { %1835 = vmatpush3.msra.mxu0 %v2254_v18  ;;  %1868 = vmatpush3.msra.mxu1 %v2431_v42 }
 0x106   :  { %1836 = vmatprep.subr.mxu0 %v2073_v2  ;;  %1869 = vmatprep.subr.mxu1 %v2073_v2 }
 0x107   :  { %1837 = vmatpush3.msra.mxu0 %v2271_v21  ;;  %1870 = vmatpush3.msra.mxu1 %v2464_v43 }
 0x108   :  { %1838 = vmatprep.subr.mxu0 %v2073_v2  ;;  %1871 = vmatprep.subr.mxu1 %v2073_v2 }
 0x109   :  { %1839 = vmatpush3.msra.mxu0 %v2285_v23  ;;  %1872 = vmatpush3.msra.mxu1 %v2471_v44 }
 0x10a   :  { %1840 = vmatprep.subr.mxu0 %v2073_v2  ;;  %1873 = vmatprep.subr.mxu1 %v2073_v2 }
 0x10b   :  { %1841 = vmatpush3.msra.mxu0 %v2299_v25  ;;  %1874 = vmatpush3.msra.mxu1 %v2477_v45 }
 0x10c   :  { %1842 = vmatprep.subr.mxu0 %v2073_v2  ;;  %1875 = vmatprep.subr.mxu1 %v2073_v2 }
 0x10d   :  { %1843 = vmatpush3.msra.mxu0 %v2313_v27  ;;  %1876 = vmatpush3.msra.mxu1 %v2483_v46 }
 0x10e   :  { %1844 = vmatprep.subr.mxu0 %v2073_v2  ;;  %1877 = vmatprep.subr.mxu1 %v2073_v2 }
 0x10f   :  { %1845 = vmatpush3.msra.mxu0 %v2327_v29  ;;  %1878 = vmatpush3.msra.mxu1 %v2490_v47 }
 0x110   :  { %1846 = vmatprep.subr.mxu0 %v2073_v2  ;;  %1879 = vmatprep.subr.mxu1 %v2073_v2 }
 0x111   :  { %1847 = vmatpush3.msra.mxu0 %v2341_v31  ;;  %1880 = vmatpush3.msra.mxu1 %v2497_v48 }
 0x112   :  { %1848 = vmatprep.subr.mxu0 %v2073_v2  ;;  %1881 = vmatprep.subr.mxu1 %v2073_v2 }
 0x113   :  { %1849 = vmatpush3.msra.mxu0 %v2357_v33  ;;  %1882 = vmatpush3.msra.mxu1 %v2504_v49 }
 0x114   :  { %1851 = vmatmul.mubr.f32.vlgmr.msra.gmra.mxu0 %v2526_v60  ;;  %1883 = vmatprep.subr.mxu1 %v2073_v2  ;;  %v839_v60 = vld [vmem:[%s3446_s5 + $0xc0] sm:$0xff] }
 0x115   :  { %1888 = vmatprep.subr.mxu0 %v2073_v2  ;;  %1884 = vmatpush3.msra.mxu1 %v2511_v50 }
 0x116   :  { %1889 = vmatpush3.msra.mxu0 %v2139_v0  ;;  %1885 = vmatprep.mubr.msk.f32.mxu1 %vm2074_vm0, %v2073_v2 }
 0x117   :  { %1890 = vmatprep.subr.mxu0 %v2073_v2  ;;  %1923 = vmatprep.subr.mxu1 %v2073_v2 }
 0x118   :  { %1891 = vmatpush3.msra.mxu0 %v2151_v3  ;;  %1920 = vmatprep.mubr.msk.f32.mxu0 %vm2074_vm0, %v2073_v2 }
 0x119   :  { %1892 = vmatprep.subr.mxu0 %v2073_v2 }
 0x11a   :  { %1893 = vmatpush3.msra.mxu0 %v2165_v5 }
 0x11b   :  { %1894 = vmatprep.subr.mxu0 %v2073_v2 }
 0x11c   :  { %1895 = vmatpush3.msra.mxu0 %v2179_v7 }
 0x11d   :  { %1896 = vmatprep.subr.mxu0 %v2073_v2 }
 0x11e   :  { %1897 = vmatpush3.msra.mxu0 %v2193_v9 }
 0x11f   :  { %1898 = vmatprep.subr.mxu0 %v2073_v2 }
 0x120   :  { %1899 = vmatpush3.msra.mxu0 %v2207_v11 }
 0x121   :  { %1900 = vmatprep.subr.mxu0 %v2073_v2 }
 0x122   :  { %1901 = vmatpush3.msra.mxu0 %v2221_v13 }
 0x123   :  { %1902 = vmatprep.subr.mxu0 %v2073_v2 }
 0x124   :  { %1903 = vmatpush3.msra.mxu0 %v2235_v15 }
 0x125   :  { %1904 = vmatprep.subr.mxu0 %v2073_v2 }
 0x126   :  { %1905 = vmatpush3.msra.mxu0 %v2249_v17 }
 0x127   :  { %1906 = vmatprep.subr.mxu0 %v2073_v2 }
 0x128   :  { %1907 = vmatpush3.msra.mxu0 %v2266_v20 }
 0x129   :  { %1908 = vmatprep.subr.mxu0 %v2073_v2 }
 0x12a   :  { %1909 = vmatpush3.msra.mxu0 %v2280_v22 }
 0x12b   :  { %1910 = vmatprep.subr.mxu0 %v2073_v2 }
 0x12c   :  { %1911 = vmatpush3.msra.mxu0 %v2294_v24 }
 0x12d   :  { %1912 = vmatprep.subr.mxu0 %v2073_v2 }
 0x12e   :  { %1913 = vmatpush3.msra.mxu0 %v2308_v26 }
 0x12f   :  { %1914 = vmatprep.subr.mxu0 %v2073_v2 }
 0x130   :  { %1915 = vmatpush3.msra.mxu0 %v2322_v28 }
 0x131   :  { %1916 = vmatprep.subr.mxu0 %v2073_v2 }
 0x132   :  { %1917 = vmatpush3.msra.mxu0 %v2336_v30 }
 0x133   :  { %1918 = vmatprep.subr.mxu0 %v2073_v2 }
 0x134   :  { %1919 = vmatpush3.msra.mxu0 %v2350_v32 }
 0x135   :  { %1958 = vmatprep.subr.mxu0 %v2073_v2 }
 0x1b4   :  { %v307_v61 = vpop.f32.mrf.mxu0 }
 0x1b5   :  { %v377_v62 = vpop.f32.mrf.mxu1 }
 0x1b6   :  { %v378_v63 = vadd.f32 %v377_v62, %v307_v61  ;;  %v1782_v19 = vpop.f32.mrf.mxu0  ;;  %v841_v61 = vld [vmem:[%s3446_s5 + $0xd0] sm:$0xff]  ;;  %v836_v62 = vld [vmem:[%s3446_s5 + $0xa8] sm:$0xff] }
 0x1b7   :  { %v1817_v34 = vpop.f32.mrf.mxu1  ;;  %v835_v19 = vld [vmem:[%s3446_s5 + $0xa0] sm:$0xff] }
 0x1b8   :  { %v381_v52 = vadd.f32 %v2520_v51, %v378_v63  ;;  %v838_v63 = vld [vmem:[%s3446_s5 + $0xb8] sm:$0xff]  ;;  %v837_v34 = vld [vmem:[%s3446_s5 + $0xb0] sm:$0xff] }
 0x1ba   :  { %2037 = vtanh.f32 %v381_v52  ;;  %v832_v52 = vld [vmem:[%s3446_s5 + $0x88] sm:$0xff] }
 0x1c7   :  { %v2038_v53 = vpop.eup %2037 }
 0x1c8   :  { %1886 = vmatmul.mubr.f32.vlgmr.msra.gmra.mxu1 %v2038_v53  ;;  %v834_v53 = vld [vmem:[%s3446_s5 + $0x98] sm:$0xff] }
 0x1c9   :  { %1924 = vmatpush3.msra.mxu1 %v2144_v1  ;;  %1955 = vmatprep.mubr.msk.f32.mxu1 %vm2074_vm0, %v2073_v2  ;;  %v1470_v1 = vld [vmem:[%s3441_s0 + $0x4] sm:$0x3] }
 0x1ca   :  { %1925 = vmatprep.subr.mxu1 %v2073_v2 }
 0x1cb   :  { %1926 = vmatpush3.msra.mxu1 %v2156_v4 }
 0x1cc   :  { %1927 = vmatprep.subr.mxu1 %v2073_v2 }
 0x1cd   :  { %1928 = vmatpush3.msra.mxu1 %v2170_v6 }
 0x1ce   :  { %1929 = vmatprep.subr.mxu1 %v2073_v2 }
 0x1cf   :  { %1930 = vmatpush3.msra.mxu1 %v2184_v8 }
 0x1d0   :  { %1931 = vmatprep.subr.mxu1 %v2073_v2 }
 0x1d1   :  { %1932 = vmatpush3.msra.mxu1 %v2198_v10 }
 0x1d2   :  { %1933 = vmatprep.subr.mxu1 %v2073_v2 }
 0x1d3   :  { %1934 = vmatpush3.msra.mxu1 %v2212_v12  ;;  %v1471_v12 = vld [vmem:[%s3441_s0 + $0x6] sm:$0x3] }
 0x1d4   :  { %1935 = vmatprep.subr.mxu1 %v2073_v2  ;;  %v451_v4 = vpop.f32.mrf.mxu0 }
 0x1d5   :  { %v455_v6 = vadd.f32 %v1470_v1, %v451_v4  ;;  %1936 = vmatpush3.msra.mxu1 %v2226_v14  ;;  %v831_v1 = vld [vmem:[%s3446_s5 + $0x80] sm:$0xff]  ;;  %v833_v4 = vld [vmem:[%s3446_s5 + $0x90] sm:$0xff] }
 0x1d6   :  { %1937 = vmatprep.subr.mxu1 %v2073_v2  ;;  %v1852_v8 = vpop.f32.mrf.mxu0 }
 0x1d7   :  { %2039 = vtanh.f32 %v455_v6  ;;  %1938 = vmatpush3.msra.mxu1 %v2240_v16  ;;  %v828_v6 = vld [vmem:[%s3446_s5 + $0x68] sm:$0xff]  ;;  %v830_v8 = vld [vmem:[%s3446_s5 + $0x78] sm:$0xff] }
 0x1d8   :  { %1939 = vmatprep.subr.mxu1 %v2073_v2 }
 0x1d9   :  { %1940 = vmatpush3.msra.mxu1 %v2254_v18  ;;  %v875_v18 = vld [vmem:[%s3446_s5 + $0x1e0] sm:$0xff] }
 0x1da   :  { %1941 = vmatprep.subr.mxu1 %v2073_v2 }
 0x1db   :  { %1942 = vmatpush3.msra.mxu1 %v2271_v21  ;;  %v877_v21 = vld [vmem:[%s3446_s5 + $0x1f0] sm:$0xff] }
 0x1dc   :  { %1943 = vmatprep.subr.mxu1 %v2073_v2 }
 0x1dd   :  { %1944 = vmatpush3.msra.mxu1 %v2285_v23 }
 0x1de   :  { %1945 = vmatprep.subr.mxu1 %v2073_v2 }
 0x1df   :  { %1946 = vmatpush3.msra.mxu1 %v2299_v25  ;;  %v871_v25 = vld [vmem:[%s3446_s5 + $0x1c0] sm:$0xff] }
 0x1e0   :  { %1947 = vmatprep.subr.mxu1 %v2073_v2 }
 0x1e1   :  { %1948 = vmatpush3.msra.mxu1 %v2313_v27  ;;  %v868_v27 = vld [vmem:[%s3446_s5 + $0x1a8] sm:$0xff] }
 0x1e2   :  { %1949 = vmatprep.subr.mxu1 %v2073_v2 }
 0x1e3   :  { %1950 = vmatpush3.msra.mxu1 %v2327_v29  ;;  %v867_v29 = vld [vmem:[%s3446_s5 + $0x1a0] sm:$0xff] }
 0x1e4   :  { %v2040_v10 = vpop.eup %2039  ;;  %1951 = vmatprep.subr.mxu1 %v2073_v2 }
 0x1e5   :  { %1952 = vmatpush3.msra.mxu1 %v2341_v31  ;;  %1921 = vmatmul.mubr.f32.vlgmr.msra.gmra.mxu0 %v2040_v10  ;;  %v864_v31 = vld [vmem:[%s3446_s5 + $0x188] sm:$0xff] }
 0x1e6   :  { %1953 = vmatprep.subr.mxu1 %v2073_v2  ;;  %1959 = vmatpush3.msra.mxu0 %v2370_v35  ;;  %v865_v35 = vld [vmem:[%s3446_s5 + $0x190] sm:$0xff] }
 0x1e7   :  { %1954 = vmatpush3.msra.mxu1 %v2357_v33  ;;  %1960 = vmatprep.subr.mxu0 %v2073_v2  ;;  %v863_v33 = vld [vmem:[%s3446_s5 + $0x180] sm:$0xff] }
 0x1e8   :  { %1956 = vmatmul.mubr.f32.vlgmr.msra.gmra.mxu1 %v2040_v10  ;;  %1993 = vmatprep.subr.mxu1 %v2073_v2  ;;  %v827_v10 = vld [vmem:[%s3446_s5 + $0x60] sm:$0xff] }
 0x1e9   :  { %1994 = vmatpush3.msra.mxu1 %v2139_v0  ;;  %1961 = vmatpush3.msra.mxu0 %v2377_v36  ;;  %v876_v0 = vld [vmem:[%s3446_s5 + $0x1e8] sm:$0xff] }
 0x1ea   :  { %1995 = vmatprep.subr.mxu1 %v2073_v2  ;;  %1962 = vmatprep.subr.mxu0 %v2073_v2  ;;  %v860_v36 = vld [vmem:[%s3446_s5 + $0x168] sm:$0xff] }
 0x1eb   :  { %1996 = vmatpush3.msra.mxu1 %v2151_v3  ;;  %1963 = vmatpush3.msra.mxu0 %v2386_v37  ;;  %v878_v3 = vld [vmem:[%s3446_s5 + $0x1f8] sm:$0xff] }
 0x1ec   :  { %1997 = vmatprep.subr.mxu1 %v2073_v2  ;;  %1964 = vmatprep.subr.mxu0 %v2073_v2  ;;  %v862_v37 = vld [vmem:[%s3446_s5 + $0x178] sm:$0xff] }
 0x1ed   :  { %1998 = vmatpush3.msra.mxu1 %v2165_v5  ;;  %1965 = vmatpush3.msra.mxu0 %v2395_v38  ;;  %v859_v38 = vld [vmem:[%s3446_s5 + $0x160] sm:$0xff] }
 0x1ee   :  { %1999 = vmatprep.subr.mxu1 %v2073_v2  ;;  %1966 = vmatprep.subr.mxu0 %v2073_v2 }
 0x1ef   :  { %2000 = vmatpush3.msra.mxu1 %v2179_v7  ;;  %1967 = vmatpush3.msra.mxu0 %v2404_v39  ;;  %v861_v39 = vld [vmem:[%s3446_s5 + $0x170] sm:$0xff] }
 0x1f0   :  { %2001 = vmatprep.subr.mxu1 %v2073_v2  ;;  %1968 = vmatprep.subr.mxu0 %v2073_v2 }
 0x1f1   :  { %2002 = vmatpush3.msra.mxu1 %v2193_v9  ;;  %1969 = vmatpush3.msra.mxu0 %v2413_v40  ;;  %v856_v40 = vld [vmem:[%s3446_s5 + $0x148] sm:$0xff] }
 0x1f2   :  { %2003 = vmatprep.subr.mxu1 %v2073_v2  ;;  %1970 = vmatprep.subr.mxu0 %v2073_v2 }
 0x1f3   :  { %2004 = vmatpush3.msra.mxu1 %v2207_v11  ;;  %1971 = vmatpush3.msra.mxu0 %v2422_v41  ;;  %v858_v41 = vld [vmem:[%s3446_s5 + $0x158] sm:$0xff] }
 0x1f4   :  { %2005 = vmatprep.subr.mxu1 %v2073_v2  ;;  %1972 = vmatprep.subr.mxu0 %v2073_v2 }
 0x1f5   :  { %2006 = vmatpush3.msra.mxu1 %v2221_v13  ;;  %1973 = vmatpush3.msra.mxu0 %v2431_v42  ;;  %v855_v42 = vld [vmem:[%s3446_s5 + $0x140] sm:$0xff] }
 0x1f6   :  { %2007 = vmatprep.subr.mxu1 %v2073_v2  ;;  %1974 = vmatprep.subr.mxu0 %v2073_v2 }
 0x1f7   :  { %2008 = vmatpush3.msra.mxu1 %v2235_v15  ;;  %1975 = vmatpush3.msra.mxu0 %v2464_v43  ;;  %v857_v43 = vld [vmem:[%s3446_s5 + $0x150] sm:$0xff] }
 0x1f8   :  { %2009 = vmatprep.subr.mxu1 %v2073_v2  ;;  %1976 = vmatprep.subr.mxu0 %v2073_v2 }
 0x1f9   :  { %2010 = vmatpush3.msra.mxu1 %v2249_v17  ;;  %1977 = vmatpush3.msra.mxu0 %v2471_v44  ;;  %v852_v44 = vld [vmem:[%s3446_s5 + $0x128] sm:$0xff] }
 0x1fa   :  { %2011 = vmatprep.subr.mxu1 %v2073_v2  ;;  %1978 = vmatprep.subr.mxu0 %v2073_v2 }
 0x1fb   :  { %2012 = vmatpush3.msra.mxu1 %v2266_v20  ;;  %1979 = vmatpush3.msra.mxu0 %v2477_v45  ;;  %v854_v45 = vld [vmem:[%s3446_s5 + $0x138] sm:$0xff] }
 0x1fc   :  { %2013 = vmatprep.subr.mxu1 %v2073_v2  ;;  %1980 = vmatprep.subr.mxu0 %v2073_v2 }
 0x1fd   :  { %2014 = vmatpush3.msra.mxu1 %v2280_v22  ;;  %1981 = vmatpush3.msra.mxu0 %v2483_v46  ;;  %v872_v22 = vld [vmem:[%s3446_s5 + $0x1c8] sm:$0xff]  ;;  %v851_v46 = vld [vmem:[%s3446_s5 + $0x120] sm:$0xff] }
 0x1fe   :  { %2015 = vmatprep.subr.mxu1 %v2073_v2  ;;  %1982 = vmatprep.subr.mxu0 %v2073_v2 }
 0x1ff   :  { %2016 = vmatpush3.msra.mxu1 %v2294_v24  ;;  %1983 = vmatpush3.msra.mxu0 %v2490_v47  ;;  %v874_v24 = vld [vmem:[%s3446_s5 + $0x1d8] sm:$0xff]  ;;  %v853_v47 = vld [vmem:[%s3446_s5 + $0x130] sm:$0xff] }
 0x200   :  { %2017 = vmatprep.subr.mxu1 %v2073_v2  ;;  %1984 = vmatprep.subr.mxu0 %v2073_v2 }
 0x201   :  { %2018 = vmatpush3.msra.mxu1 %v2308_v26  ;;  %1985 = vmatpush3.msra.mxu0 %v2497_v48  ;;  %v873_v26 = vld [vmem:[%s3446_s5 + $0x1d0] sm:$0xff]  ;;  %v848_v48 = vld [vmem:[%s3446_s5 + $0x108] sm:$0xff] }
 0x202   :  { %2019 = vmatprep.subr.mxu1 %v2073_v2  ;;  %1986 = vmatprep.subr.mxu0 %v2073_v2 }
 0x203   :  { %2020 = vmatpush3.msra.mxu1 %v2322_v28  ;;  %1987 = vmatpush3.msra.mxu0 %v2504_v49  ;;  %v870_v28 = vld [vmem:[%s3446_s5 + $0x1b8] sm:$0xff] }
 0x204   :  { %2021 = vmatprep.subr.mxu1 %v2073_v2  ;;  %1988 = vmatprep.subr.mxu0 %v2073_v2  ;;  %v850_v49 = vld [vmem:[%s3446_s5 + $0x118] sm:$0xff] }
 0x205   :  { %2022 = vmatpush3.msra.mxu1 %v2336_v30  ;;  %1989 = vmatpush3.msra.mxu0 %v2511_v50  ;;  %v869_v30 = vld [vmem:[%s3446_s5 + $0x1b0] sm:$0xff] }
 0x206   :  { %2023 = vmatprep.subr.mxu1 %v2073_v2  ;;  %1990 = vmatprep.mubr.msk.f32.mxu0 %vm2074_vm0, %v2073_v2  ;;  %v849_v50 = vld [vmem:[%s3446_s5 + $0x110] sm:$0xff] }
 0x207   :  { %2024 = vmatpush3.msra.mxu1 %v2350_v32  ;;  %2025 = vmatprep.mubr.msk.f32.mxu1 %vm2074_vm0, %v2073_v2  ;;  %v866_v32 = vld [vmem:[%s3446_s5 + $0x198] sm:$0xff] }
 0x208   :  { %901 = vmatprep.subr.mxu0 %v876_v0  ;;  %972 = vmatprep.subr.mxu1 %v878_v3  ;;  %v829_v0 = vld [vmem:[%s3446_s5 + $0x70] sm:$0xff]  ;;  %v824_v3 = vld [vmem:[%s3446_s5 + $0x48] sm:$0xff] }
 0x288   :  { %v523_v5 = vpop.f32.mrf.mxu1 }
 0x28a   :  { %v1887_v7 = vpop.f32.mrf.mxu1 }
 0x28b   :  { %v823_v7 = vld [vmem:[%s3446_s5 + $0x40] sm:$0xff] }
 0x2a5   :  { %v593_v9 = vpop.f32.mrf.mxu0 }
 0x2a6   :  { %v594_v11 = vadd.f32 %v593_v9, %v523_v5  ;;  %v826_v5 = vld [vmem:[%s3446_s5 + $0x58] sm:$0xff]  ;;  %v825_v9 = vld [vmem:[%s3446_s5 + $0x50] sm:$0xff] }
 0x2a7   :  { %v1922_v13 = vpop.f32.mrf.mxu0 }
 0x2a8   :  { %v597_v14 = vadd.f32 %v2520_v51, %v594_v11  ;;  %v667_v15 = vpop.f32.mrf.mxu1  ;;  %v820_v11 = vld [vmem:[%s3446_s5 + $0x28] sm:$0xff]  ;;  %v819_v13 = vld [vmem:[%s3446_s5 + $0x20] sm:$0xff] }
 0x2a9   :  { %v671_v16 = vadd.f32 %v1471_v12, %v667_v15  ;;  %v822_v12 = vld [vmem:[%s3446_s5 + $0x38] sm:$0xff]  ;;  %v816_v15 = vld [vmem:[%s3446_s5 + $0x8] sm:$0xff] }
 0x2aa   :  { %2041 = vtanh.f32 %v597_v14  ;;  %v1957_v17 = vpop.f32.mrf.mxu1  ;;  %v821_v14 = vld [vmem:[%s3446_s5 + $0x30] sm:$0xff] }
 0x2ab   :  { %2043 = vtanh.f32 %v671_v16  ;;  %v818_v16 = vld [vmem:[%s3446_s5 + $0x18] sm:$0xff]  ;;  %v815_v17 = vld [vmem:[%s3446_s5] sm:$0xff] }
 0x2b7   :  { %v2042_v20 = vpop.eup %2041 }
 0x2b8   :  { %v2044_v23 = vpop.eup %2043  ;;  %1991 = vmatmul.mubr.f32.vlgmr.msra.gmra.mxu0 %v2042_v20  ;;  %v1078_v20 = vld [vmem:[%s3448_s7 + $0xf8] sm:$0xff] }
 0x2b9   :  { %2026 = vmatmul.mubr.f32.vlgmr.msra.gmra.mxu1 %v2044_v23  ;;  %902 = vmatpush1.msra.mxu0 %v875_v18  ;;  %v817_v18 = vld [vmem:[%s3446_s5 + $0x10] sm:$0xff] }
 0x2ba   :  { %973 = vmatpush1.msra.mxu1 %v877_v21  ;;  %903 = vmatprep.subr.mxu0 %v872_v22  ;;  %v1142_v21 = vld [vmem:[%s3448_s7 + $0x2f8] sm:$0xff] }
 0x2bb   :  { %974 = vmatprep.subr.mxu1 %v874_v24  ;;  %904 = vmatpush1.msra.mxu0 %v871_v25 }
 0x2bc   :  { %975 = vmatpush1.msra.mxu1 %v873_v26  ;;  %905 = vmatprep.subr.mxu0 %v868_v27 }
 0x2bd   :  { %976 = vmatprep.subr.mxu1 %v870_v28  ;;  %906 = vmatpush1.msra.mxu0 %v867_v29  ;;  %v1077_v28 = vld [vmem:[%s3448_s7 + $0xf0] sm:$0xff] }
 0x2be   :  { %977 = vmatpush1.msra.mxu1 %v869_v30  ;;  %907 = vmatprep.subr.mxu0 %v864_v31  ;;  %v1141_v29 = vld [vmem:[%s3448_s7 + $0x2f0] sm:$0xff]  ;;  %v1076_v31 = vld [vmem:[%s3448_s7 + $0xe8] sm:$0xff] }
 0x2bf   :  { %978 = vmatprep.subr.mxu1 %v866_v32  ;;  %908 = vmatpush1.msra.mxu0 %v863_v33  ;;  %v1140_v32 = vld [vmem:[%s3448_s7 + $0x2e8] sm:$0xff]  ;;  %v1139_v33 = vld [vmem:[%s3448_s7 + $0x2e0] sm:$0xff] }
 0x2c0   :  { %979 = vmatpush1.msra.mxu1 %v865_v35  ;;  %909 = vmatprep.subr.mxu0 %v860_v36  ;;  %v1074_v35 = vld [vmem:[%s3448_s7 + $0xd8] sm:$0xff] }
 0x2c1   :  { %980 = vmatprep.subr.mxu1 %v862_v37  ;;  %910 = vmatpush1.msra.mxu0 %v859_v38  ;;  %v1138_v36 = vld [vmem:[%s3448_s7 + $0x2d8] sm:$0xff]  ;;  %v1073_v37 = vld [vmem:[%s3448_s7 + $0xd0] sm:$0xff] }
 0x2c2   :  { %981 = vmatpush1.msra.mxu1 %v861_v39  ;;  %911 = vmatprep.subr.mxu0 %v856_v40  ;;  %v1137_v38 = vld [vmem:[%s3448_s7 + $0x2d0] sm:$0xff]  ;;  %v1072_v39 = vld [vmem:[%s3448_s7 + $0xc8] sm:$0xff] }
 0x2c3   :  { %982 = vmatprep.subr.mxu1 %v858_v41  ;;  %912 = vmatpush1.msra.mxu0 %v855_v42  ;;  %v1136_v40 = vld [vmem:[%s3448_s7 + $0x2c8] sm:$0xff]  ;;  %v1071_v41 = vld [vmem:[%s3448_s7 + $0xc0] sm:$0xff] }
 0x2c4   :  { %983 = vmatpush1.msra.mxu1 %v857_v43  ;;  %913 = vmatprep.subr.mxu0 %v852_v44  ;;  %v1135_v42 = vld [vmem:[%s3448_s7 + $0x2c0] sm:$0xff]  ;;  %v1070_v43 = vld [vmem:[%s3448_s7 + $0xb8] sm:$0xff] }
 0x2c5   :  { %984 = vmatprep.subr.mxu1 %v854_v45  ;;  %965 = vmatprep.mubr.f32.mxu0 %v2073_v2  ;;  %v1134_v44 = vld [vmem:[%s3448_s7 + $0x2b8] sm:$0xff]  ;;  %v1069_v45 = vld [vmem:[%s3448_s7 + $0xb0] sm:$0xff] }
 0x2c6   :  { %1036 = vmatprep.mubr.f32.mxu1 %v2073_v2  ;;  %914 = vmatpush1.msra.mxu0 %v851_v46  ;;  %v847_v2 = vld [vmem:[%s3446_s5 + $0x100] sm:$0xff]  ;;  %v1133_v46 = vld [vmem:[%s3448_s7 + $0x2b0] sm:$0xff] }
 0x2c7   :  { %985 = vmatpush1.msra.mxu1 %v853_v47  ;;  %915 = vmatprep.subr.mxu0 %v848_v48  ;;  %v1068_v47 = vld [vmem:[%s3448_s7 + $0xa8] sm:$0xff] }
 0x2c8   :  { %986 = vmatprep.subr.mxu1 %v850_v49  ;;  %916 = vmatpush1.msra.mxu0 %v847_v2  ;;  %v1132_v48 = vld [vmem:[%s3448_s7 + $0x2a8] sm:$0xff]  ;;  %v1067_v49 = vld [vmem:[%s3448_s7 + $0xa0] sm:$0xff] }
 0x2c9   :  { %987 = vmatpush1.msra.mxu1 %v849_v50  ;;  %917 = vmatprep.subr.mxu0 %v844_v54  ;;  %v1131_v2 = vld [vmem:[%s3448_s7 + $0x2a0] sm:$0xff]  ;;  %v1066_v50 = vld [vmem:[%s3448_s7 + $0x98] sm:$0xff] }
 0x2ca   :  { %988 = vmatprep.subr.mxu1 %v846_v55  ;;  %918 = vmatpush1.msra.mxu0 %v843_v56  ;;  %v1130_v54 = vld [vmem:[%s3448_s7 + $0x298] sm:$0xff]  ;;  %v1065_v55 = vld [vmem:[%s3448_s7 + $0x90] sm:$0xff] }
 0x2cb   :  { %989 = vmatpush1.msra.mxu1 %v845_v57  ;;  %919 = vmatprep.subr.mxu0 %v840_v58  ;;  %v1129_v56 = vld [vmem:[%s3448_s7 + $0x290] sm:$0xff]  ;;  %v1064_v57 = vld [vmem:[%s3448_s7 + $0x88] sm:$0xff] }
 0x2cc   :  { %990 = vmatprep.subr.mxu1 %v842_v59  ;;  %920 = vmatpush1.msra.mxu0 %v839_v60  ;;  %v1128_v58 = vld [vmem:[%s3448_s7 + $0x288] sm:$0xff]  ;;  %v1063_v59 = vld [vmem:[%s3448_s7 + $0x80] sm:$0xff] }
 0x2cd   :  { %991 = vmatpush1.msra.mxu1 %v841_v61  ;;  %921 = vmatprep.subr.mxu0 %v836_v62  ;;  %v1127_v60 = vld [vmem:[%s3448_s7 + $0x280] sm:$0xff]  ;;  %v1062_v61 = vld [vmem:[%s3448_s7 + $0x78] sm:$0xff] }
 0x2ce   :  { %992 = vmatprep.subr.mxu1 %v838_v63  ;;  %922 = vmatpush1.msra.mxu0 %v835_v19  ;;  %v1126_v62 = vld [vmem:[%s3448_s7 + $0x278] sm:$0xff]  ;;  %v1061_v63 = vld [vmem:[%s3448_s7 + $0x70] sm:$0xff] }
 0x2cf   :  { %993 = vmatpush1.msra.mxu1 %v837_v34  ;;  %923 = vmatprep.subr.mxu0 %v832_v52  ;;  %v1125_v19 = vld [vmem:[%s3448_s7 + $0x270] sm:$0xff]  ;;  %v1060_v34 = vld [vmem:[%s3448_s7 + $0x68] sm:$0xff] }
 0x2d0   :  { %994 = vmatprep.subr.mxu1 %v834_v53  ;;  %924 = vmatpush1.msra.mxu0 %v831_v1  ;;  %v1124_v52 = vld [vmem:[%s3448_s7 + $0x268] sm:$0xff]  ;;  %v1059_v53 = vld [vmem:[%s3448_s7 + $0x60] sm:$0xff] }
 0x2d1   :  { %995 = vmatpush1.msra.mxu1 %v833_v4  ;;  %925 = vmatprep.subr.mxu0 %v828_v6  ;;  %v1123_v1 = vld [vmem:[%s3448_s7 + $0x260] sm:$0xff]  ;;  %v1058_v4 = vld [vmem:[%s3448_s7 + $0x58] sm:$0xff] }
 0x2d2   :  { %996 = vmatprep.subr.mxu1 %v830_v8  ;;  %926 = vmatpush1.msra.mxu0 %v827_v10  ;;  %v1122_v6 = vld [vmem:[%s3448_s7 + $0x258] sm:$0xff]  ;;  %v1057_v8 = vld [vmem:[%s3448_s7 + $0x50] sm:$0xff] }
 0x2d3   :  { %997 = vmatpush1.msra.mxu1 %v829_v0  ;;  %927 = vmatprep.subr.mxu0 %v824_v3  ;;  %v1121_v10 = vld [vmem:[%s3448_s7 + $0x250] sm:$0xff]  ;;  %v1056_v0 = vld [vmem:[%s3448_s7 + $0x48] sm:$0xff] }
 0x2d4   :  { %998 = vmatprep.subr.mxu1 %v826_v5  ;;  %928 = vmatpush1.msra.mxu0 %v823_v7  ;;  %v1120_v3 = vld [vmem:[%s3448_s7 + $0x248] sm:$0xff]  ;;  %v1055_v5 = vld [vmem:[%s3448_s7 + $0x40] sm:$0xff] }
 0x2d5   :  { %999 = vmatpush1.msra.mxu1 %v825_v9  ;;  %929 = vmatprep.subr.mxu0 %v820_v11  ;;  %v1119_v7 = vld [vmem:[%s3448_s7 + $0x240] sm:$0xff]  ;;  %v1054_v9 = vld [vmem:[%s3448_s7 + $0x38] sm:$0xff] }
 0x2d6   :  { %1000 = vmatprep.subr.mxu1 %v822_v12  ;;  %930 = vmatpush1.msra.mxu0 %v819_v13  ;;  %v1118_v11 = vld [vmem:[%s3448_s7 + $0x238] sm:$0xff]  ;;  %v1053_v12 = vld [vmem:[%s3448_s7 + $0x30] sm:$0xff] }
 0x2d7   :  { %1001 = vmatpush1.msra.mxu1 %v821_v14  ;;  %931 = vmatprep.subr.mxu0 %v816_v15  ;;  %v1117_v13 = vld [vmem:[%s3448_s7 + $0x230] sm:$0xff]  ;;  %v1052_v14 = vld [vmem:[%s3448_s7 + $0x28] sm:$0xff] }
 0x2d8   :  { %1002 = vmatprep.subr.mxu1 %v818_v16  ;;  %932 = vmatpush1.msra.mxu0 %v815_v17  ;;  %v1116_v15 = vld [vmem:[%s3448_s7 + $0x228] sm:$0xff]  ;;  %v1051_v16 = vld [vmem:[%s3448_s7 + $0x20] sm:$0xff] }
 0x2d9   :  { %1003 = vmatpush1.msra.mxu1 %v817_v18  ;;  %1187 = vmatprep.subr.mxu0 %v1078_v20  ;;  %v1115_v17 = vld [vmem:[%s3448_s7 + $0x220] sm:$0xff]  ;;  %v1050_v18 = vld [vmem:[%s3448_s7 + $0x18] sm:$0xff] }
 0x2da   :  { %1258 = vmatprep.subr.mxu1 %v1142_v21  ;;  %v1114_v20 = vld [vmem:[%s3448_s7 + $0x218] sm:$0xff]  ;;  %v1049_v21 = vld [vmem:[%s3448_s7 + $0x10] sm:$0xff] }
 0x378   :  { %v739_v22 = vpop.f32.mrf.mxu0 }
 0x379   :  { %v809_v23 = vpop.f32.mrf.mxu1 }
 0x37a   :  { %v810_v24 = vadd.f32 %v809_v23, %v739_v22  ;;  %v1992_v25 = vpop.f32.mrf.mxu0  ;;  %v1113_v22 = vld [vmem:[%s3448_s7 + $0x210] sm:$0xff]  ;;  %v1048_v23 = vld [vmem:[%s3448_s7 + $0x8] sm:$0xff] }
 0x37b   :  { %v2027_v26 = vpop.f32.mrf.mxu1  ;;  %v1047_v25 = vld [vmem:[%s3448_s7] sm:$0xff] }
 0x37c   :  { %v813_v27 = vadd.f32 %v2520_v51, %v810_v24  ;;  %v1075_v51 = vld [vmem:[%s3448_s7 + $0xe0] sm:$0xff]  ;;  %v1112_v24 = vld [vmem:[%s3448_s7 + $0x208] sm:$0xff] }
 0x37d   :  { %v1111_v26 = vld [vmem:[%s3448_s7 + $0x200] sm:$0xff] }
 0x37e   :  { %2045 = vtanh.f32 %v813_v27  ;;  %v1110_v27 = vld [vmem:[%s3448_s7 + $0x1f8] sm:$0xff] }
 0x38b   :  { %v2046_v30 = vpop.eup %2045 }
 0x38c   :  { %966 = vmatmul.mubr.f32.vlgmr.msra.gmra.mxu0 %v2046_v30  ;;  %1037 = vmatmul.mubr.f32.vlgmr.msra.gmra.mxu1 %v2046_v30  ;;  %v1173_v30 = vld [vmem:[%s3448_s7 + $0x3f0] sm:$0xff] }
 0x38d   :  { %1188 = vmatpush1.msra.mxu0 %v1077_v28  ;;  %1259 = vmatpush1.msra.mxu1 %v1141_v29  ;;  %v1174_v28 = vld [vmem:[%s3448_s7 + $0x3f8] sm:$0xff]  ;;  %v1109_v29 = vld [vmem:[%s3448_s7 + $0x1f0] sm:$0xff] }
 0x38e   :  { %1189 = vmatprep.subr.mxu0 %v1076_v31  ;;  %1260 = vmatprep.subr.mxu1 %v1140_v32  ;;  %v1108_v31 = vld [vmem:[%s3448_s7 + $0x1e8] sm:$0xff] }
 0x38f   :  { %1190 = vmatpush1.msra.mxu0 %v1075_v51  ;;  %1261 = vmatpush1.msra.mxu1 %v1139_v33  ;;  %v1172_v32 = vld [vmem:[%s3448_s7 + $0x3e8] sm:$0xff]  ;;  %v1107_v51 = vld [vmem:[%s3448_s7 + $0x1e0] sm:$0xff] }
 0x390   :  { %1191 = vmatprep.subr.mxu0 %v1074_v35  ;;  %1262 = vmatprep.subr.mxu1 %v1138_v36  ;;  %v1171_v33 = vld [vmem:[%s3448_s7 + $0x3e0] sm:$0xff]  ;;  %v1106_v35 = vld [vmem:[%s3448_s7 + $0x1d8] sm:$0xff] }
 0x391   :  { %1192 = vmatpush1.msra.mxu0 %v1073_v37  ;;  %1263 = vmatpush1.msra.mxu1 %v1137_v38  ;;  %v1170_v36 = vld [vmem:[%s3448_s7 + $0x3d8] sm:$0xff]  ;;  %v1105_v37 = vld [vmem:[%s3448_s7 + $0x1d0] sm:$0xff] }
 0x392   :  { %1193 = vmatprep.subr.mxu0 %v1072_v39  ;;  %1264 = vmatprep.subr.mxu1 %v1136_v40  ;;  %v1169_v38 = vld [vmem:[%s3448_s7 + $0x3d0] sm:$0xff]  ;;  %v1104_v39 = vld [vmem:[%s3448_s7 + $0x1c8] sm:$0xff] }
 0x393   :  { %1194 = vmatpush1.msra.mxu0 %v1071_v41  ;;  %1265 = vmatpush1.msra.mxu1 %v1135_v42  ;;  %v1168_v40 = vld [vmem:[%s3448_s7 + $0x3c8] sm:$0xff]  ;;  %v1103_v41 = vld [vmem:[%s3448_s7 + $0x1c0] sm:$0xff] }
 0x394   :  { %1195 = vmatprep.subr.mxu0 %v1070_v43  ;;  %1266 = vmatprep.subr.mxu1 %v1134_v44  ;;  %v1167_v42 = vld [vmem:[%s3448_s7 + $0x3c0] sm:$0xff]  ;;  %v1102_v43 = vld [vmem:[%s3448_s7 + $0x1b8] sm:$0xff] }
 0x395   :  { %1196 = vmatpush1.msra.mxu0 %v1069_v45  ;;  %1267 = vmatpush1.msra.mxu1 %v1133_v46  ;;  %v1166_v44 = vld [vmem:[%s3448_s7 + $0x3b8] sm:$0xff]  ;;  %v1101_v45 = vld [vmem:[%s3448_s7 + $0x1b0] sm:$0xff] }
 0x396   :  { %1197 = vmatprep.subr.mxu0 %v1068_v47  ;;  %1268 = vmatprep.subr.mxu1 %v1132_v48  ;;  %v1165_v46 = vld [vmem:[%s3448_s7 + $0x3b0] sm:$0xff]  ;;  %v1100_v47 = vld [vmem:[%s3448_s7 + $0x1a8] sm:$0xff] }
 0x397   :  { %1198 = vmatpush1.msra.mxu0 %v1067_v49  ;;  %1269 = vmatpush1.msra.mxu1 %v1131_v2  ;;  %v1164_v48 = vld [vmem:[%s3448_s7 + $0x3a8] sm:$0xff]  ;;  %v1099_v49 = vld [vmem:[%s3448_s7 + $0x1a0] sm:$0xff] }
 0x398   :  { %1199 = vmatprep.subr.mxu0 %v1066_v50  ;;  %1270 = vmatprep.subr.mxu1 %v1130_v54  ;;  %v1163_v2 = vld [vmem:[%s3448_s7 + $0x3a0] sm:$0xff]  ;;  %v1098_v50 = vld [vmem:[%s3448_s7 + $0x198] sm:$0xff] }
 0x399   :  { %1200 = vmatpush1.msra.mxu0 %v1065_v55  ;;  %1271 = vmatpush1.msra.mxu1 %v1129_v56  ;;  %v1162_v54 = vld [vmem:[%s3448_s7 + $0x398] sm:$0xff]  ;;  %v1097_v55 = vld [vmem:[%s3448_s7 + $0x190] sm:$0xff] }
 0x39a   :  { %1201 = vmatprep.subr.mxu0 %v1064_v57  ;;  %1272 = vmatprep.subr.mxu1 %v1128_v58  ;;  %v1161_v56 = vld [vmem:[%s3448_s7 + $0x390] sm:$0xff]  ;;  %v1096_v57 = vld [vmem:[%s3448_s7 + $0x188] sm:$0xff] }
 0x39b   :  { %1202 = vmatpush1.msra.mxu0 %v1063_v59  ;;  %1273 = vmatpush1.msra.mxu1 %v1127_v60  ;;  %v1160_v58 = vld [vmem:[%s3448_s7 + $0x388] sm:$0xff]  ;;  %v1095_v59 = vld [vmem:[%s3448_s7 + $0x180] sm:$0xff] }
 0x39c   :  { %1203 = vmatprep.subr.mxu0 %v1062_v61  ;;  %1274 = vmatprep.subr.mxu1 %v1126_v62  ;;  %v1159_v60 = vld [vmem:[%s3448_s7 + $0x380] sm:$0xff]  ;;  %v1094_v61 = vld [vmem:[%s3448_s7 + $0x178] sm:$0xff] }
 0x39d   :  { %1204 = vmatpush1.msra.mxu0 %v1061_v63  ;;  %1275 = vmatpush1.msra.mxu1 %v1125_v19  ;;  %v1158_v62 = vld [vmem:[%s3448_s7 + $0x378] sm:$0xff]  ;;  %v1093_v63 = vld [vmem:[%s3448_s7 + $0x170] sm:$0xff] }
 0x39e   :  { %1205 = vmatprep.subr.mxu0 %v1060_v34  ;;  %1276 = vmatprep.subr.mxu1 %v1124_v52  ;;  %v1157_v19 = vld [vmem:[%s3448_s7 + $0x370] sm:$0xff]  ;;  %v1092_v34 = vld [vmem:[%s3448_s7 + $0x168] sm:$0xff] }
 0x39f   :  { %1206 = vmatpush1.msra.mxu0 %v1059_v53  ;;  %1277 = vmatpush1.msra.mxu1 %v1123_v1  ;;  %v1156_v52 = vld [vmem:[%s3448_s7 + $0x368] sm:$0xff]  ;;  %v1091_v53 = vld [vmem:[%s3448_s7 + $0x160] sm:$0xff] }
 0x3a0   :  { %1207 = vmatprep.subr.mxu0 %v1058_v4  ;;  %1278 = vmatprep.subr.mxu1 %v1122_v6  ;;  %v1155_v1 = vld [vmem:[%s3448_s7 + $0x360] sm:$0xff]  ;;  %v1090_v4 = vld [vmem:[%s3448_s7 + $0x158] sm:$0xff] }
 0x3a1   :  { %1208 = vmatpush1.msra.mxu0 %v1057_v8  ;;  %1279 = vmatpush1.msra.mxu1 %v1121_v10  ;;  %v1154_v6 = vld [vmem:[%s3448_s7 + $0x358] sm:$0xff]  ;;  %v1089_v8 = vld [vmem:[%s3448_s7 + $0x150] sm:$0xff] }
 0x3a2   :  { %1209 = vmatprep.subr.mxu0 %v1056_v0  ;;  %1280 = vmatprep.subr.mxu1 %v1120_v3  ;;  %v1153_v10 = vld [vmem:[%s3448_s7 + $0x350] sm:$0xff]  ;;  %v1088_v0 = vld [vmem:[%s3448_s7 + $0x148] sm:$0xff] }
 0x3a3   :  { %1210 = vmatpush1.msra.mxu0 %v1055_v5  ;;  %1281 = vmatpush1.msra.mxu1 %v1119_v7  ;;  %v1152_v3 = vld [vmem:[%s3448_s7 + $0x348] sm:$0xff]  ;;  %v1087_v5 = vld [vmem:[%s3448_s7 + $0x140] sm:$0xff] }
 0x3a4   :  { %1211 = vmatprep.subr.mxu0 %v1054_v9  ;;  %1282 = vmatprep.subr.mxu1 %v1118_v11  ;;  %v1151_v7 = vld [vmem:[%s3448_s7 + $0x340] sm:$0xff]  ;;  %v1086_v9 = vld [vmem:[%s3448_s7 + $0x138] sm:$0xff] }
 0x3a5   :  { %1212 = vmatpush1.msra.mxu0 %v1053_v12  ;;  %1283 = vmatpush1.msra.mxu1 %v1117_v13  ;;  %v1150_v11 = vld [vmem:[%s3448_s7 + $0x338] sm:$0xff]  ;;  %v1085_v12 = vld [vmem:[%s3448_s7 + $0x130] sm:$0xff] }
 0x3a6   :  { %1213 = vmatprep.subr.mxu0 %v1052_v14  ;;  %1284 = vmatprep.subr.mxu1 %v1116_v15  ;;  %v1149_v13 = vld [vmem:[%s3448_s7 + $0x330] sm:$0xff]  ;;  %v1084_v14 = vld [vmem:[%s3448_s7 + $0x128] sm:$0xff] }
 0x3a7   :  { %1214 = vmatpush1.msra.mxu0 %v1051_v16  ;;  %1285 = vmatpush1.msra.mxu1 %v1115_v17  ;;  %v1148_v15 = vld [vmem:[%s3448_s7 + $0x328] sm:$0xff]  ;;  %v1083_v16 = vld [vmem:[%s3448_s7 + $0x120] sm:$0xff] }
 0x3a8   :  { %1215 = vmatprep.subr.mxu0 %v1050_v18  ;;  %1286 = vmatprep.subr.mxu1 %v1114_v20  ;;  %v1147_v17 = vld [vmem:[%s3448_s7 + $0x320] sm:$0xff]  ;;  %v1082_v18 = vld [vmem:[%s3448_s7 + $0x118] sm:$0xff] }
 0x3a9   :  { %1216 = vmatpush1.msra.mxu0 %v1049_v21  ;;  %1287 = vmatpush1.msra.mxu1 %v1113_v22  ;;  %v1146_v20 = vld [vmem:[%s3448_s7 + $0x318] sm:$0xff]  ;;  %v1081_v21 = vld [vmem:[%s3448_s7 + $0x110] sm:$0xff] }
 0x3aa   :  { %1217 = vmatprep.subr.mxu0 %v1048_v23  ;;  %1288 = vmatprep.subr.mxu1 %v1112_v24  ;;  %v1145_v22 = vld [vmem:[%s3448_s7 + $0x310] sm:$0xff]  ;;  %v1080_v23 = vld [vmem:[%s3448_s7 + $0x108] sm:$0xff] }
 0x3ab   :  { %1218 = vmatpush1.msra.mxu0 %v1047_v25  ;;  %1289 = vmatpush1.msra.mxu1 %v1111_v26  ;;  %v1144_v24 = vld [vmem:[%s3448_s7 + $0x308] sm:$0xff]  ;;  %v1079_v25 = vld [vmem:[%s3448_s7 + $0x100] sm:$0xff] }
 0x3ac   :  { %1219 = vmatprep.subr.mxu0 %v1110_v27  ;;  %1290 = vmatprep.subr.mxu1 %v1174_v28  ;;  %v1143_v26 = vld [vmem:[%s3448_s7 + $0x300] sm:$0xff]  ;;  %v1362_v27 = vld [vmem:[%s3450_s9 + $0xf8] sm:$0xff]  ;;  %v881_v28 = vlaneseq }
 0x3ad   :  { %1220 = vmatpush2.msra.mxu0 %v1109_v29  ;;  %1291 = vmatpush2.msra.mxu1 %v1173_v30 }
 0x3ae   :  { %1221 = vmatprep.subr.mxu0 %v1108_v31  ;;  %1292 = vmatprep.subr.mxu1 %v1172_v32  ;;  %v3322_v29 = vshrl.u32 %v881_v28, 7  ;;  %v879_v32 = vld [vmem:[%s3447_s6] sm:$0xf] }
 0x3af   :  { %1222 = vmatpush2.msra.mxu0 %v1107_v51  ;;  %1293 = vmatpush2.msra.mxu1 %v1171_v33 }
 0x3b0   :  { %1223 = vmatprep.subr.mxu0 %v1106_v35  ;;  %1294 = vmatprep.subr.mxu1 %v1170_v36  ;;  %v883_v30 = vsub.s32 0, %v3322_v29  ;;  %v891_v31 = vsub.s32 2, %v3322_v29  ;;  %v887_v51 = vsub.s32 1, %v3322_v29  ;;  %v895_v33 = vsub.s32 3, %v3322_v29 }
 0x3b1   :  { %1224 = vmatpush2.msra.mxu0 %v1105_v37  ;;  %1295 = vmatpush2.msra.mxu1 %v1169_v38 }
 0x3b2   :  { %1225 = vmatprep.subr.mxu0 %v1104_v39  ;;  %1296 = vmatprep.subr.mxu1 %v1168_v40  ;;  %v884_v35 = vrot.slane %v879_v32, %v883_v30  ;;  %v892_v36 = vrot.slane %v879_v32, %v891_v31  ;;  %v888_v37 = vrot.slane %v879_v32, %v887_v51 }
 0x3b3   :  { %1226 = vmatpush2.msra.mxu0 %v1103_v41  ;;  %1297 = vmatpush2.msra.mxu1 %v1167_v42  ;;  %v896_v38 = vrot.slane %v879_v32, %v895_v33 }
 0x3b4   :  { %1227 = vmatprep.subr.mxu0 %v1102_v43  ;;  %1298 = vmatprep.subr.mxu1 %v1166_v44 }
 0x3b5   :  { %1228 = vmatpush2.msra.mxu0 %v1101_v45  ;;  %1299 = vmatpush2.msra.mxu1 %v1165_v46 }
 0x3b6   :  { %1229 = vmatprep.subr.mxu0 %v1100_v47  ;;  %1300 = vmatprep.subr.mxu1 %v1164_v48 }
 0x3b7   :  { %1230 = vmatpush2.msra.mxu0 %v1099_v49  ;;  %1301 = vmatpush2.msra.mxu1 %v1163_v2 }
 0x3b8   :  { %1231 = vmatprep.subr.mxu0 %v1098_v50  ;;  %1302 = vmatprep.subr.mxu1 %v1162_v54  ;;  %v1346_v50 = vld [vmem:[%s3450_s9 + $0x78] sm:$0xff]  ;;  %v1361_v54 = vld [vmem:[%s3450_s9 + $0xf0] sm:$0xff] }
 0x3b9   :  { %1232 = vmatpush2.msra.mxu0 %v1097_v55  ;;  %1303 = vmatpush2.msra.mxu1 %v1161_v56  ;;  %v1345_v55 = vld [vmem:[%s3450_s9 + $0x70] sm:$0xff]  ;;  %v1360_v56 = vld [vmem:[%s3450_s9 + $0xe8] sm:$0xff] }
 0x3ba   :  { %1233 = vmatprep.subr.mxu0 %v1096_v57  ;;  %1304 = vmatprep.subr.mxu1 %v1160_v58  ;;  %v1344_v57 = vld [vmem:[%s3450_s9 + $0x68] sm:$0xff]  ;;  %v1359_v58 = vld [vmem:[%s3450_s9 + $0xe0] sm:$0xff] }
 0x3bb   :  { %1234 = vmatpush2.msra.mxu0 %v1095_v59  ;;  %1305 = vmatpush2.msra.mxu1 %v1159_v60  ;;  %v1343_v59 = vld [vmem:[%s3450_s9 + $0x60] sm:$0xff]  ;;  %v1358_v60 = vld [vmem:[%s3450_s9 + $0xd8] sm:$0xff] }
 0x3bc   :  { %1235 = vmatprep.subr.mxu0 %v1094_v61  ;;  %1306 = vmatprep.subr.mxu1 %v1158_v62  ;;  %v1342_v61 = vld [vmem:[%s3450_s9 + $0x58] sm:$0xff]  ;;  %v1357_v62 = vld [vmem:[%s3450_s9 + $0xd0] sm:$0xff] }
 0x3bd   :  { %1236 = vmatpush2.msra.mxu0 %v1093_v63  ;;  %1307 = vmatpush2.msra.mxu1 %v1157_v19  ;;  %v1341_v63 = vld [vmem:[%s3450_s9 + $0x50] sm:$0xff]  ;;  %v1356_v19 = vld [vmem:[%s3450_s9 + $0xc8] sm:$0xff] }
 0x3be   :  { %1237 = vmatprep.subr.mxu0 %v1092_v34  ;;  %1308 = vmatprep.subr.mxu1 %v1156_v52  ;;  %v1340_v34 = vld [vmem:[%s3450_s9 + $0x48] sm:$0xff]  ;;  %v1355_v52 = vld [vmem:[%s3450_s9 + $0xc0] sm:$0xff] }
 0x3bf   :  { %1238 = vmatpush2.msra.mxu0 %v1091_v53  ;;  %1309 = vmatpush2.msra.mxu1 %v1155_v1  ;;  %v1339_v53 = vld [vmem:[%s3450_s9 + $0x40] sm:$0xff]  ;;  %v1354_v1 = vld [vmem:[%s3450_s9 + $0xb8] sm:$0xff] }
 0x3c0   :  { %1239 = vmatprep.subr.mxu0 %v1090_v4  ;;  %1310 = vmatprep.subr.mxu1 %v1154_v6  ;;  %v1338_v4 = vld [vmem:[%s3450_s9 + $0x38] sm:$0xff]  ;;  %v1353_v6 = vld [vmem:[%s3450_s9 + $0xb0] sm:$0xff] }
 0x3c1   :  { %1240 = vmatpush2.msra.mxu0 %v1089_v8  ;;  %1311 = vmatpush2.msra.mxu1 %v1153_v10  ;;  %v1337_v8 = vld [vmem:[%s3450_s9 + $0x30] sm:$0xff]  ;;  %v1352_v10 = vld [vmem:[%s3450_s9 + $0xa8] sm:$0xff] }
 0x3c2   :  { %1241 = vmatprep.subr.mxu0 %v1088_v0  ;;  %1312 = vmatprep.subr.mxu1 %v1152_v3  ;;  %v1336_v0 = vld [vmem:[%s3450_s9 + $0x28] sm:$0xff]  ;;  %v1351_v3 = vld [vmem:[%s3450_s9 + $0xa0] sm:$0xff] }
 0x3c3   :  { %1242 = vmatpush2.msra.mxu0 %v1087_v5  ;;  %1313 = vmatpush2.msra.mxu1 %v1151_v7  ;;  %v1335_v5 = vld [vmem:[%s3450_s9 + $0x20] sm:$0xff]  ;;  %v1350_v7 = vld [vmem:[%s3450_s9 + $0x98] sm:$0xff] }
 0x3c4   :  { %1243 = vmatprep.subr.mxu0 %v1086_v9  ;;  %1314 = vmatprep.subr.mxu1 %v1150_v11  ;;  %v1334_v9 = vld [vmem:[%s3450_s9 + $0x18] sm:$0xff]  ;;  %v1349_v11 = vld [vmem:[%s3450_s9 + $0x90] sm:$0xff] }
 0x3c5   :  { %1244 = vmatpush2.msra.mxu0 %v1085_v12  ;;  %1315 = vmatpush2.msra.mxu1 %v1149_v13  ;;  %v1333_v12 = vld [vmem:[%s3450_s9 + $0x10] sm:$0xff]  ;;  %v1348_v13 = vld [vmem:[%s3450_s9 + $0x88] sm:$0xff] }
 0x3c6   :  { %1245 = vmatprep.subr.mxu0 %v1084_v14  ;;  %1316 = vmatprep.subr.mxu1 %v1148_v15  ;;  %v1332_v14 = vld [vmem:[%s3450_s9 + $0x8] sm:$0xff]  ;;  %v1347_v15 = vld [vmem:[%s3450_s9 + $0x80] sm:$0xff] }
 0x3c7   :  { %1246 = vmatpush2.msra.mxu0 %v1083_v16  ;;  %1317 = vmatpush2.msra.mxu1 %v1147_v17  ;;  %v1331_v16 = vld [vmem:[%s3450_s9] sm:$0xff] }
 0x3c8   :  { %1247 = vmatprep.subr.mxu0 %v1082_v18  ;;  %1318 = vmatprep.subr.mxu1 %v1146_v20  ;;  %v1175_v17 = vld [vmem:[%s3449_s8] sm:$0x3] }
 0x3c9   :  { %1248 = vmatpush2.msra.mxu0 %v1081_v21  ;;  %1319 = vmatpush2.msra.mxu1 %v1145_v22  ;;  %v1180_v18 = vrot.slane %v1175_v17, %v883_v30  ;;  %v1184_v20 = vrot.slane %v1175_v17, %v887_v51  ;;  %v1472_v30 = vld [vmem:[%s3451_s10] ss:$0 sm:$0xff]  ;;  %s2051_s10 = scalar_lea.vmem %s1461_s24, 32 }
 0x3ca   :  { %1249 = vmatprep.subr.mxu0 %v1080_v23  ;;  %1320 = vmatprep.subr.mxu1 %v1144_v24  ;;  %p2052_p0 = scmp.ne.s32.totalorder %s1461_s24, %s2051_s10  ;;  %p2057_p2 = scmp.lt.s32.totalorder %s2051_s10, %s2051_s10 }
 0x3cb   :  { %1250 = vmatpush2.msra.mxu0 %v1079_v25  ;;  %1321 = vmatpush2.msra.mxu1 %v1143_v26 }
 0x3cc   :  { %1643 = vmatprep.subr.mxu0 %v1362_v27  ;;  %p2058_p3 = por %p2057_p2, %p2056_p1 }
 0x3ce   :  { %p2059_p4 = pnand %p2058_p3, %p2052_p0 }
 0x44c   :  { %v967_v39 = vpop.f32.mrf.mxu0  ;;  %v1038_v40 = vpop.f32.mrf.mxu1 }
 0x44d   :  { %v968_v41 = vadd.f32 %v967_v39, %v884_v35  ;;  %v1039_v42 = vadd.f32 %v1038_v40, %v892_v36 }
 0x44e   :  { %v969_v43 = vpop.f32.mrf.mxu0  ;;  %v1040_v44 = vpop.f32.mrf.mxu1 }
 0x44f   :  { %v970_v45 = vadd.f32 %v969_v43, %v888_v37  ;;  %v1041_v46 = vadd.f32 %v1040_v44, %v896_v38  ;;  %v1043_v49 = vmax.f32 %v968_v41, 0.0  ;;  %v1045_v2 = vmax.f32 %v1039_v42, 0.0 }
 0x451   :  { %v1044_v47 = vmax.f32 %v970_v45, 0.0  ;;  %v1046_v48 = vmax.f32 %v1041_v46, 0.0 }
 0x453   :  { %1251 = vmatprep.mubr.f32.mxu0 %v1044_v47  ;;  %1322 = vmatprep.mubr.f32.mxu1 %v1046_v48 }
 0x454   :  { %1252 = vmatmul.mubr.f32.vlgmr.msra.gmra.mxu0 %v1043_v49  ;;  %1323 = vmatmul.mubr.f32.vlgmr.msra.gmra.mxu1 %v1045_v2 }
 0x455   :  { %1644 = vmatpush3.msra.mxu0 %v1346_v50 }
 0x456   :  { %1645 = vmatprep.subr.mxu0 %v1361_v54 }
 0x457   :  { %1646 = vmatpush3.msra.mxu0 %v1345_v55 }
 0x458   :  { %1647 = vmatprep.subr.mxu0 %v1360_v56 }
 0x459   :  { %1648 = vmatpush3.msra.mxu0 %v1344_v57 }
 0x45a   :  { %1649 = vmatprep.subr.mxu0 %v1359_v58 }
 0x45b   :  { %1650 = vmatpush3.msra.mxu0 %v1343_v59 }
 0x45c   :  { %1651 = vmatprep.subr.mxu0 %v1358_v60 }
 0x45d   :  { %1652 = vmatpush3.msra.mxu0 %v1342_v61 }
 0x45e   :  { %1653 = vmatprep.subr.mxu0 %v1357_v62 }
 0x45f   :  { %1654 = vmatpush3.msra.mxu0 %v1341_v63 }
 0x460   :  { %1655 = vmatprep.subr.mxu0 %v1356_v19 }
 0x461   :  { %1656 = vmatpush3.msra.mxu0 %v1340_v34 }
 0x462   :  { %1657 = vmatprep.subr.mxu0 %v1355_v52 }
 0x463   :  { %1658 = vmatpush3.msra.mxu0 %v1339_v53 }
 0x464   :  { %1659 = vmatprep.subr.mxu0 %v1354_v1 }
 0x465   :  { %1660 = vmatpush3.msra.mxu0 %v1338_v4 }
 0x466   :  { %1661 = vmatprep.subr.mxu0 %v1353_v6 }
 0x467   :  { %1662 = vmatpush3.msra.mxu0 %v1337_v8 }
 0x468   :  { %1663 = vmatprep.subr.mxu0 %v1352_v10 }
 0x469   :  { %1664 = vmatpush3.msra.mxu0 %v1336_v0 }
 0x46a   :  { %1665 = vmatprep.subr.mxu0 %v1351_v3 }
 0x46b   :  { %1666 = vmatpush3.msra.mxu0 %v1335_v5 }
 0x46c   :  { %1667 = vmatprep.subr.mxu0 %v1350_v7 }
 0x46d   :  { %1668 = vmatpush3.msra.mxu0 %v1334_v9 }
 0x46e   :  { %1669 = vmatprep.subr.mxu0 %v1349_v11 }
 0x46f   :  { %1670 = vmatpush3.msra.mxu0 %v1333_v12 }
 0x470   :  { %1671 = vmatprep.subr.mxu0 %v1348_v13 }
 0x471   :  { %1672 = vmatpush3.msra.mxu0 %v1332_v14 }
 0x472   :  { %1673 = vmatprep.subr.mxu0 %v1347_v15 }
 0x473   :  { %1674 = vmatpush3.msra.mxu0 %v1331_v16 }
 0x514   :  { %v1253_v21 = vpop.f32.mrf.mxu0  ;;  %v1324_v22 = vpop.f32.mrf.mxu1 }
 0x515   :  { %v1254_v23 = vadd.f32 %v1253_v21, %v1180_v18 }
 0x516   :  { %v1255_v24 = vpop.f32.mrf.mxu0  ;;  %v1326_v27 = vpop.f32.mrf.mxu1 }
 0x517   :  { %v1256_v25 = vadd.f32 %v1255_v24, %v1184_v20  ;;  %v1325_v26 = vadd.f32 %v1324_v22, %v1254_v23 }
 0x519   :  { %v1327_v28 = vadd.f32 %v1326_v27, %v1256_v25  ;;  %v1329_v32 = vmax.f32 %v1325_v26, 0.0 }
 0x51b   :  { %v1330_v31 = vmax.f32 %v1327_v28, 0.0 }
 0x51d   :  { %1434 = vmatprep.mubr.f32.mxu0 %v1330_v31 }
 0x51e   :  { %1435 = vmatmul.mubr.f32.vlgmr.msra.gmra.mxu0 %v1329_v32 }
 0x5de   :  { %v1675_v33 = vpop.f32.mrf.mxu0 }
 0x5e0   :  { %v1676_v35 = vpop.f32.mrf.mxu0 }
 0x5e1   :  { %v1677_v29 = vadd.f32 %v1676_v35, %v1675_v33 }
 0x5e3   :  { %v1437_v51 = vadd.f32 %v1677_v29, %v1472_v30 }
 0x5e5   :  { %v1441_v36 = vsel %vm1440_vm1, %v1437_v51, -inf }
 0x5e6   :  { %1442 = vmax.xlane.f32.xlu0 %v1441_v36 }
 0x66f   :  { %v1443_v37 = vpop.xlane.xlu0 %1442 }
 0x670   :  { %v1444_v38 = vsub.f32 %v1437_v51, %v1443_v37 }
 0x672   :  { %v1445_v39 = vmul.f32 1.442695, %v1444_v38 }
 0x674   :  { %2047 = vpow2.f32 %v1445_v39 }
 0x681   :  { %v2048_v40 = vpop.eup %2047 }
 0x682   :  { %v1447_v41 = vsel %vm1440_vm1, %v2048_v40, 0.0 }
 0x683   :  { %1448 = vadd.xlane.f32.xlu0 %v1447_v41 }
 0x70c   :  { %v1449_v42 = vpop.xlane.xlu0 %1448 }
 0x70d   :  { %2049 = vlog2.f32 %v1449_v42 }
 0x71a   :  { %v2050_v43 = vpop.eup %2049 }
 0x71b   :  { %v1451_v44 = vmul.f32 0.6931472, %v2050_v43 }
 0x71d   :  { %v1452_v45 = vsub.f32 %v1444_v38, %v1451_v44 }
 0x71f   :  { %1453 = vst [vmem:[#allocation2] sm:$0x3] %v1452_v45 }
 0x720   :  { %2062 = shalt.err (!%p2059_p4)
}
 0x721   :  { %1463 = dma.vmem_to_hbm [thread:$0]  %s1461_s24, 32, %s3452_s11, [#allocation3]  }
 0x722   :  { %2071 = dma.done.wait [#allocation3], 32  }
 0x723   :  { %2072 = vsyncadd [#allocation3], 4294967264 }
 0x724   :  { %1467 = vsyncpa [#allocation3], 1 }

// kernel: forward.2
= control target key start
LH: loop header
LB: loop body
LE: loop exit
PB: predicated region body
PF: predicated region fallthrough
CT: control target
= control target key end

     0   :  { %s10668_s0 = inlined_call_operand.vmem [shape: f32[2,64,6], index: 0, kind: input, shape index: {}]   ;;  %s10669_s1 = inlined_call_operand.vmem [shape: f32[2,4,16], index: 1, kind: input, shape index: {}]   ;;  %s10670_s2 = inlined_call_operand.vmem [shape: f32[6,64], index: 2, kind: input, shape index: {}]   ;;  %s10671_s3 = inlined_call_operand.vmem [shape: f32[1,64], index: 3, kind: input, shape index: {}]   ;;  %s10672_s4 = inlined_call_operand.vmem [shape: f32[64,128], index: 4, kind: input, shape index: {}]   ;;  %s10673_s5 = inlined_call_operand.vmem [shape: f32[1,128], index: 5, kind: input, shape index: {}]   ;;  %s10674_s6 = inlined_call_operand.vmem [shape: f32[128,1024], index: 6, kind: input, shape index: {}]   ;;  %s10675_s7 = inlined_call_operand.vmem [shape: f32[1,1024], index: 7, kind: input, shape index: {}]   ;;  %s10676_s8 = inlined_call_operand.vmem [shape: f32[1024,512], index: 8, kind: input, shape index: {}]   ;;  %s10677_s9 = inlined_call_operand.vmem [shape: f32[1,512], index: 9, kind: input, shape index: {}]   ;;  %s10678_s10 = inlined_call_operand.vmem [shape: f32[512,256], index: 10, kind: input, shape index: {}]   ;;  %s10679_s11 = inlined_call_operand.vmem [shape: f32[1,256], index: 11, kind: input, shape index: {}]   ;;  %s10680_s12 = inlined_call_operand.vmem [shape: f32[256,128], index: 12, kind: input, shape index: {}]   ;;  %s10681_s13 = inlined_call_operand.vmem [shape: f32[1,128], index: 13, kind: input, shape index: {}]   ;;  %s10682_s14 = inlined_call_operand.vmem [shape: f32[6,64], index: 14, kind: input, shape index: {}]   ;;  %s10683_s15 = inlined_call_operand.vmem [shape: f32[1,64], index: 15, kind: input, shape index: {}]   ;;  %s10684_s16 = inlined_call_operand.vmem [shape: f32[64,128], index: 16, kind: input, shape index: {}]   ;;  %s10685_s17 = inlined_call_operand.vmem [shape: f32[1,128], index: 17, kind: input, shape index: {}]   ;;  %s10686_s18 = inlined_call_operand.vmem [shape: f32[128,1024], index: 18, kind: input, shape index: {}]   ;;  %s10687_s19 = inlined_call_operand.vmem [shape: f32[1,1024], index: 19, kind: input, shape index: {}]   ;;  %s10688_s20 = inlined_call_operand.vmem [shape: f32[16,128], index: 20, kind: input, shape index: {}]   ;;  %s10689_s21 = inlined_call_operand.vmem [shape: f32[1024,128], index: 21, kind: input, shape index: {}]   ;;  %s10690_s22 = inlined_call_operand.vmem [shape: f32[1,128], index: 22, kind: input, shape index: {}]   ;;  %s10691_s23 = inlined_call_operand.vmem [shape: f32[4,2,128], index: 23, kind: output, shape index: {}]  }
   0x1   :  { %10707 = sst [smem:[#allocation11_spill]] %s10668_s0 }
   0x2   :  { %10708 = sst [smem:[#allocation12_spill]] %s10669_s1 }
   0x3   :  { %10709 = sst [smem:[#allocation13_spill]] %s10670_s2 }
   0x4   :  { %10710 = sst [smem:[#allocation14_spill]] %s10671_s3 }
   0x5   :  { %10711 = sst [smem:[#allocation15_spill]] %s10672_s4  ;;  %s6219_s4 = smov 0  }
   0x6   :  { %10712 = sst [smem:[#allocation16_spill]] %s10673_s5 }
   0x7   :  { %10713 = sst [smem:[#allocation17_spill]] %s10674_s6 }
   0x8   :  { %10714 = sst [smem:[#allocation18_spill]] %s10675_s7 }
   0x9 LB: > { %10715 = sst [smem:[#allocation2_spill]] %s6087_s4  ;;  %s6225_s30 = sadd.s32 4294967295, %s6087_s4   ;;  %s6087_s4 = sphi %s6219_s4, %s33_s4  }
   0xa   : > { %p5685_p0 = scmp.ge.s32.totalorder %s6087_s4, 1  ;;  %p646_p1 = scmp.lt.s32.totalorder %s6087_s4, 3 }
   0xc   : > { %p647_p2 = pnand %p5685_p0, %p646_p1 }
   0xe   : > { %650 = sbr.rel (%p647_p2) target bundleno = 2767 (0xacf), region = 112 }
  0x13   : > { %s10716_s5 = sld [smem:[#allocation13_spill]]  ;;  %vm771_vm0 = vcmask 1045504   ;;  %p714_p3 = scmp.lt.s32.totalorder %s6225_s30, 1  ;;  %vm746_vm1 = vcmask 48128   ;;  %vm903_vm2 = vcmask 523264   ;;  %vm1951_vm3 = vcmask 1040384  }
  0x14   : > { %s10717_s2 = sld [smem:[#allocation15_spill]]  ;;  %vm1960_vm4 = vcmask 1041408   ;;  %vm1969_vm5 = vcmask 1042432   ;;  %s6090_s29 = smov 123   ;;  %vm3588_vm6 = vcmask 7168   ;;  %vm3591_vm7 = vcmask 15360  }
  0x15   : > { %s6242_s7 = scalar_select %p714_p3, %s6225_s30, 1  ;;  %vm3594_vm8 = vcmask 23552   ;;  %vm6098_vm9 = vmmov 0   ;;  %vm5528_vm10 = vcmask 130048  }
  0x16   : > { %s10718_s1 = sld [smem:[#allocation11_spill]]  ;;  %s6093_s24 = smov 124  }
  0x17   : > { %s5735_s3 = sshll.u32 %s6242_s7, 6  ;;  %s10719_s6 = sld [smem:[#allocation17_spill]] }
  0x18   : > { %s10720_s4 = sld [smem:[#allocation14_spill]]  ;;  %s6094_s25 = smov 127  }
  0x19   : > { %v738_v0 = vld [vmem:[%s10716_s5] sm:$0x3f]  ;;  %s10721_s0 = sld [smem:[#allocation16_spill]]  ;;  %s6095_s5 = smov 126  }
  0x1a   : > { %v895_v1 = vld [vmem:[%s10717_s2 + $0x38] sm:$0xff]  ;;  %5964 = vmatprep.subr.msk.mxu0 %vm771_vm0, %v738_v0  ;;  %v894_v2 = vld [vmem:[%s10717_s2 + $0x30] sm:$0xff]  ;;  %v893_v3 = vld [vmem:[%s10717_s2 + $0x28] sm:$0xff]  ;;  %s6096_s27 = smov 1   ;;  %s6097_s28 = smov 2  }
  0x1b   : > { %5978 = vmatprep.subr.mxu1 %v895_v1  ;;  %5965 = vmatpush3.msk.msra.mxu0 %vm771_vm0, %v738_v0  ;;  %v892_v4 = vld [vmem:[%s10717_s2 + $0x20] sm:$0xff]  ;;  %v891_v13 = vld [vmem:[%s10717_s2 + $0x18] sm:$0xff]  ;;  %v890_v14 = vld [vmem:[%s10717_s2 + $0x10] sm:$0xff] }
  0x1c   : > { %5979 = vmatpush3.msra.mxu1 %v895_v1  ;;  %s6254_s26 = scalar_lea.vmem %s10718_s1, %s5735_s3  ;;  %v889_v15 = vld [vmem:[%s10717_s2 + $0x8] sm:$0xff]  ;;  %v888_v16 = vld [vmem:[%s10717_s2] sm:$0xff]  ;;  %s6091_s3 = smov 125  }
  0x1d   : > { %5980 = vmatprep.subr.mxu1 %v894_v2  ;;  %v729_v5 = vld [vmem:[%s6254_s26] sm:$0xff]  ;;  %v730_v6 = vld [vmem:[%s6254_s26 + $0x8] sm:$0xff]  ;;  %v731_v7 = vld [vmem:[%s6254_s26 + $0x10] sm:$0xff] }
  0x1e   : > { %5981 = vmatpush3.msra.mxu1 %v894_v2  ;;  %5966 = vmatprep.mubr.msk.f32.mxu0 %vm746_vm1, %v729_v5  ;;  %v732_v8 = vld [vmem:[%s6254_s26 + $0x18] sm:$0xff]  ;;  %v733_v9 = vld [vmem:[%s6254_s26 + $0x20] sm:$0xff]  ;;  %v734_v10 = vld [vmem:[%s6254_s26 + $0x28] sm:$0xff] }
  0x1f   : > { %5982 = vmatprep.subr.mxu1 %v893_v3  ;;  %5967 = vmatmul.mubr.msk.f32.vlgmr.msra.gmra.mxu0 %vm746_vm1, %v730_v6  ;;  %v735_v11 = vld [vmem:[%s6254_s26 + $0x30] sm:$0xff]  ;;  %v736_v12 = vld [vmem:[%s6254_s26 + $0x38] sm:$0xff]  ;;  %v1162_v17 = vld [vmem:[%s10719_s6 + $0x3c8] sm:$0xff] }
  0x20   : > { %5983 = vmatpush3.msra.mxu1 %v893_v3  ;;  %5969 = vmatprep.mubr.msk.f32.mxu0 %vm746_vm1, %v731_v7  ;;  %v1164_v18 = vld [vmem:[%s10719_s6 + $0x3d8] sm:$0xff]  ;;  %v1161_v19 = vld [vmem:[%s10719_s6 + $0x3c0] sm:$0xff]  ;;  %v1154_v20 = vld [vmem:[%s10719_s6 + $0x388] sm:$0xff] }
  0x21   : > { %5984 = vmatprep.subr.mxu1 %v892_v4  ;;  %1211 = vmatprep.subr.mxu0 %v1162_v17  ;;  %v1153_v21 = vld [vmem:[%s10719_s6 + $0x380] sm:$0xff]  ;;  %v1146_v22 = vld [vmem:[%s10719_s6 + $0x348] sm:$0xff]  ;;  %v1163_v53 = vld [vmem:[%s10719_s6 + $0x3d0] sm:$0xff] }
  0x22   : > { %5985 = vmatpush3.msra.mxu1 %v892_v4  ;;  %1212 = vmatpush1.msra.mxu0 %v1161_v19  ;;  %v1145_v23 = vld [vmem:[%s10719_s6 + $0x340] sm:$0xff]  ;;  %v1138_v24 = vld [vmem:[%s10719_s6 + $0x308] sm:$0xff]  ;;  %v1156_v55 = vld [vmem:[%s10719_s6 + $0x398] sm:$0xff] }
  0x23   : > { %5970 = vmatmul.mubr.msk.f32.gmra.mxu0 %vm746_vm1, %v732_v8  ;;  %5986 = vmatprep.subr.mxu1 %v891_v13  ;;  %v1137_v25 = vld [vmem:[%s10719_s6 + $0x300] sm:$0xff]  ;;  %v1130_v26 = vld [vmem:[%s10719_s6 + $0x2c8] sm:$0xff]  ;;  %v1155_v58 = vld [vmem:[%s10719_s6 + $0x390] sm:$0xff] }
  0x24   : > { %5972 = vmatprep.mubr.msk.f32.mxu0 %vm746_vm1, %v733_v9  ;;  %5987 = vmatpush3.msra.mxu1 %v891_v13  ;;  %v1129_v27 = vld [vmem:[%s10719_s6 + $0x2c0] sm:$0xff]  ;;  %v1122_v28 = vld [vmem:[%s10719_s6 + $0x288] sm:$0xff]  ;;  %v1148_v61 = vld [vmem:[%s10719_s6 + $0x358] sm:$0xff] }
  0x25   : > { %5988 = vmatprep.subr.mxu1 %v890_v14  ;;  %1213 = vmatprep.subr.mxu0 %v1154_v20  ;;  %v1121_v29 = vld [vmem:[%s10719_s6 + $0x280] sm:$0xff]  ;;  %v1114_v30 = vld [vmem:[%s10719_s6 + $0x248] sm:$0xff]  ;;  %v1147_v63 = vld [vmem:[%s10719_s6 + $0x350] sm:$0xff] }
  0x26   : > { %5989 = vmatpush3.msra.mxu1 %v890_v14  ;;  %1214 = vmatpush1.msra.mxu0 %v1153_v21  ;;  %v1113_v31 = vld [vmem:[%s10719_s6 + $0x240] sm:$0xff]  ;;  %v1106_v32 = vld [vmem:[%s10719_s6 + $0x208] sm:$0xff]  ;;  %v1140_v1 = vld [vmem:[%s10719_s6 + $0x318] sm:$0xff] }
  0x27   : > { %5973 = vmatmul.mubr.msk.f32.gmra.mxu0 %vm746_vm1, %v734_v10  ;;  %5990 = vmatprep.subr.mxu1 %v889_v15  ;;  %v1105_v33 = vld [vmem:[%s10719_s6 + $0x200] sm:$0xff]  ;;  %v1098_v34 = vld [vmem:[%s10719_s6 + $0x1c8] sm:$0xff]  ;;  %v1139_v4 = vld [vmem:[%s10719_s6 + $0x310] sm:$0xff] }
  0x28   : > { %5975 = vmatprep.mubr.msk.f32.mxu0 %vm746_vm1, %v735_v11  ;;  %5991 = vmatpush3.msra.mxu1 %v889_v15  ;;  %v1097_v35 = vld [vmem:[%s10719_s6 + $0x1c0] sm:$0xff]  ;;  %v1090_v36 = vld [vmem:[%s10719_s6 + $0x188] sm:$0xff]  ;;  %v1132_v7 = vld [vmem:[%s10719_s6 + $0x2d8] sm:$0xff] }
  0x29   : > { %5992 = vmatprep.subr.mxu1 %v888_v16  ;;  %1215 = vmatprep.subr.mxu0 %v1146_v22  ;;  %v1089_v37 = vld [vmem:[%s10719_s6 + $0x180] sm:$0xff]  ;;  %v1082_v38 = vld [vmem:[%s10719_s6 + $0x148] sm:$0xff]  ;;  %v1131_v9 = vld [vmem:[%s10719_s6 + $0x2d0] sm:$0xff] }
  0x2a   : > { %5993 = vmatpush3.msra.mxu1 %v888_v16  ;;  %1216 = vmatpush1.msra.mxu0 %v1145_v23  ;;  %v1081_v39 = vld [vmem:[%s10719_s6 + $0x140] sm:$0xff]  ;;  %v1074_v40 = vld [vmem:[%s10719_s6 + $0x108] sm:$0xff]  ;;  %v1124_v11 = vld [vmem:[%s10719_s6 + $0x298] sm:$0xff] }
  0x2b   : > { %5976 = vmatmul.mubr.msk.f32.gmra.mxu0 %vm746_vm1, %v736_v12  ;;  %1324 = vmatprep.subr.mxu1 %v1164_v18  ;;  %v1073_v41 = vld [vmem:[%s10719_s6 + $0x100] sm:$0xff]  ;;  %v1066_v42 = vld [vmem:[%s10719_s6 + $0xc8] sm:$0xff]  ;;  %v1123_v13 = vld [vmem:[%s10719_s6 + $0x290] sm:$0xff] }
  0x2c   : > { %1217 = vmatprep.subr.mxu0 %v1138_v24  ;;  %v5691_v43 = vld [vmem:[%s10720_s4] ss:$0 sm:$0xff]  ;;  %v1116_v15 = vld [vmem:[%s10719_s6 + $0x258] sm:$0xff]  ;;  %v1115_v16 = vld [vmem:[%s10719_s6 + $0x250] sm:$0xff]  ;;  %s10724_s4 = sld [smem:[#allocation18_spill]] }
  0x2d   : > { %1218 = vmatpush1.msra.mxu0 %v1137_v25  ;;  %v1108_v17 = vld [vmem:[%s10719_s6 + $0x218] sm:$0xff]  ;;  %v1107_v18 = vld [vmem:[%s10719_s6 + $0x210] sm:$0xff] }
  0x2e   : > { %1219 = vmatprep.subr.mxu0 %v1130_v26  ;;  %v1100_v19 = vld [vmem:[%s10719_s6 + $0x1d8] sm:$0xff]  ;;  %v1099_v20 = vld [vmem:[%s10719_s6 + $0x1d0] sm:$0xff] }
  0x2f   : > { %1220 = vmatpush1.msra.mxu0 %v1129_v27  ;;  %v1092_v21 = vld [vmem:[%s10719_s6 + $0x198] sm:$0xff]  ;;  %v1091_v22 = vld [vmem:[%s10719_s6 + $0x190] sm:$0xff] }
  0x30   : > { %1221 = vmatprep.subr.mxu0 %v1122_v28  ;;  %v1084_v23 = vld [vmem:[%s10719_s6 + $0x158] sm:$0xff]  ;;  %v1083_v24 = vld [vmem:[%s10719_s6 + $0x150] sm:$0xff]  ;;  %v1065_v28 = vld [vmem:[%s10719_s6 + $0xc0] sm:$0xff] }
  0x31   : > { %1222 = vmatpush1.msra.mxu0 %v1121_v29  ;;  %v1076_v25 = vld [vmem:[%s10719_s6 + $0x118] sm:$0xff]  ;;  %v1075_v26 = vld [vmem:[%s10719_s6 + $0x110] sm:$0xff] }
  0x32   : > { %1223 = vmatprep.subr.mxu0 %v1114_v30  ;;  %v1068_v27 = vld [vmem:[%s10719_s6 + $0xd8] sm:$0xff]  ;;  %v1067_v29 = vld [vmem:[%s10719_s6 + $0xd0] sm:$0xff]  ;;  %v1058_v30 = vld [vmem:[%s10719_s6 + $0x88] sm:$0xff] }
  0x33   : > { %1224 = vmatpush1.msra.mxu0 %v1113_v31  ;;  %v1060_v31 = vld [vmem:[%s10719_s6 + $0x98] sm:$0xff] }
  0x34   : > { %1225 = vmatprep.subr.mxu0 %v1106_v32  ;;  %v1057_v32 = vld [vmem:[%s10719_s6 + $0x80] sm:$0xff] }
  0x35   : > { %1226 = vmatpush1.msra.mxu0 %v1105_v33  ;;  %v1059_v33 = vld [vmem:[%s10719_s6 + $0x90] sm:$0xff] }
  0x36   : > { %1227 = vmatprep.subr.mxu0 %v1098_v34  ;;  %v1050_v34 = vld [vmem:[%s10719_s6 + $0x48] sm:$0xff] }
  0x37   : > { %1228 = vmatpush1.msra.mxu0 %v1097_v35  ;;  %v1052_v35 = vld [vmem:[%s10719_s6 + $0x58] sm:$0xff] }
  0x38   : > { %1229 = vmatprep.subr.mxu0 %v1090_v36  ;;  %v1049_v36 = vld [vmem:[%s10719_s6 + $0x40] sm:$0xff] }
  0x39   : > { %1230 = vmatpush1.msra.mxu0 %v1089_v37  ;;  %v1051_v37 = vld [vmem:[%s10719_s6 + $0x50] sm:$0xff] }
  0x3a   : > { %1231 = vmatprep.subr.mxu0 %v1082_v38  ;;  %v1042_v38 = vld [vmem:[%s10719_s6 + $0x8] sm:$0xff] }
  0x3b   : > { %1232 = vmatpush1.msra.mxu0 %v1081_v39  ;;  %v1044_v39 = vld [vmem:[%s10719_s6 + $0x18] sm:$0xff] }
  0x3c   : > { %1233 = vmatprep.subr.mxu0 %v1074_v40  ;;  %v1041_v40 = vld [vmem:[%s10719_s6] sm:$0xff] }
  0x3d   : > { %1234 = vmatpush1.msra.mxu0 %v1073_v41  ;;  %v1043_v41 = vld [vmem:[%s10719_s6 + $0x10] sm:$0xff] }
  0x3e   : > { %1235 = vmatprep.subr.mxu0 %v1066_v42  ;;  %v10697_v42 = vmov 0.0  }
  0x3f   : > { %1236 = vmatpush1.msra.mxu0 %v1065_v28  ;;  %1275 = vmatprep.mubr.f32.mxu0 %v10697_v42  ;;  %v1102_v28 = vld [vmem:[%s10719_s6 + $0x1e8] sm:$0xff] }
  0x40   : > { %1237 = vmatprep.subr.mxu0 %v1058_v30 }
  0x41   : > { %1238 = vmatpush1.msra.mxu0 %v1057_v32  ;;  %v1103_v32 = vld [vmem:[%s10719_s6 + $0x1f0] sm:$0xff] }
  0x42   : > { %1239 = vmatprep.subr.mxu0 %v1050_v34  ;;  %v1094_v34 = vld [vmem:[%s10719_s6 + $0x1a8] sm:$0xff] }
  0x43   : > { %1240 = vmatpush1.msra.mxu0 %v1049_v36  ;;  %v1093_v36 = vld [vmem:[%s10719_s6 + $0x1a0] sm:$0xff] }
  0x44   : > { %1241 = vmatprep.subr.mxu0 %v1042_v38 }
  0x45   : > { %1242 = vmatpush1.msra.mxu0 %v1041_v40  ;;  %v1086_v40 = vld [vmem:[%s10719_s6 + $0x168] sm:$0xff] }
  0xdf   : > { %v5968_v44 = vpop.f32.mrf.mxu0 }
  0xe0   : > { %v847_v45 = vadd.f32 %v5968_v44, %v5691_v43  ;;  %v1168_v44 = vld [vmem:[%s10719_s6 + $0x3f8] sm:$0xff] }
  0xe1   : > { %v841_v46 = vpop.f32.mrf.mxu0 }
  0xe2   : > { %v842_v47 = vadd.f32 %v5691_v43, %v841_v46  ;;  %v881_v51 = vmax.f32 %v847_v45, 0.0  ;;  %v6498_v46 = vld [vmem:[%s10721_s0] ss:$0 sm:$0xff]  ;;  %s6092_s0 = smov 122  }
  0xe3   : > { %v5971_v48 = vpop.f32.mrf.mxu0 }
  0xe4   : > { %v880_v49 = vmax.f32 %v842_v47, 0.0  ;;  %v857_v50 = vadd.f32 %v5971_v48, %v5691_v43 }
  0xe5   : > { %v851_v52 = vpop.f32.mrf.mxu0 }
  0xe6   : > { %v852_v54 = vadd.f32 %v5691_v43, %v851_v52  ;;  %5994 = vmatprep.mubr.msk.f32.mxu1 %vm903_vm2, %v880_v49  ;;  %v883_v56 = vmax.f32 %v857_v50, 0.0  ;;  %v1167_v52 = vld [vmem:[%s10719_s6 + $0x3f0] sm:$0xff] }
  0xe7   : > { %5995 = vmatmul.mubr.msk.f32.vlgmr.msra.gmra.mxu1 %vm903_vm2, %v881_v51  ;;  %v5974_v57 = vpop.f32.mrf.mxu0  ;;  %v1165_v51 = vld [vmem:[%s10719_s6 + $0x3e0] sm:$0xff] }
  0xe8   : > { %v882_v59 = vmax.f32 %v852_v54, 0.0  ;;  %v867_v60 = vadd.f32 %v5974_v57, %v5691_v43  ;;  %1325 = vmatpush1.msra.mxu1 %v1163_v53  ;;  %v1158_v54 = vld [vmem:[%s10719_s6 + $0x3a8] sm:$0xff]  ;;  %v1159_v57 = vld [vmem:[%s10719_s6 + $0x3b0] sm:$0xff] }
  0xe9   : > { %v861_v62 = vpop.f32.mrf.mxu0  ;;  %1326 = vmatprep.subr.mxu1 %v1156_v55  ;;  %v1160_v55 = vld [vmem:[%s10719_s6 + $0x3b8] sm:$0xff] }
  0xea   : > { %5997 = vmatprep.mubr.msk.f32.mxu1 %vm903_vm2, %v882_v59  ;;  %v862_v0 = vadd.f32 %v5691_v43, %v861_v62  ;;  %1327 = vmatpush1.msra.mxu1 %v1155_v58  ;;  %v885_v2 = vmax.f32 %v867_v60, 0.0  ;;  %v1150_v60 = vld [vmem:[%s10719_s6 + $0x368] sm:$0xff]  ;;  %v1149_v62 = vld [vmem:[%s10719_s6 + $0x360] sm:$0xff] }
  0xeb   : > { %5998 = vmatmul.mubr.msk.f32.gmra.mxu1 %vm903_vm2, %v883_v56  ;;  %v5977_v3 = vpop.f32.mrf.mxu0  ;;  %1328 = vmatprep.subr.mxu1 %v1148_v61  ;;  %v1157_v56 = vld [vmem:[%s10719_s6 + $0x3a0] sm:$0xff]  ;;  %v1152_v61 = vld [vmem:[%s10719_s6 + $0x378] sm:$0xff] }
  0xec   : > { %v884_v5 = vmax.f32 %v862_v0, 0.0  ;;  %v877_v6 = vadd.f32 %v5977_v3, %v5691_v43  ;;  %1329 = vmatpush1.msra.mxu1 %v1147_v63  ;;  %v1151_v63 = vld [vmem:[%s10719_s6 + $0x370] sm:$0xff]  ;;  %v1141_v3 = vld [vmem:[%s10719_s6 + $0x320] sm:$0xff] }
  0xed   : > { %v871_v8 = vpop.f32.mrf.mxu0  ;;  %1330 = vmatprep.subr.mxu1 %v1140_v1  ;;  %v1142_v1 = vld [vmem:[%s10719_s6 + $0x328] sm:$0xff] }
  0xee   : > { %6000 = vmatprep.mubr.msk.f32.mxu1 %vm903_vm2, %v884_v5  ;;  %v872_v10 = vadd.f32 %v5691_v43, %v871_v8  ;;  %1331 = vmatpush1.msra.mxu1 %v1139_v4  ;;  %v887_v12 = vmax.f32 %v877_v6, 0.0  ;;  %v1166_v43 = vld [vmem:[%s10719_s6 + $0x3e8] sm:$0xff]  ;;  %v1143_v4 = vld [vmem:[%s10719_s6 + $0x330] sm:$0xff] }
  0xef   : > { %6001 = vmatmul.mubr.msk.f32.gmra.mxu1 %vm903_vm2, %v885_v2  ;;  %1332 = vmatprep.subr.mxu1 %v1132_v7  ;;  %v1144_v2 = vld [vmem:[%s10719_s6 + $0x338] sm:$0xff]  ;;  %v1134_v6 = vld [vmem:[%s10719_s6 + $0x2e8] sm:$0xff] }
  0xf0   : > { %v886_v14 = vmax.f32 %v872_v10, 0.0  ;;  %1333 = vmatpush1.msra.mxu1 %v1131_v9  ;;  %1437 = vmatprep.subr.mxu0 %v1166_v43  ;;  %v1136_v7 = vld [vmem:[%s10719_s6 + $0x2f8] sm:$0xff]  ;;  %v1133_v9 = vld [vmem:[%s10719_s6 + $0x2e0] sm:$0xff]  ;;  %v1135_v10 = vld [vmem:[%s10719_s6 + $0x2f0] sm:$0xff] }
  0xf1   : > { %1334 = vmatprep.subr.mxu1 %v1124_v11  ;;  %v1085_v43 = vld [vmem:[%s10719_s6 + $0x160] sm:$0xff] }
  0xf2   : > { %6003 = vmatprep.mubr.msk.f32.mxu1 %vm903_vm2, %v886_v14  ;;  %1335 = vmatpush1.msra.mxu1 %v1123_v13  ;;  %v1128_v13 = vld [vmem:[%s10719_s6 + $0x2b8] sm:$0xff]  ;;  %v1125_v14 = vld [vmem:[%s10719_s6 + $0x2a0] sm:$0xff] }
  0xf3   : > { %6004 = vmatmul.mubr.msk.f32.gmra.mxu1 %vm903_vm2, %v887_v12  ;;  %1336 = vmatprep.subr.mxu1 %v1116_v15  ;;  %v1126_v12 = vld [vmem:[%s10719_s6 + $0x2a8] sm:$0xff]  ;;  %v1127_v15 = vld [vmem:[%s10719_s6 + $0x2b0] sm:$0xff] }
  0xf4   : > { %1337 = vmatpush1.msra.mxu1 %v1115_v16  ;;  %1388 = vmatprep.mubr.f32.mxu1 %v10697_v42 }
  0xf5   : > { %1338 = vmatprep.subr.mxu1 %v1108_v17 }
  0xf6   : > { %1339 = vmatpush1.msra.mxu1 %v1107_v18  ;;  %v1118_v18 = vld [vmem:[%s10719_s6 + $0x268] sm:$0xff] }
  0xf7   : > { %1340 = vmatprep.subr.mxu1 %v1100_v19  ;;  %v1120_v19 = vld [vmem:[%s10719_s6 + $0x278] sm:$0xff] }
  0xf8   : > { %1341 = vmatpush1.msra.mxu1 %v1099_v20  ;;  %v1117_v20 = vld [vmem:[%s10719_s6 + $0x260] sm:$0xff] }
  0xf9   : > { %1342 = vmatprep.subr.mxu1 %v1092_v21  ;;  %v1119_v21 = vld [vmem:[%s10719_s6 + $0x270] sm:$0xff] }
  0xfa   : > { %1343 = vmatpush1.msra.mxu1 %v1091_v22 }
  0xfb   : > { %1344 = vmatprep.subr.mxu1 %v1084_v23  ;;  %v1110_v23 = vld [vmem:[%s10719_s6 + $0x228] sm:$0xff] }
  0xfc   : > { %1345 = vmatpush1.msra.mxu1 %v1083_v24  ;;  %v1112_v24 = vld [vmem:[%s10719_s6 + $0x238] sm:$0xff] }
  0xfd   : > { %1346 = vmatprep.subr.mxu1 %v1076_v25  ;;  %v1109_v25 = vld [vmem:[%s10719_s6 + $0x220] sm:$0xff] }
  0xfe   : > { %1347 = vmatpush1.msra.mxu1 %v1075_v26  ;;  %v1111_v26 = vld [vmem:[%s10719_s6 + $0x230] sm:$0xff] }
  0xff   : > { %1348 = vmatprep.subr.mxu1 %v1068_v27 }
 0x100   : > { %1349 = vmatpush1.msra.mxu1 %v1067_v29  ;;  %v1104_v29 = vld [vmem:[%s10719_s6 + $0x1f8] sm:$0xff] }
 0x101   : > { %1350 = vmatprep.subr.mxu1 %v1060_v31  ;;  %v1101_v31 = vld [vmem:[%s10719_s6 + $0x1e0] sm:$0xff] }
 0x102   : > { %1351 = vmatpush1.msra.mxu1 %v1059_v33 }
 0x103   : > { %1352 = vmatprep.subr.mxu1 %v1052_v35  ;;  %v1096_v35 = vld [vmem:[%s10719_s6 + $0x1b8] sm:$0xff] }
 0x104   : > { %1353 = vmatpush1.msra.mxu1 %v1051_v37  ;;  %v1095_v37 = vld [vmem:[%s10719_s6 + $0x1b0] sm:$0xff] }
 0x105   : > { %1354 = vmatprep.subr.mxu1 %v1044_v39 }
 0x106   : > { %1355 = vmatpush1.msra.mxu1 %v1043_v41  ;;  %v1088_v41 = vld [vmem:[%s10719_s6 + $0x178] sm:$0xff] }
 0x107   : > { %1550 = vmatprep.subr.mxu1 %v1168_v44  ;;  %v1087_v44 = vld [vmem:[%s10719_s6 + $0x170] sm:$0xff] }
 0x1a7   : > { %v5996_v45 = vpop.f32.mrf.mxu1 }
 0x1a8   : > { %v1000_v53 = vadd.f32 %v5996_v45, %v6498_v46 }
 0x1a9   : > { %v994_v47 = vpop.f32.mrf.mxu1 }
 0x1aa   : > { %v995_v48 = vadd.f32 %v6498_v46, %v994_v47  ;;  %v6524_v59 = vmax.f32 %v1000_v53, 0.0  ;;  %v1078_v47 = vld [vmem:[%s10719_s6 + $0x128] sm:$0xff] }
 0x1ab   : > { %v5999_v50 = vpop.f32.mrf.mxu1  ;;  %v1070_v53 = vld [vmem:[%s10719_s6 + $0xe8] sm:$0xff] }
 0x1ac   : > { %v6501_v49 = vmax.f32 %v995_v48, 0.0  ;;  %v1010_v11 = vadd.f32 %v5999_v50, %v6498_v46  ;;  %v1080_v48 = vld [vmem:[%s10719_s6 + $0x138] sm:$0xff]  ;;  %v1077_v50 = vld [vmem:[%s10719_s6 + $0x120] sm:$0xff] }
 0x1ad   : > { %v1004_v58 = vpop.f32.mrf.mxu1 }
 0x1ae   : > { %1276 = vmatmul.mubr.f32.vlgmr.msra.gmra.mxu0 %v6501_v49  ;;  %1389 = vmatmul.mubr.f32.vlgmr.msra.gmra.mxu1 %v6501_v49  ;;  %v1005_v0 = vadd.f32 %v6498_v46, %v1004_v58  ;;  %v6586_v17 = vmax.f32 %v1010_v11, 0.0  ;;  %v1062_v58 = vld [vmem:[%s10719_s6 + $0xa8] sm:$0xff]  ;;  %v2166_v11 = vld [vmem:[%s10676_s8 + $0x5e0] sm:$0xff] }
 0x1af   : > { %1438 = vmatpush1.msra.mxu0 %v1165_v51  ;;  %1551 = vmatpush1.msra.mxu1 %v1167_v52  ;;  %v6002_v8 = vpop.f32.mrf.mxu1  ;;  %v1079_v51 = vld [vmem:[%s10719_s6 + $0x130] sm:$0xff] }
 0x1b0   : > { %1439 = vmatprep.subr.mxu0 %v1158_v54  ;;  %1552 = vmatprep.subr.mxu1 %v1160_v55  ;;  %v6555_v5 = vmax.f32 %v1005_v0, 0.0  ;;  %v1020_v33 = vadd.f32 %v6002_v8, %v6498_v46  ;;  %v1072_v54 = vld [vmem:[%s10719_s6 + $0xf8] sm:$0xff]  ;;  %v1069_v55 = vld [vmem:[%s10719_s6 + $0xe0] sm:$0xff]  ;;  %v2039_v8 = vld [vmem:[%s10676_s8 + $0x1e8] sm:$0xff] }
 0x1b1   : > { %1281 = vmatprep.mubr.f32.mxu0 %v10697_v42  ;;  %1394 = vmatprep.mubr.f32.mxu1 %v10697_v42  ;;  %v1014_v16 = vpop.f32.mrf.mxu1  ;;  %v1056_v0 = vld [vmem:[%s10719_s6 + $0x78] sm:$0xff] }
 0x1b2   : > { %1440 = vmatpush1.msra.mxu0 %v1157_v56  ;;  %1553 = vmatpush1.msra.mxu1 %v1159_v57  ;;  %v1015_v22 = vadd.f32 %v6498_v46, %v1014_v16  ;;  %v6648_v39 = vmax.f32 %v1020_v33, 0.0  ;;  %v1071_v56 = vld [vmem:[%s10719_s6 + $0xf0] sm:$0xff]  ;;  %v2030_v16 = vld [vmem:[%s10676_s8 + $0x1a0] sm:$0xff]  ;;  %v2011_v33 = vld [vmem:[%s10676_s8 + $0x108] sm:$0xff] }
 0x1b3   : > { %1282 = vmatmul.mubr.f32.gmra.mxu0 %v6524_v59  ;;  %1395 = vmatmul.mubr.f32.gmra.mxu1 %v6524_v59  ;;  %v6005_v30 = vpop.f32.mrf.mxu1 }
 0x1b4   : > { %1441 = vmatprep.subr.mxu0 %v1150_v60  ;;  %1554 = vmatprep.subr.mxu1 %v1152_v61  ;;  %v6617_v27 = vmax.f32 %v1015_v22, 0.0  ;;  %v1030_v57 = vadd.f32 %v6005_v30, %v6498_v46  ;;  %v1064_v60 = vld [vmem:[%s10719_s6 + $0xb8] sm:$0xff]  ;;  %v1063_v61 = vld [vmem:[%s10719_s6 + $0xb0] sm:$0xff]  ;;  %v2151_v22 = vld [vmem:[%s10676_s8 + $0x568] sm:$0xff] }
 0x1b5   : > { %1442 = vmatpush1.msra.mxu0 %v1149_v62  ;;  %1555 = vmatpush1.msra.mxu1 %v1151_v63  ;;  %v1024_v38 = vpop.f32.mrf.mxu1  ;;  %v1054_v63 = vld [vmem:[%s10719_s6 + $0x68] sm:$0xff] }
 0x1b6   : > { %1443 = vmatprep.subr.mxu0 %v1142_v1  ;;  %1556 = vmatprep.subr.mxu1 %v1144_v2  ;;  %v1025_v45 = vadd.f32 %v6498_v46, %v1024_v38  ;;  %v1061_v46 = vld [vmem:[%s10719_s6 + $0xa0] sm:$0xff]  ;;  %v6710_v62 = vmax.f32 %v1030_v57, 0.0  ;;  %v1055_v2 = vld [vmem:[%s10719_s6 + $0x70] sm:$0xff]  ;;  %v2143_v30 = vld [vmem:[%s10676_s8 + $0x528] sm:$0xff] }
 0x1b7   : > { %1287 = vmatprep.mubr.f32.mxu0 %v10697_v42  ;;  %1400 = vmatprep.mubr.f32.mxu1 %v10697_v42  ;;  %v1053_v1 = vld [vmem:[%s10719_s6 + $0x60] sm:$0xff]  ;;  %v2135_v38 = vld [vmem:[%s10676_s8 + $0x4e8] sm:$0xff] }
 0x1b8   : > { %1444 = vmatpush1.msra.mxu0 %v1141_v3  ;;  %1557 = vmatpush1.msra.mxu1 %v1143_v4  ;;  %v6679_v52 = vmax.f32 %v1025_v45, 0.0  ;;  %v1046_v3 = vld [vmem:[%s10719_s6 + $0x28] sm:$0xff]  ;;  %v1048_v4 = vld [vmem:[%s10719_s6 + $0x38] sm:$0xff]  ;;  %v2130_v45 = vld [vmem:[%s10676_s8 + $0x4c0] sm:$0xff] }
 0x1b9   : > { %1288 = vmatmul.mubr.f32.gmra.mxu0 %v6555_v5  ;;  %1401 = vmatmul.mubr.f32.gmra.mxu1 %v6555_v5  ;;  %v2119_v57 = vld [vmem:[%s10676_s8 + $0x468] sm:$0xff] }
 0x1ba   : > { %1445 = vmatprep.subr.mxu0 %v1134_v6  ;;  %1558 = vmatprep.subr.mxu1 %v1136_v7  ;;  %v1045_v6 = vld [vmem:[%s10719_s6 + $0x20] sm:$0xff]  ;;  %v1047_v7 = vld [vmem:[%s10719_s6 + $0x30] sm:$0xff] }
 0x1bb   : > { %1446 = vmatpush1.msra.mxu0 %v1133_v9  ;;  %1559 = vmatpush1.msra.mxu1 %v1135_v10  ;;  %v2167_v9 = vld [vmem:[%s10676_s8 + $0x5e8] sm:$0xff]  ;;  %v2038_v10 = vld [vmem:[%s10676_s8 + $0x1e0] sm:$0xff] }
 0x1bc   : > { %1447 = vmatprep.subr.mxu0 %v1126_v12  ;;  %1560 = vmatprep.subr.mxu1 %v1128_v13  ;;  %v2163_v12 = vld [vmem:[%s10676_s8 + $0x5c8] sm:$0xff]  ;;  %v2034_v13 = vld [vmem:[%s10676_s8 + $0x1c0] sm:$0xff] }
 0x1bd   : > { %1293 = vmatprep.mubr.f32.mxu0 %v10697_v42  ;;  %1406 = vmatprep.mubr.f32.mxu1 %v10697_v42 }
 0x1be   : > { %1448 = vmatpush1.msra.mxu0 %v1125_v14  ;;  %1561 = vmatpush1.msra.mxu1 %v1127_v15  ;;  %v2162_v14 = vld [vmem:[%s10676_s8 + $0x5c0] sm:$0xff]  ;;  %v2159_v15 = vld [vmem:[%s10676_s8 + $0x5a8] sm:$0xff] }
 0x1bf   : > { %1294 = vmatmul.mubr.f32.gmra.mxu0 %v6586_v17  ;;  %1407 = vmatmul.mubr.f32.gmra.mxu1 %v6586_v17 }
 0x1c0   : > { %1449 = vmatprep.subr.mxu0 %v1118_v18  ;;  %1562 = vmatprep.subr.mxu1 %v1120_v19  ;;  %v2158_v18 = vld [vmem:[%s10676_s8 + $0x5a0] sm:$0xff]  ;;  %v2155_v19 = vld [vmem:[%s10676_s8 + $0x588] sm:$0xff] }
 0x1c1   : > { %1450 = vmatpush1.msra.mxu0 %v1117_v20  ;;  %1563 = vmatpush1.msra.mxu1 %v1119_v21  ;;  %v2026_v20 = vld [vmem:[%s10676_s8 + $0x180] sm:$0xff] }
 0x1c2   : > { %1451 = vmatprep.subr.mxu0 %v1110_v23  ;;  %1564 = vmatprep.subr.mxu1 %v1112_v24  ;;  %v2154_v21 = vld [vmem:[%s10676_s8 + $0x580] sm:$0xff] }
 0x1c3   : > { %1299 = vmatprep.mubr.f32.mxu0 %v10697_v42  ;;  %1412 = vmatprep.mubr.f32.mxu1 %v10697_v42  ;;  %v2022_v23 = vld [vmem:[%s10676_s8 + $0x160] sm:$0xff] }
 0x1c4   : > { %1452 = vmatpush1.msra.mxu0 %v1109_v25  ;;  %1565 = vmatpush1.msra.mxu1 %v1111_v26  ;;  %v2150_v24 = vld [vmem:[%s10676_s8 + $0x560] sm:$0xff]  ;;  %v2019_v25 = vld [vmem:[%s10676_s8 + $0x148] sm:$0xff] }
 0x1c5   : > { %1300 = vmatmul.mubr.f32.gmra.mxu0 %v6617_v27  ;;  %1413 = vmatmul.mubr.f32.gmra.mxu1 %v6617_v27  ;;  %v2147_v26 = vld [vmem:[%s10676_s8 + $0x548] sm:$0xff] }
 0x1c6   : > { %1453 = vmatprep.subr.mxu0 %v1102_v28  ;;  %1566 = vmatprep.subr.mxu1 %v1104_v29  ;;  %v2146_v28 = vld [vmem:[%s10676_s8 + $0x540] sm:$0xff]  ;;  %v2015_v29 = vld [vmem:[%s10676_s8 + $0x128] sm:$0xff] }
 0x1c7   : > { %1454 = vmatpush1.msra.mxu0 %v1101_v31  ;;  %1567 = vmatpush1.msra.mxu1 %v1103_v32  ;;  %v2014_v31 = vld [vmem:[%s10676_s8 + $0x120] sm:$0xff] }
 0x1c8   : > { %1455 = vmatprep.subr.mxu0 %v1094_v34  ;;  %1568 = vmatprep.subr.mxu1 %v1096_v35  ;;  %v2142_v32 = vld [vmem:[%s10676_s8 + $0x520] sm:$0xff]  ;;  %v2139_v34 = vld [vmem:[%s10676_s8 + $0x508] sm:$0xff] }
 0x1c9   : > { %1305 = vmatprep.mubr.f32.mxu0 %v10697_v42  ;;  %1418 = vmatprep.mubr.f32.mxu1 %v10697_v42  ;;  %v2010_v35 = vld [vmem:[%s10676_s8 + $0x100] sm:$0xff] }
 0x1ca   : > { %1456 = vmatpush1.msra.mxu0 %v1093_v36  ;;  %1569 = vmatpush1.msra.mxu1 %v1095_v37  ;;  %v2138_v36 = vld [vmem:[%s10676_s8 + $0x500] sm:$0xff]  ;;  %v2007_v37 = vld [vmem:[%s10676_s8 + $0xe8] sm:$0xff] }
 0x1cb   : > { %1306 = vmatmul.mubr.f32.gmra.mxu0 %v6648_v39  ;;  %1419 = vmatmul.mubr.f32.gmra.mxu1 %v6648_v39 }
 0x1cc   : > { %1457 = vmatprep.subr.mxu0 %v1086_v40  ;;  %1570 = vmatprep.subr.mxu1 %v1088_v41  ;;  %v2134_v40 = vld [vmem:[%s10676_s8 + $0x4e0] sm:$0xff]  ;;  %v2003_v41 = vld [vmem:[%s10676_s8 + $0xc8] sm:$0xff] }
 0x1cd   : > { %1458 = vmatpush1.msra.mxu0 %v1085_v43  ;;  %1571 = vmatpush1.msra.mxu1 %v1087_v44  ;;  %v2131_v43 = vld [vmem:[%s10676_s8 + $0x4c8] sm:$0xff]  ;;  %v2002_v44 = vld [vmem:[%s10676_s8 + $0xc0] sm:$0xff] }
 0x1ce   : > { %1459 = vmatprep.subr.mxu0 %v1078_v47  ;;  %1572 = vmatprep.subr.mxu1 %v1080_v48  ;;  %v1999_v47 = vld [vmem:[%s10676_s8 + $0xa8] sm:$0xff] }
 0x1cf   : > { %1311 = vmatprep.mubr.f32.mxu0 %v10697_v42  ;;  %1424 = vmatprep.mubr.f32.mxu1 %v10697_v42  ;;  %v2127_v48 = vld [vmem:[%s10676_s8 + $0x4a8] sm:$0xff] }
 0x1d0   : > { %1460 = vmatpush1.msra.mxu0 %v1077_v50  ;;  %1573 = vmatpush1.msra.mxu1 %v1079_v51  ;;  %v1998_v50 = vld [vmem:[%s10676_s8 + $0xa0] sm:$0xff] }
 0x1d1   : > { %1312 = vmatmul.mubr.f32.gmra.mxu0 %v6679_v52  ;;  %1425 = vmatmul.mubr.f32.gmra.mxu1 %v6679_v52  ;;  %v2126_v51 = vld [vmem:[%s10676_s8 + $0x4a0] sm:$0xff] }
 0x1d2   : > { %1461 = vmatprep.subr.mxu0 %v1070_v53  ;;  %1574 = vmatprep.subr.mxu1 %v1072_v54  ;;  %v2123_v53 = vld [vmem:[%s10676_s8 + $0x488] sm:$0xff]  ;;  %v1994_v54 = vld [vmem:[%s10676_s8 + $0x80] sm:$0xff] }
 0x1d3   : > { %1462 = vmatpush1.msra.mxu0 %v1069_v55  ;;  %1575 = vmatpush1.msra.mxu1 %v1071_v56  ;;  %v2122_v55 = vld [vmem:[%s10676_s8 + $0x480] sm:$0xff]  ;;  %v1991_v56 = vld [vmem:[%s10676_s8 + $0x68] sm:$0xff] }
 0x1d4   : > { %1463 = vmatprep.subr.mxu0 %v1062_v58  ;;  %1576 = vmatprep.subr.mxu1 %v1064_v60  ;;  %v1990_v58 = vld [vmem:[%s10676_s8 + $0x60] sm:$0xff] }
 0x1d5   : > { %1317 = vmatprep.mubr.f32.mxu0 %v10697_v42  ;;  %1430 = vmatprep.mubr.f32.mxu1 %v10697_v42  ;;  %v2118_v60 = vld [vmem:[%s10676_s8 + $0x460] sm:$0xff] }
 0x1d6   : > { %1464 = vmatpush1.msra.mxu0 %v1061_v46  ;;  %1577 = vmatpush1.msra.mxu1 %v1063_v61  ;;  %v1987_v46 = vld [vmem:[%s10676_s8 + $0x48] sm:$0xff] }
 0x1d7   : > { %1318 = vmatmul.mubr.f32.gmra.mxu0 %v6710_v62  ;;  %1431 = vmatmul.mubr.f32.gmra.mxu1 %v6710_v62  ;;  %v2115_v61 = vld [vmem:[%s10676_s8 + $0x448] sm:$0xff] }
 0x1d8   : > { %1465 = vmatprep.subr.mxu0 %v1054_v63  ;;  %1578 = vmatprep.subr.mxu1 %v1056_v0  ;;  %v2114_v63 = vld [vmem:[%s10676_s8 + $0x440] sm:$0xff]  ;;  %v1983_v0 = vld [vmem:[%s10676_s8 + $0x28] sm:$0xff] }
 0x1d9   : > { %1466 = vmatpush1.msra.mxu0 %v1053_v1  ;;  %1579 = vmatpush1.msra.mxu1 %v1055_v2  ;;  %v2111_v1 = vld [vmem:[%s10676_s8 + $0x428] sm:$0xff]  ;;  %v1982_v2 = vld [vmem:[%s10676_s8 + $0x20] sm:$0xff] }
 0x1da   : > { %1467 = vmatprep.subr.mxu0 %v1046_v3  ;;  %1580 = vmatprep.subr.mxu1 %v1048_v4  ;;  %v2110_v3 = vld [vmem:[%s10676_s8 + $0x420] sm:$0xff]  ;;  %v1979_v4 = vld [vmem:[%s10676_s8 + $0x8] sm:$0xff] }
 0x1db   : > { %1468 = vmatpush1.msra.mxu0 %v1045_v6  ;;  %1501 = vmatprep.mubr.f32.mxu0 %v10697_v42  ;;  %v2107_v6 = vld [vmem:[%s10676_s8 + $0x408] sm:$0xff] }
 0x1dc   : > { %1581 = vmatpush1.msra.mxu1 %v1047_v7  ;;  %1614 = vmatprep.mubr.f32.mxu1 %v10697_v42  ;;  %v1978_v7 = vld [vmem:[%s10676_s8] sm:$0xff] }
 0x1dd   : > { %1502 = vmatmul.mubr.f32.vlgmr.msra.gmra.mxu0 %v6501_v49  ;;  %1615 = vmatmul.mubr.f32.vlgmr.msra.gmra.mxu1 %v6501_v49  ;;  %v2035_v49 = vld [vmem:[%s10676_s8 + $0x1c8] sm:$0xff] }
 0x1de   : > { %1507 = vmatprep.mubr.f32.mxu0 %v10697_v42  ;;  %1620 = vmatprep.mubr.f32.mxu1 %v10697_v42 }
 0x1df   : > { %2512 = vmatprep.subr.mxu0 %v2039_v8  ;;  %2583 = vmatprep.subr.mxu1 %v2167_v9  ;;  %v2106_v8 = vld [vmem:[%s10676_s8 + $0x400] sm:$0xff]  ;;  %v2103_v9 = vld [vmem:[%s10676_s8 + $0x3e8] sm:$0xff] }
 0x1e0   : > { %2513 = vmatpush1.msra.mxu0 %v2038_v10  ;;  %2584 = vmatpush1.msra.mxu1 %v2166_v11  ;;  %v2231_v10 = vld [vmem:[%s10676_s8 + $0x7e8] sm:$0xff]  ;;  %v2102_v11 = vld [vmem:[%s10676_s8 + $0x3e0] sm:$0xff] }
 0x1e1   : > { %1508 = vmatmul.mubr.f32.gmra.mxu0 %v6524_v59  ;;  %1621 = vmatmul.mubr.f32.gmra.mxu1 %v6524_v59  ;;  %v2031_v59 = vld [vmem:[%s10676_s8 + $0x1a8] sm:$0xff] }
 0x1e2   : > { %1513 = vmatprep.mubr.f32.mxu0 %v10697_v42  ;;  %1626 = vmatprep.mubr.f32.mxu1 %v10697_v42 }
 0x1e3   : > { %2514 = vmatprep.subr.mxu0 %v2035_v49  ;;  %2585 = vmatprep.subr.mxu1 %v2163_v12  ;;  %v2230_v49 = vld [vmem:[%s10676_s8 + $0x7e0] sm:$0xff]  ;;  %v2099_v12 = vld [vmem:[%s10676_s8 + $0x3c8] sm:$0xff] }
 0x1e4   : > { %2515 = vmatpush1.msra.mxu0 %v2034_v13  ;;  %2586 = vmatpush1.msra.mxu1 %v2162_v14  ;;  %v2227_v13 = vld [vmem:[%s10676_s8 + $0x7c8] sm:$0xff]  ;;  %v2098_v14 = vld [vmem:[%s10676_s8 + $0x3c0] sm:$0xff] }
 0x1e5   : > { %1514 = vmatmul.mubr.f32.gmra.mxu0 %v6555_v5  ;;  %1627 = vmatmul.mubr.f32.gmra.mxu1 %v6555_v5  ;;  %v2027_v5 = vld [vmem:[%s10676_s8 + $0x188] sm:$0xff] }
 0x1e6   : > { %1519 = vmatprep.mubr.f32.mxu0 %v10697_v42  ;;  %1632 = vmatprep.mubr.f32.mxu1 %v10697_v42 }
 0x1e7   : > { %2516 = vmatprep.subr.mxu0 %v2031_v59  ;;  %2587 = vmatprep.subr.mxu1 %v2159_v15  ;;  %v2226_v59 = vld [vmem:[%s10676_s8 + $0x7c0] sm:$0xff]  ;;  %v2095_v15 = vld [vmem:[%s10676_s8 + $0x3a8] sm:$0xff] }
 0x1e8   : > { %2517 = vmatpush1.msra.mxu0 %v2030_v16  ;;  %2588 = vmatpush1.msra.mxu1 %v2158_v18  ;;  %v2223_v16 = vld [vmem:[%s10676_s8 + $0x7a8] sm:$0xff]  ;;  %v2094_v18 = vld [vmem:[%s10676_s8 + $0x3a0] sm:$0xff] }
 0x1e9   : > { %1520 = vmatmul.mubr.f32.gmra.mxu0 %v6586_v17  ;;  %1633 = vmatmul.mubr.f32.gmra.mxu1 %v6586_v17  ;;  %v2023_v17 = vld [vmem:[%s10676_s8 + $0x168] sm:$0xff] }
 0x1ea   : > { %1525 = vmatprep.mubr.f32.mxu0 %v10697_v42  ;;  %1638 = vmatprep.mubr.f32.mxu1 %v10697_v42 }
 0x1eb   : > { %2518 = vmatprep.subr.mxu0 %v2027_v5  ;;  %2589 = vmatprep.subr.mxu1 %v2155_v19  ;;  %v2222_v5 = vld [vmem:[%s10676_s8 + $0x7a0] sm:$0xff]  ;;  %v2091_v19 = vld [vmem:[%s10676_s8 + $0x388] sm:$0xff] }
 0x1ec   : > { %2519 = vmatpush1.msra.mxu0 %v2026_v20  ;;  %2590 = vmatpush1.msra.mxu1 %v2154_v21  ;;  %v2219_v20 = vld [vmem:[%s10676_s8 + $0x788] sm:$0xff]  ;;  %v2090_v21 = vld [vmem:[%s10676_s8 + $0x380] sm:$0xff] }
 0x1ed   : > { %1526 = vmatmul.mubr.f32.gmra.mxu0 %v6617_v27  ;;  %1639 = vmatmul.mubr.f32.gmra.mxu1 %v6617_v27  ;;  %v2018_v27 = vld [vmem:[%s10676_s8 + $0x140] sm:$0xff] }
 0x1ee   : > { %1531 = vmatprep.mubr.f32.mxu0 %v10697_v42  ;;  %1644 = vmatprep.mubr.f32.mxu1 %v10697_v42 }
 0x1ef   : > { %2520 = vmatprep.subr.mxu0 %v2023_v17  ;;  %2591 = vmatprep.subr.mxu1 %v2151_v22  ;;  %v2218_v17 = vld [vmem:[%s10676_s8 + $0x780] sm:$0xff]  ;;  %v2087_v22 = vld [vmem:[%s10676_s8 + $0x368] sm:$0xff] }
 0x1f0   : > { %2521 = vmatpush1.msra.mxu0 %v2022_v23  ;;  %2592 = vmatpush1.msra.mxu1 %v2150_v24  ;;  %v2215_v23 = vld [vmem:[%s10676_s8 + $0x768] sm:$0xff]  ;;  %v2086_v24 = vld [vmem:[%s10676_s8 + $0x360] sm:$0xff] }
 0x1f1   : > { %1532 = vmatmul.mubr.f32.gmra.mxu0 %v6648_v39  ;;  %1645 = vmatmul.mubr.f32.gmra.mxu1 %v6648_v39  ;;  %v2006_v39 = vld [vmem:[%s10676_s8 + $0xe0] sm:$0xff] }
 0x1f2   : > { %1537 = vmatprep.mubr.f32.mxu0 %v10697_v42  ;;  %1650 = vmatprep.mubr.f32.mxu1 %v10697_v42 }
 0x1f3   : > { %2522 = vmatprep.subr.mxu0 %v2019_v25  ;;  %2593 = vmatprep.subr.mxu1 %v2147_v26  ;;  %v2214_v25 = vld [vmem:[%s10676_s8 + $0x760] sm:$0xff]  ;;  %v2083_v26 = vld [vmem:[%s10676_s8 + $0x348] sm:$0xff] }
 0x1f4   : > { %2523 = vmatpush1.msra.mxu0 %v2018_v27  ;;  %2594 = vmatpush1.msra.mxu1 %v2146_v28  ;;  %v2211_v27 = vld [vmem:[%s10676_s8 + $0x748] sm:$0xff]  ;;  %v2082_v28 = vld [vmem:[%s10676_s8 + $0x340] sm:$0xff] }
 0x1f5   : > { %1538 = vmatmul.mubr.f32.gmra.mxu0 %v6679_v52  ;;  %1651 = vmatmul.mubr.f32.gmra.mxu1 %v6679_v52  ;;  %v1995_v52 = vld [vmem:[%s10676_s8 + $0x88] sm:$0xff] }
 0x1f6   : > { %1543 = vmatprep.mubr.f32.mxu0 %v10697_v42  ;;  %1656 = vmatprep.mubr.f32.mxu1 %v10697_v42 }
 0x1f7   : > { %2524 = vmatprep.subr.mxu0 %v2015_v29  ;;  %2595 = vmatprep.subr.mxu1 %v2143_v30  ;;  %v2210_v29 = vld [vmem:[%s10676_s8 + $0x740] sm:$0xff]  ;;  %v2079_v30 = vld [vmem:[%s10676_s8 + $0x328] sm:$0xff] }
 0x1f8   : > { %2525 = vmatpush1.msra.mxu0 %v2014_v31  ;;  %2596 = vmatpush1.msra.mxu1 %v2142_v32  ;;  %v2207_v31 = vld [vmem:[%s10676_s8 + $0x728] sm:$0xff]  ;;  %v2078_v32 = vld [vmem:[%s10676_s8 + $0x320] sm:$0xff] }
 0x1f9   : > { %1544 = vmatmul.mubr.f32.gmra.mxu0 %v6710_v62  ;;  %1657 = vmatmul.mubr.f32.gmra.mxu1 %v6710_v62  ;;  %v1986_v62 = vld [vmem:[%s10676_s8 + $0x40] sm:$0xff] }
 0x1fa   : > { %2526 = vmatprep.subr.mxu0 %v2011_v33  ;;  %2597 = vmatprep.subr.mxu1 %v2139_v34  ;;  %v2206_v33 = vld [vmem:[%s10676_s8 + $0x720] sm:$0xff]  ;;  %v2075_v34 = vld [vmem:[%s10676_s8 + $0x308] sm:$0xff] }
 0x1fb   : > { %2527 = vmatpush1.msra.mxu0 %v2010_v35  ;;  %2598 = vmatpush1.msra.mxu1 %v2138_v36  ;;  %v2203_v35 = vld [vmem:[%s10676_s8 + $0x708] sm:$0xff]  ;;  %v2074_v36 = vld [vmem:[%s10676_s8 + $0x300] sm:$0xff] }
 0x1fc   : > { %2528 = vmatprep.subr.mxu0 %v2007_v37  ;;  %2599 = vmatprep.subr.mxu1 %v2135_v38  ;;  %v2202_v37 = vld [vmem:[%s10676_s8 + $0x700] sm:$0xff]  ;;  %v2071_v38 = vld [vmem:[%s10676_s8 + $0x2e8] sm:$0xff] }
 0x1fd   : > { %2529 = vmatpush1.msra.mxu0 %v2006_v39  ;;  %2600 = vmatpush1.msra.mxu1 %v2134_v40  ;;  %v2199_v39 = vld [vmem:[%s10676_s8 + $0x6e8] sm:$0xff]  ;;  %v2070_v40 = vld [vmem:[%s10676_s8 + $0x2e0] sm:$0xff] }
 0x1fe   : > { %2530 = vmatprep.subr.mxu0 %v2003_v41  ;;  %2601 = vmatprep.subr.mxu1 %v2131_v43  ;;  %v2198_v41 = vld [vmem:[%s10676_s8 + $0x6e0] sm:$0xff]  ;;  %v2067_v43 = vld [vmem:[%s10676_s8 + $0x2c8] sm:$0xff] }
 0x1ff   : > { %2531 = vmatpush1.msra.mxu0 %v2002_v44  ;;  %2602 = vmatpush1.msra.mxu1 %v2130_v45  ;;  %v2195_v44 = vld [vmem:[%s10676_s8 + $0x6c8] sm:$0xff]  ;;  %v2066_v45 = vld [vmem:[%s10676_s8 + $0x2c0] sm:$0xff] }
 0x200   : > { %2532 = vmatprep.subr.mxu0 %v1999_v47  ;;  %2603 = vmatprep.subr.mxu1 %v2127_v48  ;;  %v2194_v47 = vld [vmem:[%s10676_s8 + $0x6c0] sm:$0xff]  ;;  %v2063_v48 = vld [vmem:[%s10676_s8 + $0x2a8] sm:$0xff] }
 0x201   : > { %2533 = vmatpush1.msra.mxu0 %v1998_v50  ;;  %2604 = vmatpush1.msra.mxu1 %v2126_v51  ;;  %v2191_v50 = vld [vmem:[%s10676_s8 + $0x6a8] sm:$0xff]  ;;  %v2062_v51 = vld [vmem:[%s10676_s8 + $0x2a0] sm:$0xff] }
 0x202   : > { %2534 = vmatprep.subr.mxu0 %v1995_v52  ;;  %2605 = vmatprep.subr.mxu1 %v2123_v53  ;;  %v2190_v52 = vld [vmem:[%s10676_s8 + $0x6a0] sm:$0xff]  ;;  %v2059_v53 = vld [vmem:[%s10676_s8 + $0x288] sm:$0xff] }
 0x203   : > { %2535 = vmatpush1.msra.mxu0 %v1994_v54  ;;  %2606 = vmatpush1.msra.mxu1 %v2122_v55  ;;  %v2187_v54 = vld [vmem:[%s10676_s8 + $0x688] sm:$0xff]  ;;  %v2058_v55 = vld [vmem:[%s10676_s8 + $0x280] sm:$0xff] }
 0x204   : > { %2536 = vmatprep.subr.mxu0 %v1991_v56  ;;  %2607 = vmatprep.subr.mxu1 %v2119_v57  ;;  %v2186_v56 = vld [vmem:[%s10676_s8 + $0x680] sm:$0xff]  ;;  %v2055_v57 = vld [vmem:[%s10676_s8 + $0x268] sm:$0xff] }
 0x205   : > { %2537 = vmatpush1.msra.mxu0 %v1990_v58  ;;  %2608 = vmatpush1.msra.mxu1 %v2118_v60  ;;  %v2183_v58 = vld [vmem:[%s10676_s8 + $0x668] sm:$0xff]  ;;  %v2054_v60 = vld [vmem:[%s10676_s8 + $0x260] sm:$0xff] }
 0x206   : > { %2538 = vmatprep.subr.mxu0 %v1987_v46  ;;  %2609 = vmatprep.subr.mxu1 %v2115_v61  ;;  %v2182_v46 = vld [vmem:[%s10676_s8 + $0x660] sm:$0xff]  ;;  %v2051_v61 = vld [vmem:[%s10676_s8 + $0x248] sm:$0xff] }
 0x207   : > { %2539 = vmatpush1.msra.mxu0 %v1986_v62  ;;  %2610 = vmatpush1.msra.mxu1 %v2114_v63  ;;  %v2179_v62 = vld [vmem:[%s10676_s8 + $0x648] sm:$0xff]  ;;  %v2050_v63 = vld [vmem:[%s10676_s8 + $0x240] sm:$0xff] }
 0x208   : > { %2540 = vmatprep.subr.mxu0 %v1983_v0  ;;  %2611 = vmatprep.subr.mxu1 %v2111_v1  ;;  %v2178_v0 = vld [vmem:[%s10676_s8 + $0x640] sm:$0xff]  ;;  %v2047_v1 = vld [vmem:[%s10676_s8 + $0x228] sm:$0xff] }
 0x209   : > { %2541 = vmatpush1.msra.mxu0 %v1982_v2  ;;  %2612 = vmatpush1.msra.mxu1 %v2110_v3  ;;  %v2175_v2 = vld [vmem:[%s10676_s8 + $0x628] sm:$0xff]  ;;  %v2046_v3 = vld [vmem:[%s10676_s8 + $0x220] sm:$0xff] }
 0x20a   : > { %2542 = vmatprep.subr.mxu0 %v1979_v4  ;;  %2613 = vmatprep.subr.mxu1 %v2107_v6  ;;  %v2174_v4 = vld [vmem:[%s10676_s8 + $0x620] sm:$0xff]  ;;  %v2043_v6 = vld [vmem:[%s10676_s8 + $0x208] sm:$0xff] }
 0x20b   : > { %2543 = vmatpush1.msra.mxu0 %v1978_v7  ;;  %2614 = vmatpush1.msra.mxu1 %v2106_v8  ;;  %v2171_v7 = vld [vmem:[%s10676_s8 + $0x608] sm:$0xff]  ;;  %v2042_v8 = vld [vmem:[%s10676_s8 + $0x200] sm:$0xff] }
 0x20c   : > { %2544 = vmatprep.subr.mxu0 %v2103_v9  ;;  %2615 = vmatprep.subr.mxu1 %v2231_v10  ;;  %v2170_v9 = vld [vmem:[%s10676_s8 + $0x600] sm:$0xff]  ;;  %v2295_v10 = vld [vmem:[%s10676_s8 + $0x9e8] sm:$0xff] }
 0x20d   : > { %2545 = vmatpush2.msra.mxu0 %v2102_v11  ;;  %2616 = vmatpush2.msra.mxu1 %v2230_v49  ;;  %v2423_v11 = vld [vmem:[%s10676_s8 + $0xde8] sm:$0xff] }
 0x20e   : > { %2546 = vmatprep.subr.mxu0 %v2099_v12  ;;  %2617 = vmatprep.subr.mxu1 %v2227_v13 }
 0x20f   : > { %2547 = vmatpush2.msra.mxu0 %v2098_v14  ;;  %2618 = vmatpush2.msra.mxu1 %v2226_v59 }
 0x210   : > { %2548 = vmatprep.subr.mxu0 %v2095_v15  ;;  %2619 = vmatprep.subr.mxu1 %v2223_v16 }
 0x211   : > { %2549 = vmatpush2.msra.mxu0 %v2094_v18  ;;  %2620 = vmatpush2.msra.mxu1 %v2222_v5  ;;  %v1171_v5 = vlaneseq }
 0x212   : > { %2550 = vmatprep.subr.mxu0 %v2091_v19  ;;  %2621 = vmatprep.subr.mxu1 %v2219_v20 }
 0x213   : > { %2551 = vmatpush2.msra.mxu0 %v2090_v21  ;;  %2622 = vmatpush2.msra.mxu1 %v2218_v17  ;;  %v7162_v21 = vshrl.u32 %v1171_v5, 7 }
 0x214   : > { %2552 = vmatprep.subr.mxu0 %v2087_v22  ;;  %2623 = vmatprep.subr.mxu1 %v2215_v23 }
 0x215   : > { %2553 = vmatpush2.msra.mxu0 %v2086_v24  ;;  %2624 = vmatpush2.msra.mxu1 %v2214_v25  ;;  %v7165_v23 = vsub.s32 1, %v7162_v21  ;;  %v7168_v24 = vsub.s32 0, %v7162_v21 }
 0x216   : > { %2554 = vmatprep.subr.mxu0 %v2083_v26  ;;  %2625 = vmatprep.subr.mxu1 %v2211_v27  ;;  %v7173_v27 = vld [vmem:[%s10724_s4] sm:$0xff] }
 0x217   : > { %2555 = vmatpush2.msra.mxu0 %v2082_v28  ;;  %2626 = vmatpush2.msra.mxu1 %v2210_v29  ;;  %10722 = vst [vmem:[#allocation3_spill] sm:$0xff] %v7165_v23  ;;  %10723 = vst [vmem:[#allocation4_spill] sm:$0xff] %v7168_v24  ;;  %v7176_v28 = vsub.s32 2, %v7162_v21  ;;  %v7179_v29 = vsub.s32 3, %v7162_v21 }
 0x218   : > { %2556 = vmatprep.subr.mxu0 %v2079_v30  ;;  %2627 = vmatprep.subr.mxu1 %v2207_v31 }
 0x219   : > { %2557 = vmatpush2.msra.mxu0 %v2078_v32  ;;  %2628 = vmatpush2.msra.mxu1 %v2206_v33  ;;  %10725 = vst [vmem:[#allocation5_spill] sm:$0xff] %v7176_v28  ;;  %10726 = vst [vmem:[#allocation6_spill] sm:$0xff] %v7179_v29  ;;  %v7183_v32 = vrot.slane %v7173_v27, %v7165_v23  ;;  %v7187_v33 = vrot.slane %v7173_v27, %v7168_v24 }
 0x21a   : > { %2558 = vmatprep.subr.mxu0 %v2075_v34  ;;  %2629 = vmatprep.subr.mxu1 %v2203_v35  ;;  %v7191_v34 = vrot.slane %v7173_v27, %v7176_v28  ;;  %v7195_v35 = vrot.slane %v7173_v27, %v7179_v29 }
 0x21b   : > { %2559 = vmatpush2.msra.mxu0 %v2074_v36  ;;  %2630 = vmatpush2.msra.mxu1 %v2202_v37 }
 0x21c   : > { %2560 = vmatprep.subr.mxu0 %v2071_v38  ;;  %2631 = vmatprep.subr.mxu1 %v2199_v39 }
 0x21d   : > { %2561 = vmatpush2.msra.mxu0 %v2070_v40  ;;  %2632 = vmatpush2.msra.mxu1 %v2198_v41 }
 0x21e   : > { %2562 = vmatprep.subr.mxu0 %v2067_v43  ;;  %2633 = vmatprep.subr.mxu1 %v2195_v44 }
 0x21f   : > { %2563 = vmatpush2.msra.mxu0 %v2066_v45  ;;  %2634 = vmatpush2.msra.mxu1 %v2194_v47 }
 0x220   : > { %2564 = vmatprep.subr.mxu0 %v2063_v48  ;;  %2635 = vmatprep.subr.mxu1 %v2191_v50 }
 0x221   : > { %2565 = vmatpush2.msra.mxu0 %v2062_v51  ;;  %2636 = vmatpush2.msra.mxu1 %v2190_v52 }
 0x222   : > { %2566 = vmatprep.subr.mxu0 %v2059_v53  ;;  %2637 = vmatprep.subr.mxu1 %v2187_v54 }
 0x223   : > { %2567 = vmatpush2.msra.mxu0 %v2058_v55  ;;  %2638 = vmatpush2.msra.mxu1 %v2186_v56 }
 0x224   : > { %2568 = vmatprep.subr.mxu0 %v2055_v57  ;;  %2639 = vmatprep.subr.mxu1 %v2183_v58 }
 0x225   : > { %2569 = vmatpush2.msra.mxu0 %v2054_v60  ;;  %2640 = vmatpush2.msra.mxu1 %v2182_v46 }
 0x226   : > { %2570 = vmatprep.subr.mxu0 %v2051_v61  ;;  %2641 = vmatprep.subr.mxu1 %v2179_v62 }
 0x227   : > { %2571 = vmatpush2.msra.mxu0 %v2050_v63  ;;  %2642 = vmatpush2.msra.mxu1 %v2178_v0 }
 0x228   : > { %2572 = vmatprep.subr.mxu0 %v2047_v1  ;;  %2643 = vmatprep.subr.mxu1 %v2175_v2 }
 0x229   : > { %2573 = vmatpush2.msra.mxu0 %v2046_v3  ;;  %2644 = vmatpush2.msra.mxu1 %v2174_v4 }
 0x22a   : > { %2574 = vmatprep.subr.mxu0 %v2043_v6  ;;  %2645 = vmatprep.subr.mxu1 %v2171_v7 }
 0x22b   : > { %2575 = vmatpush2.msra.mxu0 %v2042_v8  ;;  %2646 = vmatpush2.msra.mxu1 %v2170_v9 }
 0x22c   : > { %2654 = vmatprep.subr.mxu0 %v2295_v10  ;;  %2725 = vmatprep.subr.mxu1 %v2423_v11 }
 0x26e   : > { %v1277_v49 = vpop.f32.mrf.mxu0  ;;  %v1390_v12 = vpop.f32.mrf.mxu1 }
 0x26f   : > { %v1278_v43 = vadd.f32 %v1277_v49, %v7187_v33  ;;  %v1391_v48 = vadd.f32 %v1390_v12, %v7191_v34 }
 0x270   : > { %v1279_v13 = vpop.f32.mrf.mxu0  ;;  %v1392_v14 = vpop.f32.mrf.mxu1 }
 0x271   : > { %v1280_v40 = vadd.f32 %v1279_v13, %v7183_v32  ;;  %v1393_v50 = vadd.f32 %v1392_v14, %v7195_v35  ;;  %v1663_v55 = vmax.f32 %v1278_v43, 0.0  ;;  %v1665_v46 = vmax.f32 %v1391_v48, 0.0 }
 0x272   : > { %v10696_v13 = vsub.s32 5, %v7162_v21  ;;  %v10695_v14 = vsub.s32 7, %v7162_v21 }
 0x273   : > { %v1283_v59 = vpop.f32.mrf.mxu0  ;;  %v1396_v15 = vpop.f32.mrf.mxu1  ;;  %v1664_v53 = vmax.f32 %v1280_v40, 0.0  ;;  %v1666_v61 = vmax.f32 %v1393_v50, 0.0 }
 0x274   : > { %v1284_v37 = vadd.f32 %v1283_v59, %v7187_v33  ;;  %v1397_v41 = vadd.f32 %v1396_v15, %v7191_v34  ;;  %v7231_v50 = vrot.slane %v7173_v27, %v10695_v14 }
 0x275   : > { %v1285_v16 = vpop.f32.mrf.mxu0  ;;  %v1398_v18 = vpop.f32.mrf.mxu1 }
 0x276   : > { %v1286_v36 = vadd.f32 %v1285_v16, %v7183_v32  ;;  %v1399_v44 = vadd.f32 %v1398_v18, %v7195_v35  ;;  %v1671_v52 = vmax.f32 %v1284_v37, 0.0  ;;  %v1673_v54 = vmax.f32 %v1397_v41, 0.0 }
 0x277   : > { %v7224_v41 = vrot.slane %v7173_v27, %v10696_v13 }
 0x278   : > { %v1672_v51 = vmax.f32 %v1286_v36, 0.0  ;;  %v1674_v56 = vmax.f32 %v1399_v44, 0.0  ;;  %v1727_v63 = vmax.f32 %v1663_v55, %v1671_v52  ;;  %v1741_v6 = vmax.f32 %v1665_v46, %v1673_v54 }
 0x279   : > { %v1289_v19 = vpop.f32.mrf.mxu0  ;;  %v1402_v20 = vpop.f32.mrf.mxu1 }
 0x27a   : > { %v1734_v62 = vmax.f32 %v1664_v53, %v1672_v51  ;;  %v1290_v0 = vadd.f32 %v1289_v19, %v7187_v33  ;;  %v1748_v8 = vmax.f32 %v1666_v61, %v1674_v56  ;;  %v1403_v9 = vadd.f32 %v1402_v20, %v7191_v34 }
 0x27b   : > { %v1291_v17 = vpop.f32.mrf.mxu0  ;;  %v1404_v22 = vpop.f32.mrf.mxu1  ;;  %v1728_v59 = vrot.slane %v1727_v63, 4 }
 0x27c   : > { %v1292_v10 = vadd.f32 %v1291_v17, %v7183_v32  ;;  %v1735_v49 = vrot.slane %v1734_v62, 4  ;;  %v1405_v12 = vadd.f32 %v1404_v22, %v7195_v35  ;;  %v1679_v15 = vmax.f32 %v1290_v0, 0.0 }
 0x27d   : > { %v1681_v20 = vmax.f32 %v1403_v9, 0.0  ;;  %v7226_v43 = vmax.f32 %v1727_v63, %v1728_v59 }
 0x27e   : > { %v7219_v40 = vmax.f32 %v1734_v62, %v1735_v49  ;;  %v1682_v22 = vmax.f32 %v1405_v12, 0.0 }
 0x27f   : > { %v1295_v25 = vpop.f32.mrf.mxu0  ;;  %v1408_v26 = vpop.f32.mrf.mxu1 }
 0x280   : > { %v1296_v57 = vadd.f32 %v1295_v25, %v7187_v33  ;;  %v1409_v1 = vadd.f32 %v1408_v26, %v7191_v34  ;;  %v1742_v25 = vrot.slane %v1741_v6, 4  ;;  %v1737_v63 = vrot.slane %v7219_v40, 2 }
 0x281   : > { %v1297_v30 = vpop.f32.mrf.mxu0  ;;  %v1410_v31 = vpop.f32.mrf.mxu1 }
 0x282   : > { %v1298_v2 = vadd.f32 %v1297_v30, %v7183_v32  ;;  %v1411_v7 = vadd.f32 %v1410_v31, %v7195_v35  ;;  %v1687_v11 = vmax.f32 %v1296_v57, 0.0  ;;  %v1689_v16 = vmax.f32 %v1409_v1, 0.0 }
 0x283   : > { %v1749_v30 = vrot.slane %v1748_v8, 4  ;;  %v1680_v31 = vmax.f32 %v1292_v10, 0.0  ;;  %v7236_v55 = vmax.f32 %v1741_v6, %v1742_v25 }
 0x284   : > { %v1688_v18 = vmax.f32 %v1298_v2, 0.0  ;;  %v1690_v26 = vmax.f32 %v1411_v7, 0.0  ;;  %v1783_v17 = vmax.f32 %v1679_v15, %v1687_v11  ;;  %v1797_v44 = vmax.f32 %v1681_v20, %v1689_v16 }
 0x285   : > { %v1301_v38 = vpop.f32.mrf.mxu0  ;;  %v1414_v39 = vpop.f32.mrf.mxu1  ;;  %v7238_v56 = vmax.f32 %v1748_v8, %v1749_v30 }
 0x286   : > { %v1790_v48 = vmax.f32 %v1680_v31, %v1688_v18  ;;  %v1804_v51 = vmax.f32 %v1682_v22, %v1690_v26  ;;  %v1302_v52 = vadd.f32 %v1301_v38, %v7187_v33  ;;  %v1415_v53 = vadd.f32 %v1414_v39, %v7191_v34 }
 0x287   : > { %v7203_v45 = vpop.f32.mrf.mxu0  ;;  %v7205_v47 = vpop.f32.mrf.mxu1  ;;  %v1784_v57 = vrot.slane %v1783_v17, 4  ;;  %v1798_v1 = vrot.slane %v1797_v44, 4 }
 0x288   : > { %v1304_v0 = vadd.f32 %v7203_v45, %v7183_v32  ;;  %v1417_v2 = vadd.f32 %v7205_v47, %v7195_v35  ;;  %v1805_v8 = vrot.slane %v1804_v51, 4  ;;  %v1695_v9 = vmax.f32 %v1302_v52, 0.0 }
 0x289   : > { %v1697_v10 = vmax.f32 %v1415_v53, 0.0  ;;  %v1785_v49 = vmax.f32 %v1783_v17, %v1784_v57  ;;  %v1799_v22 = vmax.f32 %v1797_v44, %v1798_v1 }
 0x28a   : > { %v1698_v18 = vmax.f32 %v1417_v2, 0.0  ;;  %v1806_v31 = vmax.f32 %v1804_v51, %v1805_v8  ;;  %v1751_v51 = vrot.slane %v7238_v56, 2 }
 0x28b   : > { %v1307_v58 = vpop.f32.mrf.mxu0  ;;  %v1420_v60 = vpop.f32.mrf.mxu1  ;;  %v1786_v2 = vrot.slane %v1785_v49, 2 }
 0x28c   : > { %v1308_v54 = vadd.f32 %v1307_v58, %v7187_v33  ;;  %v1421_v38 = vadd.f32 %v1420_v60, %v7191_v34  ;;  %v1791_v58 = vrot.slane %v1790_v48, 4 }
 0x28d   : > { %v1309_v3 = vpop.f32.mrf.mxu0  ;;  %v1422_v4 = vpop.f32.mrf.mxu1 }
 0x28e   : > { %v1310_v46 = vadd.f32 %v1309_v3, %v7183_v32  ;;  %v1423_v39 = vadd.f32 %v1422_v4, %v7195_v35  ;;  %v1703_v11 = vmax.f32 %v1308_v54, 0.0  ;;  %v1696_v4 = vmax.f32 %v1304_v0, 0.0 }
 0x28f   : > { %v1705_v59 = vmax.f32 %v1421_v38, 0.0  ;;  %v1792_v47 = vmax.f32 %v1790_v48, %v1791_v58  ;;  %v1807_v38 = vrot.slane %v1806_v31, 2 }
 0x290   : > { %v1704_v12 = vmax.f32 %v1310_v46, 0.0  ;;  %v1706_v15 = vmax.f32 %v1423_v39, 0.0  ;;  %v1839_v17 = vmax.f32 %v1695_v9, %v1703_v11 }
 0x291   : > { %v1313_v5 = vpop.f32.mrf.mxu0  ;;  %v1426_v19 = vpop.f32.mrf.mxu1 }
 0x292   : > { %v1314_v45 = vadd.f32 %v1313_v5, %v7187_v33  ;;  %v1427_v25 = vadd.f32 %v1426_v19, %v7191_v34  ;;  %v1846_v52 = vmax.f32 %v1696_v4, %v1704_v12  ;;  %v1860_v19 = vmax.f32 %v1698_v18, %v1706_v15 }
 0x293   : > { %v1315_v36 = vpop.f32.mrf.mxu0  ;;  %v1428_v37 = vpop.f32.mrf.mxu1  ;;  %v1840_v39 = vrot.slane %v1839_v17, 4  ;;  %v1730_v12 = vrot.slane %v7226_v43, 2  ;;  %v1808_v18 = vmax.f32 %v1806_v31, %v1807_v38 }
 0x294   : > { %v1711_v53 = vmax.f32 %v1314_v45, 0.0  ;;  %v1429_v46 = vadd.f32 %v1428_v37, %v7195_v35  ;;  %v1713_v0 = vmax.f32 %v1427_v25, 0.0  ;;  %v1861_v9 = vrot.slane %v1860_v19, 4 }
 0x295   : > { %v1744_v45 = vrot.slane %v7236_v55, 2  ;;  %v1841_v25 = vmax.f32 %v1839_v17, %v1840_v39  ;;  %v1731_v14 = vmax.f32 %v7226_v43, %v1730_v12 }
 0x297   : > { %v1319_v61 = vpop.f32.mrf.mxu0  ;;  %v1432_v62 = vpop.f32.mrf.mxu1 }
 0x298   : > { %v1320_v6 = vadd.f32 %v1319_v61, %v7187_v33  ;;  %v1433_v60 = vadd.f32 %v1432_v62, %v7191_v34  ;;  %v1316_v33 = vadd.f32 %v1315_v36, %v7183_v32  ;;  %v1853_v34 = vmax.f32 %v1697_v10, %v1705_v59 }
 0x299   : > { %v1321_v7 = vpop.f32.mrf.mxu0  ;;  %v1434_v3 = vpop.f32.mrf.mxu1  ;;  %v1793_v62 = vrot.slane %v1792_v47, 2  ;;  %v1714_v10 = vmax.f32 %v1429_v46, 0.0 }
 0x29a   : > { %v1322_v16 = vadd.f32 %v1321_v7, %v7183_v32  ;;  %v1719_v26 = vmax.f32 %v1320_v6, 0.0  ;;  %v1435_v5 = vadd.f32 %v1434_v3, %v7195_v35  ;;  %v1721_v54 = vmax.f32 %v1433_v60, 0.0 }
 0x29b   : > { %v1712_v1 = vmax.f32 %v1316_v33, 0.0  ;;  %v1800_v6 = vrot.slane %v1799_v22, 2  ;;  %v1847_v7 = vrot.slane %v1846_v52, 4  ;;  %v1854_v37 = vrot.slane %v1853_v34, 4 }
 0x29c   : > { %v1720_v61 = vmax.f32 %v1322_v16, 0.0  ;;  %v1895_v32 = vmax.f32 %v1711_v53, %v1719_v26  ;;  %v1722_v58 = vmax.f32 %v1435_v5, 0.0  ;;  %v1909_v3 = vmax.f32 %v1713_v0, %v1721_v54 }
 0x29d   : > { %v7253_v30 = vpop.f32.mrf.mxu0  ;;  %v7255_v20 = vpop.f32.mrf.mxu1  ;;  %v1738_v60 = vmax.f32 %v7219_v40, %v1737_v63  ;;  %v1794_v16 = vmax.f32 %v1792_v47, %v1793_v62  ;;  %v1752_v33 = vmax.f32 %v7238_v56, %v1751_v51  ;;  %v1787_v5 = vmax.f32 %v1785_v49, %v1786_v2 }
 0x29e   : > { %v1902_v11 = vmax.f32 %v1712_v1, %v1720_v61  ;;  %v1896_v4 = vrot.slane %v1895_v32, 4  ;;  %v1916_v26 = vmax.f32 %v1714_v10, %v1722_v58  ;;  %v1848_v53 = vmax.f32 %v1846_v52, %v1847_v7 }
 0x29f   : > { %v7259_v57 = vpop.f32.mrf.mxu0  ;;  %v7261_v48 = vpop.f32.mrf.mxu1  ;;  %v1910_v54 = vrot.slane %v1909_v3, 4  ;;  %v1801_v0 = vmax.f32 %v1799_v22, %v1800_v6  ;;  %v1855_v40 = vmax.f32 %v1853_v34, %v1854_v37  ;;  %v1862_v63 = vmax.f32 %v1860_v19, %v1861_v9 }
 0x2a0   : > { %v1903_v1 = vrot.slane %v1902_v11, 4  ;;  %v1745_v47 = vmax.f32 %v7236_v55, %v1744_v45  ;;  %v1739_v31 = vrot.slane %v1738_v60, 1  ;;  %v1897_v17 = vmax.f32 %v1895_v32, %v1896_v4 }
 0x2a1   : > { %v7265_v36 = vpop.f32.mrf.mxu0  ;;  %v7267_v44 = vpop.f32.mrf.mxu1  ;;  %v1795_v49 = vrot.slane %v1794_v16, 1  ;;  %v1809_v52 = vrot.slane %v1808_v18, 1  ;;  %v1842_v51 = vrot.slane %v1841_v25, 2  ;;  %v1917_v38 = vrot.slane %v1916_v26, 4 }
 0x2a2   : > { %v1753_v39 = vrot.slane %v1752_v33, 1  ;;  %v1788_v22 = vrot.slane %v1787_v5, 1  ;;  %v1849_v34 = vrot.slane %v1848_v53, 2  ;;  %v1911_v19 = vmax.f32 %v1909_v3, %v1910_v54 }
 0x2a3   : > { %v7269_v8 = vpop.f32.mrf.mxu0  ;;  %v7271_v35 = vpop.f32.mrf.mxu1  ;;  %v1802_v6 = vrot.slane %v1801_v0, 1  ;;  %v1856_v43 = vrot.slane %v1855_v40, 2  ;;  %v1863_v7 = vrot.slane %v1862_v63, 2  ;;  %v1904_v55 = vmax.f32 %v1902_v11, %v1903_v1 }
 0x2a4   : > { %v1732_v37 = vrot.slane %v1731_v14, 1  ;;  %v1746_v32 = vrot.slane %v1745_v47, 1  ;;  %v1740_v9 = vmax.f32 %v1738_v60, %v1739_v31  ;;  %v1898_v10 = vrot.slane %v1897_v17, 2 }
 0x2a5   : > { %v7278_v59 = vpop.f32.mrf.mxu0  ;;  %v7280_v15 = vpop.f32.mrf.mxu1  ;;  %v1796_v4 = vmax.f32 %v1794_v16, %v1795_v49  ;;  %v1810_v13 = vmax.f32 %v1808_v18, %v1809_v52  ;;  %v1843_v42 = vmax.f32 %v1841_v25, %v1842_v51  ;;  %v1918_v29 = vmax.f32 %v1916_v26, %v1917_v38 }
 0x2a6   : > { %10727 = vst [vmem:[#allocation7_spill] sm:$0xff] %v7280_v15  ;;  %v1754_v28 = vmax.f32 %v1752_v33, %v1753_v39  ;;  %v1789_v3 = vmax.f32 %v1787_v5, %v1788_v22  ;;  %v1850_v54 = vmax.f32 %v1848_v53, %v1849_v34  ;;  %v1912_v23 = vrot.slane %v1911_v19, 2 }
 0x2a7   : > { %v7283_v46 = vpop.f32.mrf.mxu0  ;;  %v7285_v61 = vpop.f32.mrf.mxu1  ;;  %v1803_v11 = vmax.f32 %v1801_v0, %v1802_v6  ;;  %v1857_v1 = vmax.f32 %v1855_v40, %v1856_v43  ;;  %v1864_v60 = vmax.f32 %v1862_v63, %v1863_v7  ;;  %v1905_v31 = vrot.slane %v1904_v55, 2 }
 0x2a8   : > { %v1899_v15 = vmax.f32 %v1897_v17, %v1898_v10  ;;  %v1844_v25 = vrot.slane %v1843_v42, 1  ;;  %v1919_v26 = vrot.slane %v1918_v29, 2  ;;  %v1953_v33 = vsel %vm1951_vm3, %v1740_v9, %v1796_v4 }
 0x2a9   : > { %v7289_v62 = vpop.f32.mrf.mxu0  ;;  %v7291_v56 = vpop.f32.mrf.mxu1  ;;  %v1955_v5 = vsel %vm1951_vm3, %v1754_v28, %v1810_v13  ;;  %v1851_v53 = vrot.slane %v1850_v54, 1  ;;  %v1913_v0 = vmax.f32 %v1911_v19, %v1912_v23  ;;  %v1512_v40 = vadd.f32 %v7269_v8, %v7224_v41 }
 0x2aa   : > { %10728 = vst [vmem:[#allocation8_spill] sm:$0xff] %v7289_v62  ;;  %10729 = vst [vmem:[#allocation9_spill] sm:$0xff] %v7291_v56  ;;  %v1733_v62 = vmax.f32 %v1731_v14, %v1732_v37  ;;  %v1858_v17 = vrot.slane %v1857_v1, 1  ;;  %v1865_v49 = vrot.slane %v1864_v60, 1  ;;  %v1906_v52 = vmax.f32 %v1904_v55, %v1905_v31 }
 0x2ab   : > { %v1523_v58 = vpop.f32.mrf.mxu0  ;;  %v1636_v2 = vpop.f32.mrf.mxu1  ;;  %v1900_v38 = vrot.slane %v1899_v15, 1  ;;  %v1506_v39 = vadd.f32 %v7259_v57, %v7224_v41  ;;  %v1619_v23 = vadd.f32 %v7261_v48, %v7231_v50  ;;  %v1845_v13 = vmax.f32 %v1843_v42, %v1844_v25  ;;  %v2294_v25 = vld [vmem:[%s10676_s8 + $0x9e0] sm:$0xff] }
 0x2ac   : > { %v1952_v14 = vsel %vm1951_vm3, %v1733_v62, %v1789_v3  ;;  %v1524_v28 = vadd.f32 %v1523_v58, %v7224_v41  ;;  %v1920_v8 = vmax.f32 %v1918_v29, %v1919_v26  ;;  %v1625_v62 = vadd.f32 %v7271_v35, %v7231_v50 }
 0x2ad   : > { %v7293_v12 = vpop.f32.mrf.mxu0  ;;  %v7295_v45 = vpop.f32.mrf.mxu1  ;;  %v1637_v22 = vadd.f32 %v1636_v2, %v7231_v50  ;;  %v1914_v6 = vrot.slane %v1913_v0, 1  ;;  %v1676_v43 = vmax.f32 %v1512_v40, 0.0  ;;  %v1518_v57 = vadd.f32 %v7283_v46, %v7224_v41  ;;  %v2291_v40 = vld [vmem:[%s10676_s8 + $0x9c8] sm:$0xff] }
 0x2ae   : > { %10730 = vst [vmem:[#allocation10_spill] sm:$0xff] %v7293_v12  ;;  %v1747_v12 = vmax.f32 %v1745_v47, %v1746_v32  ;;  %v1852_v7 = vmax.f32 %v1850_v54, %v1851_v53  ;;  %v1859_v48 = vmax.f32 %v1857_v1, %v1858_v17  ;;  %v1631_v42 = vadd.f32 %v7285_v61, %v7231_v50 }
 0x2af   : > { %v7297_v24 = vpop.f32.mrf.mxu0  ;;  %v7299_v56 = vpop.f32.mrf.mxu1  ;;  %v1907_v29 = vrot.slane %v1906_v52, 1  ;;  %v1866_v58 = vmax.f32 %v1864_v60, %v1865_v49  ;;  %v1901_v55 = vmax.f32 %v1899_v15, %v1900_v38  ;;  %v1668_v35 = vmax.f32 %v1506_v39, 0.0 }
 0x2b0   : > { %v1954_v51 = vsel %vm1951_vm3, %v1747_v12, %v1803_v11  ;;  %v1670_v37 = vmax.f32 %v1619_v23, 0.0  ;;  %v1692_v2 = vmax.f32 %v1524_v28, 0.0  ;;  %v1678_v32 = vmax.f32 %v1625_v62, 0.0  ;;  %v2287_v28 = vld [vmem:[%s10676_s8 + $0x9a8] sm:$0xff] }
 0x2b1   : > { %v7301_v16 = vpop.f32.mrf.mxu0  ;;  %v7303_v18 = vpop.f32.mrf.mxu1  ;;  %v1694_v9 = vmax.f32 %v1637_v22, 0.0  ;;  %v1908_v10 = vmax.f32 %v1906_v52, %v1907_v29  ;;  %v1921_v12 = vrot.slane %v1920_v8, 1  ;;  %v1915_v11 = vmax.f32 %v1913_v0, %v1914_v6  ;;  %v2290_v52 = vld [vmem:[%s10676_s8 + $0x9c0] sm:$0xff] }
 0x2b2   : > { %v7329_v31 = vmax.f32 %v1668_v35, %v1676_v43  ;;  %v1684_v46 = vmax.f32 %v1518_v57, 0.0  ;;  %v1962_v54 = vsel %vm1960_vm4, %v1953_v33, %v1852_v7  ;;  %v1686_v1 = vmax.f32 %v1631_v42, 0.0  ;;  %v2286_v22 = vld [vmem:[%s10676_s8 + $0x9a0] sm:$0xff]  ;;  %v2415_v7 = vld [vmem:[%s10676_s8 + $0xda8] sm:$0xff] }
 0x2b3   : > { %v1535_v63 = vpop.f32.mrf.mxu0  ;;  %v7310_v47 = vpop.f32.mrf.mxu1  ;;  %v7333_v61 = vsel %vm1969_vm5, %v1962_v54, %v1908_v10  ;;  %v1922_v15 = vmax.f32 %v1920_v8, %v1921_v12  ;;  %v1961_v60 = vsel %vm1960_vm4, %v1952_v14, %v1845_v13  ;;  %v1530_v53 = vadd.f32 %v7297_v24, %v7224_v41  ;;  %v2418_v8 = vld [vmem:[%s10676_s8 + $0xdc0] sm:$0xff]  ;;  %v2279_v12 = vld [vmem:[%s10676_s8 + $0x968] sm:$0xff] }
 0x2b4   : > { %v7339_v26 = vmax.f32 %v1684_v46, %v1692_v2  ;;  %2576 = vmatprep.mubr.f32.mxu0 %v7333_v61  ;;  %v1964_v33 = vsel %vm1960_vm4, %v1955_v5, %v1866_v58  ;;  %v7346_v0 = vsel %vm1969_vm5, %v1961_v60, %v1901_v55  ;;  %v1832_v14 = vmax.f32 %v1686_v1, %v1694_v9  ;;  %v2422_v5 = vld [vmem:[%s10676_s8 + $0xde0] sm:$0xff]  ;;  %v2411_v9 = vld [vmem:[%s10676_s8 + $0xd88] sm:$0xff] }
 0x2b5   : > { %v7321_v34 = vpop.f32.mrf.mxu0  ;;  %v7323_v19 = vpop.f32.mrf.mxu1  ;;  %v1643_v17 = vadd.f32 %v7299_v56, %v7231_v50  ;;  %v7354_v49 = vsel %vm1969_vm5, %v1964_v33, %v1922_v15  ;;  %2577 = vmatmul.mubr.f32.vlgmr.msra.gmra.mxu0 %v7346_v0  ;;  %v1963_v24 = vsel %vm1960_vm4, %v1954_v51, %v1859_v48  ;;  %v2419_v51 = vld [vmem:[%s10676_s8 + $0xdc8] sm:$0xff]  ;;  %v1536_v23 = vadd.f32 %v1535_v63, %v7224_v41  ;;  %v2414_v58 = vld [vmem:[%s10676_s8 + $0xda0] sm:$0xff] }
 0x2b6   : > { %2647 = vmatprep.mubr.f32.mxu1 %v7354_v49  ;;  %v7370_v56 = vsel %vm1969_vm5, %v1963_v24, %v1915_v11  ;;  %2655 = vmatpush1.msra.mxu0 %v2294_v25  ;;  %v1776_v13 = vmax.f32 %v1670_v37, %v1678_v32  ;;  %v1649_v62 = vadd.f32 %v7310_v47, %v7231_v50  ;;  %v1763_v63 = vrot.slane %v7329_v31, 4  ;;  %v2283_v47 = vld [vmem:[%s10676_s8 + $0x988] sm:$0xff]  ;;  %v2282_v55 = vld [vmem:[%s10676_s8 + $0x980] sm:$0xff] }
 0x2b7   : > { %v1541_v4 = vpop.f32.mrf.mxu0  ;;  %v1654_v3 = vpop.f32.mrf.mxu1  ;;  %2648 = vmatmul.mubr.f32.vlgmr.msra.gmra.mxu1 %v7370_v56  ;;  %2656 = vmatprep.subr.mxu0 %v2291_v40  ;;  %v1819_v6 = vrot.slane %v7339_v26, 4  ;;  %v1700_v43 = vmax.f32 %v1530_v53, 0.0  ;;  %v1708_v57 = vmax.f32 %v1536_v23, 0.0  ;;  %v1833_v48 = vrot.slane %v1832_v14, 4  ;;  %v2278_v54 = vld [vmem:[%s10676_s8 + $0x960] sm:$0xff]  ;;  %v2407_v15 = vld [vmem:[%s10676_s8 + $0xd68] sm:$0xff] }
 0x2b8   : > { %2726 = vmatpush1.msra.mxu1 %v2422_v5  ;;  %2657 = vmatpush1.msra.mxu0 %v2290_v52  ;;  %v1702_v42 = vmax.f32 %v1643_v17, 0.0  ;;  %v1710_v29 = vmax.f32 %v1649_v62, 0.0  ;;  %v1542_v35 = vadd.f32 %v1541_v4, %v7224_v41  ;;  %v1655_v10 = vadd.f32 %v1654_v3, %v7231_v50  ;;  %v2410_v4 = vld [vmem:[%s10676_s8 + $0xd80] sm:$0xff]  ;;  %v2275_v60 = vld [vmem:[%s10676_s8 + $0x948] sm:$0xff] }
 0x2b9   : > { %v7364_v38 = vpop.f32.mrf.mxu0  ;;  %v7366_v39 = vpop.f32.mrf.mxu1  ;;  %2727 = vmatprep.subr.mxu1 %v2419_v51  ;;  %2658 = vmatprep.subr.mxu0 %v2287_v28  ;;  %v1874_v32 = vmax.f32 %v1700_v43, %v1708_v57  ;;  %v1777_v11 = vrot.slane %v1776_v13, 4  ;;  %v7417_v1 = vmax.f32 %v7329_v31, %v1763_v63  ;;  %v1820_v33 = vmax.f32 %v7339_v26, %v1819_v6  ;;  %v2406_v24 = vld [vmem:[%s10676_s8 + $0xd60] sm:$0xff]  ;;  %v2271_v51 = vld [vmem:[%s10676_s8 + $0x928] sm:$0xff] }
 0x2ba   : > { %2728 = vmatpush1.msra.mxu1 %v2418_v8  ;;  %2659 = vmatpush1.msra.mxu0 %v2286_v22  ;;  %v1888_v46 = vmax.f32 %v1702_v42, %v1710_v29  ;;  %v7428_v40 = vmax.f32 %v1832_v14, %v1833_v48  ;;  %v1716_v17 = vmax.f32 %v1542_v35, 0.0  ;;  %v2274_v5 = vld [vmem:[%s10676_s8 + $0x940] sm:$0xff]  ;;  %v1189_v22 = vsub.s32 4, %v7162_v21  ;;  %v2267_v43 = vld [vmem:[%s10676_s8 + $0x908] sm:$0xff] }
 0x2bb   : > { %v1547_v37 = vpop.f32.mrf.mxu0  ;;  %v1660_v2 = vpop.f32.mrf.mxu1  ;;  %2729 = vmatprep.subr.mxu1 %v2415_v7  ;;  %2660 = vmatprep.subr.mxu0 %v2283_v47  ;;  %v1875_v3 = vrot.slane %v1874_v32, 4  ;;  %v1778_v23 = vmax.f32 %v1776_v13, %v1777_v11  ;;  %v2402_v8 = vld [vmem:[%s10676_s8 + $0xd40] sm:$0xff]  ;;  %v2399_v13 = vld [vmem:[%s10676_s8 + $0xd28] sm:$0xff]  ;;  %v1197_v57 = vsub.s32 6, %v7162_v21  ;;  %v1765_v7 = vrot.slane %v7417_v1, 2 }
 0x2bc   : > { %2730 = vmatpush1.msra.mxu1 %v2414_v58  ;;  %2661 = vmatpush1.msra.mxu0 %v2282_v55  ;;  %v1548_v25 = vadd.f32 %v1547_v37, %v7224_v41  ;;  %v1661_v53 = vadd.f32 %v1660_v2, %v7231_v50  ;;  %v1889_v31 = vrot.slane %v1888_v46, 4  ;;  %v1718_v41 = vmax.f32 %v1655_v10, 0.0  ;;  %v2403_v50 = vld [vmem:[%s10676_s8 + $0xd48] sm:$0xff]  ;;  %v2270_v62 = vld [vmem:[%s10676_s8 + $0x920] sm:$0xff] }
 0x2bd   : > { %2731 = vmatprep.subr.mxu1 %v2411_v9  ;;  %2662 = vmatprep.subr.mxu0 %v2279_v12  ;;  %v1876_v52 = vmax.f32 %v1874_v32, %v1875_v3  ;;  %v1821_v47 = vrot.slane %v1820_v33, 2  ;;  %v2398_v48 = vld [vmem:[%s10676_s8 + $0xd20] sm:$0xff]  ;;  %v1835_v29 = vrot.slane %v7428_v40, 2  ;;  %v2395_v37 = vld [vmem:[%s10676_s8 + $0xd08] sm:$0xff]  ;;  %v1779_v32 = vrot.slane %v1778_v23, 2 }
 0x2be   : > { %2732 = vmatpush1.msra.mxu1 %v2410_v4  ;;  %2663 = vmatpush1.msra.mxu0 %v2278_v54  ;;  %v1724_v26 = vmax.f32 %v1548_v25, 0.0  ;;  %v1726_v14 = vmax.f32 %v1661_v53, 0.0  ;;  %v1890_v28 = vmax.f32 %v1888_v46, %v1889_v31  ;;  %v2266_v42 = vld [vmem:[%s10676_s8 + $0x900] sm:$0xff]  ;;  %v2263_v2 = vld [vmem:[%s10676_s8 + $0x8e8] sm:$0xff]  ;;  %v7479_v11 = vrot.slane %v7173_v27, %v1189_v22 }
 0x2bf   : > { %2733 = vmatprep.subr.mxu1 %v2407_v15  ;;  %2664 = vmatprep.subr.mxu0 %v2275_v60  ;;  %v1877_v58 = vrot.slane %v1876_v52, 2  ;;  %v2394_v10 = vld [vmem:[%s10676_s8 + $0xd00] sm:$0xff]  ;;  %v2391_v54 = vld [vmem:[%s10676_s8 + $0xce8] sm:$0xff]  ;;  %v7490_v15 = vrot.slane %v7173_v27, %v1197_v57  ;;  %v7493_v60 = vmax.f32 %v7417_v1, %v1765_v7  ;;  %v1822_v25 = vmax.f32 %v1820_v33, %v1821_v47 }
 0x2c0   : > { %2734 = vmatpush1.msra.mxu1 %v2406_v24  ;;  %2665 = vmatpush1.msra.mxu0 %v2274_v5  ;;  %v1930_v63 = vmax.f32 %v1716_v17, %v1724_v26  ;;  %v1944_v6 = vmax.f32 %v1718_v41, %v1726_v14  ;;  %v1891_v9 = vrot.slane %v1890_v28, 2  ;;  %v2262_v12 = vld [vmem:[%s10676_s8 + $0x8e0] sm:$0xff]  ;;  %v2259_v3 = vld [vmem:[%s10676_s8 + $0x8c8] sm:$0xff]  ;;  %v1836_v17 = vmax.f32 %v7428_v40, %v1835_v29 }
 0x2c1   : > { %2735 = vmatprep.subr.mxu1 %v2403_v50  ;;  %2666 = vmatprep.subr.mxu0 %v2271_v51  ;;  %v2390_v53 = vld [vmem:[%s10676_s8 + $0xce0] sm:$0xff]  ;;  %v1878_v24 = vmax.f32 %v1876_v52, %v1877_v58  ;;  %v2387_v1 = vld [vmem:[%s10676_s8 + $0xcc8] sm:$0xff]  ;;  %v1780_v41 = vmax.f32 %v1778_v23, %v1779_v32 }
 0x2c2   : > { %2736 = vmatpush1.msra.mxu1 %v2402_v8  ;;  %v1931_v55 = vrot.slane %v1930_v63, 4  ;;  %v1945_v35 = vrot.slane %v1944_v6, 4  ;;  %2667 = vmatpush1.msra.mxu0 %v2270_v62  ;;  %v2258_v31 = vld [vmem:[%s10676_s8 + $0x8c0] sm:$0xff]  ;;  %v2255_v33 = vld [vmem:[%s10676_s8 + $0x8a8] sm:$0xff]  ;;  %v1892_v50 = vmax.f32 %v1890_v28, %v1891_v9  ;;  %v7522_v28 = vadd.f32 %v7253_v30, %v7479_v11 }
 0x2c3   : > { %2737 = vmatprep.subr.mxu1 %v2399_v13  ;;  %2668 = vmatprep.subr.mxu0 %v2267_v43  ;;  %v2386_v40 = vld [vmem:[%s10676_s8 + $0xcc0] sm:$0xff]  ;;  %v2383_v51 = vld [vmem:[%s10676_s8 + $0xca8] sm:$0xff]  ;;  %v1823_v8 = vrot.slane %v1822_v25, 1  ;;  %v1767_v13 = vrot.slane %v7493_v60, 1  ;;  %v1837_v43 = vrot.slane %v1836_v17, 1  ;;  %v1879_v30 = vrot.slane %v1878_v24, 1 }
 0x2c4   : > { %v1932_v46 = vmax.f32 %v1930_v63, %v1931_v55  ;;  %v1946_v4 = vmax.f32 %v1944_v6, %v1945_v35  ;;  %2738 = vmatpush1.msra.mxu1 %v2398_v48  ;;  %2669 = vmatpush1.msra.mxu0 %v2266_v42  ;;  %v2254_v52 = vld [vmem:[%s10676_s8 + $0x8a0] sm:$0xff]  ;;  %v2251_v23 = vld [vmem:[%s10676_s8 + $0x888] sm:$0xff]  ;;  %v7532_v6 = vadd.f32 %v7255_v20, %v7490_v15  ;;  %v1781_v20 = vrot.slane %v1780_v41, 1 }
 0x2c5   : > { %2739 = vmatprep.subr.mxu1 %v2395_v37  ;;  %2670 = vmatprep.subr.mxu0 %v2263_v2  ;;  %v2382_v62 = vld [vmem:[%s10676_s8 + $0xca0] sm:$0xff]  ;;  %v2379_v7 = vld [vmem:[%s10676_s8 + $0xc88] sm:$0xff]  ;;  %v7543_v48 = vadd.f32 %v7265_v36, %v7479_v11  ;;  %v1893_v42 = vrot.slane %v1892_v50, 1  ;;  %v7553_v35 = vadd.f32 %v7267_v44, %v7490_v15  ;;  %v7557_v36 = vadd.f32 %v7278_v59, %v7479_v11  ;;  %v10733_v59 = vld [vmem:[#allocation9_spill] sm:$0xff] }
 0x2c6   : > { %v1933_v5 = vrot.slane %v1932_v46, 2  ;;  %v1947_v27 = vrot.slane %v1946_v4, 2  ;;  %2740 = vmatpush1.msra.mxu1 %v2394_v10  ;;  %2671 = vmatpush1.msra.mxu0 %v2262_v12  ;;  %v2250_v63 = vld [vmem:[%s10676_s8 + $0x880] sm:$0xff]  ;;  %v2247_v47 = vld [vmem:[%s10676_s8 + $0x868] sm:$0xff] }
 0x2c7   : > { %2741 = vmatprep.subr.mxu1 %v2391_v54  ;;  %2672 = vmatprep.subr.mxu0 %v2259_v3  ;;  %v2378_v29 = vld [vmem:[%s10676_s8 + $0xc80] sm:$0xff]  ;;  %v2375_v32 = vld [vmem:[%s10676_s8 + $0xc68] sm:$0xff] }
 0x2c8   : > { %v1934_v26 = vmax.f32 %v1932_v46, %v1933_v5  ;;  %v1948_v14 = vmax.f32 %v1946_v4, %v1947_v27  ;;  %2742 = vmatpush1.msra.mxu1 %v2390_v53  ;;  %2673 = vmatpush1.msra.mxu0 %v2258_v31  ;;  %v2246_v58 = vld [vmem:[%s10676_s8 + $0x860] sm:$0xff]  ;;  %v2243_v9 = vld [vmem:[%s10676_s8 + $0x848] sm:$0xff]  ;;  %v7575_v46 = vadd.f32 %v10733_v59, %v7490_v15  ;;  %v1667_v59 = vmax.f32 %v7522_v28, 0.0 }
 0x2c9   : > { %2743 = vmatprep.subr.mxu1 %v2387_v1  ;;  %2674 = vmatprep.subr.mxu0 %v2255_v33  ;;  %v10731_v37 = vld [vmem:[#allocation7_spill] sm:$0xff]  ;;  %v10732_v10 = vld [vmem:[#allocation8_spill] sm:$0xff]  ;;  %v1824_v4 = vmax.f32 %v1822_v25, %v1823_v8  ;;  %v1768_v53 = vmax.f32 %v7493_v60, %v1767_v13  ;;  %v1838_v31 = vmax.f32 %v1836_v17, %v1837_v43 }
 0x2ca   : > { %2744 = vmatpush1.msra.mxu1 %v2386_v40  ;;  %2675 = vmatpush1.msra.mxu0 %v2254_v52  ;;  %v1935_v55 = vrot.slane %v1934_v26, 1  ;;  %v7561_v2 = vadd.f32 %v10731_v37, %v7490_v15  ;;  %v1949_v44 = vrot.slane %v1948_v14, 1  ;;  %v7571_v12 = vadd.f32 %v10732_v10, %v7479_v11  ;;  %v2374_v54 = vld [vmem:[%s10676_s8 + $0xc60] sm:$0xff]  ;;  %v2371_v5 = vld [vmem:[%s10676_s8 + $0xc48] sm:$0xff]  ;;  %v10734_v52 = vld [vmem:[#allocation10_spill] sm:$0xff] }
 0x2cb   : > { %2745 = vmatprep.subr.mxu1 %v2383_v51  ;;  %2676 = vmatprep.subr.mxu0 %v2251_v23  ;;  %v2242_v3 = vld [vmem:[%s10676_s8 + $0x840] sm:$0xff]  ;;  %v2239_v25 = vld [vmem:[%s10676_s8 + $0x828] sm:$0xff]  ;;  %v1880_v27 = vmax.f32 %v1878_v24, %v1879_v30  ;;  %v1782_v1 = vmax.f32 %v1780_v41, %v1781_v20  ;;  %v1894_v40 = vmax.f32 %v1892_v50, %v1893_v42  ;;  %v1693_v42 = vmax.f32 %v7575_v46, 0.0 }
 0x2cc   : > { %2746 = vmatpush1.msra.mxu1 %v2382_v62  ;;  %2677 = vmatpush1.msra.mxu0 %v2250_v63  ;;  %v2370_v33 = vld [vmem:[%s10676_s8 + $0xc40] sm:$0xff]  ;;  %v1936_v17 = vmax.f32 %v1934_v26, %v1935_v55  ;;  %v7598_v51 = vadd.f32 %v10734_v52, %v7479_v11  ;;  %v7602_v24 = vadd.f32 %v7301_v16, %v7479_v11  ;;  %v2367_v41 = vld [vmem:[%s10676_s8 + $0xc28] sm:$0xff]  ;;  %v1691_v30 = vmax.f32 %v7571_v12, 0.0 }
 0x2cd   : > { %2747 = vmatprep.subr.mxu1 %v2379_v7  ;;  %2678 = vmatprep.subr.mxu0 %v2247_v47  ;;  %v2238_v60 = vld [vmem:[%s10676_s8 + $0x820] sm:$0xff]  ;;  %v2235_v23 = vld [vmem:[%s10676_s8 + $0x808] sm:$0xff]  ;;  %v1950_v26 = vmax.f32 %v1948_v14, %v1949_v44  ;;  %v7612_v50 = vadd.f32 %v7303_v18, %v7490_v15  ;;  %v7616_v8 = vadd.f32 %v7364_v38, %v7479_v11  ;;  %v1675_v37 = vmax.f32 %v7543_v48, 0.0 }
 0x2ce   : > { %2748 = vmatpush1.msra.mxu1 %v2378_v29  ;;  %2679 = vmatpush1.msra.mxu0 %v2246_v58  ;;  %v2366_v16 = vld [vmem:[%s10676_s8 + $0xc20] sm:$0xff]  ;;  %v1957_v14 = vsel %vm1951_vm3, %v1768_v53, %v1824_v4  ;;  %v7627_v18 = vadd.f32 %v7366_v39, %v7490_v15  ;;  %v2363_v38 = vld [vmem:[%s10676_s8 + $0xc08] sm:$0xff]  ;;  %v1959_v43 = vsel %vm1951_vm3, %v1782_v1, %v1838_v31  ;;  %v1685_v48 = vmax.f32 %v7561_v2, 0.0 }
 0x2cf   : > { %2749 = vmatprep.subr.mxu1 %v2375_v32  ;;  %2680 = vmatprep.subr.mxu0 %v2243_v9  ;;  %v2234_v62 = vld [vmem:[%s10676_s8 + $0x800] sm:$0xff]  ;;  %v2359_v63 = vld [vmem:[%s10676_s8 + $0xbe8] sm:$0xff]  ;;  %v1966_v13 = vsel %vm1960_vm4, %v1957_v14, %v1880_v27  ;;  %v1641_v39 = vadd.f32 %v7295_v45, %v7490_v15  ;;  %v1968_v20 = vsel %vm1960_vm4, %v1959_v43, %v1894_v40  ;;  %v1677_v32 = vmax.f32 %v7553_v35, 0.0 }
 0x2d0   : > { %2750 = vmatpush1.msra.mxu1 %v2374_v54  ;;  %2681 = vmatpush1.msra.mxu0 %v2242_v3  ;;  %v2362_v7 = vld [vmem:[%s10676_s8 + $0xc00] sm:$0xff]  ;;  %v7644_v47 = vsel %vm1969_vm5, %v1966_v13, %v1936_v17  ;;  %v1540_v29 = vadd.f32 %v7321_v34, %v7479_v11  ;;  %v1653_v58 = vadd.f32 %v7323_v19, %v7490_v15  ;;  %v2487_v45 = vld [vmem:[%s10676_s8 + $0xfe8] sm:$0xff]  ;;  %v1707_v9 = vmax.f32 %v7602_v24, 0.0 }
 0x2d1   : > { %2751 = vmatprep.subr.mxu1 %v2371_v5  ;;  %2682 = vmatprep.subr.mxu0 %v2239_v25  ;;  %v7656_v55 = vsel %vm1969_vm5, %v1968_v20, %v1950_v26  ;;  %v1709_v34 = vmax.f32 %v7612_v50, 0.0  ;;  %v2358_v19 = vld [vmem:[%s10676_s8 + $0xbe0] sm:$0xff]  ;;  %v1683_v15 = vmax.f32 %v7557_v36, 0.0  ;;  %v1723_v35 = vmax.f32 %v7616_v8, 0.0  ;;  %v2355_v10 = vld [vmem:[%s10676_s8 + $0xbc8] sm:$0xff] }
 0x2d2   : > { %2752 = vmatpush1.msra.mxu1 %v2370_v33  ;;  %2683 = vmatpush1.msra.mxu0 %v2238_v60  ;;  %v2486_v11 = vld [vmem:[%s10676_s8 + $0xfe0] sm:$0xff]  ;;  %v1725_v44 = vmax.f32 %v7627_v18, 0.0  ;;  %v2483_v12 = vld [vmem:[%s10676_s8 + $0xfc8] sm:$0xff]  ;;  %v1669_v36 = vmax.f32 %v7532_v6, 0.0  ;;  %v1699_v2 = vmax.f32 %v7598_v51, 0.0  ;;  %v1701_v46 = vmax.f32 %v1641_v39, 0.0 }
 0x2d3   : > { %2753 = vmatprep.subr.mxu1 %v2367_v41  ;;  %2684 = vmatprep.subr.mxu0 %v2235_v23  ;;  %v2354_v4 = vld [vmem:[%s10676_s8 + $0xbc0] sm:$0xff]  ;;  %v1811_v3 = vmax.f32 %v1683_v15, %v1691_v30  ;;  %v1825_v53 = vmax.f32 %v1685_v48, %v1693_v42  ;;  %v1715_v31 = vmax.f32 %v1540_v29, 0.0  ;;  %v1717_v28 = vmax.f32 %v1653_v58, 0.0  ;;  %v2351_v6 = vld [vmem:[%s10676_s8 + $0xba8] sm:$0xff] }
 0x2d4   : > { %2754 = vmatpush1.msra.mxu1 %v2366_v16  ;;  %2685 = vmatpush1.msra.mxu0 %v2234_v62  ;;  %v2482_v54 = vld [vmem:[%s10676_s8 + $0xfc0] sm:$0xff]  ;;  %v2479_v5 = vld [vmem:[%s10676_s8 + $0xfa8] sm:$0xff]  ;;  %v1755_v25 = vmax.f32 %v1667_v59, %v1675_v37  ;;  %v1867_v27 = vmax.f32 %v1699_v2, %v1707_v9  ;;  %v1881_v1 = vmax.f32 %v1701_v46, %v1709_v34 }
 0x2d5   : > { %2755 = vmatprep.subr.mxu1 %v2363_v38  ;;  %2686 = vmatprep.subr.mxu0 %v2359_v63  ;;  %v2350_v33 = vld [vmem:[%s10676_s8 + $0xba0] sm:$0xff]  ;;  %v1769_v17 = vmax.f32 %v1669_v36, %v1677_v32  ;;  %v1923_v40 = vmax.f32 %v1715_v31, %v1723_v35  ;;  %v1937_v52 = vmax.f32 %v1717_v28, %v1725_v44  ;;  %v2347_v51 = vld [vmem:[%s10676_s8 + $0xb88] sm:$0xff]  ;;  %v1812_v26 = vrot.slane %v1811_v3, 4 }
 0x2d6   : > { %2756 = vmatpush1.msra.mxu1 %v2362_v7  ;;  %2718 = vmatprep.mubr.f32.mxu0 %v7644_v47  ;;  %v2478_v60 = vld [vmem:[%s10676_s8 + $0xfa0] sm:$0xff]  ;;  %v2475_v24 = vld [vmem:[%s10676_s8 + $0xf88] sm:$0xff]  ;;  %v1826_v50 = vrot.slane %v1825_v53, 4  ;;  %v1756_v62 = vrot.slane %v1755_v25, 4  ;;  %v1868_v14 = vrot.slane %v1867_v27, 4  ;;  %v1882_v18 = vrot.slane %v1881_v1, 4 }
 0x2d7   : > { %2757 = vmatprep.subr.mxu1 %v2487_v45  ;;  %2789 = vmatprep.mubr.f32.mxu1 %v7656_v55  ;;  %v2346_v41 = vld [vmem:[%s10676_s8 + $0xb80] sm:$0xff]  ;;  %v2343_v8 = vld [vmem:[%s10676_s8 + $0xb68] sm:$0xff]  ;;  %v1770_v13 = vrot.slane %v1769_v17, 4  ;;  %v1924_v43 = vrot.slane %v1923_v40, 4  ;;  %v1938_v30 = vrot.slane %v1937_v52, 4  ;;  %v1813_v29 = vmax.f32 %v1811_v3, %v1812_v26 }
 0x2d8   : > { %2687 = vmatpush2.msra.mxu0 %v2358_v19  ;;  %2758 = vmatpush2.msra.mxu1 %v2486_v11  ;;  %v2474_v23 = vld [vmem:[%s10676_s8 + $0xf80] sm:$0xff]  ;;  %v2471_v16 = vld [vmem:[%s10676_s8 + $0xf68] sm:$0xff]  ;;  %v1827_v58 = vmax.f32 %v1825_v53, %v1826_v50  ;;  %v1757_v32 = vmax.f32 %v1755_v25, %v1756_v62  ;;  %v1869_v9 = vmax.f32 %v1867_v27, %v1868_v14 }
 0x2d9   : > { %2688 = vmatprep.subr.mxu0 %v2355_v10  ;;  %2759 = vmatprep.subr.mxu1 %v2483_v12  ;;  %v2342_v38 = vld [vmem:[%s10676_s8 + $0xb60] sm:$0xff]  ;;  %v2339_v39 = vld [vmem:[%s10676_s8 + $0xb48] sm:$0xff]  ;;  %v1883_v34 = vmax.f32 %v1881_v1, %v1882_v18  ;;  %v1771_v15 = vmax.f32 %v1769_v17, %v1770_v13  ;;  %v1925_v48 = vmax.f32 %v1923_v40, %v1924_v43  ;;  %v1814_v36 = vrot.slane %v1813_v29, 2 }
 0x2da   : > { %2689 = vmatpush2.msra.mxu0 %v2354_v4  ;;  %2760 = vmatpush2.msra.mxu1 %v2482_v54  ;;  %v2470_v63 = vld [vmem:[%s10676_s8 + $0xf60] sm:$0xff]  ;;  %v2467_v7 = vld [vmem:[%s10676_s8 + $0xf48] sm:$0xff]  ;;  %v1939_v35 = vmax.f32 %v1937_v52, %v1938_v30  ;;  %v1828_v2 = vrot.slane %v1827_v58, 2  ;;  %v1758_v54 = vrot.slane %v1757_v32, 2  ;;  %v1870_v3 = vrot.slane %v1869_v9, 2 }
 0x2db   : > { %2690 = vmatprep.subr.mxu0 %v2351_v6  ;;  %2761 = vmatprep.subr.mxu1 %v2479_v5  ;;  %v2338_v20 = vld [vmem:[%s10676_s8 + $0xb40] sm:$0xff]  ;;  %v2335_v45 = vld [vmem:[%s10676_s8 + $0xb28] sm:$0xff]  ;;  %v1884_v53 = vrot.slane %v1883_v34, 2  ;;  %v1772_v6 = vrot.slane %v1771_v15, 2  ;;  %v1926_v5 = vrot.slane %v1925_v48, 2  ;;  %v1815_v17 = vmax.f32 %v1813_v29, %v1814_v36 }
 0x2dc   : > { %2691 = vmatpush2.msra.mxu0 %v2350_v33  ;;  %2762 = vmatpush2.msra.mxu1 %v2478_v60  ;;  %v2466_v42 = vld [vmem:[%s10676_s8 + $0xf40] sm:$0xff]  ;;  %v2463_v37 = vld [vmem:[%s10676_s8 + $0xf28] sm:$0xff]  ;;  %v1940_v25 = vrot.slane %v1939_v35, 2  ;;  %v1829_v40 = vmax.f32 %v1827_v58, %v1828_v2 }
 0x2dd   : > { %2692 = vmatprep.subr.mxu0 %v2347_v51  ;;  %2763 = vmatprep.subr.mxu1 %v2475_v24  ;;  %v2334_v19 = vld [vmem:[%s10676_s8 + $0xb20] sm:$0xff]  ;;  %v2331_v44 = vld [vmem:[%s10676_s8 + $0xb08] sm:$0xff]  ;;  %v1759_v24 = vmax.f32 %v1757_v32, %v1758_v54  ;;  %v1816_v13 = vrot.slane %v1815_v17, 1 }
 0x2de   : > { %2693 = vmatpush2.msra.mxu0 %v2346_v41  ;;  %2764 = vmatpush2.msra.mxu1 %v2474_v23  ;;  %v2462_v11 = vld [vmem:[%s10676_s8 + $0xf20] sm:$0xff]  ;;  %v2459_v10 = vld [vmem:[%s10676_s8 + $0xf08] sm:$0xff]  ;;  %v1871_v41 = vmax.f32 %v1869_v9, %v1870_v3  ;;  %v1885_v23 = vmax.f32 %v1883_v34, %v1884_v53  ;;  %v1941_v62 = vmax.f32 %v1939_v35, %v1940_v25  ;;  %v1830_v43 = vrot.slane %v1829_v40, 1 }
 0x2df   : > { %2694 = vmatprep.subr.mxu0 %v2343_v8  ;;  %2765 = vmatprep.subr.mxu1 %v2471_v16  ;;  %v2330_v12 = vld [vmem:[%s10676_s8 + $0xb00] sm:$0xff]  ;;  %v2327_v46 = vld [vmem:[%s10676_s8 + $0xae8] sm:$0xff]  ;;  %v1773_v8 = vmax.f32 %v1771_v15, %v1772_v6  ;;  %v1927_v16 = vmax.f32 %v1925_v48, %v1926_v5  ;;  %v1817_v15 = vmax.f32 %v1815_v17, %v1816_v13  ;;  %v2152_v13 = vld [vmem:[%s10676_s8 + $0x570] sm:$0xff] }
 0x2e0   : > { %2695 = vmatpush2.msra.mxu0 %v2342_v38  ;;  %2766 = vmatpush2.msra.mxu1 %v2470_v63  ;;  %v2458_v59 = vld [vmem:[%s10676_s8 + $0xf00] sm:$0xff]  ;;  %v2455_v4 = vld [vmem:[%s10676_s8 + $0xee8] sm:$0xff]  ;;  %v1942_v32 = vrot.slane %v1941_v62, 1  ;;  %v1831_v48 = vmax.f32 %v1829_v40, %v1830_v43  ;;  %v2040_v40 = vld [vmem:[%s10676_s8 + $0x1f0] sm:$0xff] }
 0x2e1   : > { %2696 = vmatprep.subr.mxu0 %v2339_v39  ;;  %2767 = vmatprep.subr.mxu1 %v2467_v7  ;;  %v2326_v31 = vld [vmem:[%s10676_s8 + $0xae0] sm:$0xff]  ;;  %v2323_v27 = vld [vmem:[%s10676_s8 + $0xac8] sm:$0xff]  ;;  %v1760_v7 = vrot.slane %v1759_v24, 1  ;;  %v2021_v43 = vld [vmem:[%s10676_s8 + $0x158] sm:$0xff] }
 0x2e2   : > { %2697 = vmatpush2.msra.mxu0 %v2338_v20  ;;  %2768 = vmatpush2.msra.mxu1 %v2466_v42  ;;  %v2454_v28 = vld [vmem:[%s10676_s8 + $0xee0] sm:$0xff]  ;;  %v2451_v1 = vld [vmem:[%s10676_s8 + $0xec8] sm:$0xff]  ;;  %v1872_v20 = vrot.slane %v1871_v41, 1  ;;  %v1886_v42 = vrot.slane %v1885_v23, 1  ;;  %v1943_v53 = vmax.f32 %v1941_v62, %v1942_v32  ;;  %v2028_v62 = vld [vmem:[%s10676_s8 + $0x190] sm:$0xff] }
 0x2e3   : > { %2698 = vmatprep.subr.mxu0 %v2335_v45  ;;  %2769 = vmatprep.subr.mxu1 %v2463_v37  ;;  %v2322_v33 = vld [vmem:[%s10676_s8 + $0xac0] sm:$0xff]  ;;  %v2319_v52 = vld [vmem:[%s10676_s8 + $0xaa8] sm:$0xff]  ;;  %v1774_v45 = vrot.slane %v1773_v8, 1  ;;  %v1928_v37 = vrot.slane %v1927_v16, 1  ;;  %v2012_v32 = vld [vmem:[%s10676_s8 + $0x110] sm:$0xff] }
 0x2e4   : > { %2699 = vmatpush2.msra.mxu0 %v2334_v19  ;;  %2770 = vmatpush2.msra.mxu1 %v2462_v11  ;;  %v2450_v60 = vld [vmem:[%s10676_s8 + $0xec0] sm:$0xff]  ;;  %v2447_v51 = vld [vmem:[%s10676_s8 + $0xea8] sm:$0xff] }
 0x2e5   : > { %2700 = vmatprep.subr.mxu0 %v2331_v44  ;;  %2771 = vmatprep.subr.mxu1 %v2459_v10  ;;  %v2318_v26 = vld [vmem:[%s10676_s8 + $0xaa0] sm:$0xff]  ;;  %v2315_v14 = vld [vmem:[%s10676_s8 + $0xa88] sm:$0xff]  ;;  %v1761_v10 = vmax.f32 %v1759_v24, %v1760_v7  ;;  %v1929_v3 = vmax.f32 %v1927_v16, %v1928_v37  ;;  %v2165_v24 = vld [vmem:[%s10676_s8 + $0x5d8] sm:$0xff] }
 0x2e6   : > { %2701 = vmatpush2.msra.mxu0 %v2330_v12  ;;  %2772 = vmatpush2.msra.mxu1 %v2458_v59  ;;  %v2446_v50 = vld [vmem:[%s10676_s8 + $0xea0] sm:$0xff]  ;;  %v2443_v18 = vld [vmem:[%s10676_s8 + $0xe88] sm:$0xff]  ;;  %v1873_v12 = vmax.f32 %v1871_v41, %v1872_v20  ;;  %v1887_v59 = vmax.f32 %v1885_v23, %v1886_v42  ;;  %v2036_v41 = vld [vmem:[%s10676_s8 + $0x1d0] sm:$0xff] }
 0x2e7   : > { %2702 = vmatprep.subr.mxu0 %v2327_v46  ;;  %2773 = vmatprep.subr.mxu1 %v2455_v4  ;;  %v2314_v38 = vld [vmem:[%s10676_s8 + $0xa80] sm:$0xff]  ;;  %v2311_v30 = vld [vmem:[%s10676_s8 + $0xa68] sm:$0xff]  ;;  %v1775_v46 = vmax.f32 %v1773_v8, %v1774_v45  ;;  %v1956_v6 = vsel %vm1951_vm3, %v1761_v10, %v1817_v15  ;;  %v2164_v23 = vld [vmem:[%s10676_s8 + $0x5d0] sm:$0xff] }
 0x2e8   : > { %2703 = vmatpush2.msra.mxu0 %v2326_v31  ;;  %2774 = vmatpush2.msra.mxu1 %v2454_v28  ;;  %v2442_v63 = vld [vmem:[%s10676_s8 + $0xe80] sm:$0xff]  ;;  %v2439_v39 = vld [vmem:[%s10676_s8 + $0xe68] sm:$0xff]  ;;  %v1965_v25 = vsel %vm1960_vm4, %v1956_v6, %v1873_v12  ;;  %v2160_v8 = vld [vmem:[%s10676_s8 + $0x5b0] sm:$0xff] }
 0x2e9   : > { %2704 = vmatprep.subr.mxu0 %v2323_v27  ;;  %2775 = vmatprep.subr.mxu1 %v2451_v1  ;;  %v2310_v29 = vld [vmem:[%s10676_s8 + $0xa60] sm:$0xff]  ;;  %v2307_v9 = vld [vmem:[%s10676_s8 + $0xa48] sm:$0xff]  ;;  %v1958_v5 = vsel %vm1951_vm3, %v1775_v46, %v1831_v48  ;;  %v2041_v1 = vld [vmem:[%s10676_s8 + $0x1f8] sm:$0xff] }
 0x2ea   : > { %2705 = vmatpush2.msra.mxu0 %v2322_v33  ;;  %2776 = vmatpush2.msra.mxu1 %v2450_v60  ;;  %v2438_v58 = vld [vmem:[%s10676_s8 + $0xe60] sm:$0xff]  ;;  %v2435_v34 = vld [vmem:[%s10676_s8 + $0xe48] sm:$0xff]  ;;  %v1967_v27 = vsel %vm1960_vm4, %v1958_v5, %v1887_v59  ;;  %v2169_v33 = vld [vmem:[%s10676_s8 + $0x5f8] sm:$0xff]  ;;  %v7868_v60 = vsel %vm1969_vm5, %v1965_v25, %v1929_v3 }
 0x2eb   : > { %2706 = vmatprep.subr.mxu0 %v2319_v52  ;;  %2777 = vmatprep.subr.mxu1 %v2447_v51  ;;  %v2306_v19 = vld [vmem:[%s10676_s8 + $0xa40] sm:$0xff]  ;;  %v2303_v35 = vld [vmem:[%s10676_s8 + $0xa28] sm:$0xff]  ;;  %v7871_v17 = vsel %vm1969_vm5, %v1967_v27, %v1943_v53  ;;  %v2168_v52 = vld [vmem:[%s10676_s8 + $0x5f0] sm:$0xff] }
 0x2ec   : > { %2707 = vmatpush2.msra.mxu0 %v2318_v26  ;;  %2778 = vmatpush2.msra.mxu1 %v2446_v50  ;;  %v2434_v11 = vld [vmem:[%s10676_s8 + $0xe40] sm:$0xff]  ;;  %v2431_v44 = vld [vmem:[%s10676_s8 + $0xe28] sm:$0xff]  ;;  %v2037_v51 = vld [vmem:[%s10676_s8 + $0x1d8] sm:$0xff] }
 0x2ed   : > { %2708 = vmatprep.subr.mxu0 %v2315_v14  ;;  %2779 = vmatprep.subr.mxu1 %v2443_v18  ;;  %v2302_v36 = vld [vmem:[%s10676_s8 + $0xa20] sm:$0xff]  ;;  %v2299_v4 = vld [vmem:[%s10676_s8 + $0xa08] sm:$0xff]  ;;  %v2033_v26 = vld [vmem:[%s10676_s8 + $0x1b8] sm:$0xff] }
 0x2ee   : > { %2709 = vmatpush2.msra.mxu0 %v2314_v38  ;;  %2780 = vmatpush2.msra.mxu1 %v2442_v63  ;;  %v2430_v2 = vld [vmem:[%s10676_s8 + $0xe20] sm:$0xff]  ;;  %v2427_v54 = vld [vmem:[%s10676_s8 + $0xe08] sm:$0xff]  ;;  %v2161_v50 = vld [vmem:[%s10676_s8 + $0x5b8] sm:$0xff] }
 0x2ef   : > { %2710 = vmatprep.subr.mxu0 %v2311_v30  ;;  %2781 = vmatprep.subr.mxu1 %v2439_v39  ;;  %v2298_v31 = vld [vmem:[%s10676_s8 + $0xa00] sm:$0xff]  ;;  %v2157_v16 = vld [vmem:[%s10676_s8 + $0x598] sm:$0xff]  ;;  %v2156_v14 = vld [vmem:[%s10676_s8 + $0x590] sm:$0xff] }
 0x2f0   : > { %2711 = vmatpush2.msra.mxu0 %v2310_v29  ;;  %2782 = vmatpush2.msra.mxu1 %v2438_v58  ;;  %v2426_v28 = vld [vmem:[%s10676_s8 + $0xe00] sm:$0xff]  ;;  %v2025_v18 = vld [vmem:[%s10676_s8 + $0x178] sm:$0xff]  ;;  %v2024_v63 = vld [vmem:[%s10676_s8 + $0x170] sm:$0xff] }
 0x2f1   : > { %2712 = vmatprep.subr.mxu0 %v2307_v9  ;;  %2783 = vmatprep.subr.mxu1 %v2435_v34  ;;  %v2153_v38 = vld [vmem:[%s10676_s8 + $0x578] sm:$0xff]  ;;  %v2020_v39 = vld [vmem:[%s10676_s8 + $0x150] sm:$0xff] }
 0x2f2   : > { %2713 = vmatpush2.msra.mxu0 %v2306_v19  ;;  %2784 = vmatpush2.msra.mxu1 %v2434_v11  ;;  %v2149_v30 = vld [vmem:[%s10676_s8 + $0x558] sm:$0xff]  ;;  %v2148_v7 = vld [vmem:[%s10676_s8 + $0x550] sm:$0xff] }
 0x2f3   : > { %2714 = vmatprep.subr.mxu0 %v2303_v35  ;;  %2785 = vmatprep.subr.mxu1 %v2431_v44  ;;  %v2017_v20 = vld [vmem:[%s10676_s8 + $0x138] sm:$0xff]  ;;  %v2016_v29 = vld [vmem:[%s10676_s8 + $0x130] sm:$0xff] }
 0x2f4   : > { %2715 = vmatpush2.msra.mxu0 %v2302_v36  ;;  %2786 = vmatpush2.msra.mxu1 %v2430_v2  ;;  %v2145_v42 = vld [vmem:[%s10676_s8 + $0x538] sm:$0xff]  ;;  %v2144_v58 = vld [vmem:[%s10676_s8 + $0x530] sm:$0xff] }
 0x2f5   : > { %2716 = vmatprep.subr.mxu0 %v2299_v4  ;;  %2787 = vmatprep.subr.mxu1 %v2427_v54  ;;  %v2013_v45 = vld [vmem:[%s10676_s8 + $0x118] sm:$0xff]  ;;  %v2140_v9 = vld [vmem:[%s10676_s8 + $0x510] sm:$0xff] }
 0x2f6   : > { %2717 = vmatpush2.msra.mxu0 %v2298_v31  ;;  %2788 = vmatpush2.msra.mxu1 %v2426_v28  ;;  %v2141_v37 = vld [vmem:[%s10676_s8 + $0x518] sm:$0xff]  ;;  %v2008_v11 = vld [vmem:[%s10676_s8 + $0xf0] sm:$0xff] }
 0x2f7   : > { %2719 = vmatmul.mubr.f32.vlgmr.msra.gmra.mxu0 %v7868_v60  ;;  %2790 = vmatmul.mubr.f32.vlgmr.msra.gmra.mxu1 %v7871_v17  ;;  %v2009_v34 = vld [vmem:[%s10676_s8 + $0xf8] sm:$0xff]  ;;  %v2136_v15 = vld [vmem:[%s10676_s8 + $0x4f0] sm:$0xff] }
 0x2f8   : > { %2796 = vmatprep.subr.mxu0 %v2041_v1  ;;  %2867 = vmatprep.subr.mxu1 %v2169_v33  ;;  %v2137_v19 = vld [vmem:[%s10676_s8 + $0x4f8] sm:$0xff]  ;;  %v2004_v44 = vld [vmem:[%s10676_s8 + $0xd0] sm:$0xff] }
 0x2f9   : > { %2797 = vmatpush1.msra.mxu0 %v2040_v40  ;;  %2860 = vmatprep.mubr.f32.mxu0 %v7333_v61  ;;  %v2032_v61 = vld [vmem:[%s10676_s8 + $0x1b0] sm:$0xff]  ;;  %v2005_v48 = vld [vmem:[%s10676_s8 + $0xd8] sm:$0xff] }
 0x2fa   : > { %2868 = vmatpush1.msra.mxu1 %v2168_v52  ;;  %2931 = vmatprep.mubr.f32.mxu1 %v7354_v49  ;;  %v2029_v49 = vld [vmem:[%s10676_s8 + $0x198] sm:$0xff]  ;;  %v2132_v10 = vld [vmem:[%s10676_s8 + $0x4d0] sm:$0xff] }
 0x2fb   : > { %2798 = vmatprep.subr.mxu0 %v2037_v51  ;;  %2869 = vmatprep.subr.mxu1 %v2165_v24  ;;  %v2133_v35 = vld [vmem:[%s10676_s8 + $0x4d8] sm:$0xff]  ;;  %v2000_v36 = vld [vmem:[%s10676_s8 + $0xb0] sm:$0xff] }
 0x2fc   : > { %2799 = vmatpush1.msra.mxu0 %v2036_v41  ;;  %2870 = vmatpush1.msra.mxu1 %v2164_v23  ;;  %v2001_v12 = vld [vmem:[%s10676_s8 + $0xb8] sm:$0xff]  ;;  %v2128_v2 = vld [vmem:[%s10676_s8 + $0x4b0] sm:$0xff] }
 0x2fd   : > { %2800 = vmatprep.subr.mxu0 %v2033_v26  ;;  %2871 = vmatprep.subr.mxu1 %v2161_v50  ;;  %v2129_v59 = vld [vmem:[%s10676_s8 + $0x4b8] sm:$0xff]  ;;  %v1996_v54 = vld [vmem:[%s10676_s8 + $0x90] sm:$0xff] }
 0x2fe   : > { %2801 = vmatpush1.msra.mxu0 %v2032_v61  ;;  %2872 = vmatpush1.msra.mxu1 %v2160_v8  ;;  %v1997_v46 = vld [vmem:[%s10676_s8 + $0x98] sm:$0xff]  ;;  %v2124_v3 = vld [vmem:[%s10676_s8 + $0x490] sm:$0xff] }
 0x2ff   : > { %2802 = vmatprep.subr.mxu0 %v2029_v49  ;;  %2873 = vmatprep.subr.mxu1 %v2157_v16  ;;  %v2125_v4 = vld [vmem:[%s10676_s8 + $0x498] sm:$0xff]  ;;  %v1992_v28 = vld [vmem:[%s10676_s8 + $0x70] sm:$0xff] }
 0x300   : > { %2803 = vmatpush1.msra.mxu0 %v2028_v62  ;;  %2874 = vmatpush1.msra.mxu1 %v2156_v14  ;;  %v1993_v53 = vld [vmem:[%s10676_s8 + $0x78] sm:$0xff]  ;;  %v2120_v6 = vld [vmem:[%s10676_s8 + $0x470] sm:$0xff] }
 0x301   : > { %2804 = vmatprep.subr.mxu0 %v2025_v18  ;;  %2875 = vmatprep.subr.mxu1 %v2153_v38  ;;  %v2121_v31 = vld [vmem:[%s10676_s8 + $0x478] sm:$0xff]  ;;  %v1988_v27 = vld [vmem:[%s10676_s8 + $0x50] sm:$0xff] }
 0x302   : > { %2805 = vmatpush1.msra.mxu0 %v2024_v63  ;;  %2876 = vmatpush1.msra.mxu1 %v2152_v13  ;;  %v1989_v5 = vld [vmem:[%s10676_s8 + $0x58] sm:$0xff]  ;;  %v2116_v1 = vld [vmem:[%s10676_s8 + $0x450] sm:$0xff] }
 0x303   : > { %2806 = vmatprep.subr.mxu0 %v2021_v43  ;;  %2877 = vmatprep.subr.mxu1 %v2149_v30  ;;  %v2117_v25 = vld [vmem:[%s10676_s8 + $0x458] sm:$0xff]  ;;  %v1984_v52 = vld [vmem:[%s10676_s8 + $0x30] sm:$0xff] }
 0x304   : > { %2807 = vmatpush1.msra.mxu0 %v2020_v39  ;;  %2878 = vmatpush1.msra.mxu1 %v2148_v7  ;;  %v1985_v33 = vld [vmem:[%s10676_s8 + $0x38] sm:$0xff]  ;;  %v2112_v51 = vld [vmem:[%s10676_s8 + $0x430] sm:$0xff] }
 0x305   : > { %2808 = vmatprep.subr.mxu0 %v2017_v20  ;;  %2879 = vmatprep.subr.mxu1 %v2145_v42  ;;  %v2113_v40 = vld [vmem:[%s10676_s8 + $0x438] sm:$0xff]  ;;  %v1980_v23 = vld [vmem:[%s10676_s8 + $0x10] sm:$0xff] }
 0x306   : > { %2809 = vmatpush1.msra.mxu0 %v2016_v29  ;;  %2880 = vmatpush1.msra.mxu1 %v2144_v58  ;;  %v1981_v24 = vld [vmem:[%s10676_s8 + $0x18] sm:$0xff]  ;;  %v2108_v26 = vld [vmem:[%s10676_s8 + $0x410] sm:$0xff] }
 0x307   : > { %2810 = vmatprep.subr.mxu0 %v2013_v45  ;;  %2881 = vmatprep.subr.mxu1 %v2141_v37  ;;  %v2109_v41 = vld [vmem:[%s10676_s8 + $0x418] sm:$0xff]  ;;  %v2104_v8 = vld [vmem:[%s10676_s8 + $0x3f0] sm:$0xff] }
 0x308   : > { %2811 = vmatpush1.msra.mxu0 %v2012_v32  ;;  %2882 = vmatpush1.msra.mxu1 %v2140_v9  ;;  %v2105_v50 = vld [vmem:[%s10676_s8 + $0x3f8] sm:$0xff]  ;;  %v2232_v49 = vld [vmem:[%s10676_s8 + $0x7f0] sm:$0xff] }
 0x309   : > { %2812 = vmatprep.subr.mxu0 %v2009_v34  ;;  %2883 = vmatprep.subr.mxu1 %v2137_v19  ;;  %v2233_v61 = vld [vmem:[%s10676_s8 + $0x7f8] sm:$0xff]  ;;  %v2100_v14 = vld [vmem:[%s10676_s8 + $0x3d0] sm:$0xff] }
 0x30a   : > { %2813 = vmatpush1.msra.mxu0 %v2008_v11  ;;  %2884 = vmatpush1.msra.mxu1 %v2136_v15  ;;  %v2101_v16 = vld [vmem:[%s10676_s8 + $0x3d8] sm:$0xff]  ;;  %v2228_v18 = vld [vmem:[%s10676_s8 + $0x7d0] sm:$0xff] }
 0x30b   : > { %2814 = vmatprep.subr.mxu0 %v2005_v48  ;;  %2885 = vmatprep.subr.mxu1 %v2133_v35  ;;  %v2229_v62 = vld [vmem:[%s10676_s8 + $0x7d8] sm:$0xff]  ;;  %v2096_v13 = vld [vmem:[%s10676_s8 + $0x3b0] sm:$0xff] }
 0x30c   : > { %2815 = vmatpush1.msra.mxu0 %v2004_v44  ;;  %2886 = vmatpush1.msra.mxu1 %v2132_v10  ;;  %v2097_v38 = vld [vmem:[%s10676_s8 + $0x3b8] sm:$0xff]  ;;  %v2224_v43 = vld [vmem:[%s10676_s8 + $0x7b0] sm:$0xff] }
 0x30d   : > { %2816 = vmatprep.subr.mxu0 %v2001_v12  ;;  %2887 = vmatprep.subr.mxu1 %v2129_v59  ;;  %v2225_v63 = vld [vmem:[%s10676_s8 + $0x7b8] sm:$0xff]  ;;  %v2092_v7 = vld [vmem:[%s10676_s8 + $0x390] sm:$0xff] }
 0x30e   : > { %2817 = vmatpush1.msra.mxu0 %v2000_v36  ;;  %2888 = vmatpush1.msra.mxu1 %v2128_v2  ;;  %v2093_v30 = vld [vmem:[%s10676_s8 + $0x398] sm:$0xff]  ;;  %v2220_v20 = vld [vmem:[%s10676_s8 + $0x790] sm:$0xff] }
 0x30f   : > { %2818 = vmatprep.subr.mxu0 %v1997_v46  ;;  %2889 = vmatprep.subr.mxu1 %v2125_v4  ;;  %v2221_v39 = vld [vmem:[%s10676_s8 + $0x798] sm:$0xff]  ;;  %v2088_v58 = vld [vmem:[%s10676_s8 + $0x370] sm:$0xff] }
 0x310   : > { %2819 = vmatpush1.msra.mxu0 %v1996_v54  ;;  %2890 = vmatpush1.msra.mxu1 %v2124_v3  ;;  %v2089_v42 = vld [vmem:[%s10676_s8 + $0x378] sm:$0xff]  ;;  %v2216_v45 = vld [vmem:[%s10676_s8 + $0x770] sm:$0xff] }
 0x311   : > { %2820 = vmatprep.subr.mxu0 %v1993_v53  ;;  %2891 = vmatprep.subr.mxu1 %v2121_v31  ;;  %v2217_v29 = vld [vmem:[%s10676_s8 + $0x778] sm:$0xff]  ;;  %v2084_v9 = vld [vmem:[%s10676_s8 + $0x350] sm:$0xff] }
 0x312   : > { %2821 = vmatpush1.msra.mxu0 %v1992_v28  ;;  %2892 = vmatpush1.msra.mxu1 %v2120_v6  ;;  %v2085_v37 = vld [vmem:[%s10676_s8 + $0x358] sm:$0xff]  ;;  %v2212_v34 = vld [vmem:[%s10676_s8 + $0x750] sm:$0xff] }
 0x313   : > { %2822 = vmatprep.subr.mxu0 %v1989_v5  ;;  %2893 = vmatprep.subr.mxu1 %v2117_v25  ;;  %v2213_v32 = vld [vmem:[%s10676_s8 + $0x758] sm:$0xff]  ;;  %v2080_v15 = vld [vmem:[%s10676_s8 + $0x330] sm:$0xff] }
 0x314   : > { %2823 = vmatpush1.msra.mxu0 %v1988_v27  ;;  %2894 = vmatpush1.msra.mxu1 %v2116_v1  ;;  %v2081_v19 = vld [vmem:[%s10676_s8 + $0x338] sm:$0xff]  ;;  %v2208_v48 = vld [vmem:[%s10676_s8 + $0x730] sm:$0xff] }
 0x315   : > { %2824 = vmatprep.subr.mxu0 %v1985_v33  ;;  %2895 = vmatprep.subr.mxu1 %v2113_v40  ;;  %v2209_v11 = vld [vmem:[%s10676_s8 + $0x738] sm:$0xff]  ;;  %v2076_v10 = vld [vmem:[%s10676_s8 + $0x310] sm:$0xff] }
 0x316   : > { %2825 = vmatpush1.msra.mxu0 %v1984_v52  ;;  %2896 = vmatpush1.msra.mxu1 %v2112_v51  ;;  %v2077_v35 = vld [vmem:[%s10676_s8 + $0x318] sm:$0xff]  ;;  %v2204_v12 = vld [vmem:[%s10676_s8 + $0x710] sm:$0xff] }
 0x317   : > { %2826 = vmatprep.subr.mxu0 %v1981_v24  ;;  %2897 = vmatprep.subr.mxu1 %v2109_v41  ;;  %v2205_v44 = vld [vmem:[%s10676_s8 + $0x718] sm:$0xff]  ;;  %v2072_v2 = vld [vmem:[%s10676_s8 + $0x2f0] sm:$0xff] }
 0x318   : > { %2827 = vmatpush1.msra.mxu0 %v1980_v23  ;;  %2898 = vmatpush1.msra.mxu1 %v2108_v26  ;;  %v2073_v59 = vld [vmem:[%s10676_s8 + $0x2f8] sm:$0xff]  ;;  %v2200_v46 = vld [vmem:[%s10676_s8 + $0x6f0] sm:$0xff] }
 0x319   : > { %2828 = vmatprep.subr.mxu0 %v2105_v50  ;;  %2899 = vmatprep.subr.mxu1 %v2233_v61  ;;  %v2201_v36 = vld [vmem:[%s10676_s8 + $0x6f8] sm:$0xff]  ;;  %v2068_v3 = vld [vmem:[%s10676_s8 + $0x2d0] sm:$0xff] }
 0x31a   : > { %2829 = vmatpush2.msra.mxu0 %v2104_v8  ;;  %2900 = vmatpush2.msra.mxu1 %v2232_v49  ;;  %v2069_v4 = vld [vmem:[%s10676_s8 + $0x2d8] sm:$0xff]  ;;  %v2196_v53 = vld [vmem:[%s10676_s8 + $0x6d0] sm:$0xff] }
 0x31b   : > { %2830 = vmatprep.subr.mxu0 %v2101_v16  ;;  %2901 = vmatprep.subr.mxu1 %v2229_v62  ;;  %v2197_v54 = vld [vmem:[%s10676_s8 + $0x6d8] sm:$0xff]  ;;  %v2064_v6 = vld [vmem:[%s10676_s8 + $0x2b0] sm:$0xff] }
 0x31c   : > { %2831 = vmatpush2.msra.mxu0 %v2100_v14  ;;  %2902 = vmatpush2.msra.mxu1 %v2228_v18  ;;  %v2065_v31 = vld [vmem:[%s10676_s8 + $0x2b8] sm:$0xff]  ;;  %v2192_v5 = vld [vmem:[%s10676_s8 + $0x6b0] sm:$0xff] }
 0x31d   : > { %2832 = vmatprep.subr.mxu0 %v2097_v38  ;;  %2903 = vmatprep.subr.mxu1 %v2225_v63  ;;  %v2193_v28 = vld [vmem:[%s10676_s8 + $0x6b8] sm:$0xff]  ;;  %v2060_v1 = vld [vmem:[%s10676_s8 + $0x290] sm:$0xff] }
 0x31e   : > { %2833 = vmatpush2.msra.mxu0 %v2096_v13  ;;  %2904 = vmatpush2.msra.mxu1 %v2224_v43  ;;  %v2061_v25 = vld [vmem:[%s10676_s8 + $0x298] sm:$0xff]  ;;  %v2188_v33 = vld [vmem:[%s10676_s8 + $0x690] sm:$0xff] }
 0x31f   : > { %2834 = vmatprep.subr.mxu0 %v2093_v30  ;;  %2905 = vmatprep.subr.mxu1 %v2221_v39  ;;  %v2189_v27 = vld [vmem:[%s10676_s8 + $0x698] sm:$0xff]  ;;  %v2056_v51 = vld [vmem:[%s10676_s8 + $0x270] sm:$0xff] }
 0x320   : > { %2835 = vmatpush2.msra.mxu0 %v2092_v7  ;;  %2906 = vmatpush2.msra.mxu1 %v2220_v20  ;;  %v2057_v40 = vld [vmem:[%s10676_s8 + $0x278] sm:$0xff]  ;;  %v2184_v24 = vld [vmem:[%s10676_s8 + $0x670] sm:$0xff] }
 0x321   : > { %2836 = vmatprep.subr.mxu0 %v2089_v42  ;;  %2907 = vmatprep.subr.mxu1 %v2217_v29  ;;  %v2185_v52 = vld [vmem:[%s10676_s8 + $0x678] sm:$0xff]  ;;  %v2052_v26 = vld [vmem:[%s10676_s8 + $0x250] sm:$0xff] }
 0x322   : > { %2837 = vmatpush2.msra.mxu0 %v2088_v58  ;;  %2908 = vmatpush2.msra.mxu1 %v2216_v45  ;;  %v2053_v41 = vld [vmem:[%s10676_s8 + $0x258] sm:$0xff]  ;;  %v2180_v50 = vld [vmem:[%s10676_s8 + $0x650] sm:$0xff] }
 0x323   : > { %2838 = vmatprep.subr.mxu0 %v2085_v37  ;;  %2909 = vmatprep.subr.mxu1 %v2213_v32  ;;  %v2181_v23 = vld [vmem:[%s10676_s8 + $0x658] sm:$0xff]  ;;  %v2048_v49 = vld [vmem:[%s10676_s8 + $0x230] sm:$0xff] }
 0x324   : > { %2839 = vmatpush2.msra.mxu0 %v2084_v9  ;;  %2910 = vmatpush2.msra.mxu1 %v2212_v34  ;;  %v2049_v61 = vld [vmem:[%s10676_s8 + $0x238] sm:$0xff]  ;;  %v2176_v16 = vld [vmem:[%s10676_s8 + $0x630] sm:$0xff] }
 0x325   : > { %2840 = vmatprep.subr.mxu0 %v2081_v19  ;;  %2911 = vmatprep.subr.mxu1 %v2209_v11  ;;  %v2177_v8 = vld [vmem:[%s10676_s8 + $0x638] sm:$0xff]  ;;  %v2044_v18 = vld [vmem:[%s10676_s8 + $0x210] sm:$0xff] }
 0x326   : > { %2841 = vmatpush2.msra.mxu0 %v2080_v15  ;;  %2912 = vmatpush2.msra.mxu1 %v2208_v48  ;;  %v2045_v62 = vld [vmem:[%s10676_s8 + $0x218] sm:$0xff]  ;;  %v2172_v38 = vld [vmem:[%s10676_s8 + $0x610] sm:$0xff] }
 0x327   : > { %2842 = vmatprep.subr.mxu0 %v2077_v35  ;;  %2913 = vmatprep.subr.mxu1 %v2205_v44  ;;  %v2173_v14 = vld [vmem:[%s10676_s8 + $0x618] sm:$0xff]  ;;  %v2296_v43 = vld [vmem:[%s10676_s8 + $0x9f0] sm:$0xff] }
 0x328   : > { %2843 = vmatpush2.msra.mxu0 %v2076_v10  ;;  %2914 = vmatpush2.msra.mxu1 %v2204_v12  ;;  %v2297_v63 = vld [vmem:[%s10676_s8 + $0x9f8] sm:$0xff]  ;;  %v2424_v30 = vld [vmem:[%s10676_s8 + $0xdf0] sm:$0xff] }
 0x329   : > { %2844 = vmatprep.subr.mxu0 %v2073_v59  ;;  %2915 = vmatprep.subr.mxu1 %v2201_v36  ;;  %v2425_v13 = vld [vmem:[%s10676_s8 + $0xdf8] sm:$0xff]  ;;  %v2416_v29 = vld [vmem:[%s10676_s8 + $0xdb0] sm:$0xff] }
 0x32a   : > { %2845 = vmatpush2.msra.mxu0 %v2072_v2  ;;  %2916 = vmatpush2.msra.mxu1 %v2200_v46  ;;  %v2293_v39 = vld [vmem:[%s10676_s8 + $0x9d8] sm:$0xff]  ;;  %v2284_v45 = vld [vmem:[%s10676_s8 + $0x990] sm:$0xff] }
 0x32b   : > { %2846 = vmatprep.subr.mxu0 %v2069_v4  ;;  %2917 = vmatprep.subr.mxu1 %v2197_v54  ;;  %v2421_v7 = vld [vmem:[%s10676_s8 + $0xdd8] sm:$0xff]  ;;  %v2412_v37 = vld [vmem:[%s10676_s8 + $0xd90] sm:$0xff] }
 0x32c   : > { %2847 = vmatpush2.msra.mxu0 %v2068_v3  ;;  %2918 = vmatpush2.msra.mxu1 %v2196_v53  ;;  %v2289_v20 = vld [vmem:[%s10676_s8 + $0x9b8] sm:$0xff]  ;;  %v2280_v34 = vld [vmem:[%s10676_s8 + $0x970] sm:$0xff] }
 0x32d   : > { %2848 = vmatprep.subr.mxu0 %v2065_v31  ;;  %2919 = vmatprep.subr.mxu1 %v2193_v28  ;;  %v2417_v42 = vld [vmem:[%s10676_s8 + $0xdb8] sm:$0xff]  ;;  %v2408_v19 = vld [vmem:[%s10676_s8 + $0xd70] sm:$0xff] }
 0x32e   : > { %2849 = vmatpush2.msra.mxu0 %v2064_v6  ;;  %2920 = vmatpush2.msra.mxu1 %v2192_v5  ;;  %v2413_v58 = vld [vmem:[%s10676_s8 + $0xd98] sm:$0xff]  ;;  %v2276_v48 = vld [vmem:[%s10676_s8 + $0x950] sm:$0xff] }
 0x32f   : > { %2850 = vmatprep.subr.mxu0 %v2061_v25  ;;  %2921 = vmatprep.subr.mxu1 %v2189_v27  ;;  %v2281_v32 = vld [vmem:[%s10676_s8 + $0x978] sm:$0xff]  ;;  %v2404_v35 = vld [vmem:[%s10676_s8 + $0xd50] sm:$0xff] }
 0x330   : > { %2851 = vmatpush2.msra.mxu0 %v2060_v1  ;;  %2922 = vmatpush2.msra.mxu1 %v2188_v33  ;;  %v2409_v9 = vld [vmem:[%s10676_s8 + $0xd78] sm:$0xff]  ;;  %v2272_v12 = vld [vmem:[%s10676_s8 + $0x930] sm:$0xff] }
 0x331   : > { %2852 = vmatprep.subr.mxu0 %v2057_v40  ;;  %2923 = vmatprep.subr.mxu1 %v2185_v52  ;;  %v2277_v11 = vld [vmem:[%s10676_s8 + $0x958] sm:$0xff]  ;;  %v2400_v59 = vld [vmem:[%s10676_s8 + $0xd30] sm:$0xff] }
 0x332   : > { %2853 = vmatpush2.msra.mxu0 %v2056_v51  ;;  %2924 = vmatpush2.msra.mxu1 %v2184_v24  ;;  %v2405_v15 = vld [vmem:[%s10676_s8 + $0xd58] sm:$0xff]  ;;  %v2268_v46 = vld [vmem:[%s10676_s8 + $0x910] sm:$0xff] }
 0x333   : > { %2854 = vmatprep.subr.mxu0 %v2053_v41  ;;  %2925 = vmatprep.subr.mxu1 %v2181_v23  ;;  %v2273_v44 = vld [vmem:[%s10676_s8 + $0x938] sm:$0xff]  ;;  %v2396_v4 = vld [vmem:[%s10676_s8 + $0xd10] sm:$0xff] }
 0x334   : > { %2855 = vmatpush2.msra.mxu0 %v2052_v26  ;;  %2926 = vmatpush2.msra.mxu1 %v2180_v50  ;;  %v2401_v10 = vld [vmem:[%s10676_s8 + $0xd38] sm:$0xff]  ;;  %v2264_v53 = vld [vmem:[%s10676_s8 + $0x8f0] sm:$0xff] }
 0x335   : > { %2856 = vmatprep.subr.mxu0 %v2049_v61  ;;  %2927 = vmatprep.subr.mxu1 %v2177_v8  ;;  %v2269_v36 = vld [vmem:[%s10676_s8 + $0x918] sm:$0xff]  ;;  %v2392_v31 = vld [vmem:[%s10676_s8 + $0xcf0] sm:$0xff] }
 0x336   : > { %2857 = vmatpush2.msra.mxu0 %v2048_v49  ;;  %2928 = vmatpush2.msra.mxu1 %v2176_v16  ;;  %v2397_v2 = vld [vmem:[%s10676_s8 + $0xd18] sm:$0xff]  ;;  %v2260_v5 = vld [vmem:[%s10676_s8 + $0x8d0] sm:$0xff] }
 0x337   : > { %2858 = vmatprep.subr.mxu0 %v2045_v62  ;;  %2929 = vmatprep.subr.mxu1 %v2173_v14  ;;  %v2265_v54 = vld [vmem:[%s10676_s8 + $0x8f8] sm:$0xff]  ;;  %v2388_v25 = vld [vmem:[%s10676_s8 + $0xcd0] sm:$0xff] }
 0x338   : > { %2859 = vmatpush2.msra.mxu0 %v2044_v18  ;;  %2930 = vmatpush2.msra.mxu1 %v2172_v38  ;;  %v2393_v3 = vld [vmem:[%s10676_s8 + $0xcf8] sm:$0xff]  ;;  %v2256_v33 = vld [vmem:[%s10676_s8 + $0x8b0] sm:$0xff] }
 0x339   : > { %2861 = vmatmul.mubr.f32.vlgmr.msra.gmra.mxu0 %v7346_v0  ;;  %2932 = vmatmul.mubr.f32.vlgmr.msra.gmra.mxu1 %v7370_v56  ;;  %v2292_v0 = vld [vmem:[%s10676_s8 + $0x9d0] sm:$0xff]  ;;  %v2261_v28 = vld [vmem:[%s10676_s8 + $0x8d8] sm:$0xff] }
 0x33a   : > { %2938 = vmatprep.subr.mxu0 %v2297_v63  ;;  %3009 = vmatprep.subr.mxu1 %v2425_v13  ;;  %v2420_v56 = vld [vmem:[%s10676_s8 + $0xdd0] sm:$0xff]  ;;  %v2389_v6 = vld [vmem:[%s10676_s8 + $0xcd8] sm:$0xff] }
 0x33b   : > { %2939 = vmatpush1.msra.mxu0 %v2296_v43  ;;  %3002 = vmatprep.mubr.f32.mxu0 %v7644_v47  ;;  %v2288_v47 = vld [vmem:[%s10676_s8 + $0x9b0] sm:$0xff]  ;;  %v2257_v27 = vld [vmem:[%s10676_s8 + $0x8b8] sm:$0xff] }
 0x33c   : > { %3010 = vmatpush1.msra.mxu1 %v2424_v30  ;;  %3073 = vmatprep.mubr.f32.mxu1 %v7656_v55  ;;  %v2285_v55 = vld [vmem:[%s10676_s8 + $0x998] sm:$0xff]  ;;  %v2384_v40 = vld [vmem:[%s10676_s8 + $0xcb0] sm:$0xff] }
 0x33d   : > { %2940 = vmatprep.subr.mxu0 %v2293_v39  ;;  %3011 = vmatprep.subr.mxu1 %v2421_v7  ;;  %v2385_v1 = vld [vmem:[%s10676_s8 + $0xcb8] sm:$0xff]  ;;  %v2252_v24 = vld [vmem:[%s10676_s8 + $0x890] sm:$0xff] }
 0x33e   : > { %2941 = vmatpush1.msra.mxu0 %v2292_v0  ;;  %3012 = vmatpush1.msra.mxu1 %v2420_v56  ;;  %v2253_v52 = vld [vmem:[%s10676_s8 + $0x898] sm:$0xff]  ;;  %v2380_v41 = vld [vmem:[%s10676_s8 + $0xc90] sm:$0xff] }
 0x33f   : > { %2942 = vmatprep.subr.mxu0 %v2289_v20  ;;  %3013 = vmatprep.subr.mxu1 %v2417_v42  ;;  %v2381_v51 = vld [vmem:[%s10676_s8 + $0xc98] sm:$0xff]  ;;  %v2248_v50 = vld [vmem:[%s10676_s8 + $0x870] sm:$0xff] }
 0x340   : > { %2943 = vmatpush1.msra.mxu0 %v2288_v47  ;;  %3014 = vmatpush1.msra.mxu1 %v2416_v29  ;;  %v2249_v23 = vld [vmem:[%s10676_s8 + $0x878] sm:$0xff]  ;;  %v2376_v61 = vld [vmem:[%s10676_s8 + $0xc70] sm:$0xff] }
 0x341   : > { %2944 = vmatprep.subr.mxu0 %v2285_v55  ;;  %3015 = vmatprep.subr.mxu1 %v2413_v58  ;;  %v2377_v26 = vld [vmem:[%s10676_s8 + $0xc78] sm:$0xff]  ;;  %v2244_v16 = vld [vmem:[%s10676_s8 + $0x850] sm:$0xff] }
 0x342   : > { %2945 = vmatpush1.msra.mxu0 %v2284_v45  ;;  %3016 = vmatpush1.msra.mxu1 %v2412_v37  ;;  %v2245_v8 = vld [vmem:[%s10676_s8 + $0x858] sm:$0xff]  ;;  %v2372_v62 = vld [vmem:[%s10676_s8 + $0xc50] sm:$0xff] }
 0x343   : > { %2946 = vmatprep.subr.mxu0 %v2281_v32  ;;  %3017 = vmatprep.subr.mxu1 %v2409_v9  ;;  %v2373_v49 = vld [vmem:[%s10676_s8 + $0xc58] sm:$0xff]  ;;  %v2240_v38 = vld [vmem:[%s10676_s8 + $0x830] sm:$0xff] }
 0x344   : > { %2947 = vmatpush1.msra.mxu0 %v2280_v34  ;;  %3018 = vmatpush1.msra.mxu1 %v2408_v19  ;;  %v2241_v14 = vld [vmem:[%s10676_s8 + $0x838] sm:$0xff]  ;;  %v2368_v63 = vld [vmem:[%s10676_s8 + $0xc30] sm:$0xff] }
 0x345   : > { %2948 = vmatprep.subr.mxu0 %v2277_v11  ;;  %3019 = vmatprep.subr.mxu1 %v2405_v15  ;;  %v2369_v18 = vld [vmem:[%s10676_s8 + $0xc38] sm:$0xff]  ;;  %v2236_v30 = vld [vmem:[%s10676_s8 + $0x810] sm:$0xff] }
 0x346   : > { %2949 = vmatpush1.msra.mxu0 %v2276_v48  ;;  %3020 = vmatpush1.msra.mxu1 %v2404_v35  ;;  %v2237_v13 = vld [vmem:[%s10676_s8 + $0x818] sm:$0xff]  ;;  %v2364_v39 = vld [vmem:[%s10676_s8 + $0xc10] sm:$0xff] }
 0x347   : > { %2950 = vmatprep.subr.mxu0 %v2273_v44  ;;  %3021 = vmatprep.subr.mxu1 %v2401_v10  ;;  %v2365_v43 = vld [vmem:[%s10676_s8 + $0xc18] sm:$0xff]  ;;  %v2360_v56 = vld [vmem:[%s10676_s8 + $0xbf0] sm:$0xff] }
 0x348   : > { %2951 = vmatpush1.msra.mxu0 %v2272_v12  ;;  %3022 = vmatpush1.msra.mxu1 %v2400_v59  ;;  %v2361_v7 = vld [vmem:[%s10676_s8 + $0xbf8] sm:$0xff]  ;;  %v2488_v20 = vld [vmem:[%s10676_s8 + $0xff0] sm:$0xff] }
 0x349   : > { %2952 = vmatprep.subr.mxu0 %v2269_v36  ;;  %3023 = vmatprep.subr.mxu1 %v2397_v2  ;;  %v2489_v0 = vld [vmem:[%s10676_s8 + $0xff8] sm:$0xff]  ;;  %v2356_v29 = vld [vmem:[%s10676_s8 + $0xbd0] sm:$0xff] }
 0x34a   : > { %2953 = vmatpush1.msra.mxu0 %v2268_v46  ;;  %3024 = vmatpush1.msra.mxu1 %v2396_v4  ;;  %v2357_v42 = vld [vmem:[%s10676_s8 + $0xbd8] sm:$0xff]  ;;  %v2484_v55 = vld [vmem:[%s10676_s8 + $0xfd0] sm:$0xff] }
 0x34b   : > { %2954 = vmatprep.subr.mxu0 %v2265_v54  ;;  %3025 = vmatprep.subr.mxu1 %v2393_v3  ;;  %v2485_v47 = vld [vmem:[%s10676_s8 + $0xfd8] sm:$0xff]  ;;  %v2352_v37 = vld [vmem:[%s10676_s8 + $0xbb0] sm:$0xff] }
 0x34c   : > { %2955 = vmatpush1.msra.mxu0 %v2264_v53  ;;  %3026 = vmatpush1.msra.mxu1 %v2392_v31  ;;  %v2353_v58 = vld [vmem:[%s10676_s8 + $0xbb8] sm:$0xff]  ;;  %v2480_v32 = vld [vmem:[%s10676_s8 + $0xfb0] sm:$0xff] }
 0x34d   : > { %2956 = vmatprep.subr.mxu0 %v2261_v28  ;;  %3027 = vmatprep.subr.mxu1 %v2389_v6  ;;  %v2481_v45 = vld [vmem:[%s10676_s8 + $0xfb8] sm:$0xff]  ;;  %v2348_v19 = vld [vmem:[%s10676_s8 + $0xb90] sm:$0xff] }
 0x34e   : > { %2957 = vmatpush1.msra.mxu0 %v2260_v5  ;;  %3028 = vmatpush1.msra.mxu1 %v2388_v25  ;;  %v2349_v9 = vld [vmem:[%s10676_s8 + $0xb98] sm:$0xff]  ;;  %v2476_v11 = vld [vmem:[%s10676_s8 + $0xf90] sm:$0xff] }
 0x34f   : > { %2958 = vmatprep.subr.mxu0 %v2257_v27  ;;  %3029 = vmatprep.subr.mxu1 %v2385_v1  ;;  %v2477_v34 = vld [vmem:[%s10676_s8 + $0xf98] sm:$0xff]  ;;  %v2344_v35 = vld [vmem:[%s10676_s8 + $0xb70] sm:$0xff] }
 0x350   : > { %2959 = vmatpush1.msra.mxu0 %v2256_v33  ;;  %3030 = vmatpush1.msra.mxu1 %v2384_v40  ;;  %v2345_v15 = vld [vmem:[%s10676_s8 + $0xb78] sm:$0xff]  ;;  %v2472_v44 = vld [vmem:[%s10676_s8 + $0xf70] sm:$0xff] }
 0x351   : > { %2960 = vmatprep.subr.mxu0 %v2253_v52  ;;  %3031 = vmatprep.subr.mxu1 %v2381_v51  ;;  %v2473_v48 = vld [vmem:[%s10676_s8 + $0xf78] sm:$0xff]  ;;  %v2340_v59 = vld [vmem:[%s10676_s8 + $0xb50] sm:$0xff] }
 0x352   : > { %2961 = vmatpush1.msra.mxu0 %v2252_v24  ;;  %3032 = vmatpush1.msra.mxu1 %v2380_v41  ;;  %v2341_v10 = vld [vmem:[%s10676_s8 + $0xb58] sm:$0xff]  ;;  %v2468_v36 = vld [vmem:[%s10676_s8 + $0xf50] sm:$0xff] }
 0x353   : > { %2962 = vmatprep.subr.mxu0 %v2249_v23  ;;  %3033 = vmatprep.subr.mxu1 %v2377_v26  ;;  %v2469_v12 = vld [vmem:[%s10676_s8 + $0xf58] sm:$0xff]  ;;  %v2336_v4 = vld [vmem:[%s10676_s8 + $0xb30] sm:$0xff] }
 0x354   : > { %2963 = vmatpush1.msra.mxu0 %v2248_v50  ;;  %3034 = vmatpush1.msra.mxu1 %v2376_v61  ;;  %v2337_v2 = vld [vmem:[%s10676_s8 + $0xb38] sm:$0xff]  ;;  %v2464_v54 = vld [vmem:[%s10676_s8 + $0xf30] sm:$0xff] }
 0x355   : > { %2964 = vmatprep.subr.mxu0 %v2245_v8  ;;  %3035 = vmatprep.subr.mxu1 %v2373_v49  ;;  %v2465_v46 = vld [vmem:[%s10676_s8 + $0xf38] sm:$0xff]  ;;  %v2332_v31 = vld [vmem:[%s10676_s8 + $0xb10] sm:$0xff] }
 0x356   : > { %2965 = vmatpush1.msra.mxu0 %v2244_v16  ;;  %3036 = vmatpush1.msra.mxu1 %v2372_v62  ;;  %v2333_v3 = vld [vmem:[%s10676_s8 + $0xb18] sm:$0xff]  ;;  %v2460_v28 = vld [vmem:[%s10676_s8 + $0xf10] sm:$0xff] }
 0x357   : > { %2966 = vmatprep.subr.mxu0 %v2241_v14  ;;  %3037 = vmatprep.subr.mxu1 %v2369_v18  ;;  %v2461_v53 = vld [vmem:[%s10676_s8 + $0xf18] sm:$0xff]  ;;  %v2328_v25 = vld [vmem:[%s10676_s8 + $0xaf0] sm:$0xff] }
 0x358   : > { %2967 = vmatpush1.msra.mxu0 %v2240_v38  ;;  %3038 = vmatpush1.msra.mxu1 %v2368_v63  ;;  %v2329_v6 = vld [vmem:[%s10676_s8 + $0xaf8] sm:$0xff]  ;;  %v2456_v27 = vld [vmem:[%s10676_s8 + $0xef0] sm:$0xff] }
 0x359   : > { %2968 = vmatprep.subr.mxu0 %v2237_v13  ;;  %3039 = vmatprep.subr.mxu1 %v2365_v43  ;;  %v2457_v5 = vld [vmem:[%s10676_s8 + $0xef8] sm:$0xff]  ;;  %v2324_v40 = vld [vmem:[%s10676_s8 + $0xad0] sm:$0xff] }
 0x35a   : > { %2969 = vmatpush1.msra.mxu0 %v2236_v30  ;;  %3040 = vmatpush1.msra.mxu1 %v2364_v39  ;;  %v2325_v1 = vld [vmem:[%s10676_s8 + $0xad8] sm:$0xff]  ;;  %v2452_v52 = vld [vmem:[%s10676_s8 + $0xed0] sm:$0xff] }
 0x35b   : > { %2970 = vmatprep.subr.mxu0 %v2361_v7  ;;  %3041 = vmatprep.subr.mxu1 %v2489_v0  ;;  %v2453_v33 = vld [vmem:[%s10676_s8 + $0xed8] sm:$0xff]  ;;  %v2320_v41 = vld [vmem:[%s10676_s8 + $0xab0] sm:$0xff] }
 0x35c   : > { %2971 = vmatpush2.msra.mxu0 %v2360_v56  ;;  %3042 = vmatpush2.msra.mxu1 %v2488_v20  ;;  %v2321_v51 = vld [vmem:[%s10676_s8 + $0xab8] sm:$0xff]  ;;  %v2448_v23 = vld [vmem:[%s10676_s8 + $0xeb0] sm:$0xff] }
 0x35d   : > { %2972 = vmatprep.subr.mxu0 %v2357_v42  ;;  %3043 = vmatprep.subr.mxu1 %v2485_v47  ;;  %v2449_v24 = vld [vmem:[%s10676_s8 + $0xeb8] sm:$0xff]  ;;  %v2316_v61 = vld [vmem:[%s10676_s8 + $0xa90] sm:$0xff] }
 0x35e   : > { %2973 = vmatpush2.msra.mxu0 %v2356_v29  ;;  %3044 = vmatpush2.msra.mxu1 %v2484_v55  ;;  %v2317_v26 = vld [vmem:[%s10676_s8 + $0xa98] sm:$0xff]  ;;  %v2444_v8 = vld [vmem:[%s10676_s8 + $0xe90] sm:$0xff]  ;;  %v3113_v55 = vld [vmem:[%s10678_s10 + $0xe8] sm:$0xff] }
 0x35f   : > { %2974 = vmatprep.subr.mxu0 %v2353_v58  ;;  %3045 = vmatprep.subr.mxu1 %v2481_v45  ;;  %v2445_v50 = vld [vmem:[%s10676_s8 + $0xe98] sm:$0xff]  ;;  %v2312_v62 = vld [vmem:[%s10676_s8 + $0xa70] sm:$0xff]  ;;  %v3112_v58 = vld [vmem:[%s10678_s10 + $0xe0] sm:$0xff] }
 0x360   : > { %2975 = vmatpush2.msra.mxu0 %v2352_v37  ;;  %3046 = vmatpush2.msra.mxu1 %v2480_v32  ;;  %v2313_v49 = vld [vmem:[%s10676_s8 + $0xa78] sm:$0xff]  ;;  %v2440_v14 = vld [vmem:[%s10676_s8 + $0xe70] sm:$0xff]  ;;  %v3177_v32 = vld [vmem:[%s10678_s10 + $0x2e8] sm:$0xff] }
 0x361   : > { %2976 = vmatprep.subr.mxu0 %v2349_v9  ;;  %3047 = vmatprep.subr.mxu1 %v2477_v34  ;;  %v2441_v16 = vld [vmem:[%s10676_s8 + $0xe78] sm:$0xff]  ;;  %v2308_v63 = vld [vmem:[%s10676_s8 + $0xa50] sm:$0xff]  ;;  %v3109_v9 = vld [vmem:[%s10678_s10 + $0xc8] sm:$0xff] }
 0x362   : > { %2977 = vmatpush2.msra.mxu0 %v2348_v19  ;;  %3048 = vmatpush2.msra.mxu1 %v2476_v11  ;;  %v2309_v18 = vld [vmem:[%s10676_s8 + $0xa58] sm:$0xff]  ;;  %v2436_v13 = vld [vmem:[%s10676_s8 + $0xe50] sm:$0xff]  ;;  %v3176_v34 = vld [vmem:[%s10678_s10 + $0x2e0] sm:$0xff] }
 0x363   : > { %2978 = vmatprep.subr.mxu0 %v2345_v15  ;;  %3049 = vmatprep.subr.mxu1 %v2473_v48  ;;  %v2437_v38 = vld [vmem:[%s10676_s8 + $0xe58] sm:$0xff]  ;;  %v2304_v39 = vld [vmem:[%s10676_s8 + $0xa30] sm:$0xff]  ;;  %v3108_v19 = vld [vmem:[%s10678_s10 + $0xc0] sm:$0xff] }
 0x364   : > { %2979 = vmatpush2.msra.mxu0 %v2344_v35  ;;  %3050 = vmatpush2.msra.mxu1 %v2472_v44  ;;  %v2305_v43 = vld [vmem:[%s10676_s8 + $0xa38] sm:$0xff]  ;;  %v2432_v7 = vld [vmem:[%s10676_s8 + $0xe30] sm:$0xff]  ;;  %v3173_v44 = vld [vmem:[%s10678_s10 + $0x2c8] sm:$0xff] }
 0x365   : > { %2980 = vmatprep.subr.mxu0 %v2341_v10  ;;  %3051 = vmatprep.subr.mxu1 %v2469_v12  ;;  %v2433_v30 = vld [vmem:[%s10676_s8 + $0xe38] sm:$0xff]  ;;  %v2300_v20 = vld [vmem:[%s10676_s8 + $0xa10] sm:$0xff]  ;;  %v3105_v10 = vld [vmem:[%s10678_s10 + $0xa8] sm:$0xff] }
 0x366   : > { %2981 = vmatpush2.msra.mxu0 %v2340_v59  ;;  %3052 = vmatpush2.msra.mxu1 %v2468_v36  ;;  %v2301_v0 = vld [vmem:[%s10676_s8 + $0xa18] sm:$0xff]  ;;  %v2428_v42 = vld [vmem:[%s10676_s8 + $0xe10] sm:$0xff]  ;;  %v3172_v12 = vld [vmem:[%s10678_s10 + $0x2c0] sm:$0xff] }
 0x367   : > { %2982 = vmatprep.subr.mxu0 %v2337_v2  ;;  %3053 = vmatprep.subr.mxu1 %v2465_v46  ;;  %v2429_v56 = vld [vmem:[%s10676_s8 + $0xe18] sm:$0xff]  ;;  %v3114_v29 = vld [vmem:[%s10678_s10 + $0xf0] sm:$0xff]  ;;  %v3104_v59 = vld [vmem:[%s10678_s10 + $0xa0] sm:$0xff] }
 0x368   : > { %2983 = vmatpush2.msra.mxu0 %v2336_v4  ;;  %3054 = vmatpush2.msra.mxu1 %v2464_v54  ;;  %v3115_v47 = vld [vmem:[%s10678_s10 + $0xf8] sm:$0xff]  ;;  %v3178_v37 = vld [vmem:[%s10678_s10 + $0x2f0] sm:$0xff]  ;;  %v3169_v54 = vld [vmem:[%s10678_s10 + $0x2a8] sm:$0xff] }
 0x369   : > { %2984 = vmatprep.subr.mxu0 %v2333_v3  ;;  %3055 = vmatprep.subr.mxu1 %v2461_v53  ;;  %v3111_v45 = vld [vmem:[%s10678_s10 + $0xd8] sm:$0xff]  ;;  %v3174_v48 = vld [vmem:[%s10678_s10 + $0x2d0] sm:$0xff]  ;;  %v3101_v3 = vld [vmem:[%s10678_s10 + $0x88] sm:$0xff] }
 0x36a   : > { %2985 = vmatpush2.msra.mxu0 %v2332_v31  ;;  %3056 = vmatpush2.msra.mxu1 %v2460_v28  ;;  %v3175_v11 = vld [vmem:[%s10678_s10 + $0x2d8] sm:$0xff]  ;;  %v3106_v35 = vld [vmem:[%s10678_s10 + $0xb0] sm:$0xff]  ;;  %v3168_v53 = vld [vmem:[%s10678_s10 + $0x2a0] sm:$0xff] }
 0x36b   : > { %2986 = vmatprep.subr.mxu0 %v2329_v6  ;;  %3057 = vmatprep.subr.mxu1 %v2457_v5  ;;  %v3107_v15 = vld [vmem:[%s10678_s10 + $0xb8] sm:$0xff]  ;;  %v3170_v46 = vld [vmem:[%s10678_s10 + $0x2b0] sm:$0xff]  ;;  %v3100_v31 = vld [vmem:[%s10678_s10 + $0x80] sm:$0xff] }
 0x36c   : > { %2987 = vmatpush2.msra.mxu0 %v2328_v25  ;;  %3058 = vmatpush2.msra.mxu1 %v2456_v27  ;;  %v3171_v36 = vld [vmem:[%s10678_s10 + $0x2b8] sm:$0xff]  ;;  %v3102_v4 = vld [vmem:[%s10678_s10 + $0x90] sm:$0xff]  ;;  %v3165_v27 = vld [vmem:[%s10678_s10 + $0x288] sm:$0xff] }
 0x36d   : > { %2988 = vmatprep.subr.mxu0 %v2325_v1  ;;  %3059 = vmatprep.subr.mxu1 %v2453_v33  ;;  %v3103_v2 = vld [vmem:[%s10678_s10 + $0x98] sm:$0xff]  ;;  %v3166_v5 = vld [vmem:[%s10678_s10 + $0x290] sm:$0xff]  ;;  %v3097_v1 = vld [vmem:[%s10678_s10 + $0x68] sm:$0xff] }
 0x36e   : > { %2989 = vmatpush2.msra.mxu0 %v2324_v40  ;;  %3060 = vmatpush2.msra.mxu1 %v2452_v52  ;;  %v3167_v28 = vld [vmem:[%s10678_s10 + $0x298] sm:$0xff]  ;;  %v3098_v25 = vld [vmem:[%s10678_s10 + $0x70] sm:$0xff]  ;;  %v3164_v33 = vld [vmem:[%s10678_s10 + $0x280] sm:$0xff] }
 0x36f   : > { %2990 = vmatprep.subr.mxu0 %v2321_v51  ;;  %3061 = vmatprep.subr.mxu1 %v2449_v24  ;;  %v3099_v6 = vld [vmem:[%s10678_s10 + $0x78] sm:$0xff]  ;;  %v3096_v40 = vld [vmem:[%s10678_s10 + $0x60] sm:$0xff]  ;;  %v3162_v24 = vld [vmem:[%s10678_s10 + $0x270] sm:$0xff] }
 0x370   : > { %2991 = vmatpush2.msra.mxu0 %v2320_v41  ;;  %3062 = vmatpush2.msra.mxu1 %v2448_v23  ;;  %v3163_v52 = vld [vmem:[%s10678_s10 + $0x278] sm:$0xff]  ;;  %v3094_v41 = vld [vmem:[%s10678_s10 + $0x50] sm:$0xff]  ;;  %v3161_v23 = vld [vmem:[%s10678_s10 + $0x268] sm:$0xff] }
 0x371   : > { %2992 = vmatprep.subr.mxu0 %v2317_v26  ;;  %3063 = vmatprep.subr.mxu1 %v2445_v50  ;;  %v3095_v51 = vld [vmem:[%s10678_s10 + $0x58] sm:$0xff]  ;;  %v3093_v26 = vld [vmem:[%s10678_s10 + $0x48] sm:$0xff]  ;;  %v3160_v50 = vld [vmem:[%s10678_s10 + $0x260] sm:$0xff] }
 0x372   : > { %2993 = vmatpush2.msra.mxu0 %v2316_v61  ;;  %3064 = vmatpush2.msra.mxu1 %v2444_v8  ;;  %v3092_v61 = vld [vmem:[%s10678_s10 + $0x40] sm:$0xff]  ;;  %v3159_v8 = vld [vmem:[%s10678_s10 + $0x258] sm:$0xff] }
 0x373   : > { %2994 = vmatprep.subr.mxu0 %v2313_v49  ;;  %3065 = vmatprep.subr.mxu1 %v2441_v16  ;;  %v3091_v49 = vld [vmem:[%s10678_s10 + $0x38] sm:$0xff]  ;;  %v3158_v16 = vld [vmem:[%s10678_s10 + $0x250] sm:$0xff] }
 0x374   : > { %2995 = vmatpush2.msra.mxu0 %v2312_v62  ;;  %3066 = vmatpush2.msra.mxu1 %v2440_v14  ;;  %v3090_v62 = vld [vmem:[%s10678_s10 + $0x30] sm:$0xff]  ;;  %v3157_v14 = vld [vmem:[%s10678_s10 + $0x248] sm:$0xff] }
 0x375   : > { %2996 = vmatprep.subr.mxu0 %v2309_v18  ;;  %3067 = vmatprep.subr.mxu1 %v2437_v38  ;;  %v3089_v18 = vld [vmem:[%s10678_s10 + $0x28] sm:$0xff]  ;;  %v3156_v38 = vld [vmem:[%s10678_s10 + $0x240] sm:$0xff] }
 0x376   : > { %2997 = vmatpush2.msra.mxu0 %v2308_v63  ;;  %3068 = vmatpush2.msra.mxu1 %v2436_v13  ;;  %v3088_v63 = vld [vmem:[%s10678_s10 + $0x20] sm:$0xff]  ;;  %v3155_v13 = vld [vmem:[%s10678_s10 + $0x238] sm:$0xff] }
 0x377   : > { %2998 = vmatprep.subr.mxu0 %v2305_v43  ;;  %3069 = vmatprep.subr.mxu1 %v2433_v30  ;;  %v3087_v43 = vld [vmem:[%s10678_s10 + $0x18] sm:$0xff]  ;;  %v3154_v30 = vld [vmem:[%s10678_s10 + $0x230] sm:$0xff] }
 0x378   : > { %2999 = vmatpush2.msra.mxu0 %v2304_v39  ;;  %3070 = vmatpush2.msra.mxu1 %v2432_v7  ;;  %v3086_v39 = vld [vmem:[%s10678_s10 + $0x10] sm:$0xff]  ;;  %v3153_v7 = vld [vmem:[%s10678_s10 + $0x228] sm:$0xff] }
 0x379   : > { %3000 = vmatprep.subr.mxu0 %v2301_v0  ;;  %3071 = vmatprep.subr.mxu1 %v2429_v56  ;;  %v3085_v0 = vld [vmem:[%s10678_s10 + $0x8] sm:$0xff]  ;;  %v3152_v56 = vld [vmem:[%s10678_s10 + $0x220] sm:$0xff] }
 0x37a   : > { %3001 = vmatpush2.msra.mxu0 %v2300_v20  ;;  %3072 = vmatpush2.msra.mxu1 %v2428_v42  ;;  %v3084_v20 = vld [vmem:[%s10678_s10] sm:$0xff]  ;;  %v3151_v42 = vld [vmem:[%s10678_s10 + $0x218] sm:$0xff] }
 0x37b   : > { %3003 = vmatmul.mubr.f32.vlgmr.msra.gmra.mxu0 %v7868_v60  ;;  %3074 = vmatmul.mubr.f32.vlgmr.msra.gmra.mxu1 %v7871_v17  ;;  %v3110_v60 = vld [vmem:[%s10678_s10 + $0xd0] sm:$0xff]  ;;  %v3179_v17 = vld [vmem:[%s10678_s10 + $0x2f8] sm:$0xff] }
 0x37c   : > { %3224 = vmatprep.subr.mxu0 %v3115_v47  ;;  %3295 = vmatprep.subr.mxu1 %v3179_v17  ;;  %v3147_v47 = vld [vmem:[%s10678_s10 + $0x1f8] sm:$0xff]  ;;  %v3144_v17 = vld [vmem:[%s10678_s10 + $0x1e0] sm:$0xff] }
 0x37d   : > { %3225 = vmatpush1.msra.mxu0 %v3114_v29  ;;  %3296 = vmatpush1.msra.mxu1 %v3178_v37  ;;  %v3150_v29 = vld [vmem:[%s10678_s10 + $0x210] sm:$0xff]  ;;  %v3211_v37 = vld [vmem:[%s10678_s10 + $0x3f8] sm:$0xff] }
 0x37e   : > { %3226 = vmatprep.subr.mxu0 %v3113_v55  ;;  %3297 = vmatprep.subr.mxu1 %v3177_v32  ;;  %v3146_v55 = vld [vmem:[%s10678_s10 + $0x1f0] sm:$0xff]  ;;  %v3143_v32 = vld [vmem:[%s10678_s10 + $0x1d8] sm:$0xff] }
 0x37f   : > { %3227 = vmatpush1.msra.mxu0 %v3112_v58  ;;  %3298 = vmatpush1.msra.mxu1 %v3176_v34  ;;  %v3149_v58 = vld [vmem:[%s10678_s10 + $0x208] sm:$0xff]  ;;  %v3142_v34 = vld [vmem:[%s10678_s10 + $0x1d0] sm:$0xff] }
 0x380   : > { %3228 = vmatprep.subr.mxu0 %v3111_v45  ;;  %3299 = vmatprep.subr.mxu1 %v3175_v11  ;;  %v3145_v45 = vld [vmem:[%s10678_s10 + $0x1e8] sm:$0xff] }
 0x381   : > { %3229 = vmatpush1.msra.mxu0 %v3110_v60  ;;  %3300 = vmatpush1.msra.mxu1 %v3174_v48  ;;  %v3148_v60 = vld [vmem:[%s10678_s10 + $0x200] sm:$0xff]  ;;  %v3141_v11 = vld [vmem:[%s10678_s10 + $0x1c8] sm:$0xff] }
 0x382   : > { %3230 = vmatprep.subr.mxu0 %v3109_v9  ;;  %3301 = vmatprep.subr.mxu1 %v3173_v44  ;;  %v3210_v9 = vld [vmem:[%s10678_s10 + $0x3f0] sm:$0xff]  ;;  %v3140_v48 = vld [vmem:[%s10678_s10 + $0x1c0] sm:$0xff]  ;;  %v3139_v44 = vld [vmem:[%s10678_s10 + $0x1b8] sm:$0xff] }
 0x383   : > { %3231 = vmatpush1.msra.mxu0 %v3108_v19  ;;  %3302 = vmatpush1.msra.mxu1 %v3172_v12  ;;  %v3209_v19 = vld [vmem:[%s10678_s10 + $0x3e8] sm:$0xff]  ;;  %v3138_v12 = vld [vmem:[%s10678_s10 + $0x1b0] sm:$0xff] }
 0x384   : > { %3232 = vmatprep.subr.mxu0 %v3107_v15  ;;  %3303 = vmatprep.subr.mxu1 %v3171_v36  ;;  %v3208_v15 = vld [vmem:[%s10678_s10 + $0x3e0] sm:$0xff]  ;;  %v3137_v36 = vld [vmem:[%s10678_s10 + $0x1a8] sm:$0xff] }
 0x385   : > { %3233 = vmatpush1.msra.mxu0 %v3106_v35  ;;  %3304 = vmatpush1.msra.mxu1 %v3170_v46  ;;  %v3207_v35 = vld [vmem:[%s10678_s10 + $0x3d8] sm:$0xff]  ;;  %v3136_v46 = vld [vmem:[%s10678_s10 + $0x1a0] sm:$0xff] }
 0x386   : > { %3234 = vmatprep.subr.mxu0 %v3105_v10  ;;  %3305 = vmatprep.subr.mxu1 %v3169_v54  ;;  %v3206_v10 = vld [vmem:[%s10678_s10 + $0x3d0] sm:$0xff]  ;;  %v3135_v54 = vld [vmem:[%s10678_s10 + $0x198] sm:$0xff] }
 0x387   : > { %3235 = vmatpush1.msra.mxu0 %v3104_v59  ;;  %3306 = vmatpush1.msra.mxu1 %v3168_v53  ;;  %v3205_v59 = vld [vmem:[%s10678_s10 + $0x3c8] sm:$0xff]  ;;  %v3134_v53 = vld [vmem:[%s10678_s10 + $0x190] sm:$0xff] }
 0x388   : > { %3236 = vmatprep.subr.mxu0 %v3103_v2  ;;  %3307 = vmatprep.subr.mxu1 %v3167_v28  ;;  %v3204_v2 = vld [vmem:[%s10678_s10 + $0x3c0] sm:$0xff]  ;;  %v3133_v28 = vld [vmem:[%s10678_s10 + $0x188] sm:$0xff] }
 0x389   : > { %3237 = vmatpush1.msra.mxu0 %v3102_v4  ;;  %3308 = vmatpush1.msra.mxu1 %v3166_v5  ;;  %v3203_v4 = vld [vmem:[%s10678_s10 + $0x3b8] sm:$0xff]  ;;  %v3132_v5 = vld [vmem:[%s10678_s10 + $0x180] sm:$0xff] }
 0x38a   : > { %3238 = vmatprep.subr.mxu0 %v3101_v3  ;;  %3309 = vmatprep.subr.mxu1 %v3165_v27  ;;  %v3202_v3 = vld [vmem:[%s10678_s10 + $0x3b0] sm:$0xff]  ;;  %v3131_v27 = vld [vmem:[%s10678_s10 + $0x178] sm:$0xff] }
 0x38b   : > { %3239 = vmatpush1.msra.mxu0 %v3100_v31  ;;  %3310 = vmatpush1.msra.mxu1 %v3164_v33  ;;  %v3201_v31 = vld [vmem:[%s10678_s10 + $0x3a8] sm:$0xff]  ;;  %v3130_v33 = vld [vmem:[%s10678_s10 + $0x170] sm:$0xff] }
 0x38c   : > { %3240 = vmatprep.subr.mxu0 %v3099_v6  ;;  %3311 = vmatprep.subr.mxu1 %v3163_v52  ;;  %v3200_v6 = vld [vmem:[%s10678_s10 + $0x3a0] sm:$0xff] }
 0x38d   : > { %3241 = vmatpush1.msra.mxu0 %v3098_v25  ;;  %3312 = vmatpush1.msra.mxu1 %v3162_v24  ;;  %v3199_v25 = vld [vmem:[%s10678_s10 + $0x398] sm:$0xff]  ;;  %v8939_v52 = vld [vmem:[%s10677_s9] sm:$0xf] }
 0x38e   : > { %3242 = vmatprep.subr.mxu0 %v3097_v1  ;;  %3313 = vmatprep.subr.mxu1 %v3161_v23  ;;  %v3198_v1 = vld [vmem:[%s10678_s10 + $0x390] sm:$0xff]  ;;  %v3196_v24 = vld [vmem:[%s10678_s10 + $0x380] sm:$0xff]  ;;  %v3195_v23 = vld [vmem:[%s10678_s10 + $0x378] sm:$0xff] }
 0x38f   : > { %3243 = vmatpush1.msra.mxu0 %v3096_v40  ;;  %3314 = vmatpush1.msra.mxu1 %v3160_v50  ;;  %v3197_v40 = vld [vmem:[%s10678_s10 + $0x388] sm:$0xff]  ;;  %v3127_v50 = vld [vmem:[%s10678_s10 + $0x158] sm:$0xff] }
 0x390   : > { %3244 = vmatprep.subr.mxu0 %v3095_v51  ;;  %3315 = vmatprep.subr.mxu1 %v3159_v8  ;;  %v3129_v51 = vld [vmem:[%s10678_s10 + $0x168] sm:$0xff] }
 0x391   : > { %3245 = vmatpush1.msra.mxu0 %v3094_v41  ;;  %3316 = vmatpush1.msra.mxu1 %v3158_v16  ;;  %v3128_v41 = vld [vmem:[%s10678_s10 + $0x160] sm:$0xff]  ;;  %v10735_v8 = vld [vmem:[#allocation4_spill] sm:$0xff]  ;;  %v3126_v16 = vld [vmem:[%s10678_s10 + $0x150] sm:$0xff] }
 0x392   : > { %3246 = vmatprep.subr.mxu0 %v3093_v26  ;;  %3317 = vmatprep.subr.mxu1 %v3157_v14  ;;  %v2578_v26 = vpop.f32.mrf.mxu0  ;;  %v3125_v14 = vld [vmem:[%s10678_s10 + $0x148] sm:$0xff] }
 0x393   : > { %3247 = vmatpush1.msra.mxu0 %v3092_v61  ;;  %3318 = vmatpush1.msra.mxu1 %v3156_v38  ;;  %v3194_v61 = vld [vmem:[%s10678_s10 + $0x370] sm:$0xff]  ;;  %v10736_v38 = vld [vmem:[#allocation3_spill] sm:$0xff] }
 0x394   : > { %3248 = vmatprep.subr.mxu0 %v3091_v49  ;;  %3319 = vmatprep.subr.mxu1 %v3155_v13  ;;  %v2495_v49 = vrot.slane %v8939_v52, %v10735_v8  ;;  %v3124_v13 = vld [vmem:[%s10678_s10 + $0x140] sm:$0xff] }
 0x395   : > { %3249 = vmatpush1.msra.mxu0 %v3090_v62  ;;  %3320 = vmatpush1.msra.mxu1 %v3154_v30  ;;  %v3193_v62 = vld [vmem:[%s10678_s10 + $0x368] sm:$0xff]  ;;  %v2649_v30 = vpop.f32.mrf.mxu1 }
 0x396   : > { %3250 = vmatprep.subr.mxu0 %v3089_v18  ;;  %3321 = vmatprep.subr.mxu1 %v3153_v7  ;;  %v3192_v18 = vld [vmem:[%s10678_s10 + $0x360] sm:$0xff]  ;;  %v3123_v7 = vld [vmem:[%s10678_s10 + $0x138] sm:$0xff] }
 0x397   : > { %3251 = vmatpush1.msra.mxu0 %v3088_v63  ;;  %3322 = vmatpush1.msra.mxu1 %v3152_v56  ;;  %v2499_v63 = vrot.slane %v8939_v52, %v10736_v38  ;;  %v2579_v56 = vadd.f32 %v2578_v26, %v2495_v49  ;;  %v3378_v26 = vld [vmem:[%s10680_s12 + $0x50] sm:$0xff]  ;;  %v3392_v49 = vld [vmem:[%s10680_s12 + $0xc0] sm:$0xff] }
 0x398   : > { %3252 = vmatprep.subr.mxu0 %v3087_v43  ;;  %3323 = vmatprep.subr.mxu1 %v3151_v42  ;;  %v3191_v43 = vld [vmem:[%s10678_s10 + $0x358] sm:$0xff]  ;;  %v3121_v42 = vld [vmem:[%s10678_s10 + $0x128] sm:$0xff] }
 0x399   : > { %3253 = vmatpush1.msra.mxu0 %v3086_v39  ;;  %3324 = vmatpush1.msra.mxu1 %v3150_v29  ;;  %v2580_v39 = vpop.f32.mrf.mxu0  ;;  %v3120_v29 = vld [vmem:[%s10678_s10 + $0x120] sm:$0xff] }
 0x39a   : > { %3254 = vmatprep.subr.mxu0 %v3085_v0  ;;  %3325 = vmatprep.subr.mxu1 %v3149_v58  ;;  %v3190_v0 = vld [vmem:[%s10678_s10 + $0x350] sm:$0xff]  ;;  %v3119_v58 = vld [vmem:[%s10678_s10 + $0x118] sm:$0xff] }
 0x39b   : > { %3255 = vmatpush1.msra.mxu0 %v3084_v20  ;;  %3326 = vmatpush1.msra.mxu1 %v3148_v60  ;;  %v3122_v20 = vld [vmem:[%s10678_s10 + $0x130] sm:$0xff] }
 0x39c   : > { %3256 = vmatprep.subr.mxu0 %v3147_v47  ;;  %3327 = vmatprep.subr.mxu1 %v3211_v37  ;;  %v2581_v47 = vadd.f32 %v2580_v39, %v2499_v63  ;;  %v3118_v60 = vld [vmem:[%s10678_s10 + $0x110] sm:$0xff]  ;;  %v3372_v39 = vld [vmem:[%s10680_s12 + $0x20] sm:$0xff] }
 0x39d   : > { %3257 = vmatpush2.msra.mxu0 %v3146_v55  ;;  %3328 = vmatpush2.msra.mxu1 %v3210_v9  ;;  %v2651_v55 = vpop.f32.mrf.mxu1  ;;  %v3374_v63 = vld [vmem:[%s10680_s12 + $0x30] sm:$0xff] }
 0x39e   : > { %3258 = vmatprep.subr.mxu0 %v3145_v45  ;;  %3329 = vmatprep.subr.mxu1 %v3209_v19  ;;  %v2650_v45 = vadd.f32 %v2649_v30, %v2579_v56  ;;  %v2652_v9 = vadd.f32 %v2651_v55, %v2581_v47  ;;  %v3116_v19 = vld [vmem:[%s10678_s10 + $0x100] sm:$0xff] }
 0x39f   : > { %3259 = vmatpush2.msra.mxu0 %v3144_v17  ;;  %3330 = vmatpush2.msra.mxu1 %v3208_v15  ;;  %v3388_v30 = vld [vmem:[%s10680_s12 + $0xa0] sm:$0xff] }
 0x3a0   : > { %3260 = vmatprep.subr.mxu0 %v3143_v32  ;;  %3331 = vmatprep.subr.mxu1 %v3207_v35  ;;  %v3117_v32 = vld [vmem:[%s10678_s10 + $0x108] sm:$0xff] }
 0x3a1   : > { %3261 = vmatpush2.msra.mxu0 %v3142_v34  ;;  %3332 = vmatpush2.msra.mxu1 %v3206_v10  ;;  %v3189_v10 = vld [vmem:[%s10678_s10 + $0x348] sm:$0xff] }
 0x3a2   : > { %3262 = vmatprep.subr.mxu0 %v3141_v11  ;;  %3333 = vmatprep.subr.mxu1 %v3205_v59  ;;  %v3188_v59 = vld [vmem:[%s10678_s10 + $0x340] sm:$0xff] }
 0x3a3   : > { %3263 = vmatpush2.msra.mxu0 %v3140_v48  ;;  %3334 = vmatpush2.msra.mxu1 %v3204_v2  ;;  %v3187_v2 = vld [vmem:[%s10678_s10 + $0x338] sm:$0xff] }
 0x3a4   : > { %3264 = vmatprep.subr.mxu0 %v3139_v44  ;;  %3335 = vmatprep.subr.mxu1 %v3203_v4  ;;  %v3185_v4 = vld [vmem:[%s10678_s10 + $0x328] sm:$0xff] }
 0x3a5   : > { %3265 = vmatpush2.msra.mxu0 %v3138_v12  ;;  %3336 = vmatpush2.msra.mxu1 %v3202_v3  ;;  %v3183_v3 = vld [vmem:[%s10678_s10 + $0x318] sm:$0xff] }
 0x3a6   : > { %3266 = vmatprep.subr.mxu0 %v3137_v36  ;;  %3337 = vmatprep.subr.mxu1 %v3201_v31  ;;  %v3181_v31 = vld [vmem:[%s10678_s10 + $0x308] sm:$0xff] }
 0x3a7   : > { %3267 = vmatpush2.msra.mxu0 %v3136_v46  ;;  %3338 = vmatpush2.msra.mxu1 %v3200_v6  ;;  %v3186_v46 = vld [vmem:[%s10678_s10 + $0x330] sm:$0xff]  ;;  %v3399_v6 = vld [vmem:[%s10680_s12 + $0xf8] sm:$0xff] }
 0x3a8   : > { %3268 = vmatprep.subr.mxu0 %v3135_v54  ;;  %3339 = vmatprep.subr.mxu1 %v3199_v25  ;;  %v3184_v54 = vld [vmem:[%s10678_s10 + $0x320] sm:$0xff]  ;;  %v3398_v25 = vld [vmem:[%s10680_s12 + $0xf0] sm:$0xff] }
 0x3a9   : > { %3269 = vmatpush2.msra.mxu0 %v3134_v53  ;;  %3340 = vmatpush2.msra.mxu1 %v3198_v1  ;;  %v3182_v53 = vld [vmem:[%s10678_s10 + $0x310] sm:$0xff]  ;;  %v3397_v1 = vld [vmem:[%s10680_s12 + $0xe8] sm:$0xff] }
 0x3aa   : > { %3270 = vmatprep.subr.mxu0 %v3133_v28  ;;  %3341 = vmatprep.subr.mxu1 %v3197_v40  ;;  %v3180_v28 = vld [vmem:[%s10678_s10 + $0x300] sm:$0xff] }
 0x3ab   : > { %3271 = vmatpush2.msra.mxu0 %v3132_v5  ;;  %3342 = vmatpush2.msra.mxu1 %v3196_v24  ;;  %v3383_v5 = vld [vmem:[%s10680_s12 + $0x78] sm:$0xff]  ;;  %v3396_v40 = vld [vmem:[%s10680_s12 + $0xe0] sm:$0xff] }
 0x3ac   : > { %3272 = vmatprep.subr.mxu0 %v3131_v27  ;;  %3343 = vmatprep.subr.mxu1 %v3195_v23  ;;  %v3382_v27 = vld [vmem:[%s10680_s12 + $0x70] sm:$0xff]  ;;  %v3395_v24 = vld [vmem:[%s10680_s12 + $0xd8] sm:$0xff] }
 0x3ad   : > { %3273 = vmatpush2.msra.mxu0 %v3130_v33  ;;  %3344 = vmatpush2.msra.mxu1 %v3194_v61  ;;  %v3381_v33 = vld [vmem:[%s10680_s12 + $0x68] sm:$0xff]  ;;  %v3394_v23 = vld [vmem:[%s10680_s12 + $0xd0] sm:$0xff] }
 0x3ae   : > { %3274 = vmatprep.subr.mxu0 %v3129_v51  ;;  %3345 = vmatprep.subr.mxu1 %v3193_v62  ;;  %v3380_v51 = vld [vmem:[%s10680_s12 + $0x60] sm:$0xff]  ;;  %v3377_v61 = vld [vmem:[%s10680_s12 + $0x48] sm:$0xff]  ;;  %v3391_v62 = vld [vmem:[%s10680_s12 + $0xb8] sm:$0xff] }
 0x3af   : > { %3275 = vmatpush2.msra.mxu0 %v3128_v41  ;;  %3346 = vmatpush2.msra.mxu1 %v3192_v18  ;;  %v3379_v41 = vld [vmem:[%s10680_s12 + $0x58] sm:$0xff]  ;;  %v3390_v18 = vld [vmem:[%s10680_s12 + $0xb0] sm:$0xff] }
 0x3b0   : > { %3276 = vmatprep.subr.mxu0 %v3127_v50  ;;  %3347 = vmatprep.subr.mxu1 %v3191_v43  ;;  %v3393_v50 = vld [vmem:[%s10680_s12 + $0xc8] sm:$0xff] }
 0x3b1   : > { %3277 = vmatpush2.msra.mxu0 %v3126_v16  ;;  %3348 = vmatpush2.msra.mxu1 %v3190_v0  ;;  %v3376_v16 = vld [vmem:[%s10680_s12 + $0x40] sm:$0xff]  ;;  %v3373_v43 = vld [vmem:[%s10680_s12 + $0x28] sm:$0xff]  ;;  %v10737_v0 = vld [vmem:[#allocation5_spill] sm:$0xff] }
 0x3b2   : > { %3278 = vmatprep.subr.mxu0 %v3125_v14  ;;  %3349 = vmatprep.subr.mxu1 %v3189_v10  ;;  %v3375_v14 = vld [vmem:[%s10680_s12 + $0x38] sm:$0xff]  ;;  %v2503_v56 = vrot.slane %v8939_v52, %v10737_v0 }
 0x3b3   : > { %3279 = vmatpush2.msra.mxu0 %v3124_v13  ;;  %3350 = vmatpush2.msra.mxu1 %v3188_v59  ;;  %v3389_v13 = vld [vmem:[%s10680_s12 + $0xa8] sm:$0xff]  ;;  %v3371_v10 = vld [vmem:[%s10680_s12 + $0x18] sm:$0xff]  ;;  %v3370_v59 = vld [vmem:[%s10680_s12 + $0x10] sm:$0xff] }
 0x3b4   : > { %3280 = vmatprep.subr.mxu0 %v3123_v7  ;;  %3351 = vmatprep.subr.mxu1 %v3187_v2  ;;  %v3369_v2 = vld [vmem:[%s10680_s12 + $0x8] sm:$0xff] }
 0x3b5   : > { %3281 = vmatpush2.msra.mxu0 %v3122_v20  ;;  %3352 = vmatpush2.msra.mxu1 %v3186_v46  ;;  %v10738_v20 = vld [vmem:[#allocation6_spill] sm:$0xff]  ;;  %v3384_v46 = vld [vmem:[%s10680_s12 + $0x80] sm:$0xff] }
 0x3b6   : > { %3282 = vmatprep.subr.mxu0 %v3121_v42  ;;  %3353 = vmatprep.subr.mxu1 %v3185_v4  ;;  %v2507_v42 = vrot.slane %v8939_v52, %v10738_v20  ;;  %v3387_v52 = vld [vmem:[%s10680_s12 + $0x98] sm:$0xff]  ;;  %v3368_v4 = vld [vmem:[%s10680_s12] sm:$0xff] }
 0x3b7   : > { %v2720_v17 = vpop.f32.mrf.mxu0  ;;  %v2791_v37 = vpop.f32.mrf.mxu1  ;;  %3283 = vmatpush2.msra.mxu0 %v3120_v29  ;;  %3354 = vmatpush2.msra.mxu1 %v3184_v54  ;;  %v3212_v54 = vld [vmem:[%s10679_s11] sm:$0x3] }
 0x3b8   : > { %v2721_v34 = vadd.f32 %v2720_v17, %v2650_v45  ;;  %3284 = vmatprep.subr.mxu0 %v3119_v58  ;;  %3355 = vmatprep.subr.mxu1 %v3183_v3 }
 0x3b9   : > { %v2722_v11 = vpop.f32.mrf.mxu0  ;;  %3285 = vmatpush2.msra.mxu0 %v3118_v60  ;;  %v2793_v35 = vpop.f32.mrf.mxu1  ;;  %3356 = vmatpush2.msra.mxu1 %v3182_v53  ;;  %v3217_v53 = vrot.slane %v3212_v54, %v10735_v8 }
 0x3ba   : > { %v2723_v15 = vadd.f32 %v2722_v11, %v2652_v9  ;;  %3286 = vmatprep.subr.mxu0 %v3117_v32  ;;  %v2792_v48 = vadd.f32 %v2791_v37, %v2721_v34  ;;  %3357 = vmatprep.subr.mxu1 %v3181_v31  ;;  %v3221_v31 = vrot.slane %v3212_v54, %v10736_v38 }
 0x3bb   : > { %3287 = vmatpush2.msra.mxu0 %v3116_v19  ;;  %3358 = vmatpush2.msra.mxu1 %v3180_v28 }
 0x3bc   : > { %v2794_v44 = vadd.f32 %v2793_v35, %v2723_v15  ;;  %v3080_v36 = vmax.f32 %v2792_v48, 0.0  ;;  %5761 = vmatprep.subr.mxu0 %v3399_v6 }
 0x3be   : > { %v3081_v12 = vmax.f32 %v2794_v44, 0.0 }
 0x3c0   : > { %3288 = vmatprep.mubr.f32.mxu0 %v3081_v12  ;;  %v3386_v12 = vld [vmem:[%s10680_s12 + $0x90] sm:$0xff] }
 0x3c1   : > { %3289 = vmatmul.mubr.f32.vlgmr.msra.gmra.mxu0 %v3080_v36  ;;  %v3385_v36 = vld [vmem:[%s10680_s12 + $0x88] sm:$0xff] }
 0x3c2   : > { %5762 = vmatpush3.msra.mxu0 %v3383_v5 }
 0x3c3   : > { %5763 = vmatprep.subr.mxu0 %v3398_v25 }
 0x3c4   : > { %5764 = vmatpush3.msra.mxu0 %v3382_v27 }
 0x3c5   : > { %5765 = vmatprep.subr.mxu0 %v3397_v1 }
 0x3c6   : > { %5766 = vmatpush3.msra.mxu0 %v3381_v33 }
 0x3c7   : > { %5767 = vmatprep.subr.mxu0 %v3396_v40 }
 0x3c8   : > { %5768 = vmatpush3.msra.mxu0 %v3380_v51 }
 0x3c9   : > { %5769 = vmatprep.subr.mxu0 %v3395_v24  ;;  %v10739_v24 = vmov 0.0  }
 0x3ca   : > { %5770 = vmatpush3.msra.mxu0 %v3379_v41 }
 0x3cb   : > { %5771 = vmatprep.subr.mxu0 %v3394_v23  ;;  %v5710_v23 = vld [vmem:[%s10681_s13] ss:$0 sm:$0xff] }
 0x3cc   : > { %5772 = vmatpush3.msra.mxu0 %v3378_v26 }
 0x3cd   : > { %5773 = vmatprep.subr.mxu0 %v3393_v50 }
 0x3ce   : > { %5774 = vmatpush3.msra.mxu0 %v3377_v61 }
 0x3cf   : > { %5775 = vmatprep.subr.mxu0 %v3392_v49 }
 0x3d0   : > { %5776 = vmatpush3.msra.mxu0 %v3376_v16 }
 0x3d1   : > { %5777 = vmatprep.subr.mxu0 %v3391_v62 }
 0x3d2   : > { %5778 = vmatpush3.msra.mxu0 %v3375_v14 }
 0x3d3   : > { %5779 = vmatprep.subr.mxu0 %v3390_v18 }
 0x3d4   : > { %5780 = vmatpush3.msra.mxu0 %v3374_v63  ;;  %v9192_v63 = vld [vmem:[%s6254_s26] sm:$0xff] }
 0x3d5   : > { %5781 = vmatprep.subr.mxu0 %v3389_v13 }
 0x3d6   : > { %5782 = vmatpush3.msra.mxu0 %v3373_v43  ;;  %v9196_v43 = vld [vmem:[%s6254_s26 + $0x8] sm:$0xff] }
 0x3d7   : > { %5783 = vmatprep.subr.mxu0 %v3388_v30 }
 0x3d8   : > { %5784 = vmatpush3.msra.mxu0 %v3372_v39 }
 0x3d9   : > { %5785 = vmatprep.subr.mxu0 %v3387_v52 }
 0x3da   : > { %5786 = vmatpush3.msra.mxu0 %v3371_v10 }
 0x3db   : > { %5787 = vmatprep.subr.mxu0 %v3386_v12 }
 0x3dc   : > { %5788 = vmatpush3.msra.mxu0 %v3370_v59  ;;  %v9248_v59 = vld [vmem:[%s6254_s26 + $0x20] sm:$0xff] }
 0x3dd   : > { %5789 = vmatprep.subr.mxu0 %v3385_v36 }
 0x3de   : > { %5790 = vmatpush3.msra.mxu0 %v3369_v2  ;;  %v9252_v2 = vld [vmem:[%s6254_s26 + $0x28] sm:$0xff] }
 0x3df   : > { %5791 = vmatprep.subr.mxu0 %v3384_v46 }
 0x3e0   : > { %5792 = vmatpush3.msra.mxu0 %v3368_v4 }
 0x3f9   : > { %v2862_v7 = vpop.f32.mrf.mxu0  ;;  %v2933_v47 = vpop.f32.mrf.mxu1 }
 0x3fa   : > { %v2863_v55 = vadd.f32 %v2862_v7, %v2503_v56 }
 0x3fb   : > { %v2864_v29 = vpop.f32.mrf.mxu0  ;;  %v2935_v45 = vpop.f32.mrf.mxu1 }
 0x3fc   : > { %v2865_v58 = vadd.f32 %v2864_v29, %v2507_v42  ;;  %v2934_v60 = vadd.f32 %v2933_v47, %v2863_v55 }
 0x3fe   : > { %v2936_v32 = vadd.f32 %v2935_v45, %v2865_v58 }
 0x43b   : > { %v3004_v17 = vpop.f32.mrf.mxu0  ;;  %v3075_v37 = vpop.f32.mrf.mxu1 }
 0x43c   : > { %v3005_v9 = vadd.f32 %v3004_v17, %v2934_v60  ;;  %v9220_v17 = vld [vmem:[%s6254_s26 + $0x10] sm:$0xff] }
 0x43d   : > { %v3006_v34 = vpop.f32.mrf.mxu0  ;;  %v3077_v15 = vpop.f32.mrf.mxu1 }
 0x43e   : > { %v3007_v19 = vadd.f32 %v3006_v34, %v2936_v32  ;;  %v3076_v11 = vadd.f32 %v3075_v37, %v3005_v9  ;;  %v9224_v32 = vld [vmem:[%s6254_s26 + $0x18] sm:$0xff] }
 0x440   : > { %v3078_v48 = vadd.f32 %v3077_v15, %v3007_v19  ;;  %v3082_v44 = vmax.f32 %v3076_v11, 0.0 }
 0x442   : > { %v3083_v35 = vmax.f32 %v3078_v48, 0.0 }
 0x444   : > { %3359 = vmatprep.mubr.f32.mxu1 %v3083_v35 }
 0x445   : > { %3360 = vmatmul.mubr.f32.vlgmr.msra.gmra.mxu1 %v3082_v44 }
 0x481   : > { %v3290_v3 = vpop.f32.mrf.mxu0 }
 0x482   : > { %v3291_v6 = vadd.f32 %v3290_v3, %v3217_v53 }
 0x483   : > { %v3292_v28 = vpop.f32.mrf.mxu0 }
 0x484   : > { %v3293_v25 = vadd.f32 %v3292_v28, %v3221_v31 }
 0x505   : > { %v3361_v5 = vpop.f32.mrf.mxu1 }
 0x506   : > { %v3362_v27 = vadd.f32 %v3361_v5, %v3291_v6 }
 0x507   : > { %v3363_v1 = vpop.f32.mrf.mxu1 }
 0x508   : > { %v3364_v33 = vadd.f32 %v3363_v1, %v3293_v25  ;;  %v3366_v51 = vmax.f32 %v3362_v27, 0.0  ;;  %v9270_v1 = vld [vmem:[%s6254_s26 + $0x30] sm:$0xff] }
 0x50a   : > { %v3367_v40 = vmax.f32 %v3364_v33, 0.0 }
 0x50c   : > { %3471 = vmatprep.mubr.f32.mxu0 %v3367_v40  ;;  %v9274_v40 = vld [vmem:[%s6254_s26 + $0x38] sm:$0xff] }
 0x50d   : > { %3472 = vmatmul.mubr.f32.vlgmr.msra.gmra.mxu0 %v3366_v51 }
 0x50e   : > { %4482 = vmatprep.mubr.f32.mxu0 %v10739_v24 }
 0x5cd   : > { %v5793_v41 = vpop.f32.mrf.mxu0 }
 0x5cf   : > { %v5794_v26 = vpop.f32.mrf.mxu0 }
 0x5d0   : > { %v5795_v50 = vadd.f32 %v5794_v26, %v5793_v41 }
 0x5d2   : > { %v3474_v61 = vadd.f32 %v5795_v50, %v5710_v23 }
 0x5d4   : > { %v9148_v49 = vrot.slane %v3474_v61, %v10735_v8  ;;  %v9155_v16 = vrot.slane %v3474_v61, %v10736_v38  ;;  %v9162_v62 = vrot.slane %v3474_v61, %v10737_v0  ;;  %v9169_v14 = vrot.slane %v3474_v61, %v10738_v20 }
 0x5d6   : > { %3534 = vrot.lane.b32.xlu1 %v9148_v49, %s6090_s29  ;;  %3519 = vrot.lane.b32.xlu0 %v9148_v49, %s6091_s3 }
 0x5da   : > { %3557 = vrot.lane.b32.xlu1 %v9148_v49, %s6092_s0  ;;  %3499 = vrot.lane.b32.xlu0 %v9148_v49, %s6093_s24 }
 0x5de   : > { %3619 = vrot.lane.b32.xlu1 %v9155_v16, %s6093_s24  ;;  %3639 = vrot.lane.b32.xlu0 %v9155_v16, %s6091_s3 }
 0x5e2   : > { %3677 = vrot.lane.b32.xlu1 %v9155_v16, %s6092_s0  ;;  %3654 = vrot.lane.b32.xlu0 %v9155_v16, %s6090_s29 }
 0x5e6   : > { %3736 = vrot.lane.b32.xlu1 %v9162_v62, %s6093_s24  ;;  %3756 = vrot.lane.b32.xlu0 %v9162_v62, %s6091_s3 }
 0x5ea   : > { %3794 = vrot.lane.b32.xlu1 %v9162_v62, %s6092_s0  ;;  %3771 = vrot.lane.b32.xlu0 %v9162_v62, %s6090_s29 }
 0x5ee   : > { %3853 = vrot.lane.b32.xlu1 %v9169_v14, %s6093_s24  ;;  %3873 = vrot.lane.b32.xlu0 %v9169_v14, %s6091_s3 }
 0x5f2   : > { %3911 = vrot.lane.b32.xlu1 %v9169_v14, %s6092_s0  ;;  %3888 = vrot.lane.b32.xlu0 %v9169_v14, %s6090_s29  ;;  %s5689_s0 = sshll.u32 %s6225_s30, 1 }
 0x5f3   : > { %p724_p4 = scmp.lt.s32.totalorder %s5689_s0, 3 }
 0x5f5   : > { %s10745_s0 = smov (!%p724_p4, %s5689_s0), 3 }
 0x5f6   : > { %3514 = vrot.lane.b32.xlu1 %v9148_v49, %s6094_s25  ;;  %3484 = vrot.lane.b32.xlu0 %v9148_v49, %s6095_s5  ;;  %s5690_s24 = sshll.u32 %s10745_s0, 1 }
 0x5f7   : > { %s727_s26 = scalar_lea.vmem %s10691_s23, %s5690_s24 }
 0x5fa   : > { %3634 = vrot.lane.b32.xlu1 %v9155_v16, %s6094_s25  ;;  %3604 = vrot.lane.b32.xlu0 %v9155_v16, %s6095_s5 }
 0x5fe   : > { %3751 = vrot.lane.b32.xlu1 %v9162_v62, %s6094_s25  ;;  %3721 = vrot.lane.b32.xlu0 %v9162_v62, %s6095_s5 }
 0x602   : > { %3868 = vrot.lane.b32.xlu1 %v9169_v14, %s6094_s25  ;;  %3838 = vrot.lane.b32.xlu0 %v9169_v14, %s6095_s5 }
 0x648   : > { %v3520_v18 = vpop.permute.xlu0 %3519  ;;  %v3535_v39 = vpop.permute.xlu1 %3534 }
 0x649   : > { %v3522_v13 = vmul.f32 %v9192_v63, %v3520_v18  ;;  %v3523_v30 = vmul.f32 %v9196_v43, %v3520_v18  ;;  %v3537_v56 = vmul.f32 %v9192_v63, %v3535_v39  ;;  %v3538_v47 = vmul.f32 %v9196_v43, %v3535_v39 }
 0x64b   : > { %3528 = vrot.lane.b32.xlu1 %v3523_v30, %s6094_s25  ;;  %3526 = vrot.lane.b32.xlu0 %v3522_v13, %s6094_s25 }
 0x64c   : > { %v3500_v7 = vpop.permute.xlu0 %3499  ;;  %v3558_v55 = vpop.permute.xlu1 %3557 }
 0x64d   : > { %v9203_v42 = vmul.f32 %v9192_v63, %v3500_v7  ;;  %v9210_v29 = vmul.f32 %v9196_v43, %v3500_v7  ;;  %v3560_v45 = vmul.f32 %v9192_v63, %v3558_v55  ;;  %v3561_v60 = vmul.f32 %v9196_v43, %v3558_v55 }
 0x64f   : > { %3541 = vrot.lane.b32.xlu1 %v3537_v56, %s6095_s5  ;;  %3549 = vrot.lane.b32.xlu0 %v9203_v42, %s6094_s25 }
 0x650   : > { %v3640_v58 = vpop.permute.xlu0 %3639  ;;  %v3620_v34 = vpop.permute.xlu1 %3619 }
 0x651   : > { %v3642_v37 = vmul.f32 %v9220_v17, %v3640_v58  ;;  %v3643_v9 = vmul.f32 %v9224_v32, %v3640_v58  ;;  %v9230_v11 = vmul.f32 %v9220_v17, %v3620_v34  ;;  %v9237_v48 = vmul.f32 %v9224_v32, %v3620_v34 }
 0x653   : > { %3543 = vrot.lane.b32.xlu1 %v3538_v47, %s6095_s5  ;;  %3551 = vrot.lane.b32.xlu0 %v9210_v29, %s6094_s25 }
 0x654   : > { %v3655_v19 = vpop.permute.xlu0 %3654  ;;  %v3678_v44 = vpop.permute.xlu1 %3677 }
 0x655   : > { %v3657_v15 = vmul.f32 %v9220_v17, %v3655_v19  ;;  %v3658_v35 = vmul.f32 %v9224_v32, %v3655_v19  ;;  %v3680_v10 = vmul.f32 %v9220_v17, %v3678_v44  ;;  %v3681_v12 = vmul.f32 %v9224_v32, %v3678_v44 }
 0x657   : > { %3566 = vrot.lane.b32.xlu1 %v3561_v60, %s6095_s5  ;;  %3564 = vrot.lane.b32.xlu0 %v3560_v45, %s6095_s5 }
 0x658   : > { %v3757_v52 = vpop.permute.xlu0 %3756  ;;  %v3737_v4 = vpop.permute.xlu1 %3736 }
 0x659   : > { %v3759_v36 = vmul.f32 %v9248_v59, %v3757_v52  ;;  %v3760_v46 = vmul.f32 %v9252_v2, %v3757_v52  ;;  %v3739_v3 = vmul.f32 %v9248_v59, %v3737_v4  ;;  %v3740_v31 = vmul.f32 %v9252_v2, %v3737_v4 }
 0x65b   : > { %3648 = vrot.lane.b32.xlu1 %v3643_v9, %s6094_s25  ;;  %3646 = vrot.lane.b32.xlu0 %v3642_v37, %s6094_s25 }
 0x65c   : > { %v3772_v54 = vpop.permute.xlu0 %3771  ;;  %v3795_v6 = vpop.permute.xlu1 %3794 }
 0x65d   : > { %v3774_v53 = vmul.f32 %v9248_v59, %v3772_v54  ;;  %v3775_v28 = vmul.f32 %v9252_v2, %v3772_v54  ;;  %v3797_v25 = vmul.f32 %v9248_v59, %v3795_v6  ;;  %v3798_v27 = vmul.f32 %v9252_v2, %v3795_v6 }
 0x65f   : > { %3669 = vrot.lane.b32.xlu0 %v9230_v11, %s6094_s25  ;;  %3661 = vrot.lane.b32.xlu1 %v3657_v15, %s6095_s5 }
 0x660   : > { %v3874_v5 = vpop.permute.xlu0 %3873  ;;  %v3854_v41 = vpop.permute.xlu1 %3853 }
 0x661   : > { %v3876_v33 = vmul.f32 %v9270_v1, %v3874_v5  ;;  %v3877_v51 = vmul.f32 %v9274_v40, %v3874_v5  ;;  %v3856_v26 = vmul.f32 %v9270_v1, %v3854_v41  ;;  %v3857_v61 = vmul.f32 %v9274_v40, %v3854_v41 }
 0x663   : > { %3671 = vrot.lane.b32.xlu0 %v9237_v48, %s6094_s25  ;;  %3663 = vrot.lane.b32.xlu1 %v3658_v35, %s6095_s5 }
 0x664   : > { %v3889_v23 = vpop.permute.xlu0 %3888  ;;  %v3912_v13 = vpop.permute.xlu1 %3911 }
 0x665   : > { %v3891_v50 = vmul.f32 %v9270_v1, %v3889_v23  ;;  %v3892_v18 = vmul.f32 %v9274_v40, %v3889_v23  ;;  %v3914_v30 = vmul.f32 %v9270_v1, %v3912_v13  ;;  %v3915_v39 = vmul.f32 %v9274_v40, %v3912_v13 }
 0x667   : > { %3684 = vrot.lane.b32.xlu0 %v3680_v10, %s6095_s5  ;;  %3686 = vrot.lane.b32.xlu1 %v3681_v12, %s6095_s5  ;;  %v3948_v12 = vld [vmem:[%s10682_s14] sm:$0x3f] }
 0x668   : > { %v3485_v7 = vpop.permute.xlu0 %3484  ;;  %v3515_v19 = vpop.permute.xlu1 %3514  ;;  %6006 = vmatprep.subr.msk.mxu1 %vm771_vm0, %v3948_v12 }
 0x669   : > { %v3487_v56 = vmul.f32 %v9192_v63, %v3485_v7  ;;  %v3488_v47 = vmul.f32 %v9196_v43, %v3485_v7  ;;  %v3517_v52 = vmul.f32 %v9192_v63, %v3515_v19  ;;  %v3518_v4 = vmul.f32 %v9196_v43, %v3515_v19  ;;  %6007 = vmatpush3.msk.msra.mxu1 %vm771_vm0, %v3948_v12 }
 0x66b   : > { %3765 = vrot.lane.b32.xlu1 %v3760_v46, %s6094_s25  ;;  %3763 = vrot.lane.b32.xlu0 %v3759_v36, %s6094_s25 }
 0x66c   : > { %v3605_v55 = vpop.permute.xlu0 %3604 }
 0x66d   : > { %v9300_v58 = vmul.f32 %v9220_v17, %v3605_v55  ;;  %v9303_v45 = vmul.f32 %v9224_v32, %v3605_v55 }
 0x66f   : > { %3786 = vrot.lane.b32.xlu0 %v3739_v3, %s6094_s25  ;;  %3778 = vrot.lane.b32.xlu1 %v3774_v53, %s6095_s5 }
 0x670   : > { %v3722_v60 = vpop.permute.xlu0 %3721 }
 0x673   : > { %3788 = vrot.lane.b32.xlu0 %v3740_v31, %s6094_s25  ;;  %3780 = vrot.lane.b32.xlu1 %v3775_v28, %s6095_s5 }
 0x674   : > { %v3839_v37 = vpop.permute.xlu0 %3838 }
 0x675   : > { %v9326_v9 = vmul.f32 %v9270_v1, %v3839_v37  ;;  %v9329_v34 = vmul.f32 %v9274_v40, %v3839_v37 }
 0x677   : > { %3801 = vrot.lane.b32.xlu0 %v3797_v25, %s6095_s5  ;;  %3803 = vrot.lane.b32.xlu1 %v3798_v27, %s6095_s5 }
 0x67b   : > { %3882 = vrot.lane.b32.xlu1 %v3877_v51, %s6094_s25  ;;  %3880 = vrot.lane.b32.xlu0 %v3876_v33, %s6094_s25 }
 0x67f   : > { %3903 = vrot.lane.b32.xlu0 %v3856_v26, %s6094_s25  ;;  %3895 = vrot.lane.b32.xlu1 %v3891_v50, %s6095_s5 }
 0x683   : > { %3905 = vrot.lane.b32.xlu0 %v3857_v61, %s6094_s25  ;;  %3897 = vrot.lane.b32.xlu1 %v3892_v18, %s6095_s5 }
 0x687   : > { %3918 = vrot.lane.b32.xlu0 %v3914_v30, %s6095_s5  ;;  %3920 = vrot.lane.b32.xlu1 %v3915_v39, %s6095_s5 }
 0x68b   : > { %3493 = vrot.lane.b32.xlu1 %v3488_v47, %s6094_s25  ;;  %3491 = vrot.lane.b32.xlu0 %v3487_v56, %s6094_s25 }
 0x68f   : > { %3508 = vrot.lane.b32.xlu1 %v9210_v29, %s6095_s5  ;;  %3506 = vrot.lane.b32.xlu0 %v9203_v42, %s6095_s5  ;;  %v9314_v42 = vmul.f32 %v9248_v59, %v3722_v60  ;;  %v9317_v29 = vmul.f32 %v9252_v2, %v3722_v60 }
 0x693   : > { %3613 = vrot.lane.b32.xlu1 %v9303_v45, %s6094_s25  ;;  %3611 = vrot.lane.b32.xlu0 %v9300_v58, %s6094_s25 }
 0x697   : > { %3628 = vrot.lane.b32.xlu1 %v9237_v48, %s6095_s5  ;;  %3626 = vrot.lane.b32.xlu0 %v9230_v11, %s6095_s5  ;;  %v3635_v11 = vpop.permute.xlu1 %3634 }
 0x698   : > { %v3638_v13 = vmul.f32 %v9224_v32, %v3635_v11 }
 0x69b   : > { %3730 = vrot.lane.b32.xlu1 %v9317_v29, %s6094_s25  ;;  %3728 = vrot.lane.b32.xlu0 %v9314_v42, %s6094_s25  ;;  %v3752_v15 = vpop.permute.xlu1 %3751 }
 0x69f   : > { %3745 = vrot.lane.b32.xlu1 %v3740_v31, %s6095_s5  ;;  %3743 = vrot.lane.b32.xlu0 %v3739_v3, %s6095_s5  ;;  %v9337_v48 = vpop.permute.xlu1 %3868 }
 0x6a3   : > { %3847 = vrot.lane.b32.xlu1 %v9329_v34, %s6094_s25  ;;  %3845 = vrot.lane.b32.xlu0 %v9326_v9, %s6094_s25 }
 0x6a7   : > { %3862 = vrot.lane.b32.xlu1 %v3857_v61, %s6095_s5  ;;  %3860 = vrot.lane.b32.xlu0 %v3856_v26, %s6095_s5  ;;  %v3637_v26 = vmul.f32 %v9220_v17, %v3635_v11  ;;  %s5688_s5 = sshll.u32 %s6242_s7, 2 }
 0x6bd   : > { %v3529_v35 = vpop.permute.xlu1 %3528  ;;  %v3527_v44 = vpop.permute.xlu0 %3526 }
 0x6be   : > { %v3532_v10 = vadd.f32 %v3527_v44, %v3517_v52  ;;  %v3533_v3 = vadd.f32 %v3529_v35, %v3518_v4 }
 0x6c1   : > { %v3542_v36 = vpop.permute.xlu1 %3541  ;;  %v3550_v46 = vpop.permute.xlu0 %3549 }
 0x6c2   : > { %v3547_v54 = vadd.f32 %v3542_v36, %v3532_v10  ;;  %v3555_v6 = vadd.f32 %v3550_v46, %v3487_v56  ;;  %v3754_v10 = vmul.f32 %v9248_v59, %v3752_v15 }
 0x6c4   : > { %3574 = vrot.lane.b32.xlu0 %v3547_v54, %s6096_s27 }
 0x6c5   : > { %v3544_v53 = vpop.permute.xlu1 %3543  ;;  %v3552_v31 = vpop.permute.xlu0 %3551 }
 0x6c6   : > { %v3548_v28 = vadd.f32 %v3544_v53, %v3533_v3  ;;  %v3556_v5 = vadd.f32 %v3552_v31, %v3488_v47 }
 0x6c8   : > { %3576 = vrot.lane.b32.xlu1 %v3548_v28, %s6096_s27 }
 0x6c9   : > { %v3567_v25 = vpop.permute.xlu1 %3566  ;;  %v3565_v27 = vpop.permute.xlu0 %3564 }
 0x6ca   : > { %v3571_v33 = vadd.f32 %v3567_v25, %v3556_v5  ;;  %v3570_v51 = vadd.f32 %v3565_v27, %v3555_v6 }
 0x6cc   : > { %3584 = vrot.lane.b32.xlu1 %v3571_v33, %s6097_s28  ;;  %3582 = vrot.lane.b32.xlu0 %v3570_v51, %s6097_s28  ;;  %v3871_v51 = vmul.f32 %v9270_v1, %v9337_v48 }
 0x6cd   : > { %v3649_v41 = vpop.permute.xlu1 %3648  ;;  %v3647_v23 = vpop.permute.xlu0 %3646 }
 0x6ce   : > { %v3652_v50 = vadd.f32 %v3647_v23, %v3637_v26  ;;  %v3653_v39 = vadd.f32 %v3649_v41, %v3638_v13 }
 0x6d1   : > { %v3662_v61 = vpop.permute.xlu1 %3661  ;;  %v3670_v18 = vpop.permute.xlu0 %3669 }
 0x6d2   : > { %v3667_v30 = vadd.f32 %v3662_v61, %v3652_v50  ;;  %v3675_v55 = vadd.f32 %v3670_v18, %v9300_v58  ;;  %v3755_v58 = vmul.f32 %v9252_v2, %v3752_v15  ;;  %v4103_v50 = vld [vmem:[%s10684_s16 + $0x38] sm:$0xff] }
 0x6d3   : > { %6020 = vmatprep.subr.mxu1 %v4103_v50 }
 0x6d4   : > { %3694 = vrot.lane.b32.xlu0 %v3667_v30, %s6096_s27 }
 0x6d5   : > { %v3664_v7 = vpop.permute.xlu1 %3663  ;;  %v3672_v56 = vpop.permute.xlu0 %3671 }
 0x6d6   : > { %v3668_v47 = vadd.f32 %v3664_v7, %v3653_v39  ;;  %v3676_v60 = vadd.f32 %v3672_v56, %v9303_v45 }
 0x6d8   : > { %3696 = vrot.lane.b32.xlu1 %v3668_v47, %s6096_s27 }
 0x6d9   : > { %v3687_v37 = vpop.permute.xlu1 %3686  ;;  %v3685_v19 = vpop.permute.xlu0 %3684 }
 0x6da   : > { %v3691_v35 = vadd.f32 %v3687_v37, %v3676_v60  ;;  %v3690_v44 = vadd.f32 %v3685_v19, %v3675_v55 }
 0x6dc   : > { %3704 = vrot.lane.b32.xlu1 %v3691_v35, %s6097_s28  ;;  %3702 = vrot.lane.b32.xlu0 %v3690_v44, %s6097_s28 }
 0x6dd   : > { %v3766_v11 = vpop.permute.xlu1 %3765  ;;  %v3764_v52 = vpop.permute.xlu0 %3763 }
 0x6de   : > { %v3769_v12 = vadd.f32 %v3764_v52, %v3754_v10  ;;  %v3770_v4 = vadd.f32 %v3766_v11, %v3755_v58 }
 0x6e1   : > { %v3779_v36 = vpop.permute.xlu1 %3778  ;;  %v3787_v46 = vpop.permute.xlu0 %3786 }
 0x6e2   : > { %v3784_v45 = vadd.f32 %v3779_v36, %v3769_v12  ;;  %v3792_v31 = vadd.f32 %v3787_v46, %v9314_v42 }
 0x6e4   : > { %3811 = vrot.lane.b32.xlu0 %v3784_v45, %s6096_s27 }
 0x6e5   : > { %v3781_v54 = vpop.permute.xlu1 %3780  ;;  %v3789_v3 = vpop.permute.xlu0 %3788 }
 0x6e6   : > { %v3785_v53 = vadd.f32 %v3781_v54, %v3770_v4  ;;  %v3793_v28 = vadd.f32 %v3789_v3, %v9317_v29  ;;  %v3872_v29 = vmul.f32 %v9274_v40, %v9337_v48  ;;  %v3482_v54 = vmul.f32 %v9196_v43, %v9148_v49 }
 0x6e7   : > { %v3481_v3 = vmul.f32 %v9192_v63, %v9148_v49 }
 0x6e8   : > { %3813 = vrot.lane.b32.xlu1 %v3785_v53, %s6096_s27 }
 0x6e9   : > { %v3804_v6 = vpop.permute.xlu1 %3803  ;;  %v3802_v5 = vpop.permute.xlu0 %3801 }
 0x6ea   : > { %v3808_v25 = vadd.f32 %v3804_v6, %v3793_v28  ;;  %v3807_v27 = vadd.f32 %v3802_v5, %v3792_v31 }
 0x6ec   : > { %3821 = vrot.lane.b32.xlu1 %v3808_v25, %s6097_s28  ;;  %3819 = vrot.lane.b32.xlu0 %v3807_v27, %s6097_s28 }
 0x6ed   : > { %v3883_v15 = vpop.permute.xlu1 %3882  ;;  %v3881_v33 = vpop.permute.xlu0 %3880 }
 0x6ee   : > { %v3886_v41 = vadd.f32 %v3881_v33, %v3871_v51  ;;  %v3887_v61 = vadd.f32 %v3883_v15, %v3872_v29  ;;  %v4102_v29 = vld [vmem:[%s10684_s16 + $0x30] sm:$0xff] }
 0x6f1   : > { %v3896_v23 = vpop.permute.xlu1 %3895  ;;  %v3904_v42 = vpop.permute.xlu0 %3903 }
 0x6f2   : > { %v3901_v26 = vadd.f32 %v3896_v23, %v3886_v41  ;;  %v3909_v39 = vadd.f32 %v3904_v42, %v9326_v9 }
 0x6f4   : > { %3928 = vrot.lane.b32.xlu0 %v3901_v26, %s6096_s27  ;;  %v4101_v26 = vld [vmem:[%s10684_s16 + $0x28] sm:$0xff] }
 0x6f5   : > { %v3898_v18 = vpop.permute.xlu1 %3897  ;;  %v3906_v13 = vpop.permute.xlu0 %3905 }
 0x6f6   : > { %v3902_v30 = vadd.f32 %v3898_v18, %v3887_v61  ;;  %v3910_v7 = vadd.f32 %v3906_v13, %v9329_v34  ;;  %v3601_v61 = vmul.f32 %v9220_v17, %v9155_v16 }
 0x6f8   : > { %3930 = vrot.lane.b32.xlu1 %v3902_v30, %s6096_s27 }
 0x6f9   : > { %v3921_v56 = vpop.permute.xlu1 %3920  ;;  %v3919_v48 = vpop.permute.xlu0 %3918 }
 0x6fa   : > { %v3925_v47 = vadd.f32 %v3921_v56, %v3910_v7  ;;  %v3924_v55 = vadd.f32 %v3919_v48, %v3909_v39 }
 0x6fc   : > { %3938 = vrot.lane.b32.xlu1 %v3925_v47, %s6097_s28  ;;  %3936 = vrot.lane.b32.xlu0 %v3924_v55, %s6097_s28  ;;  %s10742_s28 = sld [smem:[#allocation12_spill]] }
 0x6fd   : > { %v3494_v60 = vpop.permute.xlu1 %3493  ;;  %v3492_v37 = vpop.permute.xlu0 %3491 }
 0x6fe   : > { %v3498_v53 = vadd.f32 %v3494_v60, %v3482_v54  ;;  %v3497_v31 = vadd.f32 %v3492_v37, %v3481_v3 }
 0x701   : > { %v3509_v19 = vpop.permute.xlu1 %3508  ;;  %v3507_v35 = vpop.permute.xlu0 %3506 }
 0x702   : > { %v3513_v5 = vadd.f32 %v3509_v19, %v3498_v53  ;;  %v3512_v25 = vadd.f32 %v3507_v35, %v3497_v31  ;;  %v3719_v35 = vmul.f32 %v9252_v2, %v9162_v62  ;;  %s722_s4 = scalar_lea.vmem %s10742_s28, %s5688_s5 }
 0x705   : > { %v3614_v44 = vpop.permute.xlu1 %3613  ;;  %v3612_v11 = vpop.permute.xlu0 %3611 }
 0x706   : > { %v3617_v18 = vadd.f32 %v3612_v11, %v3601_v61  ;;  %v4353_v61 = vld [vmem:[%s10686_s18 + $0x348] sm:$0xff] }
 0x709   : > { %v3629_v52 = vpop.permute.xlu1 %3628  ;;  %v3627_v9 = vpop.permute.xlu0 %3626 }
 0x70a   : > { %v3632_v7 = vadd.f32 %v3627_v9, %v3617_v18  ;;  %v4345_v18 = vld [vmem:[%s10686_s18 + $0x308] sm:$0xff] }
 0x70d   : > { %v3731_v10 = vpop.permute.xlu1 %3730  ;;  %v3729_v34 = vpop.permute.xlu0 %3728 }
 0x70e   : > { %v3735_v11 = vadd.f32 %v3731_v10, %v3719_v35  ;;  %v3836_v10 = vmul.f32 %v9274_v40, %v9169_v14  ;;  %v4296_v35 = vld [vmem:[%s10686_s18 + $0x180] sm:$0xff] }
 0x711   : > { %v3746_v12 = vpop.permute.xlu1 %3745  ;;  %v3744_v36 = vpop.permute.xlu0 %3743 }
 0x712   : > { %v3750_v3 = vadd.f32 %v3746_v12, %v3735_v11  ;;  %v4288_v11 = vld [vmem:[%s10686_s18 + $0x140] sm:$0xff] }
 0x715   : > { %v9379_v46 = vpop.permute.xlu1 %3847  ;;  %v9381_v58 = vpop.permute.xlu0 %3845 }
 0x716   : > { %v3852_v12 = vadd.f32 %v9379_v46, %v3836_v10  ;;  %v4355_v10 = vld [vmem:[%s10686_s18 + $0x358] sm:$0xff] }
 0x719   : > { %v9383_v45 = vpop.permute.xlu1 %3862  ;;  %v9385_v4 = vpop.permute.xlu0 %3860 }
 0x736   : > { %v3575_v28 = vpop.permute.xlu0 %3574 }
 0x737   : > { %v3589_v27 = vsel %vm3588_vm6, %v3512_v25, %v3575_v28 }
 0x73a   : > { %v3577_v6 = vpop.permute.xlu1 %3576 }
 0x73b   : > { %v3590_v15 = vsel %vm3588_vm6, %v3513_v5, %v3577_v6 }
 0x73e   : > { %v3585_v33 = vpop.permute.xlu1 %3584  ;;  %v3583_v51 = vpop.permute.xlu0 %3582 }
 0x73f   : > { %v3593_v41 = vsel %vm3591_vm7, %v3590_v15, %v3585_v33  ;;  %v3592_v23 = vsel %vm3591_vm7, %v3589_v27, %v3583_v51 }
 0x740   : > { %v3596_v49 = vsel %vm3594_vm8, %v3593_v41, %v9196_v43  ;;  %v3595_v42 = vsel %vm3594_vm8, %v3592_v23, %v9192_v63  ;;  %v4100_v43 = vld [vmem:[%s10684_s16 + $0x20] sm:$0xff]  ;;  %v3602_v63 = vmul.f32 %v9224_v32, %v9155_v16 }
 0x741   : > { %6008 = vmatprep.mubr.msk.f32.mxu1 %vm746_vm1, %v3595_v42  ;;  %v4369_v42 = vld [vmem:[%s10686_s18 + $0x3c8] sm:$0xff] }
 0x742   : > { %6009 = vmatmul.mubr.msk.f32.vlgmr.msra.gmra.mxu1 %vm746_vm1, %v3596_v49  ;;  %4418 = vmatprep.subr.mxu0 %v4369_v42  ;;  %v4299_v42 = vld [vmem:[%s10686_s18 + $0x198] sm:$0xff] }
 0x743   : > { %6021 = vmatpush3.msra.mxu1 %v4103_v50  ;;  %v3618_v50 = vadd.f32 %v3614_v44, %v3602_v63  ;;  %v3718_v44 = vmul.f32 %v9248_v59, %v9162_v62  ;;  %v4360_v63 = vld [vmem:[%s10686_s18 + $0x380] sm:$0xff] }
 0x744   : > { %6022 = vmatprep.subr.mxu1 %v4102_v29 }
 0x745   : > { %6023 = vmatpush3.msra.mxu1 %v4102_v29  ;;  %v3633_v39 = vadd.f32 %v3629_v52, %v3618_v50  ;;  %v3734_v52 = vadd.f32 %v3729_v34, %v3718_v44  ;;  %v3835_v34 = vmul.f32 %v9270_v1, %v9169_v14  ;;  %v4371_v29 = vld [vmem:[%s10686_s18 + $0x3d8] sm:$0xff]  ;;  %v4352_v50 = vld [vmem:[%s10686_s18 + $0x340] sm:$0xff]  ;;  %v4289_v44 = vld [vmem:[%s10686_s18 + $0x148] sm:$0xff] }
 0x746   : > { %6024 = vmatprep.subr.mxu1 %v4101_v26  ;;  %v3695_v13 = vpop.permute.xlu0 %3694 }
 0x747   : > { %6025 = vmatpush3.msra.mxu1 %v4101_v26  ;;  %v3708_v56 = vsel %vm3588_vm6, %v3632_v7, %v3695_v13  ;;  %v3749_v53 = vadd.f32 %v3744_v36, %v3734_v52  ;;  %v3851_v36 = vadd.f32 %v9381_v58, %v3835_v34  ;;  %v4368_v26 = vld [vmem:[%s10686_s18 + $0x3c0] sm:$0xff]  ;;  %v4329_v7 = vld [vmem:[%s10686_s18 + $0x288] sm:$0xff]  ;;  %v4354_v34 = vld [vmem:[%s10686_s18 + $0x350] sm:$0xff] }
 0x748   : > { %6026 = vmatprep.subr.mxu1 %v4100_v43  ;;  %4419 = vmatpush1.msra.mxu0 %v4368_v26  ;;  %v4344_v13 = vld [vmem:[%s10686_s18 + $0x300] sm:$0xff]  ;;  %v4281_v52 = vld [vmem:[%s10686_s18 + $0x108] sm:$0xff]  ;;  %v4291_v26 = vld [vmem:[%s10686_s18 + $0x158] sm:$0xff] }
 0x749   : > { %6027 = vmatpush3.msra.mxu1 %v4100_v43  ;;  %v4361_v43 = vld [vmem:[%s10686_s18 + $0x388] sm:$0xff] }
 0x74a   : > { %v3697_v30 = vpop.permute.xlu1 %3696  ;;  %4420 = vmatprep.subr.mxu0 %v4361_v43  ;;  %v4290_v43 = vld [vmem:[%s10686_s18 + $0x150] sm:$0xff] }
 0x74b   : > { %v3709_v48 = vsel %vm3588_vm6, %v3633_v39, %v3697_v30  ;;  %4421 = vmatpush1.msra.mxu0 %v4360_v63  ;;  %v4337_v30 = vld [vmem:[%s10686_s18 + $0x2c8] sm:$0xff]  ;;  %v4336_v39 = vld [vmem:[%s10686_s18 + $0x2c0] sm:$0xff]  ;;  %v4283_v63 = vld [vmem:[%s10686_s18 + $0x118] sm:$0xff] }
 0x74c   : > { %4422 = vmatprep.subr.mxu0 %v4353_v61  ;;  %v4282_v61 = vld [vmem:[%s10686_s18 + $0x110] sm:$0xff] }
 0x74d   : > { %4423 = vmatpush1.msra.mxu0 %v4352_v50  ;;  %v4275_v50 = vld [vmem:[%s10686_s18 + $0xd8] sm:$0xff] }
 0x74e   : > { %v3705_v47 = vpop.permute.xlu1 %3704  ;;  %v3703_v55 = vpop.permute.xlu0 %3702  ;;  %4424 = vmatprep.subr.mxu0 %v4345_v18 }
 0x74f   : > { %v3711_v60 = vsel %vm3591_vm7, %v3709_v48, %v3705_v47  ;;  %v3710_v37 = vsel %vm3591_vm7, %v3708_v56, %v3703_v55  ;;  %4425 = vmatpush1.msra.mxu0 %v4344_v13  ;;  %v4328_v56 = vld [vmem:[%s10686_s18 + $0x280] sm:$0xff]  ;;  %v4321_v48 = vld [vmem:[%s10686_s18 + $0x248] sm:$0xff] }
 0x750   : > { %v3712_v16 = vsel %vm3594_vm8, %v3710_v37, %v9220_v17  ;;  %v3713_v19 = vsel %vm3594_vm8, %v3711_v60, %v9224_v32  ;;  %4426 = vmatprep.subr.mxu0 %v4337_v30  ;;  %v4320_v47 = vld [vmem:[%s10686_s18 + $0x240] sm:$0xff]  ;;  %v4313_v55 = vld [vmem:[%s10686_s18 + $0x208] sm:$0xff] }
 0x751   : > { %6011 = vmatprep.mubr.msk.f32.mxu1 %vm746_vm1, %v3712_v16  ;;  %4427 = vmatpush1.msra.mxu0 %v4336_v39  ;;  %v4312_v60 = vld [vmem:[%s10686_s18 + $0x200] sm:$0xff]  ;;  %v4305_v37 = vld [vmem:[%s10686_s18 + $0x1c8] sm:$0xff] }
 0x752   : > { %6012 = vmatmul.mubr.msk.f32.gmra.mxu1 %vm746_vm1, %v3713_v19  ;;  %4428 = vmatprep.subr.mxu0 %v4329_v7  ;;  %v4304_v16 = vld [vmem:[%s10686_s18 + $0x1c0] sm:$0xff]  ;;  %v4297_v19 = vld [vmem:[%s10686_s18 + $0x188] sm:$0xff] }
 0x753   : > { %4429 = vmatpush1.msra.mxu0 %v4328_v56 }
 0x754   : > { %4430 = vmatprep.subr.mxu0 %v4321_v48 }
 0x755   : > { %4431 = vmatpush1.msra.mxu0 %v4320_v47 }
 0x756   : > { %v3812_v9 = vpop.permute.xlu0 %3811  ;;  %4432 = vmatprep.subr.mxu0 %v4313_v55 }
 0x757   : > { %v3825_v17 = vsel %vm3588_vm6, %v3749_v53, %v3812_v9  ;;  %4433 = vmatpush1.msra.mxu0 %v4312_v60  ;;  %v4280_v9 = vld [vmem:[%s10686_s18 + $0x100] sm:$0xff] }
 0x758   : > { %4434 = vmatprep.subr.mxu0 %v4305_v37 }
 0x759   : > { %4435 = vmatpush1.msra.mxu0 %v4304_v16 }
 0x75a   : > { %v3814_v54 = vpop.permute.xlu1 %3813  ;;  %4436 = vmatprep.subr.mxu0 %v4297_v19  ;;  %v4272_v19 = vld [vmem:[%s10686_s18 + $0xc0] sm:$0xff] }
 0x75b   : > { %v3826_v32 = vsel %vm3588_vm6, %v3750_v3, %v3814_v54  ;;  %4437 = vmatpush1.msra.mxu0 %v4296_v35  ;;  %v4273_v54 = vld [vmem:[%s10686_s18 + $0xc8] sm:$0xff]  ;;  %v9549_v3 = vld [vmem:[%s10683_s15] ss:$0 sm:$0xff]  ;;  %v4274_v35 = vld [vmem:[%s10686_s18 + $0xd0] sm:$0xff] }
 0x75c   : > { %4438 = vmatprep.subr.mxu0 %v4289_v44  ;;  %v4265_v44 = vld [vmem:[%s10686_s18 + $0x88] sm:$0xff] }
 0x75d   : > { %4439 = vmatpush1.msra.mxu0 %v4288_v11  ;;  %v4267_v11 = vld [vmem:[%s10686_s18 + $0x98] sm:$0xff] }
 0x75e   : > { %v3822_v31 = vpop.permute.xlu1 %3821  ;;  %v3820_v28 = vpop.permute.xlu0 %3819  ;;  %4440 = vmatprep.subr.mxu0 %v4281_v52  ;;  %v4264_v52 = vld [vmem:[%s10686_s18 + $0x80] sm:$0xff] }
 0x75f   : > { %v3828_v6 = vsel %vm3591_vm7, %v3826_v32, %v3822_v31  ;;  %v3827_v5 = vsel %vm3591_vm7, %v3825_v17, %v3820_v28  ;;  %4441 = vmatpush1.msra.mxu0 %v4280_v9  ;;  %v4266_v9 = vld [vmem:[%s10686_s18 + $0x90] sm:$0xff] }
 0x760   : > { %v3829_v25 = vsel %vm3594_vm8, %v3827_v5, %v9248_v59  ;;  %v3830_v62 = vsel %vm3594_vm8, %v3828_v6, %v9252_v2  ;;  %v3867_v59 = vadd.f32 %v9383_v45, %v3852_v12  ;;  %v3866_v2 = vadd.f32 %v9385_v4, %v3851_v36  ;;  %v4099_v45 = vld [vmem:[%s10684_s16 + $0x18] sm:$0xff]  ;;  %v4098_v4 = vld [vmem:[%s10684_s16 + $0x10] sm:$0xff]  ;;  %4442 = vmatprep.subr.mxu0 %v4273_v54  ;;  %v4257_v54 = vld [vmem:[%s10686_s18 + $0x48] sm:$0xff] }
 0x761   : > { %6014 = vmatprep.mubr.msk.f32.mxu1 %vm746_vm1, %v3829_v25  ;;  %6028 = vmatprep.subr.mxu1 %v4099_v45  ;;  %v4370_v5 = vld [vmem:[%s10686_s18 + $0x3d0] sm:$0xff]  ;;  %v4363_v25 = vld [vmem:[%s10686_s18 + $0x398] sm:$0xff] }
 0x762   : > { %6015 = vmatmul.mubr.msk.f32.gmra.mxu1 %vm746_vm1, %v3830_v62  ;;  %v4362_v62 = vld [vmem:[%s10686_s18 + $0x390] sm:$0xff]  ;;  %v4347_v12 = vld [vmem:[%s10686_s18 + $0x318] sm:$0xff]  ;;  %4443 = vmatpush1.msra.mxu0 %v4272_v19 }
 0x763   : > { %6029 = vmatpush3.msra.mxu1 %v4099_v45  ;;  %v4346_v36 = vld [vmem:[%s10686_s18 + $0x310] sm:$0xff]  ;;  %4444 = vmatprep.subr.mxu0 %v4265_v44 }
 0x764   : > { %6030 = vmatprep.subr.mxu1 %v4098_v4  ;;  %4445 = vmatpush1.msra.mxu0 %v4264_v52  ;;  %v4318_v44 = vld [vmem:[%s10686_s18 + $0x230] sm:$0xff]  ;;  %v4311_v52 = vld [vmem:[%s10686_s18 + $0x1f8] sm:$0xff] }
 0x765   : > { %6031 = vmatpush3.msra.mxu1 %v4098_v4  ;;  %v4307_v4 = vld [vmem:[%s10686_s18 + $0x1d8] sm:$0xff]  ;;  %4446 = vmatprep.subr.mxu0 %v4257_v54  ;;  %v4310_v54 = vld [vmem:[%s10686_s18 + $0x1f0] sm:$0xff] }
 0x766   : > { %v3929_v27 = vpop.permute.xlu0 %3928 }
 0x767   : > { %v3942_v33 = vsel %vm3588_vm6, %v3866_v2, %v3929_v27  ;;  %v4339_v27 = vld [vmem:[%s10686_s18 + $0x2d8] sm:$0xff] }
 0x76a   : > { %v3931_v15 = vpop.permute.xlu1 %3930 }
 0x76b   : > { %v3943_v51 = vsel %vm3588_vm6, %v3867_v59, %v3931_v15  ;;  %v4338_v15 = vld [vmem:[%s10686_s18 + $0x2d0] sm:$0xff]  ;;  %v4331_v59 = vld [vmem:[%s10686_s18 + $0x298] sm:$0xff] }
 0x76e   : > { %v3939_v41 = vpop.permute.xlu1 %3938  ;;  %v3937_v23 = vpop.permute.xlu0 %3936 }
 0x76f   : > { %v3945_v49 = vsel %vm3591_vm7, %v3943_v51, %v3939_v41  ;;  %v3944_v14 = vsel %vm3591_vm7, %v3942_v33, %v3937_v23  ;;  %v4330_v33 = vld [vmem:[%s10686_s18 + $0x290] sm:$0xff]  ;;  %v4323_v51 = vld [vmem:[%s10686_s18 + $0x258] sm:$0xff] }
 0x770   : > { %v3946_v46 = vsel %vm3594_vm8, %v3944_v14, %v9270_v1  ;;  %v3947_v58 = vsel %vm3594_vm8, %v3945_v49, %v9274_v40  ;;  %v4097_v1 = vld [vmem:[%s10684_s16 + $0x8] sm:$0xff]  ;;  %v4096_v40 = vld [vmem:[%s10684_s16] sm:$0xff]  ;;  %v4322_v49 = vld [vmem:[%s10686_s18 + $0x250] sm:$0xff] }
 0x771   : > { %6017 = vmatprep.mubr.msk.f32.mxu1 %vm746_vm1, %v3946_v46  ;;  %6032 = vmatprep.subr.mxu1 %v4097_v1  ;;  %v4315_v46 = vld [vmem:[%s10686_s18 + $0x218] sm:$0xff] }
 0x772   : > { %6018 = vmatmul.mubr.msk.f32.gmra.mxu1 %vm746_vm1, %v3947_v58  ;;  %v4314_v58 = vld [vmem:[%s10686_s18 + $0x210] sm:$0xff] }
 0x773   : > { %6033 = vmatpush3.msra.mxu1 %v4097_v1 }
 0x774   : > { %6034 = vmatprep.subr.mxu1 %v4096_v40 }
 0x775   : > { %6035 = vmatpush3.msra.mxu1 %v4096_v40  ;;  %v4306_v40 = vld [vmem:[%s10686_s18 + $0x1d0] sm:$0xff] }
 0x776   : > { %4531 = vmatprep.subr.mxu1 %v4371_v29  ;;  %v4298_v29 = vld [vmem:[%s10686_s18 + $0x190] sm:$0xff] }
 0x802   : > { %v6010_v53 = vpop.f32.mrf.mxu1 }
 0x803   : > { %v4055_v17 = vadd.f32 %v6010_v53, %v9549_v3  ;;  %v4256_v53 = vld [vmem:[%s10686_s18 + $0x40] sm:$0xff] }
 0x804   : > { %v4049_v32 = vpop.f32.mrf.mxu1  ;;  %4447 = vmatpush1.msra.mxu0 %v4256_v53  ;;  %v4303_v53 = vld [vmem:[%s10686_s18 + $0x1b8] sm:$0xff] }
 0x805   : > { %v4050_v31 = vadd.f32 %v9549_v3, %v4049_v32  ;;  %v4089_v6 = vmax.f32 %v4055_v17, 0.0  ;;  %v4258_v17 = vld [vmem:[%s10686_s18 + $0x50] sm:$0xff]  ;;  %v4249_v32 = vld [vmem:[%s10686_s18 + $0x8] sm:$0xff] }
 0x806   : > { %4448 = vmatprep.subr.mxu0 %v4249_v32  ;;  %v4302_v32 = vld [vmem:[%s10686_s18 + $0x1b0] sm:$0xff] }
 0x807   : > { %v4088_v28 = vmax.f32 %v4050_v31, 0.0  ;;  %v4251_v31 = vld [vmem:[%s10686_s18 + $0x18] sm:$0xff] }
 0x809   : > { %6036 = vmatprep.mubr.msk.f32.mxu1 %vm903_vm2, %v4088_v28  ;;  %v4248_v28 = vld [vmem:[%s10686_s18] sm:$0xff] }
 0x80a   : > { %6037 = vmatmul.mubr.msk.f32.vlgmr.msra.gmra.mxu1 %vm903_vm2, %v4089_v6  ;;  %v4250_v6 = vld [vmem:[%s10686_s18 + $0x10] sm:$0xff]  ;;  %4449 = vmatpush1.msra.mxu0 %v4248_v28  ;;  %v4295_v28 = vld [vmem:[%s10686_s18 + $0x178] sm:$0xff] }
 0x80b   : > { %4532 = vmatpush1.msra.mxu1 %v4370_v5  ;;  %v4373_v5 = vld [vmem:[%s10686_s18 + $0x3e8] sm:$0xff] }
 0x80c   : > { %4533 = vmatprep.subr.mxu1 %v4363_v25  ;;  %v4375_v25 = vld [vmem:[%s10686_s18 + $0x3f8] sm:$0xff]  ;;  %4644 = vmatprep.subr.mxu0 %v4373_v5  ;;  %v4292_v5 = vld [vmem:[%s10686_s18 + $0x160] sm:$0xff] }
 0x80d   : > { %4534 = vmatpush1.msra.mxu1 %v4362_v62 }
 0x80e   : > { %4535 = vmatprep.subr.mxu1 %v4355_v10  ;;  %v9691_v10 = vld [vmem:[%s10685_s17] ss:$0 sm:$0xff] }
 0x80f   : > { %4536 = vmatpush1.msra.mxu1 %v4354_v34 }
 0x810   : > { %4537 = vmatprep.subr.mxu1 %v4347_v12 }
 0x811   : > { %4538 = vmatpush1.msra.mxu1 %v4346_v36 }
 0x812   : > { %v6013_v2 = vpop.f32.mrf.mxu1  ;;  %4539 = vmatprep.subr.mxu1 %v4339_v27 }
 0x813   : > { %4540 = vmatpush1.msra.mxu1 %v4338_v15  ;;  %v4065_v41 = vadd.f32 %v6013_v2, %v9549_v3  ;;  %v4372_v15 = vld [vmem:[%s10686_s18 + $0x3e0] sm:$0xff]  ;;  %v4365_v2 = vld [vmem:[%s10686_s18 + $0x3a8] sm:$0xff] }
 0x814   : > { %v4059_v23 = vpop.f32.mrf.mxu1  ;;  %4541 = vmatprep.subr.mxu1 %v4331_v59  ;;  %v4374_v59 = vld [vmem:[%s10686_s18 + $0x3f0] sm:$0xff] }
 0x815   : > { %v4060_v14 = vadd.f32 %v9549_v3, %v4059_v23  ;;  %4542 = vmatpush1.msra.mxu1 %v4330_v33  ;;  %v4091_v1 = vmax.f32 %v4065_v41, 0.0  ;;  %v4367_v33 = vld [vmem:[%s10686_s18 + $0x3b8] sm:$0xff]  ;;  %v4364_v41 = vld [vmem:[%s10686_s18 + $0x3a0] sm:$0xff]  ;;  %v4366_v23 = vld [vmem:[%s10686_s18 + $0x3b0] sm:$0xff] }
 0x816   : > { %4543 = vmatprep.subr.mxu1 %v4323_v51 }
 0x817   : > { %v4090_v45 = vmax.f32 %v4060_v14, 0.0  ;;  %4544 = vmatpush1.msra.mxu1 %v4322_v49  ;;  %v4357_v49 = vld [vmem:[%s10686_s18 + $0x368] sm:$0xff]  ;;  %v4359_v14 = vld [vmem:[%s10686_s18 + $0x378] sm:$0xff] }
 0x818   : > { %4545 = vmatprep.subr.mxu1 %v4315_v46  ;;  %v4356_v46 = vld [vmem:[%s10686_s18 + $0x360] sm:$0xff] }
 0x819   : > { %6039 = vmatprep.mubr.msk.f32.mxu1 %vm903_vm2, %v4090_v45  ;;  %4546 = vmatpush1.msra.mxu1 %v4314_v58  ;;  %v4358_v58 = vld [vmem:[%s10686_s18 + $0x370] sm:$0xff]  ;;  %v4349_v45 = vld [vmem:[%s10686_s18 + $0x328] sm:$0xff] }
 0x81a   : > { %6040 = vmatmul.mubr.msk.f32.gmra.mxu1 %vm903_vm2, %v4091_v1  ;;  %4547 = vmatprep.subr.mxu1 %v4307_v4  ;;  %v4351_v4 = vld [vmem:[%s10686_s18 + $0x338] sm:$0xff]  ;;  %v4348_v1 = vld [vmem:[%s10686_s18 + $0x320] sm:$0xff] }
 0x81b   : > { %4548 = vmatpush1.msra.mxu1 %v4306_v40  ;;  %v4350_v40 = vld [vmem:[%s10686_s18 + $0x330] sm:$0xff] }
 0x81c   : > { %4549 = vmatprep.subr.mxu1 %v4299_v42  ;;  %v4341_v42 = vld [vmem:[%s10686_s18 + $0x2e8] sm:$0xff] }
 0x81d   : > { %4550 = vmatpush1.msra.mxu1 %v4298_v29  ;;  %v4343_v29 = vld [vmem:[%s10686_s18 + $0x2f8] sm:$0xff] }
 0x81e   : > { %4551 = vmatprep.subr.mxu1 %v4291_v26 }
 0x81f   : > { %4552 = vmatpush1.msra.mxu1 %v4290_v43  ;;  %v4340_v43 = vld [vmem:[%s10686_s18 + $0x2e0] sm:$0xff] }
 0x820   : > { %4553 = vmatprep.subr.mxu1 %v4283_v63  ;;  %v4342_v63 = vld [vmem:[%s10686_s18 + $0x2f0] sm:$0xff] }
 0x821   : > { %4554 = vmatpush1.msra.mxu1 %v4282_v61  ;;  %v4333_v61 = vld [vmem:[%s10686_s18 + $0x2a8] sm:$0xff] }
 0x822   : > { %v6016_v18 = vpop.f32.mrf.mxu1  ;;  %4555 = vmatprep.subr.mxu1 %v4275_v50  ;;  %v4335_v50 = vld [vmem:[%s10686_s18 + $0x2b8] sm:$0xff] }
 0x823   : > { %v4075_v13 = vadd.f32 %v6016_v18, %v9549_v3  ;;  %4556 = vmatpush1.msra.mxu1 %v4274_v35  ;;  %v4316_v35 = vld [vmem:[%s10686_s18 + $0x220] sm:$0xff] }
 0x824   : > { %v4069_v30 = vpop.f32.mrf.mxu1  ;;  %4557 = vmatprep.subr.mxu1 %v4267_v11  ;;  %v4309_v11 = vld [vmem:[%s10686_s18 + $0x1e8] sm:$0xff] }
 0x825   : > { %v4070_v39 = vadd.f32 %v9549_v3, %v4069_v30  ;;  %v4093_v56 = vmax.f32 %v4075_v13, 0.0  ;;  %4558 = vmatpush1.msra.mxu1 %v4266_v9  ;;  %v4332_v13 = vld [vmem:[%s10686_s18 + $0x2a0] sm:$0xff]  ;;  %v4334_v30 = vld [vmem:[%s10686_s18 + $0x2b0] sm:$0xff] }
 0x826   : > { %v4308_v9 = vld [vmem:[%s10686_s18 + $0x1e0] sm:$0xff] }
 0x827   : > { %v4092_v7 = vmax.f32 %v4070_v39, 0.0 }
 0x829   : > { %6042 = vmatprep.mubr.msk.f32.mxu1 %vm903_vm2, %v4092_v7  ;;  %v4325_v7 = vld [vmem:[%s10686_s18 + $0x268] sm:$0xff] }
 0x82a   : > { %6043 = vmatmul.mubr.msk.f32.gmra.mxu1 %vm903_vm2, %v4093_v56  ;;  %v4327_v56 = vld [vmem:[%s10686_s18 + $0x278] sm:$0xff] }
 0x832   : > { %v6019_v48 = vpop.f32.mrf.mxu1 }
 0x833   : > { %v4085_v47 = vadd.f32 %v6019_v48, %v9549_v3 }
 0x834   : > { %v4079_v55 = vpop.f32.mrf.mxu1 }
 0x835   : > { %v4080_v60 = vadd.f32 %v9549_v3, %v4079_v55  ;;  %v4095_v16 = vmax.f32 %v4085_v47, 0.0  ;;  %v4259_v3 = vld [vmem:[%s10686_s18 + $0x58] sm:$0xff]  ;;  %v4324_v55 = vld [vmem:[%s10686_s18 + $0x260] sm:$0xff] }
 0x836   : > { %4559 = vmatprep.subr.mxu1 %v4259_v3  ;;  %v4301_v3 = vld [vmem:[%s10686_s18 + $0x1a8] sm:$0xff] }
 0x837   : > { %v4094_v37 = vmax.f32 %v4080_v60, 0.0  ;;  %4560 = vmatpush1.msra.mxu1 %v4258_v17  ;;  %v4326_v60 = vld [vmem:[%s10686_s18 + $0x270] sm:$0xff]  ;;  %v4300_v17 = vld [vmem:[%s10686_s18 + $0x1a0] sm:$0xff] }
 0x838   : > { %4561 = vmatprep.subr.mxu1 %v4251_v31  ;;  %v4293_v31 = vld [vmem:[%s10686_s18 + $0x168] sm:$0xff] }
 0x839   : > { %6045 = vmatprep.mubr.msk.f32.mxu1 %vm903_vm2, %v4094_v37  ;;  %4562 = vmatpush1.msra.mxu1 %v4250_v6  ;;  %v4317_v37 = vld [vmem:[%s10686_s18 + $0x228] sm:$0xff] }
 0x83a   : > { %6046 = vmatmul.mubr.msk.f32.gmra.mxu1 %vm903_vm2, %v4095_v16  ;;  %4757 = vmatprep.subr.mxu1 %v4375_v25  ;;  %v4319_v16 = vld [vmem:[%s10686_s18 + $0x238] sm:$0xff]  ;;  %v4294_v25 = vld [vmem:[%s10686_s18 + $0x170] sm:$0xff] }
 0x83b   : > { %4595 = vmatprep.mubr.f32.mxu1 %v10739_v24 }
 0x8ca   : > { %v6038_v62 = vpop.f32.mrf.mxu1 }
 0x8cb   : > { %v4207_v36 = vadd.f32 %v6038_v62, %v9691_v10  ;;  %v4285_v62 = vld [vmem:[%s10686_s18 + $0x128] sm:$0xff] }
 0x8cc   : > { %v4201_v34 = vpop.f32.mrf.mxu1 }
 0x8cd   : > { %v4202_v12 = vadd.f32 %v9691_v10, %v4201_v34  ;;  %v9713_v51 = vmax.f32 %v4207_v36, 0.0  ;;  %v4287_v34 = vld [vmem:[%s10686_s18 + $0x138] sm:$0xff]  ;;  %v4284_v36 = vld [vmem:[%s10686_s18 + $0x120] sm:$0xff] }
 0x8cf   : > { %v9695_v27 = vmax.f32 %v4202_v12, 0.0 }
 0x8d1   : > { %4483 = vmatmul.mubr.f32.vlgmr.msra.gmra.mxu0 %v9695_v27  ;;  %4596 = vmatmul.mubr.f32.vlgmr.msra.gmra.mxu1 %v9695_v27 }
 0x8d2   : > { %4488 = vmatprep.mubr.f32.mxu0 %v10739_v24  ;;  %4601 = vmatprep.mubr.f32.mxu1 %v10739_v24 }
 0x8d3   : > { %4645 = vmatpush1.msra.mxu0 %v4372_v15  ;;  %4758 = vmatpush1.msra.mxu1 %v4374_v59  ;;  %v4286_v15 = vld [vmem:[%s10686_s18 + $0x130] sm:$0xff] }
 0x8d4   : > { %4646 = vmatprep.subr.mxu0 %v4365_v2  ;;  %4759 = vmatprep.subr.mxu1 %v4367_v33  ;;  %v4277_v2 = vld [vmem:[%s10686_s18 + $0xe8] sm:$0xff]  ;;  %v4279_v33 = vld [vmem:[%s10686_s18 + $0xf8] sm:$0xff] }
 0x8d5   : > { %4489 = vmatmul.mubr.f32.gmra.mxu0 %v9713_v51  ;;  %4602 = vmatmul.mubr.f32.gmra.mxu1 %v9713_v51 }
 0x8d6   : > { %4494 = vmatprep.mubr.f32.mxu0 %v10739_v24  ;;  %4607 = vmatprep.mubr.f32.mxu1 %v10739_v24 }
 0x8d7   : > { %4647 = vmatpush1.msra.mxu0 %v4364_v41  ;;  %4760 = vmatpush1.msra.mxu1 %v4366_v23 }
 0x8d8   : > { %4648 = vmatprep.subr.mxu0 %v4357_v49  ;;  %4761 = vmatprep.subr.mxu1 %v4359_v14  ;;  %v4276_v49 = vld [vmem:[%s10686_s18 + $0xe0] sm:$0xff]  ;;  %v4278_v14 = vld [vmem:[%s10686_s18 + $0xf0] sm:$0xff] }
 0x8d9   : > { %4649 = vmatpush1.msra.mxu0 %v4356_v46  ;;  %4762 = vmatpush1.msra.mxu1 %v4358_v58  ;;  %v4269_v46 = vld [vmem:[%s10686_s18 + $0xa8] sm:$0xff]  ;;  %v4271_v58 = vld [vmem:[%s10686_s18 + $0xb8] sm:$0xff] }
 0x8da   : > { %v6041_v26 = vpop.f32.mrf.mxu1  ;;  %4650 = vmatprep.subr.mxu0 %v4349_v45  ;;  %4763 = vmatprep.subr.mxu1 %v4351_v4  ;;  %v4268_v4 = vld [vmem:[%s10686_s18 + $0xa0] sm:$0xff] }
 0x8db   : > { %4651 = vmatpush1.msra.mxu0 %v4348_v1  ;;  %4764 = vmatpush1.msra.mxu1 %v4350_v40  ;;  %v4217_v48 = vadd.f32 %v6041_v26, %v9691_v10  ;;  %v4270_v1 = vld [vmem:[%s10686_s18 + $0xb0] sm:$0xff]  ;;  %v4261_v40 = vld [vmem:[%s10686_s18 + $0x68] sm:$0xff] }
 0x8dc   : > { %v4211_v18 = vpop.f32.mrf.mxu1  ;;  %4652 = vmatprep.subr.mxu0 %v4341_v42  ;;  %4765 = vmatprep.subr.mxu1 %v4343_v29  ;;  %v4263_v42 = vld [vmem:[%s10686_s18 + $0x78] sm:$0xff]  ;;  %v4260_v29 = vld [vmem:[%s10686_s18 + $0x60] sm:$0xff]  ;;  %v4262_v26 = vld [vmem:[%s10686_s18 + $0x70] sm:$0xff] }
 0x8dd   : > { %v4212_v39 = vadd.f32 %v9691_v10, %v4211_v18  ;;  %4653 = vmatpush1.msra.mxu0 %v4340_v43  ;;  %4766 = vmatpush1.msra.mxu1 %v4342_v63  ;;  %v9799_v19 = vmax.f32 %v4217_v48, 0.0  ;;  %v4253_v43 = vld [vmem:[%s10686_s18 + $0x28] sm:$0xff]  ;;  %v4255_v63 = vld [vmem:[%s10686_s18 + $0x38] sm:$0xff] }
 0x8de   : > { %4654 = vmatprep.subr.mxu0 %v4333_v61  ;;  %4767 = vmatprep.subr.mxu1 %v4335_v50  ;;  %v4252_v61 = vld [vmem:[%s10686_s18 + $0x20] sm:$0xff]  ;;  %v4254_v50 = vld [vmem:[%s10686_s18 + $0x30] sm:$0xff]  ;;  %v5167_v48 = vld [vmem:[%s10689_s21 + $0x178] sm:$0xff] }
 0x8df   : > { %v9781_v47 = vmax.f32 %v4212_v39, 0.0  ;;  %4655 = vmatpush1.msra.mxu0 %v4332_v13  ;;  %4768 = vmatpush1.msra.mxu1 %v4334_v30 }
 0x8e0   : > { %4656 = vmatprep.subr.mxu0 %v4325_v7  ;;  %4769 = vmatprep.subr.mxu1 %v4327_v56 }
 0x8e1   : > { %4495 = vmatmul.mubr.f32.gmra.mxu0 %v9781_v47  ;;  %4608 = vmatmul.mubr.f32.gmra.mxu1 %v9781_v47 }
 0x8e2   : > { %4500 = vmatprep.mubr.f32.mxu0 %v10739_v24  ;;  %4613 = vmatprep.mubr.f32.mxu1 %v10739_v24 }
 0x8e3   : > { %4657 = vmatpush1.msra.mxu0 %v4324_v55  ;;  %4770 = vmatpush1.msra.mxu1 %v4326_v60  ;;  %v5182_v55 = vld [vmem:[%s10689_s21 + $0x1f0] sm:$0xff] }
 0x8e4   : > { %4658 = vmatprep.subr.mxu0 %v4317_v37  ;;  %4771 = vmatprep.subr.mxu1 %v4319_v16  ;;  %v5134_v60 = vld [vmem:[%s10689_s21 + $0x70] sm:$0xff]  ;;  %v5149_v16 = vld [vmem:[%s10689_s21 + $0xe8] sm:$0xff] }
 0x8e5   : > { %4501 = vmatmul.mubr.f32.gmra.mxu0 %v9799_v19  ;;  %4614 = vmatmul.mubr.f32.gmra.mxu1 %v9799_v19  ;;  %v5166_v37 = vld [vmem:[%s10689_s21 + $0x170] sm:$0xff] }
 0x8e6   : > { %4506 = vmatprep.mubr.f32.mxu0 %v10739_v24  ;;  %4619 = vmatprep.mubr.f32.mxu1 %v10739_v24 }
 0x8e7   : > { %4659 = vmatpush1.msra.mxu0 %v4316_v35  ;;  %4772 = vmatpush1.msra.mxu1 %v4318_v44  ;;  %v5133_v35 = vld [vmem:[%s10689_s21 + $0x68] sm:$0xff] }
 0x8e8   : > { %4660 = vmatprep.subr.mxu0 %v4309_v11  ;;  %4773 = vmatprep.subr.mxu1 %v4311_v52  ;;  %v5165_v44 = vld [vmem:[%s10689_s21 + $0x168] sm:$0xff]  ;;  %v5148_v11 = vld [vmem:[%s10689_s21 + $0xe0] sm:$0xff] }
 0x8e9   : > { %4661 = vmatpush1.msra.mxu0 %v4308_v9  ;;  %4774 = vmatpush1.msra.mxu1 %v4310_v54  ;;  %v5180_v52 = vld [vmem:[%s10689_s21 + $0x1e0] sm:$0xff] }
 0x8ea   : > { %v6044_v6 = vpop.f32.mrf.mxu1  ;;  %4662 = vmatprep.subr.mxu0 %v4301_v3  ;;  %4775 = vmatprep.subr.mxu1 %v4303_v53  ;;  %v5132_v9 = vld [vmem:[%s10689_s21 + $0x60] sm:$0xff]  ;;  %v5147_v3 = vld [vmem:[%s10689_s21 + $0xd8] sm:$0xff] }
 0x8eb   : > { %4663 = vmatpush1.msra.mxu0 %v4300_v17  ;;  %4776 = vmatpush1.msra.mxu1 %v4302_v32  ;;  %v4227_v41 = vadd.f32 %v6044_v6, %v9691_v10  ;;  %v5164_v54 = vld [vmem:[%s10689_s21 + $0x160] sm:$0xff]  ;;  %v5179_v53 = vld [vmem:[%s10689_s21 + $0x1d8] sm:$0xff]  ;;  %v5130_v6 = vld [vmem:[%s10689_s21 + $0x50] sm:$0xff] }
 0x8ec   : > { %v4221_v12 = vpop.f32.mrf.mxu1  ;;  %4664 = vmatprep.subr.mxu0 %v4293_v31  ;;  %4777 = vmatprep.subr.mxu1 %v4295_v28  ;;  %v5131_v17 = vld [vmem:[%s10689_s21 + $0x58] sm:$0xff]  ;;  %v5146_v31 = vld [vmem:[%s10689_s21 + $0xd0] sm:$0xff] }
 0x8ed   : > { %v4222_v59 = vadd.f32 %v9691_v10, %v4221_v12  ;;  %4665 = vmatpush1.msra.mxu0 %v4292_v5  ;;  %4778 = vmatpush1.msra.mxu1 %v4294_v25  ;;  %v9885_v45 = vmax.f32 %v4227_v41, 0.0  ;;  %v5163_v32 = vld [vmem:[%s10689_s21 + $0x158] sm:$0xff]  ;;  %v5178_v28 = vld [vmem:[%s10689_s21 + $0x1d0] sm:$0xff]  ;;  %v5145_v25 = vld [vmem:[%s10689_s21 + $0xc8] sm:$0xff] }
 0x8ee   : > { %4666 = vmatprep.subr.mxu0 %v4285_v62  ;;  %4779 = vmatprep.subr.mxu1 %v4287_v34  ;;  %v5162_v5 = vld [vmem:[%s10689_s21 + $0x150] sm:$0xff]  ;;  %v5177_v62 = vld [vmem:[%s10689_s21 + $0x1c8] sm:$0xff]  ;;  %v5175_v41 = vld [vmem:[%s10689_s21 + $0x1b8] sm:$0xff] }
 0x8ef   : > { %v9867_v23 = vmax.f32 %v4222_v59, 0.0  ;;  %4667 = vmatpush1.msra.mxu0 %v4284_v36  ;;  %4780 = vmatpush1.msra.mxu1 %v4286_v15  ;;  %v5129_v34 = vld [vmem:[%s10689_s21 + $0x48] sm:$0xff]  ;;  %v5144_v36 = vld [vmem:[%s10689_s21 + $0xc0] sm:$0xff] }
 0x8f0   : > { %4668 = vmatprep.subr.mxu0 %v4277_v2  ;;  %4781 = vmatprep.subr.mxu1 %v4279_v33  ;;  %v5161_v12 = vld [vmem:[%s10689_s21 + $0x148] sm:$0xff]  ;;  %v5176_v15 = vld [vmem:[%s10689_s21 + $0x1c0] sm:$0xff]  ;;  %v5143_v33 = vld [vmem:[%s10689_s21 + $0xb8] sm:$0xff] }
 0x8f1   : > { %4507 = vmatmul.mubr.f32.gmra.mxu0 %v9867_v23  ;;  %4620 = vmatmul.mubr.f32.gmra.mxu1 %v9867_v23  ;;  %v5128_v59 = vld [vmem:[%s10689_s21 + $0x40] sm:$0xff] }
 0x8f2   : > { %4512 = vmatprep.mubr.f32.mxu0 %v10739_v24  ;;  %4625 = vmatprep.mubr.f32.mxu1 %v10739_v24  ;;  %v5160_v2 = vld [vmem:[%s10689_s21 + $0x140] sm:$0xff] }
 0x8f3   : > { %4669 = vmatpush1.msra.mxu0 %v4276_v49  ;;  %4782 = vmatpush1.msra.mxu1 %v4278_v14  ;;  %v5159_v49 = vld [vmem:[%s10689_s21 + $0x138] sm:$0xff]  ;;  %v5142_v14 = vld [vmem:[%s10689_s21 + $0xb0] sm:$0xff] }
 0x8f4   : > { %4670 = vmatprep.subr.mxu0 %v4269_v46  ;;  %4783 = vmatprep.subr.mxu1 %v4271_v58  ;;  %v5174_v46 = vld [vmem:[%s10689_s21 + $0x1b0] sm:$0xff] }
 0x8f5   : > { %4513 = vmatmul.mubr.f32.gmra.mxu0 %v9885_v45  ;;  %4626 = vmatmul.mubr.f32.gmra.mxu1 %v9885_v45  ;;  %v5126_v58 = vld [vmem:[%s10689_s21 + $0x30] sm:$0xff] }
 0x8f6   : > { %4518 = vmatprep.mubr.f32.mxu0 %v10739_v24  ;;  %4631 = vmatprep.mubr.f32.mxu1 %v10739_v24 }
 0x8f7   : > { %4671 = vmatpush1.msra.mxu0 %v4268_v4  ;;  %4784 = vmatpush1.msra.mxu1 %v4270_v1  ;;  %v5141_v4 = vld [vmem:[%s10689_s21 + $0xa8] sm:$0xff] }
 0x8f8   : > { %4672 = vmatprep.subr.mxu0 %v4261_v40  ;;  %4785 = vmatprep.subr.mxu1 %v4263_v42  ;;  %v5173_v1 = vld [vmem:[%s10689_s21 + $0x1a8] sm:$0xff] }
 0x8f9   : > { %4673 = vmatpush1.msra.mxu0 %v4260_v29  ;;  %4786 = vmatpush1.msra.mxu1 %v4262_v26  ;;  %v5125_v40 = vld [vmem:[%s10689_s21 + $0x28] sm:$0xff]  ;;  %v5140_v29 = vld [vmem:[%s10689_s21 + $0xa0] sm:$0xff] }
 0x8fa   : > { %v6047_v18 = vpop.f32.mrf.mxu1  ;;  %4674 = vmatprep.subr.mxu0 %v4253_v43  ;;  %4787 = vmatprep.subr.mxu1 %v4255_v63  ;;  %v5157_v42 = vld [vmem:[%s10689_s21 + $0x128] sm:$0xff]  ;;  %v5172_v26 = vld [vmem:[%s10689_s21 + $0x1a0] sm:$0xff] }
 0x8fb   : > { %4675 = vmatpush1.msra.mxu0 %v4252_v61  ;;  %4788 = vmatpush1.msra.mxu1 %v4254_v50  ;;  %v4237_v39 = vadd.f32 %v6047_v18, %v9691_v10  ;;  %v5124_v43 = vld [vmem:[%s10689_s21 + $0x20] sm:$0xff]  ;;  %v5139_v61 = vld [vmem:[%s10689_s21 + $0x98] sm:$0xff] }
 0x8fc   : > { %v4231_v13 = vpop.f32.mrf.mxu1  ;;  %v5156_v63 = vld [vmem:[%s10689_s21 + $0x120] sm:$0xff]  ;;  %v5171_v50 = vld [vmem:[%s10689_s21 + $0x198] sm:$0xff] }
 0x8fd   : > { %v4232_v30 = vadd.f32 %v9691_v10, %v4231_v13  ;;  %v4247_v56 = vmax.f32 %v4237_v39, 0.0  ;;  %v5151_v10 = vld [vmem:[%s10689_s21 + $0xf8] sm:$0xff]  ;;  %v5170_v39 = vld [vmem:[%s10689_s21 + $0x190] sm:$0xff] }
 0x8fe   : > { %5821 = vmatprep.subr.mxu0 %v5151_v10  ;;  %v5123_v18 = vld [vmem:[%s10689_s21 + $0x18] sm:$0xff]  ;;  %v5137_v10 = vld [vmem:[%s10689_s21 + $0x88] sm:$0xff] }
 0x8ff   : > { %v4246_v7 = vmax.f32 %v4232_v30, 0.0  ;;  %v5155_v13 = vld [vmem:[%s10689_s21 + $0x118] sm:$0xff]  ;;  %v5138_v30 = vld [vmem:[%s10689_s21 + $0x90] sm:$0xff] }
 0x901   : > { %4519 = vmatmul.mubr.f32.gmra.mxu0 %v4246_v7  ;;  %4632 = vmatmul.mubr.f32.gmra.mxu1 %v4246_v7 }
 0x902   : > { %4524 = vmatprep.mubr.f32.mxu0 %v10739_v24  ;;  %4637 = vmatprep.mubr.f32.mxu1 %v10739_v24 }
 0x905   : > { %4525 = vmatmul.mubr.f32.gmra.mxu0 %v4247_v56  ;;  %4638 = vmatmul.mubr.f32.gmra.mxu1 %v4247_v56 }
 0x906   : > { %4708 = vmatprep.mubr.f32.mxu0 %v10739_v24  ;;  %4821 = vmatprep.mubr.f32.mxu1 %v10739_v24 }
 0x909   : > { %4709 = vmatmul.mubr.f32.vlgmr.msra.gmra.mxu0 %v9695_v27  ;;  %4822 = vmatmul.mubr.f32.vlgmr.msra.gmra.mxu1 %v9695_v27  ;;  %v5183_v27 = vld [vmem:[%s10689_s21 + $0x1f8] sm:$0xff] }
 0x90a   : > { %4714 = vmatprep.mubr.f32.mxu0 %v10739_v24  ;;  %4827 = vmatprep.mubr.f32.mxu1 %v10739_v24 }
 0x90b   : > { %5856 = vmatprep.subr.mxu1 %v5183_v27  ;;  %v5169_v27 = vld [vmem:[%s10689_s21 + $0x188] sm:$0xff] }
 0x90c   : > { %5857 = vmatpush3.msra.mxu1 %v5167_v48  ;;  %v5153_v48 = vld [vmem:[%s10689_s21 + $0x108] sm:$0xff] }
 0x90d   : > { %4715 = vmatmul.mubr.f32.gmra.mxu0 %v9713_v51  ;;  %4828 = vmatmul.mubr.f32.gmra.mxu1 %v9713_v51  ;;  %v5135_v51 = vld [vmem:[%s10689_s21 + $0x78] sm:$0xff] }
 0x90e   : > { %4720 = vmatprep.mubr.f32.mxu0 %v10739_v24  ;;  %4833 = vmatprep.mubr.f32.mxu1 %v10739_v24 }
 0x90f   : > { %5822 = vmatpush3.msra.mxu0 %v5135_v51  ;;  %5858 = vmatprep.subr.mxu1 %v5182_v55  ;;  %v5121_v51 = vld [vmem:[%s10689_s21 + $0x8] sm:$0xff]  ;;  %v5168_v55 = vld [vmem:[%s10689_s21 + $0x180] sm:$0xff] }
 0x910   : > { %5859 = vmatpush3.msra.mxu1 %v5166_v37  ;;  %v5152_v37 = vld [vmem:[%s10689_s21 + $0x100] sm:$0xff] }
 0x911   : > { %4721 = vmatmul.mubr.f32.gmra.mxu0 %v9781_v47  ;;  %4834 = vmatmul.mubr.f32.gmra.mxu1 %v9781_v47  ;;  %v5150_v47 = vld [vmem:[%s10689_s21 + $0xf0] sm:$0xff] }
 0x912   : > { %4726 = vmatprep.mubr.f32.mxu0 %v10739_v24  ;;  %4839 = vmatprep.mubr.f32.mxu1 %v10739_v24 }
 0x913   : > { %5823 = vmatprep.subr.mxu0 %v5150_v47  ;;  %v5136_v47 = vld [vmem:[%s10689_s21 + $0x80] sm:$0xff] }
 0x914   : > { %5824 = vmatpush3.msra.mxu0 %v5134_v60  ;;  %v5120_v60 = vld [vmem:[%s10689_s21] sm:$0xff] }
 0x915   : > { %4727 = vmatmul.mubr.f32.gmra.mxu0 %v9799_v19  ;;  %4840 = vmatmul.mubr.f32.gmra.mxu1 %v9799_v19  ;;  %v5181_v19 = vld [vmem:[%s10689_s21 + $0x1e8] sm:$0xff] }
 0x916   : > { %4732 = vmatprep.mubr.f32.mxu0 %v10739_v24  ;;  %4845 = vmatprep.mubr.f32.mxu1 %v10739_v24 }
 0x917   : > { %5825 = vmatprep.subr.mxu0 %v5149_v16  ;;  %5860 = vmatprep.subr.mxu1 %v5181_v19  ;;  %v5215_v16 = vld [vmem:[%s10689_s21 + $0x2f8] sm:$0xff] }
 0x918   : > { %5826 = vmatpush3.msra.mxu0 %v5133_v35  ;;  %5861 = vmatpush3.msra.mxu1 %v5165_v44  ;;  %v5247_v19 = vld [vmem:[%s10689_s21 + $0x3f8] sm:$0xff] }
 0x919   : > { %4733 = vmatmul.mubr.f32.gmra.mxu0 %v9867_v23  ;;  %4846 = vmatmul.mubr.f32.gmra.mxu1 %v9867_v23  ;;  %v5127_v23 = vld [vmem:[%s10689_s21 + $0x38] sm:$0xff] }
 0x91a   : > { %4738 = vmatprep.mubr.f32.mxu0 %v10739_v24  ;;  %4851 = vmatprep.mubr.f32.mxu1 %v10739_v24 }
 0x91b   : > { %5827 = vmatprep.subr.mxu0 %v5148_v11  ;;  %5862 = vmatprep.subr.mxu1 %v5180_v52 }
 0x91c   : > { %5828 = vmatpush3.msra.mxu0 %v5132_v9  ;;  %5863 = vmatpush3.msra.mxu1 %v5164_v54 }
 0x91d   : > { %4739 = vmatmul.mubr.f32.gmra.mxu0 %v9885_v45  ;;  %4852 = vmatmul.mubr.f32.gmra.mxu1 %v9885_v45  ;;  %v5158_v45 = vld [vmem:[%s10689_s21 + $0x130] sm:$0xff] }
 0x91e   : > { %4744 = vmatprep.mubr.f32.mxu0 %v10739_v24  ;;  %4857 = vmatprep.mubr.f32.mxu1 %v10739_v24 }
 0x91f   : > { %5829 = vmatprep.subr.mxu0 %v5147_v3  ;;  %5864 = vmatprep.subr.mxu1 %v5179_v53 }
 0x920   : > { %5830 = vmatpush3.msra.mxu0 %v5131_v17  ;;  %5865 = vmatpush3.msra.mxu1 %v5163_v32 }
 0x921   : > { %4745 = vmatmul.mubr.f32.gmra.mxu0 %v4246_v7  ;;  %4858 = vmatmul.mubr.f32.gmra.mxu1 %v4246_v7  ;;  %v5122_v7 = vld [vmem:[%s10689_s21 + $0x10] sm:$0xff] }
 0x922   : > { %4750 = vmatprep.mubr.f32.mxu0 %v10739_v24  ;;  %4863 = vmatprep.mubr.f32.mxu1 %v10739_v24 }
 0x923   : > { %5831 = vmatprep.subr.mxu0 %v5146_v31  ;;  %5866 = vmatprep.subr.mxu1 %v5178_v28 }
 0x924   : > { %5832 = vmatpush3.msra.mxu0 %v5130_v6  ;;  %5867 = vmatpush3.msra.mxu1 %v5162_v5 }
 0x925   : > { %4751 = vmatmul.mubr.f32.gmra.mxu0 %v4247_v56  ;;  %4864 = vmatmul.mubr.f32.gmra.mxu1 %v4247_v56  ;;  %v5154_v56 = vld [vmem:[%s10689_s21 + $0x110] sm:$0xff] }
 0x926   : > { %5833 = vmatprep.subr.mxu0 %v5145_v25  ;;  %5868 = vmatprep.subr.mxu1 %v5177_v62  ;;  %v10154_v25 = vld [vmem:[%s10687_s19] sm:$0xff] }
 0x927   : > { %5834 = vmatpush3.msra.mxu0 %v5129_v34  ;;  %5869 = vmatpush3.msra.mxu1 %v5161_v12  ;;  %v10158_v12 = vrot.slane %v10154_v25, %v10735_v8 }
 0x928   : > { %5835 = vmatprep.subr.mxu0 %v5144_v36  ;;  %5870 = vmatprep.subr.mxu1 %v5176_v15  ;;  %v10162_v36 = vrot.slane %v10154_v25, %v10737_v0  ;;  %v10166_v15 = vrot.slane %v10154_v25, %v10736_v38 }
 0x929   : > { %5836 = vmatpush3.msra.mxu0 %v5128_v59  ;;  %5871 = vmatpush3.msra.mxu1 %v5160_v2 }
 0x92a   : > { %5837 = vmatprep.subr.mxu0 %v5143_v33  ;;  %5872 = vmatprep.subr.mxu1 %v5175_v41  ;;  %v10170_v33 = vrot.slane %v10154_v25, %v10738_v20 }
 0x92b   : > { %5838 = vmatpush3.msra.mxu0 %v5127_v23  ;;  %5873 = vmatpush3.msra.mxu1 %v5159_v49 }
 0x92c   : > { %5839 = vmatprep.subr.mxu0 %v5142_v14  ;;  %5874 = vmatprep.subr.mxu1 %v5174_v46 }
 0x92d   : > { %5840 = vmatpush3.msra.mxu0 %v5126_v58  ;;  %5875 = vmatpush3.msra.mxu1 %v5158_v45 }
 0x92e   : > { %5841 = vmatprep.subr.mxu0 %v5141_v4  ;;  %5876 = vmatprep.subr.mxu1 %v5173_v1 }
 0x92f   : > { %5842 = vmatpush3.msra.mxu0 %v5125_v40  ;;  %5877 = vmatpush3.msra.mxu1 %v5157_v42 }
 0x930   : > { %5843 = vmatprep.subr.mxu0 %v5140_v29  ;;  %5878 = vmatprep.subr.mxu1 %v5172_v26 }
 0x931   : > { %5844 = vmatpush3.msra.mxu0 %v5124_v43  ;;  %5879 = vmatpush3.msra.mxu1 %v5156_v63 }
 0x932   : > { %5845 = vmatprep.subr.mxu0 %v5139_v61  ;;  %5880 = vmatprep.subr.mxu1 %v5171_v50 }
 0x933   : > { %5846 = vmatpush3.msra.mxu0 %v5123_v18  ;;  %5881 = vmatpush3.msra.mxu1 %v5155_v13 }
 0x934   : > { %5847 = vmatprep.subr.mxu0 %v5138_v30  ;;  %5882 = vmatprep.subr.mxu1 %v5170_v39 }
 0x935   : > { %5848 = vmatpush3.msra.mxu0 %v5122_v7  ;;  %5883 = vmatpush3.msra.mxu1 %v5154_v56 }
 0x936   : > { %5849 = vmatprep.subr.mxu0 %v5137_v10  ;;  %5884 = vmatprep.subr.mxu1 %v5169_v27 }
 0x937   : > { %5850 = vmatpush3.msra.mxu0 %v5121_v51  ;;  %5885 = vmatpush3.msra.mxu1 %v5153_v48 }
 0x938   : > { %5851 = vmatprep.subr.mxu0 %v5136_v47  ;;  %5886 = vmatprep.subr.mxu1 %v5168_v55 }
 0x939   : > { %5852 = vmatpush3.msra.mxu0 %v5120_v60  ;;  %5887 = vmatpush3.msra.mxu1 %v5152_v37 }
 0x93a   : > { %5891 = vmatprep.subr.mxu0 %v5215_v16  ;;  %5926 = vmatprep.subr.mxu1 %v5247_v19 }
 0x991   : > { %v4484_v35 = vpop.f32.mrf.mxu0  ;;  %v4597_v44 = vpop.f32.mrf.mxu1 }
 0x992   : > { %v4485_v0 = vadd.f32 %v4484_v35, %v10158_v12  ;;  %v4598_v46 = vadd.f32 %v4597_v44, %v10162_v36 }
 0x993   : > { %v4486_v11 = vpop.f32.mrf.mxu0  ;;  %v4599_v52 = vpop.f32.mrf.mxu1 }
 0x994   : > { %v4487_v58 = vadd.f32 %v4486_v11, %v10166_v15  ;;  %v4600_v4 = vadd.f32 %v4599_v52, %v10170_v33 }
 0x995   : > { %v4490_v9 = vpop.f32.mrf.mxu0  ;;  %v4603_v54 = vpop.f32.mrf.mxu1 }
 0x996   : > { %v4491_v41 = vadd.f32 %v4490_v9, %v10158_v12  ;;  %v4604_v23 = vadd.f32 %v4603_v54, %v10162_v36 }
 0x997   : > { %v4492_v3 = vpop.f32.mrf.mxu0  ;;  %v4605_v53 = vpop.f32.mrf.mxu1 }
 0x998   : > { %v4493_v8 = vadd.f32 %v4492_v3, %v10166_v15  ;;  %v4606_v38 = vadd.f32 %v4605_v53, %v10170_v33  ;;  %v4870_v1 = vmax.f32 %v4485_v0, %v4491_v41  ;;  %v4884_v40 = vmax.f32 %v4598_v46, %v4604_v23 }
 0x999   : > { %v10741_v46 = vsub.s32 7, %v7162_v21 }
 0x99a   : > { %v4877_v26 = vmax.f32 %v4487_v58, %v4493_v8  ;;  %v4891_v50 = vmax.f32 %v4600_v4, %v4606_v38  ;;  %v4871_v39 = vrot.slane %v4870_v1, 4  ;;  %v4885_v7 = vrot.slane %v4884_v40, 4 }
 0x99b   : > { %v10214_v38 = vrot.slane %v10154_v25, %v10741_v46 }
 0x99c   : > { %v4878_v27 = vrot.slane %v4877_v26, 4  ;;  %v4892_v47 = vrot.slane %v4891_v50, 4  ;;  %v4872_v11 = vmax.f32 %v4870_v1, %v4871_v39  ;;  %v4886_v52 = vmax.f32 %v4884_v40, %v4885_v7 }
 0x99e   : > { %v4873_v58 = vrot.slane %v4872_v11, 2 }
 0x9a0   : > { %v4874_v39 = vmax.f32 %v4872_v11, %v4873_v58 }
 0x9a1   : > { %v4496_v17 = vpop.f32.mrf.mxu0  ;;  %v4609_v32 = vpop.f32.mrf.mxu1 }
 0x9a2   : > { %v4497_v43 = vadd.f32 %v4496_v17, %v10158_v12  ;;  %v4610_v63 = vadd.f32 %v4609_v32, %v10162_v36 }
 0x9a3   : > { %v4498_v31 = vpop.f32.mrf.mxu0  ;;  %v4611_v28 = vpop.f32.mrf.mxu1 }
 0x9a4   : > { %v4499_v18 = vadd.f32 %v4498_v31, %v10166_v15  ;;  %v4612_v55 = vadd.f32 %v4611_v28, %v10170_v33  ;;  %v4879_v31 = vmax.f32 %v4877_v26, %v4878_v27  ;;  %v4893_v28 = vmax.f32 %v4891_v50, %v4892_v47 }
 0x9a5   : > { %v4502_v6 = vpop.f32.mrf.mxu0  ;;  %v4615_v5 = vpop.f32.mrf.mxu1 }
 0x9a6   : > { %v4503_v45 = vadd.f32 %v4502_v6, %v10158_v12  ;;  %v4616_v20 = vadd.f32 %v4615_v5, %v10162_v36  ;;  %v4880_v40 = vrot.slane %v4879_v31, 2 }
 0x9a7   : > { %v4504_v62 = vpop.f32.mrf.mxu0  ;;  %v4617_v34 = vpop.f32.mrf.mxu1 }
 0x9a8   : > { %v4505_v61 = vadd.f32 %v4504_v62, %v10166_v15  ;;  %v4926_v13 = vmax.f32 %v4497_v43, %v4503_v45  ;;  %v4940_v30 = vmax.f32 %v4610_v63, %v4616_v20  ;;  %v4618_v48 = vadd.f32 %v4617_v34, %v10170_v33 }
 0x9a9   : > { %v4887_v45 = vrot.slane %v4886_v52, 2 }
 0x9aa   : > { %v4933_v51 = vmax.f32 %v4499_v18, %v4505_v61  ;;  %v4927_v16 = vrot.slane %v4926_v13, 4  ;;  %v4941_v19 = vrot.slane %v4940_v30, 4  ;;  %v4947_v53 = vmax.f32 %v4612_v55, %v4618_v48 }
 0x9ab   : > { %v4888_v7 = vmax.f32 %v4886_v52, %v4887_v45 }
 0x9ac   : > { %v4934_v3 = vrot.slane %v4933_v51, 4  ;;  %v4928_v62 = vmax.f32 %v4926_v13, %v4927_v16  ;;  %v4942_v34 = vmax.f32 %v4940_v30, %v4941_v19 }
 0x9ae   : > { %v4935_v20 = vmax.f32 %v4933_v51, %v4934_v3  ;;  %v4929_v26 = vrot.slane %v4928_v62, 2  ;;  %v4943_v43 = vrot.slane %v4942_v34, 2 }
 0x9b0   : > { %v4944_v11 = vmax.f32 %v4942_v34, %v4943_v43 }
 0x9b1   : > { %v4508_v59 = vpop.f32.mrf.mxu0  ;;  %v4621_v2 = vpop.f32.mrf.mxu1 }
 0x9b2   : > { %v4509_v9 = vadd.f32 %v4508_v59, %v10158_v12  ;;  %v4622_v54 = vadd.f32 %v4621_v2, %v10162_v36  ;;  %v10199_v59 = vrot.slane %v10154_v25, %v1189_v22  ;;  %v10204_v2 = vrot.slane %v10154_v25, %v1197_v57 }
 0x9b3   : > { %v4510_v49 = vpop.f32.mrf.mxu0  ;;  %v4623_v14 = vpop.f32.mrf.mxu1  ;;  %v4948_v22 = vrot.slane %v4947_v53, 4 }
 0x9b4   : > { %v4511_v17 = vadd.f32 %v4510_v49, %v10166_v15  ;;  %v4624_v32 = vadd.f32 %v4623_v14, %v10170_v33  ;;  %v10740_v49 = vsub.s32 5, %v7162_v21 }
 0x9b5   : > { %v4514_v42 = vpop.f32.mrf.mxu0  ;;  %v4627_v29 = vpop.f32.mrf.mxu1 }
 0x9b6   : > { %v4515_v60 = vadd.f32 %v4514_v42, %v10158_v12  ;;  %v4628_v37 = vadd.f32 %v4627_v29, %v10162_v36  ;;  %v10209_v14 = vrot.slane %v10154_v25, %v10740_v49  ;;  %v4894_v42 = vrot.slane %v4893_v28, 2 }
 0x9b7   : > { %v4516_v56 = vpop.f32.mrf.mxu0  ;;  %v4629_v10 = vpop.f32.mrf.mxu1  ;;  %v4889_v49 = vrot.slane %v4888_v7, 1 }
 0x9b8   : > { %v4517_v35 = vadd.f32 %v4516_v56, %v10166_v15  ;;  %v4630_v44 = vadd.f32 %v4629_v10, %v10170_v33  ;;  %v4982_v6 = vmax.f32 %v4509_v9, %v4515_v60  ;;  %v4996_v5 = vmax.f32 %v4622_v54, %v4628_v37 }
 0x9b9   : > { %v4936_v56 = vrot.slane %v4935_v20, 2  ;;  %v4949_v10 = vmax.f32 %v4947_v53, %v4948_v22  ;;  %v4881_v37 = vmax.f32 %v4879_v31, %v4880_v40  ;;  %v4895_v16 = vmax.f32 %v4893_v28, %v4894_v42 }
 0x9ba   : > { %v4989_v41 = vmax.f32 %v4511_v17, %v4517_v35  ;;  %v5003_v23 = vmax.f32 %v4624_v32, %v4630_v44  ;;  %v4983_v57 = vrot.slane %v4982_v6, 4  ;;  %v4997_v29 = vrot.slane %v4996_v5, 4 }
 0x9bb   : > { %v4937_v28 = vmax.f32 %v4935_v20, %v4936_v56  ;;  %v4882_v46 = vrot.slane %v4881_v37, 1  ;;  %v4945_v22 = vrot.slane %v4944_v11, 1 }
 0x9bc   : > { %v4990_v63 = vrot.slane %v4989_v41, 4  ;;  %v5004_v61 = vrot.slane %v5003_v23, 4  ;;  %v4984_v48 = vmax.f32 %v4982_v6, %v4983_v57  ;;  %v4998_v47 = vmax.f32 %v4996_v5, %v4997_v29 }
 0x9bd   : > { %v4950_v6 = vrot.slane %v4949_v10, 2  ;;  %v4938_v20 = vrot.slane %v4937_v28, 1 }
 0x9be   : > { %v4991_v52 = vmax.f32 %v4989_v41, %v4990_v63  ;;  %v5005_v9 = vmax.f32 %v5003_v23, %v5004_v61  ;;  %v4985_v5 = vrot.slane %v4984_v48, 2  ;;  %v4890_v63 = vmax.f32 %v4888_v7, %v4889_v49 }
 0x9bf   : > { %v4951_v57 = vmax.f32 %v4949_v10, %v4950_v6 }
 0x9c0   : > { %v4992_v58 = vrot.slane %v4991_v52, 2  ;;  %v4986_v29 = vmax.f32 %v4984_v48, %v4985_v5 }
 0x9c1   : > { %v4520_v8 = vpop.f32.mrf.mxu0  ;;  %v4633_v0 = vpop.f32.mrf.mxu1  ;;  %v4952_v7 = vrot.slane %v4951_v57, 1 }
 0x9c2   : > { %v4521_v21 = vadd.f32 %v4520_v8, %v10158_v12  ;;  %v4634_v25 = vadd.f32 %v4633_v0, %v10162_v36  ;;  %v4999_v8 = vrot.slane %v4998_v47, 2  ;;  %v4875_v0 = vrot.slane %v4874_v39, 1 }
 0x9c3   : > { %v4522_v4 = vpop.f32.mrf.mxu0  ;;  %v4635_v1 = vpop.f32.mrf.mxu1  ;;  %v4987_v48 = vrot.slane %v4986_v29, 1  ;;  %v4953_v49 = vmax.f32 %v4951_v57, %v4952_v7 }
 0x9c4   : > { %v4523_v54 = vadd.f32 %v4522_v4, %v10166_v15  ;;  %v4636_v3 = vadd.f32 %v4635_v1, %v10170_v33  ;;  %v4876_v43 = vmax.f32 %v4874_v39, %v4875_v0  ;;  %v4939_v39 = vmax.f32 %v4937_v28, %v4938_v20 }
 0x9c5   : > { %v4526_v50 = vpop.f32.mrf.mxu0  ;;  %v4639_v18 = vpop.f32.mrf.mxu1 }
 0x9c6   : > { %v4527_v13 = vadd.f32 %v4526_v50, %v10158_v12  ;;  %v4640_v30 = vadd.f32 %v4639_v18, %v10162_v36  ;;  %v4930_v36 = vmax.f32 %v4928_v62, %v4929_v26  ;;  %v5000_v26 = vmax.f32 %v4998_v47, %v4999_v8 }
 0x9c7   : > { %v4528_v27 = vpop.f32.mrf.mxu0  ;;  %v4641_v51 = vpop.f32.mrf.mxu1 }
 0x9c8   : > { %v5038_v55 = vmax.f32 %v4521_v21, %v4527_v13  ;;  %v5052_v60 = vmax.f32 %v4634_v25, %v4640_v30  ;;  %v4529_v19 = vadd.f32 %v4528_v27, %v10166_v15  ;;  %v4642_v35 = vadd.f32 %v4641_v51, %v10170_v33 }
 0x9c9   : > { %v10222_v44 = vpop.f32.mrf.mxu0  ;;  %v10224_v12 = vpop.f32.mrf.mxu1  ;;  %v4896_v15 = vrot.slane %v4895_v16, 1  ;;  %v5006_v33 = vrot.slane %v5005_v9, 2  ;;  %v4931_v45 = vrot.slane %v4930_v36, 1  ;;  %v4883_v25 = vmax.f32 %v4881_v37, %v4882_v46 }
 0x9ca   : > { %v5039_v53 = vrot.slane %v5038_v55, 4  ;;  %v5053_v17 = vrot.slane %v5052_v60, 4  ;;  %v5045_v62 = vmax.f32 %v4523_v54, %v4529_v19  ;;  %v5059_v34 = vmax.f32 %v4636_v3, %v4642_v35 }
 0x9cb   : > { %v10228_v32 = vpop.f32.mrf.mxu0  ;;  %v10230_v31 = vpop.f32.mrf.mxu1  ;;  %v4897_v13 = vmax.f32 %v4895_v16, %v4896_v15  ;;  %v4993_v30 = vmax.f32 %v4991_v52, %v4992_v58  ;;  %v5007_v56 = vmax.f32 %v5005_v9, %v5006_v33  ;;  %v4932_v27 = vmax.f32 %v4930_v36, %v4931_v45 }
 0x9cc   : > { %v5040_v4 = vmax.f32 %v5038_v55, %v5039_v53  ;;  %v5054_v1 = vmax.f32 %v5052_v60, %v5053_v17  ;;  %v5046_v61 = vrot.slane %v5045_v62, 4  ;;  %v5060_v50 = vrot.slane %v5059_v34, 4 }
 0x9cd   : > { %v4716_v41 = vpop.f32.mrf.mxu0  ;;  %v4829_v23 = vpop.f32.mrf.mxu1  ;;  %v4946_v51 = vmax.f32 %v4944_v11, %v4945_v22  ;;  %v5001_v47 = vrot.slane %v5000_v26, 1  ;;  %v4994_v36 = vrot.slane %v4993_v30, 1  ;;  %v5008_v11 = vrot.slane %v5007_v56, 1 }
 0x9ce   : > { %v5041_v55 = vrot.slane %v5040_v4, 2  ;;  %v5055_v60 = vrot.slane %v5054_v1, 2  ;;  %v5047_v35 = vmax.f32 %v5045_v62, %v5046_v61  ;;  %v5061_v54 = vmax.f32 %v5059_v34, %v5060_v50 }
 0x9cf   : > { %v4718_v40 = vpop.f32.mrf.mxu0  ;;  %v4831_v42 = vpop.f32.mrf.mxu1  ;;  %v4717_v3 = vadd.f32 %v4716_v41, %v10199_v59  ;;  %v4830_v37 = vadd.f32 %v4829_v23, %v10204_v2  ;;  %v4711_v9 = vadd.f32 %v10222_v44, %v10199_v59  ;;  %v4824_v6 = vadd.f32 %v10224_v12, %v10204_v2 }
 0x9d0   : > { %v4719_v53 = vadd.f32 %v4718_v40, %v10209_v14  ;;  %v5042_v17 = vmax.f32 %v5040_v4, %v5041_v55  ;;  %v5056_v28 = vmax.f32 %v5054_v1, %v5055_v60  ;;  %v4832_v5 = vadd.f32 %v4831_v42, %v10214_v38 }
 0x9d1   : > { %v10232_v18 = vpop.f32.mrf.mxu0  ;;  %v10234_v21 = vpop.f32.mrf.mxu1  ;;  %v4988_v62 = vmax.f32 %v4986_v29, %v4987_v48  ;;  %v4713_v34 = vadd.f32 %v10228_v32, %v10209_v14  ;;  %v4826_v41 = vadd.f32 %v10230_v31, %v10214_v38  ;;  %v5048_v44 = vrot.slane %v5047_v35, 2 }
 0x9d2   : > { %v5062_v23 = vrot.slane %v5061_v54, 2  ;;  %v4898_v46 = vmax.f32 %v4711_v9, %v4717_v3  ;;  %v4912_v15 = vmax.f32 %v4824_v6, %v4830_v37  ;;  %v5002_v12 = vmax.f32 %v5000_v26, %v5001_v47 }
 0x9d3   : > { %v10236_v19 = vpop.f32.mrf.mxu0  ;;  %v10238_v10 = vpop.f32.mrf.mxu1  ;;  %v4905_v45 = vmax.f32 %v4713_v34, %v4719_v53  ;;  %v4995_v22 = vmax.f32 %v4993_v30, %v4994_v36  ;;  %v5009_v4 = vmax.f32 %v5007_v56, %v5008_v11  ;;  %v5043_v1 = vrot.slane %v5042_v17, 1 }
 0x9d4   : > { %v5057_v40 = vrot.slane %v5056_v28, 1  ;;  %v4919_v42 = vmax.f32 %v4826_v41, %v4832_v5  ;;  %v5094_v20 = vsel %vm1951_vm3, %v4876_v43, %v4932_v27  ;;  %v5095_v31 = vsel %vm1951_vm3, %v4883_v25, %v4939_v39 }
 0x9d5   : > { %v4728_v16 = vpop.f32.mrf.mxu0  ;;  %v10242_v52 = vpop.f32.mrf.mxu1  ;;  %v5097_v29 = vsel %vm1951_vm3, %v4897_v13, %v4953_v49  ;;  %v5102_v61 = vsel %vm1960_vm4, %v5094_v20, %v4988_v62  ;;  %v5096_v50 = vsel %vm1951_vm3, %v4890_v63, %v4946_v51  ;;  %v5049_v26 = vmax.f32 %v5047_v35, %v5048_v44  ;;  %v5246_v20 = vld [vmem:[%s10689_s21 + $0x3f0] sm:$0xff] }
 0x9d6   : > { %v5063_v55 = vmax.f32 %v5061_v54, %v5062_v23  ;;  %v4899_v30 = vrot.slane %v4898_v46, 4  ;;  %v4913_v56 = vrot.slane %v4912_v15, 4  ;;  %v4906_v48 = vrot.slane %v4905_v45, 4 }
 0x9d7   : > { %v4730_v8 = vpop.f32.mrf.mxu0  ;;  %v4843_v0 = vpop.f32.mrf.mxu1  ;;  %v5103_v43 = vsel %vm1960_vm4, %v5095_v31, %v4995_v22  ;;  %v5105_v27 = vsel %vm1960_vm4, %v5097_v29, %v5009_v4  ;;  %v5104_v47 = vsel %vm1960_vm4, %v5096_v50, %v5002_v12  ;;  %v5044_v25 = vmax.f32 %v5042_v17, %v5043_v1  ;;  %v5231_v12 = vld [vmem:[%s10689_s21 + $0x378] sm:$0xff]  ;;  %v5198_v50 = vld [vmem:[%s10689_s21 + $0x270] sm:$0xff] }
 0x9d8   : > { %v5058_v39 = vmax.f32 %v5056_v28, %v5057_v40  ;;  %v4920_v13 = vrot.slane %v4919_v42, 4  ;;  %v4729_v3 = vadd.f32 %v4728_v16, %v10199_v59  ;;  %v4723_v51 = vadd.f32 %v10232_v18, %v10199_v59 }
 0x9d9   : > { %v4734_v58 = vpop.f32.mrf.mxu0  ;;  %v10254_v33 = vpop.f32.mrf.mxu1  ;;  %v4836_v35 = vadd.f32 %v10234_v21, %v10204_v2  ;;  %v4731_v54 = vadd.f32 %v4730_v8, %v10209_v14  ;;  %v4844_v36 = vadd.f32 %v4843_v0, %v10214_v38  ;;  %v10273_v11 = vmax.f32 %v4898_v46, %v4899_v30 }
 0x9da   : > { %v10275_v9 = vmax.f32 %v4912_v15, %v4913_v56  ;;  %v5050_v53 = vrot.slane %v5049_v26, 1  ;;  %v5064_v17 = vrot.slane %v5063_v55, 1  ;;  %v10277_v6 = vmax.f32 %v4905_v45, %v4906_v48  ;;  %v5199_v15 = vld [vmem:[%s10689_s21 + $0x278] sm:$0xff] }
 0x9db   : > { %v4736_v32 = vpop.f32.mrf.mxu0  ;;  %v10257_v57 = vpop.f32.mrf.mxu1  ;;  %v4725_v18 = vadd.f32 %v10236_v19, %v10209_v14  ;;  %v4838_v21 = vadd.f32 %v10238_v10, %v10214_v38  ;;  %v4842_v5 = vadd.f32 %v10242_v52, %v10204_v2  ;;  %v10285_v8 = vmax.f32 %v4919_v42, %v4920_v13  ;;  %v5214_v42 = vld [vmem:[%s10689_s21 + $0x2f0] sm:$0xff]  ;;  %v5229_v13 = vld [vmem:[%s10689_s21 + $0x368] sm:$0xff] }
 0x9dc   : > { %v10287_v0 = vmax.f32 %v4723_v51, %v4729_v3  ;;  %v5051_v49 = vmax.f32 %v5049_v26, %v5050_v53  ;;  %v5065_v62 = vmax.f32 %v5063_v55, %v5064_v17  ;;  %v4735_v19 = vadd.f32 %v4734_v58, %v10199_v59  ;;  %v5230_v26 = vld [vmem:[%s10689_s21 + $0x370] sm:$0xff]  ;;  %v5244_v51 = vld [vmem:[%s10689_s21 + $0x3e0] sm:$0xff] }
 0x9dd   : > { %v4740_v60 = vpop.f32.mrf.mxu0  ;;  %v4853_v7 = vpop.f32.mrf.mxu1  ;;  %v10291_v44 = vmax.f32 %v4725_v18, %v4731_v54  ;;  %v10293_v23 = vmax.f32 %v4838_v21, %v4844_v36  ;;  %v5110_v10 = vsel %vm1969_vm5, %v5102_v61, %v5044_v25  ;;  %v4901_v58 = vrot.slane %v10273_v11, 2  ;;  %v5228_v18 = vld [vmem:[%s10689_s21 + $0x360] sm:$0xff] }
 0x9de   : > { %v5111_v46 = vsel %vm1969_vm5, %v5103_v43, %v5051_v49  ;;  %v5113_v52 = vsel %vm1969_vm5, %v5105_v27, %v5065_v62  ;;  %v4741_v45 = vadd.f32 %v4740_v60, %v10199_v59  ;;  %v4854_v22 = vadd.f32 %v4853_v7, %v10204_v2  ;;  %v5245_v7 = vld [vmem:[%s10689_s21 + $0x3e8] sm:$0xff]  ;;  %v5243_v49 = vld [vmem:[%s10689_s21 + $0x3d8] sm:$0xff] }
 0x9df   : > { %v4742_v37 = vpop.f32.mrf.mxu0  ;;  %v4855_v63 = vpop.f32.mrf.mxu1  ;;  %5312 = vmatprep.mubr.f32.mxu0 %v5111_v46  ;;  %5382 = vmatprep.mubr.f32.mxu1 %v5113_v52  ;;  %v5112_v1 = vsel %vm1969_vm5, %v5104_v47, %v5058_v39  ;;  %v4737_v40 = vadd.f32 %v4736_v32, %v10209_v14  ;;  %v4915_v29 = vrot.slane %v10275_v9, 2  ;;  %v4848_v61 = vadd.f32 %v10254_v33, %v10204_v2  ;;  %v5197_v39 = vld [vmem:[%s10689_s21 + $0x268] sm:$0xff]  ;;  %v5195_v46 = vld [vmem:[%s10689_s21 + $0x258] sm:$0xff] }
 0x9e0   : > { %v4743_v31 = vadd.f32 %v4742_v37, %v10209_v14  ;;  %5313 = vmatmul.mubr.f32.vlgmr.msra.gmra.mxu0 %v5110_v10  ;;  %5383 = vmatmul.mubr.f32.vlgmr.msra.gmra.mxu1 %v5112_v1  ;;  %v4850_v32 = vadd.f32 %v10257_v57, %v10214_v38  ;;  %v4856_v55 = vadd.f32 %v4855_v63, %v10214_v38  ;;  %v4962_v33 = vrot.slane %v10291_v44, 4  ;;  %v5213_v57 = vld [vmem:[%s10689_s21 + $0x2e8] sm:$0xff]  ;;  %v5212_v63 = vld [vmem:[%s10689_s21 + $0x2e0] sm:$0xff]  ;;  %v5227_v52 = vld [vmem:[%s10689_s21 + $0x358] sm:$0xff] }
 0x9e1   : > { %v4746_v28 = vpop.f32.mrf.mxu0  ;;  %v4859_v16 = vpop.f32.mrf.mxu1  ;;  %v10329_v56 = vmax.f32 %v4836_v35, %v4842_v5  ;;  %5892 = vmatpush3.msra.mxu0 %v5199_v15  ;;  %5927 = vmatpush3.msra.mxu1 %v5231_v12  ;;  %v10332_v60 = vmax.f32 %v4735_v19, %v4741_v45  ;;  %v4976_v27 = vrot.slane %v10293_v23, 4  ;;  %v10341_v47 = vmax.f32 %v4848_v61, %v4854_v22  ;;  %v5211_v5 = vld [vmem:[%s10689_s21 + $0x2d8] sm:$0xff]  ;;  %v5242_v22 = vld [vmem:[%s10689_s21 + $0x3d0] sm:$0xff] }
 0x9e2   : > { %v5017_v48 = vmax.f32 %v4737_v40, %v4743_v31  ;;  %5893 = vmatprep.subr.mxu0 %v5214_v42  ;;  %5928 = vmatprep.subr.mxu1 %v5246_v20  ;;  %v5031_v25 = vmax.f32 %v4850_v32, %v4856_v55  ;;  %v4747_v3 = vadd.f32 %v4746_v28, %v10199_v59  ;;  %v5196_v28 = vld [vmem:[%s10689_s21 + $0x260] sm:$0xff]  ;;  %v5194_v42 = vld [vmem:[%s10689_s21 + $0x250] sm:$0xff]  ;;  %v4908_v61 = vrot.slane %v10277_v6, 2 }
 0x9e3   : > { %v4748_v34 = vpop.f32.mrf.mxu0  ;;  %v10289_v41 = vpop.f32.mrf.mxu1  ;;  %5894 = vmatpush3.msra.mxu0 %v5198_v50  ;;  %5929 = vmatpush3.msra.mxu1 %v5230_v26  ;;  %v4860_v35 = vadd.f32 %v4859_v16, %v10204_v2  ;;  %v10360_v53 = vmax.f32 %v10273_v11, %v4901_v58  ;;  %v4969_v11 = vrot.slane %v10329_v56, 4  ;;  %v5011_v10 = vrot.slane %v10332_v60, 4  ;;  %v5226_v20 = vld [vmem:[%s10689_s21 + $0x350] sm:$0xff]  ;;  %v5209_v50 = vld [vmem:[%s10689_s21 + $0x2c8] sm:$0xff] }
 0x9e4   : > { %v5018_v37 = vrot.slane %v5017_v48, 4  ;;  %5895 = vmatprep.subr.mxu0 %v5213_v57  ;;  %5930 = vmatprep.subr.mxu1 %v5245_v7  ;;  %v5032_v17 = vrot.slane %v5031_v25, 4  ;;  %v4749_v16 = vadd.f32 %v4748_v34, %v10209_v14  ;;  %v10379_v34 = vmax.f32 %v10291_v44, %v4962_v33  ;;  %v5241_v26 = vld [vmem:[%s10689_s21 + $0x3c8] sm:$0xff] }
 0x9e5   : > { %v4752_v4 = vpop.f32.mrf.mxu0  ;;  %v4865_v30 = vpop.f32.mrf.mxu1  ;;  %5896 = vmatpush3.msra.mxu0 %v5197_v39  ;;  %5931 = vmatpush3.msra.mxu1 %v5229_v13  ;;  %v5025_v12 = vrot.slane %v10341_v47, 4  ;;  %v10406_v58 = vmax.f32 %v10275_v9, %v4915_v29  ;;  %v10419_v9 = vmax.f32 %v10329_v56, %v4969_v11  ;;  %v4862_v29 = vadd.f32 %v10289_v41, %v10214_v38  ;;  %v5193_v41 = vld [vmem:[%s10689_s21 + $0x248] sm:$0xff]  ;;  %v5192_v13 = vld [vmem:[%s10689_s21 + $0x240] sm:$0xff] }
 0x9e6   : > { %v4753_v54 = vadd.f32 %v4752_v4, %v10199_v59  ;;  %v4866_v36 = vadd.f32 %v4865_v30, %v10204_v2  ;;  %v4955_v2 = vrot.slane %v10287_v0, 4  ;;  %5897 = vmatprep.subr.mxu0 %v5212_v63  ;;  %5932 = vmatprep.subr.mxu1 %v5244_v51  ;;  %v10392_v44 = vmax.f32 %v5017_v48, %v5018_v37  ;;  %v5225_v56 = vld [vmem:[%s10689_s21 + $0x348] sm:$0xff]  ;;  %v5208_v48 = vld [vmem:[%s10689_s21 + $0x2c0] sm:$0xff] }
 0x9e7   : > { %v4754_v43 = vpop.f32.mrf.mxu0  ;;  %v4867_v21 = vpop.f32.mrf.mxu1  ;;  %v10394_v45 = vmax.f32 %v5031_v25, %v5032_v17  ;;  %5898 = vmatpush3.msra.mxu0 %v5196_v28  ;;  %5933 = vmatpush3.msra.mxu1 %v5228_v18  ;;  %v4964_v55 = vrot.slane %v10379_v34, 2  ;;  %v10432_v30 = vmax.f32 %v10332_v60, %v5011_v10  ;;  %v10441_v33 = vmax.f32 %v10341_v47, %v5025_v12 }
 0x9e8   : > { %v4755_v59 = vadd.f32 %v4754_v43, %v10209_v14  ;;  %v5066_v62 = vmax.f32 %v4747_v3, %v4753_v54  ;;  %v5080_v19 = vmax.f32 %v4860_v35, %v4866_v36  ;;  %v10382_v14 = vmax.f32 %v10293_v23, %v4976_v27  ;;  %v5210_v23 = vld [vmem:[%s10689_s21 + $0x2d0] sm:$0xff]  ;;  %5899 = vmatprep.subr.mxu0 %v5211_v5  ;;  %v5240_v43 = vld [vmem:[%s10689_s21 + $0x3c0] sm:$0xff]  ;;  %v5207_v54 = vld [vmem:[%s10689_s21 + $0x2b8] sm:$0xff] }
 0x9e9   : > { %v4868_v4 = vadd.f32 %v4867_v21, %v10214_v38  ;;  %5934 = vmatprep.subr.mxu1 %v5243_v49  ;;  %v10416_v32 = vmax.f32 %v10287_v0, %v4955_v2  ;;  %5900 = vmatpush3.msra.mxu0 %v5195_v46  ;;  %v5020_v57 = vrot.slane %v10392_v44, 2  ;;  %v5034_v7 = vrot.slane %v10394_v45, 2  ;;  %v5224_v3 = vld [vmem:[%s10689_s21 + $0x340] sm:$0xff]  ;;  %v5239_v36 = vld [vmem:[%s10689_s21 + $0x3b8] sm:$0xff]  ;;  %v5206_v49 = vld [vmem:[%s10689_s21 + $0x2b0] sm:$0xff] }
 0x9ea   : > { %v5073_v15 = vmax.f32 %v4749_v16, %v4755_v59  ;;  %v5067_v1 = vrot.slane %v5066_v62, 4  ;;  %v5081_v40 = vrot.slane %v5080_v19, 4  ;;  %5935 = vmatpush3.msra.mxu1 %v5227_v52  ;;  %v4978_v0 = vrot.slane %v10382_v14, 2  ;;  %5901 = vmatprep.subr.mxu0 %v5210_v23  ;;  %v5191_v59 = vld [vmem:[%s10689_s21 + $0x238] sm:$0xff]  ;;  %v5190_v46 = vld [vmem:[%s10689_s21 + $0x230] sm:$0xff]  ;;  %v5237_v23 = vld [vmem:[%s10689_s21 + $0x3a8] sm:$0xff] }
 0x9eb   : > { %5936 = vmatprep.subr.mxu1 %v5242_v22  ;;  %5902 = vmatpush3.msra.mxu0 %v5194_v42  ;;  %v5087_v60 = vmax.f32 %v4862_v29, %v4868_v4  ;;  %v4922_v27 = vrot.slane %v10285_v8, 2  ;;  %v4903_v37 = vrot.slane %v10360_v53, 1  ;;  %v4957_v63 = vrot.slane %v10416_v32, 2  ;;  %v5223_v21 = vld [vmem:[%s10689_s21 + $0x338] sm:$0xff]  ;;  %v5222_v52 = vld [vmem:[%s10689_s21 + $0x330] sm:$0xff]  ;;  %v5189_v42 = vld [vmem:[%s10689_s21 + $0x228] sm:$0xff] }
 0x9ec   : > { %v5074_v31 = vrot.slane %v5073_v15, 4  ;;  %5937 = vmatpush3.msra.mxu1 %v5226_v20  ;;  %v10452_v25 = vmax.f32 %v5066_v62, %v5067_v1  ;;  %v10454_v47 = vmax.f32 %v5080_v19, %v5081_v40  ;;  %5903 = vmatprep.subr.mxu0 %v5209_v50  ;;  %v4971_v51 = vrot.slane %v10419_v9, 2  ;;  %v5238_v62 = vld [vmem:[%s10689_s21 + $0x3b0] sm:$0xff]  ;;  %v5221_v20 = vld [vmem:[%s10689_s21 + $0x328] sm:$0xff]  ;;  %v5204_v29 = vld [vmem:[%s10689_s21 + $0x2a0] sm:$0xff] }
 0x9ed   : > { %5938 = vmatprep.subr.mxu1 %v5241_v26  ;;  %v5088_v35 = vrot.slane %v5087_v60, 4  ;;  %5904 = vmatpush3.msra.mxu0 %v5193_v41  ;;  %v10472_v17 = vmax.f32 %v10277_v6, %v4908_v61  ;;  %v10475_v28 = vmax.f32 %v10379_v34, %v4964_v55  ;;  %v10478_v18 = vmax.f32 %v10382_v14, %v4978_v0  ;;  %v5236_v50 = vld [vmem:[%s10689_s21 + $0x3a0] sm:$0xff] }
 0x9ee   : > { %v5075_v38 = vmax.f32 %v5073_v15, %v5074_v31  ;;  %5939 = vmatpush3.msra.mxu1 %v5225_v56  ;;  %v5013_v16 = vrot.slane %v10432_v30, 2  ;;  %5905 = vmatprep.subr.mxu0 %v5208_v48  ;;  %v5027_v6 = vrot.slane %v10441_v33, 2  ;;  %v10489_v2 = vmax.f32 %v10392_v44, %v5020_v57 }
 0x9ef   : > { %5940 = vmatprep.subr.mxu1 %v5240_v43  ;;  %v10492_v11 = vmax.f32 %v10394_v45, %v5034_v7  ;;  %v5089_v5 = vmax.f32 %v5087_v60, %v5088_v35  ;;  %5906 = vmatpush3.msra.mxu0 %v5192_v13  ;;  %v10501_v19 = vmax.f32 %v10285_v8, %v4922_v27  ;;  %v5069_v34 = vrot.slane %v10452_v25, 2  ;;  %v5205_v45 = vld [vmem:[%s10689_s21 + $0x2a8] sm:$0xff]  ;;  %v5203_v7 = vld [vmem:[%s10689_s21 + $0x298] sm:$0xff] }
 0x9f0   : > { %v5076_v39 = vrot.slane %v5075_v38, 2  ;;  %5941 = vmatpush3.msra.mxu1 %v5224_v3  ;;  %v5083_v14 = vrot.slane %v10454_v47, 2  ;;  %5907 = vmatprep.subr.mxu0 %v5207_v54  ;;  %v4917_v15 = vrot.slane %v10406_v58, 1  ;;  %v10515_v8 = vmax.f32 %v10416_v32, %v4957_v63  ;;  %v5235_v60 = vld [vmem:[%s10689_s21 + $0x398] sm:$0xff] }
 0x9f1   : > { %5942 = vmatprep.subr.mxu1 %v5239_v36  ;;  %v10518_v12 = vmax.f32 %v10419_v9, %v4971_v51  ;;  %v5090_v44 = vrot.slane %v5089_v5, 2  ;;  %5908 = vmatpush3.msra.mxu0 %v5191_v59  ;;  %v4910_v22 = vrot.slane %v10472_v17, 1  ;;  %v4966_v4 = vrot.slane %v10475_v28, 1 }
 0x9f2   : > { %v10505_v10 = vmax.f32 %v5075_v38, %v5076_v39  ;;  %5943 = vmatpush3.msra.mxu1 %v5223_v21  ;;  %v4980_v1 = vrot.slane %v10478_v18, 1  ;;  %v5014_v40 = vmax.f32 %v10432_v30, %v5013_v16  ;;  %5909 = vmatprep.subr.mxu0 %v5206_v49  ;;  %v10537_v31 = vmax.f32 %v10441_v33, %v5027_v6  ;;  %v5188_v30 = vld [vmem:[%s10689_s21 + $0x220] sm:$0xff]  ;;  %v5219_v39 = vld [vmem:[%s10689_s21 + $0x318] sm:$0xff]  ;;  %v5201_v21 = vld [vmem:[%s10689_s21 + $0x288] sm:$0xff] }
 0x9f3   : > { %5944 = vmatprep.subr.mxu1 %v5238_v62  ;;  %v5022_v61 = vrot.slane %v10489_v2, 1  ;;  %v5036_v32 = vrot.slane %v10492_v11, 1  ;;  %v5091_v9 = vmax.f32 %v5089_v5, %v5090_v44  ;;  %5910 = vmatpush3.msra.mxu0 %v5190_v46  ;;  %v4924_v26 = vrot.slane %v10501_v19, 1  ;;  %v5220_v38 = vld [vmem:[%s10689_s21 + $0x320] sm:$0xff]  ;;  %v5233_v6 = vld [vmem:[%s10689_s21 + $0x388] sm:$0xff] }
 0x9f4   : > { %5945 = vmatpush3.msra.mxu1 %v5222_v52  ;;  %v10549_v55 = vmax.f32 %v10452_v25, %v5069_v34  ;;  %v10552_v0 = vmax.f32 %v10454_v47, %v5083_v14  ;;  %5911 = vmatprep.subr.mxu0 %v5205_v45  ;;  %v5078_v41 = vrot.slane %v10505_v10, 1  ;;  %v10564_v56 = vmax.f32 %v10360_v53, %v4903_v37  ;;  %v5187_v47 = vld [vmem:[%s10689_s21 + $0x218] sm:$0xff]  ;;  %v5234_v37 = vld [vmem:[%s10689_s21 + $0x390] sm:$0xff]  ;;  %v5185_v5 = vld [vmem:[%s10689_s21 + $0x208] sm:$0xff] }
 0x9f5   : > { %5946 = vmatprep.subr.mxu1 %v5237_v23  ;;  %v4959_v33 = vrot.slane %v10515_v8, 1  ;;  %v4973_v57 = vrot.slane %v10518_v12, 1  ;;  %5912 = vmatpush3.msra.mxu0 %v5189_v42  ;;  %v5092_v48 = vrot.slane %v5091_v9, 1  ;;  %v4918_v43 = vmax.f32 %v10406_v58, %v4917_v15  ;;  %v5202_v58 = vld [vmem:[%s10689_s21 + $0x290] sm:$0xff]  ;;  %v5217_v49 = vld [vmem:[%s10689_s21 + $0x308] sm:$0xff]  ;;  %v5200_v14 = vld [vmem:[%s10689_s21 + $0x280] sm:$0xff] }
 0x9f6   : > { %5947 = vmatpush3.msra.mxu1 %v5221_v20  ;;  %v4967_v53 = vmax.f32 %v10475_v28, %v4966_v4  ;;  %v4981_v27 = vmax.f32 %v10478_v18, %v4980_v1  ;;  %v5015_v25 = vrot.slane %v5014_v40, 1  ;;  %5913 = vmatprep.subr.mxu0 %v5204_v29  ;;  %v4911_v13 = vmax.f32 %v10472_v17, %v4910_v22  ;;  %v5186_v17 = vld [vmem:[%s10689_s21 + $0x210] sm:$0xff]  ;;  %v5184_v15 = vld [vmem:[%s10689_s21 + $0x200] sm:$0xff] }
 0x9f7   : > { %5948 = vmatprep.subr.mxu1 %v5236_v50  ;;  %v5029_v3 = vrot.slane %v10537_v31, 1  ;;  %5914 = vmatpush3.msra.mxu0 %v5188_v30  ;;  %v5023_v63 = vmax.f32 %v10489_v2, %v5022_v61  ;;  %v5037_v51 = vmax.f32 %v10492_v11, %v5036_v32  ;;  %v4925_v35 = vmax.f32 %v10501_v19, %v4924_v26  ;;  %v5218_v28 = vld [vmem:[%s10689_s21 + $0x310] sm:$0xff]  ;;  %v5216_v45 = vld [vmem:[%s10689_s21 + $0x300] sm:$0xff] }
 0x9f8   : > { %5949 = vmatpush3.msra.mxu1 %v5220_v38  ;;  %v5071_v54 = vrot.slane %v10549_v55, 1  ;;  %v5085_v36 = vrot.slane %v10552_v0, 1  ;;  %5915 = vmatprep.subr.mxu0 %v5203_v7  ;;  %v5079_v18 = vmax.f32 %v10505_v10, %v5078_v41  ;;  %v4960_v16 = vmax.f32 %v10515_v8, %v4959_v33  ;;  %v5232_v10 = vld [vmem:[%s10689_s21 + $0x380] sm:$0xff] }
 0x9f9   : > { %5950 = vmatprep.subr.mxu1 %v5235_v60  ;;  %v4974_v59 = vmax.f32 %v10518_v12, %v4973_v57  ;;  %5916 = vmatpush3.msra.mxu0 %v5187_v47  ;;  %v5093_v2 = vmax.f32 %v5091_v9, %v5092_v48  ;;  %v5016_v11 = vmax.f32 %v5014_v40, %v5015_v25  ;;  %v5118_v61 = vld [vmem:[%s10688_s20] sm:$0xff] }
 0x9fa   : > { %5951 = vmatpush3.msra.mxu1 %v5219_v39  ;;  %5917 = vmatprep.subr.mxu0 %v5202_v58  ;;  %v5099_v62 = vsel %vm1951_vm3, %v4911_v13, %v4967_v53  ;;  %v5101_v19 = vsel %vm1951_vm3, %v4925_v35, %v4981_v27  ;;  %v5030_v34 = vmax.f32 %v10537_v31, %v5029_v3  ;;  %v5119_v31 = vld [vmem:[%s10688_s20 + $0x8] sm:$0xff]  ;;  %v737_v32 = vld [vmem:[%s722_s4] sm:$0xf] }
 0x9fb   : > { %5952 = vmatprep.subr.mxu1 %v5234_v37  ;;  %5918 = vmatpush3.msra.mxu0 %v5186_v17  ;;  %v5107_v46 = vsel %vm1960_vm4, %v5099_v62, %v5023_v63  ;;  %v5109_v52 = vsel %vm1960_vm4, %v5101_v19, %v5037_v51  ;;  %v5072_v12 = vmax.f32 %v10549_v55, %v5071_v54  ;;  %v5731_v53 = vld [vmem:[%s10690_s22] ss:$0 sm:$0xff] }
 0x9fc   : > { %5953 = vmatpush3.msra.mxu1 %v5218_v28  ;;  %5919 = vmatprep.subr.mxu0 %v5201_v21  ;;  %v5115_v8 = vsel %vm1969_vm5, %v5107_v46, %v5079_v18  ;;  %v5086_v44 = vmax.f32 %v10552_v0, %v5085_v36  ;;  %v5117_v23 = vsel %vm1969_vm5, %v5109_v52, %v5093_v2 }
 0x9fd   : > { %5954 = vmatprep.subr.mxu1 %v5233_v6  ;;  %5920 = vmatpush3.msra.mxu0 %v5185_v5  ;;  %v5098_v22 = vsel %vm1951_vm3, %v10564_v56, %v4960_v16  ;;  %v5100_v4 = vsel %vm1951_vm3, %v4918_v43, %v4974_v59 }
 0x9fe   : > { %5955 = vmatpush3.msra.mxu1 %v5217_v49  ;;  %5921 = vmatprep.subr.mxu0 %v5200_v14  ;;  %v5106_v1 = vsel %vm1960_vm4, %v5098_v22, %v5016_v11  ;;  %v5108_v40 = vsel %vm1960_vm4, %v5100_v4, %v5030_v34 }
 0x9ff   : > { %5956 = vmatprep.subr.mxu1 %v5232_v10  ;;  %5922 = vmatpush3.msra.mxu0 %v5184_v15  ;;  %v5114_v42 = vsel %vm1969_vm5, %v5106_v1, %v5072_v12  ;;  %v5116_v20 = vsel %vm1969_vm5, %v5108_v40, %v5086_v44 }
 0xa00   : > { %5452 = vmatprep.mubr.f32.mxu0 %v5115_v8  ;;  %5957 = vmatpush3.msra.mxu1 %v5216_v45 }
 0xa01   : > { %5522 = vmatprep.mubr.f32.mxu1 %v5117_v23  ;;  %5453 = vmatmul.mubr.f32.vlgmr.msra.gmra.mxu0 %v5114_v42 }
 0xa02   : > { %5523 = vmatmul.mubr.f32.vlgmr.msra.gmra.mxu1 %v5116_v20  ;;  %6048 = vmatprep.subr.mxu0 %v10739_v24 }
 0xa03   : > { %6052 = vmatprep.mubr.msk.f32.mxu0 %vm6098_vm9, %v10739_v24  ;;  %6049 = vmatpush3.msra.mxu0 %v5119_v31 }
 0xa04   : > { %6050 = vmatprep.subr.mxu0 %v10739_v24 }
 0xa05   : > { %6051 = vmatpush3.msra.mxu0 %v5118_v61 }
 0xa06   : > { %6053 = vmatmul.mubr.msk.f32.vlgmr.msra.gmra.mxu0 %vm5528_vm10, %v737_v32 }
 0xaa0   : > { %v5853_v9 = vpop.f32.mrf.mxu0  ;;  %v5888_v29 = vpop.f32.mrf.mxu1 }
 0xaa2   : > { %v5854_v50 = vpop.f32.mrf.mxu0  ;;  %v5889_v26 = vpop.f32.mrf.mxu1 }
 0xaa3   : > { %v5855_v55 = vadd.f32 %v5854_v50, %v5853_v9  ;;  %v5890_v0 = vadd.f32 %v5889_v26, %v5888_v29 }
 0xaa5   : > { %v5385_v33 = vadd.f32 %v5890_v0, %v5855_v55 }
 0xac1   : > { %v5923_v30 = vpop.f32.mrf.mxu0 }
 0xac2   : > { %v5958_v38 = vpop.f32.mrf.mxu1 }
 0xac3   : > { %v5924_v41 = vpop.f32.mrf.mxu0 }
 0xac4   : > { %v5959_v56 = vpop.f32.mrf.mxu1  ;;  %v5925_v57 = vadd.f32 %v5924_v41, %v5923_v30 }
 0xac5   : > { %v5960_v60 = vadd.f32 %v5959_v56, %v5958_v38 }
 0xac6   : > { %v5455_v7 = vadd.f32 %v5925_v57, %v5385_v33  ;;  %v5598_v24 = vpop.f32.mrf.mxu0 }
 0xac8   : > { %v5525_v48 = vadd.f32 %v5960_v60, %v5455_v7  ;;  %v6054_v43 = vpop.f32.mrf.mxu0 }
 0xaca   : > { %v5599_v27 = vadd.f32 %v5598_v24, %v5525_v48 }
 0xacc   : > { %v5609_v25 = vadd.f32 %v5731_v53, %v5599_v27 }
 0xace   : > { %5610 = vst [vmem:[%s727_s26] sm:$0xf] %v5609_v25  }
 0xacf PF: > { %s10743_s1 = sld [smem:[#allocation2_spill]] }
 0xad5   : > { %s33_s4 = sadd.s32 1, %s10743_s1  }
 0xad6   : > { %p30_p5 = scmp.ge.s32.totalorder %s33_s4, 4  }
 0xad8   :  { %32 = sbr.rel (!%p30_p5) target bundleno = 9 (0x9), region = 146 }

</bundles_post_ra>
